<compile_context>
chip_gen: v5e
topology: v5e:2x2
jax: 0.10.0
libtpu: 0.0.40
codegen_flags: <defaults>
</compile_context>

<pallas_src>
import numpy as np
import jax
import jax.numpy as jnp
from jax.experimental import pallas as pl
from jax.experimental.pallas import tpu as pltpu

# ----------------------------- sizes (small, synthetic) -----------------------------
B = 2          # batch
S = 8          # decode steps (questions.size(1))
IN_DIM = 16    # input_dim (question embedding size)
H = 32         # hid_size
T_UP = 8       # number of up nodes
T_DOWN = 8     # number of down nodes
assert T_UP == T_DOWN, "branch-stacked attention assumes equal node counts"
T = T_UP
OUT_SIZE = 32  # output vocab size
MAX_OOV = 16   # max_oov_num
VTOT = OUT_SIZE + MAX_OOV
VPAD = 128     # lane-dense padded vocab (sliced back to VTOT in the wrapper)
HID_PAD = 128  # padded width of the fused attention-query/copy-switch projection (3H+1=97 -> 128)
NEG = -1e9


# ----------------------------- kernel -----------------------------
def lstm_decoder_kernel(
    # data
    q_ref, h0_ref, c0_ref, up_ref, dn_ref, bias_ref, scat_ref,
    # fused attention-query + copy-switch projection (u_wq | d_wq | c_wq | cs_w | pad), and w_hh
    attn_w_ref, attn_b_ref, whh_ref,
    # attention key projections (down/copy fused) + stacked score vectors
    u_wk_ref, u_bk_ref, dc_wk_ref, dc_bk_ref, v_all_ref,
    # fused input path: prj_w @ w_ih split into question rows / context rows, + folded gate bias
    gwq_ref, gwc_ref, gate_b_ref,
    # padded output projection
    out_w_ref, out_b_ref,
    # outputs
    scores_ref, h_out_ref, c_out_ref,
):
    h = h0_ref[...]
    c = c0_ref[...]
    up_keys = up_ref[...]                 # (B, T, H)
    dn_keys = dn_ref[...]                 # (B, T, H)
    bias_all = bias_ref[...]              # (B, 3, T, 1) additive mask bias (+bv), T on sublanes
    scatter = scat_ref[...]               # (B, T, VPAD)

    attn_w = attn_w_ref[...]              # (H, 128)  [u_wq | d_wq | c_wq | cs_w | pad]
    attn_b = attn_b_ref[...]              # (1, 128)
    w_hh = whh_ref[...]                   # (H, 4H)
    gwq = gwq_ref[...]                    # (IN_DIM, 4H)
    gwc = gwc_ref[...]                    # (2H, 4H)
    gate_b = gate_b_ref[...]              # (1, 4H)   full folded LSTM gate bias
    out_w = out_w_ref[...]                # (H, VPAD)
    out_b = out_b_ref[...]                # (1, VPAD)
    v_all = v_all_ref[...]                # (3, 1, H) stacked score vectors

    # ---- step-invariant work, hoisted off the recurrent chain ----
    # attention key projections (down & copy share the LHS -> one fused dot)
    kp_up = (jnp.dot(up_keys.reshape(B * T, H), u_wk_ref[...],
                     preferred_element_type=jnp.float32)
             + u_bk_ref[...]).reshape(B, T, H)
    kp_dc = (jnp.dot(dn_keys.reshape(B * T, H), dc_wk_ref[...],
                     preferred_element_type=jnp.float32)
             + dc_bk_ref[...])                                   # (B*T, 2H)
    kp_dn = kp_dc[:, 0:H].reshape(B, T, H)
    kp_cp = kp_dc[:, H:2 * H].reshape(B, T, H)
    kp_all = jnp.stack([kp_up, kp_dn, kp_cp], axis=1)            # (B, 3, T, H)

    # question contribution to the LSTM gates (with the full gate bias folded in)
    q_gates = (jnp.dot(q_ref[...].reshape(B * S, IN_DIM), gwq,
                       preferred_element_type=jnp.float32)
               + gate_b).reshape(B, S, 4 * H)                    # (B, S, 4H)

    for step in range(S):
        hid = h  # previous hidden (pre LSTM update) — used by attentions and p_gen

        # (a) attention queries + copy switch: issued first, consumed immediately on the chain
        hp = jnp.dot(hid, attn_w, preferred_element_type=jnp.float32) + attn_b   # (B, 128)
        # (b) recurrent gate contribution: not needed until after both contexts are formed
        gates_h = jnp.dot(hid, w_hh, preferred_element_type=jnp.float32)          # (B, 4H)

        # fused Bahdanau attention over the 3 branches (up / down / copy)
        qp_seg = jnp.stack([hp[:, 0:H], hp[:, H:2 * H], hp[:, 2 * H:3 * H]],
                           axis=1)                               # (B, 3, H), lane-aligned slices
        e = jnp.tanh(kp_all + qp_seg[:, :, None, :])             # (B, 3, T, H)  one EUP stream
        s = jnp.sum(e * v_all, axis=-1, keepdims=True) + bias_all  # (B, 3, T, 1), T on sublanes
        m = jnp.max(s, axis=2, keepdims=True)
        p = jnp.exp(s - m)
        a = p / jnp.sum(p, axis=2, keepdims=True)                # segmented softmax over T

        # contexts / copy distribution: VPU multiply + sublane reduce (no lane->sublane relayout)
        up_vec = jnp.sum(a[:, 0] * up_keys, axis=1)              # (B, H)
        dn_vec = jnp.sum(a[:, 1] * dn_keys, axis=1)              # (B, H)
        copy_dist = jnp.sum(a[:, 2] * scatter, axis=1)           # (B, VPAD)

        p_gen = jax.nn.sigmoid(hp[:, 3 * H:3 * H + 1])           # (B, 1)

        # LSTM gates: hoisted question term + context term + recurrent term
        ctx = jnp.concatenate([up_vec, dn_vec], axis=-1)         # (B, 2H)
        gates = (jnp.dot(ctx, gwc, preferred_element_type=jnp.float32)
                 + gates_h + q_gates[:, step, :])                # (B, 4H)

        # whole-vreg activations, then slice (PyTorch gate order i, f, g, o)
        sig = jax.nn.sigmoid(gates)
        tnh = jnp.tanh(gates)
        i_g = sig[:, 0 * H:1 * H]
        f_g = sig[:, 1 * H:2 * H]
        g_g = tnh[:, 2 * H:3 * H]
        o_g = sig[:, 3 * H:4 * H]
        c = f_g * c + i_g * g_g
        h = o_g * jnp.tanh(c)

        # generation distribution: softmax over padded logits == [softmax(V), zeros]
        logits = jnp.dot(h, out_w, preferred_element_type=jnp.float32) + out_b   # (B, VPAD)
        m2 = jnp.max(logits, axis=-1, keepdims=True)
        ex = jnp.exp(logits - m2)
        gen = ex / jnp.sum(ex, axis=-1, keepdims=True)

        scores_ref[:, step, :] = p_gen * gen + (1.0 - p_gen) * copy_dist

    h_out_ref[...] = h
    c_out_ref[...] = c


# ----------------------------- wrapper -----------------------------
def lstm_decoder_forward(questions, h0, c0, up_nodes, down_nodes,
                         up_mask, down_mask, copy_mask, src2trg_map,
                         kparams, u_bv, d_bv, c_bv):
    # step-invariant glue: additive mask biases (fold in the attention score bias bv),
    # stacked on the branch axis with T kept as a sublane dim: (B, 3, T, 1)
    up_bias = (1.0 - up_mask) * NEG + u_bv
    dn_bias = (1.0 - down_mask) * NEG + d_bv
    cp_bias = (1.0 - copy_mask) * NEG + c_bv
    bias_all = jnp.stack([up_bias, dn_bias, cp_bias], axis=1)[:, :, :, None]
    # F.one_hot(src2trg_map, output_size + max_oov), padded to VPAD lanes (extra cols are zero)
    scatter = jax.nn.one_hot(src2trg_map, VPAD, dtype=jnp.float32)

    inputs = (questions, h0, c0, up_nodes, down_nodes, bias_all, scatter) + tuple(kparams)
    out_shapes = (
        jax.ShapeDtypeStruct((B, S, VPAD), jnp.float32),
        jax.ShapeDtypeStruct((B, H), jnp.float32),
        jax.ShapeDtypeStruct((B, H), jnp.float32),
    )
    fn = pl.pallas_call(
        lstm_decoder_kernel,
        out_shape=out_shapes,
        in_specs=[pl.BlockSpec(memory_space=pltpu.MemorySpace.VMEM) for _ in inputs],
        out_specs=[pl.BlockSpec(memory_space=pltpu.MemorySpace.VMEM) for _ in out_shapes],
    )
    full, h_T, c_T = fn(*inputs)
    return full[:, :, :VTOT], h_T, c_T


# ----------------------------- pure-JAX reference (mirrors the PyTorch math) -----------------------------
def _attend_ref(hid, keys, mask, wq, bq, wk, bk, v, bv):
    qp = hid @ wq + bq
    kp = jnp.einsum("bth,hk->btk", keys, wk) + bk
    e = jnp.tanh(qp[:, None, :] + kp)
    scores = jnp.sum(e * v[None, :, :], axis=-1) + bv
    scores = jnp.where(mask > 0.5, scores, NEG)
    attn = jax.nn.softmax(scores, axis=-1)
    ctx = jnp.einsum("bt,bth->bh", attn, keys)
    return ctx, attn


def reference_forward(questions, h0, c0, up_nodes, down_nodes,
                      up_mask, down_mask, copy_mask, scatter, rp):
    h, c = h0, c0
    outs = []
    for step in range(S):
        hid = h
        up_vec, _ = _attend_ref(hid, up_nodes, up_mask, *rp["up"])
        dn_vec, _ = _attend_ref(hid, down_nodes, down_mask, *rp["down"])
        cur = jnp.concatenate([questions[:, step, :], up_vec, dn_vec], axis=-1)
        x = cur @ rp["prj_w"] + rp["prj_b"]
        gates = x @ rp["w_ih"] + h @ rp["w_hh"] + rp["b_ih"] + rp["b_hh"]
        i_g = jax.nn.sigmoid(gates[:, :H])
        f_g = jax.nn.sigmoid(gates[:, H:2 * H])
        g_g = jnp.tanh(gates[:, 2 * H:3 * H])
        o_g = jax.nn.sigmoid(gates[:, 3 * H:])
        c = f_g * c + i_g * g_g
        h = o_g * jnp.tanh(c)
        probs = jax.nn.softmax(h @ rp["out_w"] + rp["out_b"], axis=-1)
        gen = jnp.concatenate([probs, jnp.zeros((B, MAX_OOV), jnp.float32)], axis=-1)
        _, cp_attn = _attend_ref(hid, down_nodes, copy_mask, *rp["copy"])
        copy_dist = jnp.einsum("bt,btv->bv", cp_attn, scatter)
        p_gen = jax.nn.sigmoid(hid @ rp["cs_w"] + rp["cs_b"])
        outs.append(p_gen * gen + (1.0 - p_gen) * copy_dist)
    return jnp.stack(outs, axis=1), h, c


# ----------------------------- main -----------------------------
if __name__ == "__main__":
    key = jax.random.PRNGKey(0)
    ks = iter(jax.random.split(key, 64))

    def unif(shape, bound):
        return jax.random.uniform(next(ks), shape, jnp.float32, -bound, bound)

    def linear(in_f, out_f):
        b = 1.0 / np.sqrt(in_f)
        return unif((in_f, out_f), b), unif((1, out_f), b)

    def attn_params():
        wq, bq = linear(H, H)
        wk, bk = linear(H, H)
        b = 1.0 / np.sqrt(H)
        v = unif((1, H), b)        # nn.Linear(H,1) weight stored as a row
        bv = unif((1, 1), b)
        return (wq, bq, wk, bk, v, bv)

    up_p = attn_params()
    down_p = attn_params()
    copy_p = attn_params()
    u_wq, u_bq, u_wk, u_bk, u_v, u_bv = up_p
    d_wq, d_bq, d_wk, d_bk, d_v, d_bv = down_p
    c_wq, c_bq, c_wk, c_bk, c_v, c_bv = copy_p

    prj_w, prj_b = linear(IN_DIM + 2 * H, H)

    bl = 1.0 / np.sqrt(H)
    w_ih = unif((H, 4 * H), bl)
    w_hh = unif((H, 4 * H), bl)
    b_ih = unif((1, 4 * H), bl)
    b_hh = unif((1, 4 * H), bl)

    out_w, out_b = linear(H, OUT_SIZE)
    cs_w, cs_b = linear(H, 1)

    # ------------------ fused kernel parameters (built once, outside the kernel) ------------------
    # attention queries + copy switch, lane-aligned & padded to one 128-lane vreg
    pad_w = jnp.zeros((H, HID_PAD - 3 * H - 1), jnp.float32)
    pad_b = jnp.zeros((1, HID_PAD - 3 * H - 1), jnp.float32)
    attn_w = jnp.concatenate([u_wq, d_wq, c_wq, cs_w, pad_w], axis=1)        # (H, 128)
    attn_b = jnp.concatenate([u_bq, d_bq, c_bq, cs_b, pad_b], axis=1)        # (1, 128)
    # down / copy key projections fused (shared LHS)
    dc_wk = jnp.concatenate([d_wk, c_wk], axis=1)                            # (H, 2H)
    dc_bk = jnp.concatenate([d_bk, c_bk], axis=1)                            # (1, 2H)
    # stacked score vectors for the branch-stacked attention
    v_all = jnp.stack([u_v, d_v, c_v], axis=0)                               # (3, 1, H)
    # input_prj folded into the LSTM input weights (exact: both linear); split question/context rows
    gwq = prj_w[:IN_DIM] @ w_ih                                              # (IN_DIM, 4H)
    gwc = prj_w[IN_DIM:] @ w_ih                                              # (2H, 4H)
    gate_bias = prj_b @ w_ih + b_ih + b_hh                                   # (1, 4H)
    # output projection padded to 128 lanes: pad bias -1e30 -> padded softmax probs are exactly 0
    out_w_pad = jnp.concatenate([out_w, jnp.zeros((H, VPAD - OUT_SIZE), jnp.float32)], axis=1)
    out_b_pad = jnp.concatenate([out_b, jnp.full((1, VPAD - OUT_SIZE), -1e30, jnp.float32)], axis=1)

    kernel_params = (attn_w, attn_b, w_hh,
                     u_wk, u_bk, dc_wk, dc_bk, v_all,
                     gwq, gwc, gate_bias,
                     out_w_pad, out_b_pad)

    # ------------------ inputs ------------------
    questions = jax.random.normal(next(ks), (B, S, IN_DIM), jnp.float32)
    h0 = jax.random.normal(next(ks), (B, H), jnp.float32)
    c0 = jax.random.normal(next(ks), (B, H), jnp.float32)
    up_nodes = jax.random.normal(next(ks), (B, T_UP, H), jnp.float32)
    down_nodes = jax.random.normal(next(ks), (B, T_DOWN, H), jnp.float32)

    up_mask = jax.random.bernoulli(next(ks), 0.8, (B, T_UP)).astype(jnp.float32).at[:, 0].set(1.0)
    down_mask = jax.random.bernoulli(next(ks), 0.8, (B, T_DOWN)).astype(jnp.float32).at[:, 0].set(1.0)
    copy_mask = jax.random.bernoulli(next(ks), 0.8, (B, T_DOWN)).astype(jnp.float32).at[:, 0].set(1.0)

    src2trg_map = jax.random.randint(next(ks), (B, T_DOWN), 0, VTOT)

    # ------------------ run kernel ------------------
    run = jax.jit(lambda *a: lstm_decoder_forward(*a, kernel_params, u_bv, d_bv, c_bv))
    dec_out, h_T, c_T = run(questions, h0, c0, up_nodes, down_nodes,
                            up_mask, down_mask, copy_mask, src2trg_map)
    jax.block_until_ready((dec_out, h_T, c_T))

    # ------------------ verify against pure-JAX reference ------------------
    scatter_ref = jax.nn.one_hot(src2trg_map, VTOT, dtype=jnp.float32)
    ref_params = dict(up=up_p, down=down_p, copy=copy_p,
                      prj_w=prj_w, prj_b=prj_b,
                      w_ih=w_ih, w_hh=w_hh, b_ih=b_ih, b_hh=b_hh,
                      out_w=out_w, out_b=out_b, cs_w=cs_w, cs_b=cs_b)
    ref_out, ref_h, ref_c = reference_forward(questions, h0, c0, up_nodes, down_nodes,
                                              up_mask, down_mask, copy_mask, scatter_ref, ref_params)

    assert dec_out.shape == (B, S, VTOT)
    np.testing.assert_allclose(np.asarray(dec_out), np.asarray(ref_out), rtol=1e-3, atol=1e-3)
    np.testing.assert_allclose(np.asarray(h_T), np.asarray(ref_h), rtol=1e-3, atol=1e-3)
    np.testing.assert_allclose(np.asarray(c_T), np.asarray(ref_c), rtol=1e-3, atol=1e-3)

    print("KERNEL_OK")
</pallas_src>

<mosaic_0001>
module attributes {stable_mosaic.version = 11 : i64} {
  func.func @lstm_decoder_kernel(%arg0: memref<2x8x16xf32, #tpu.memory_space<vmem>>, %arg1: memref<2x32xf32, #tpu.memory_space<vmem>>, %arg2: memref<2x32xf32, #tpu.memory_space<vmem>>, %arg3: memref<2x8x32xf32, #tpu.memory_space<vmem>>, %arg4: memref<2x8x32xf32, #tpu.memory_space<vmem>>, %arg5: memref<2x3x8x1xf32, #tpu.memory_space<vmem>>, %arg6: memref<2x8x128xf32, #tpu.memory_space<vmem>>, %arg7: memref<32x128xf32, #tpu.memory_space<vmem>>, %arg8: memref<1x128xf32, #tpu.memory_space<vmem>>, %arg9: memref<32x128xf32, #tpu.memory_space<vmem>>, %arg10: memref<32x32xf32, #tpu.memory_space<vmem>>, %arg11: memref<1x32xf32, #tpu.memory_space<vmem>>, %arg12: memref<32x64xf32, #tpu.memory_space<vmem>>, %arg13: memref<1x64xf32, #tpu.memory_space<vmem>>, %arg14: memref<3x1x32xf32, #tpu.memory_space<vmem>>, %arg15: memref<16x128xf32, #tpu.memory_space<vmem>>, %arg16: memref<64x128xf32, #tpu.memory_space<vmem>>, %arg17: memref<1x128xf32, #tpu.memory_space<vmem>>, %arg18: memref<32x128xf32, #tpu.memory_space<vmem>>, %arg19: memref<1x128xf32, #tpu.memory_space<vmem>>, %arg20: memref<2x8x128xf32, #tpu.memory_space<vmem>>, %arg21: memref<2x32xf32, #tpu.memory_space<vmem>>, %arg22: memref<2x32xf32, #tpu.memory_space<vmem>>) attributes {dimension_semantics = [], scalar_prefetch = 0 : i64, scratch_operands = 0 : i64, tpu.core_type = #tpu.core_type<tc>} {
    %c0 = arith.constant 0 : index
    %c0_0 = arith.constant 0 : index
    %0 = vector.load %arg1[%c0, %c0_0] : memref<2x32xf32, #tpu.memory_space<vmem>>, vector<2x32xf32>
    %c0_1 = arith.constant 0 : index
    %c0_2 = arith.constant 0 : index
    %1 = vector.load %arg2[%c0_1, %c0_2] : memref<2x32xf32, #tpu.memory_space<vmem>>, vector<2x32xf32>
    %c0_3 = arith.constant 0 : index
    %c0_4 = arith.constant 0 : index
    %c0_5 = arith.constant 0 : index
    %2 = vector.load %arg3[%c0_3, %c0_4, %c0_5] : memref<2x8x32xf32, #tpu.memory_space<vmem>>, vector<2x8x32xf32>
    %c0_6 = arith.constant 0 : index
    %c0_7 = arith.constant 0 : index
    %c0_8 = arith.constant 0 : index
    %3 = vector.load %arg4[%c0_6, %c0_7, %c0_8] : memref<2x8x32xf32, #tpu.memory_space<vmem>>, vector<2x8x32xf32>
    %c0_9 = arith.constant 0 : index
    %c0_10 = arith.constant 0 : index
    %c0_11 = arith.constant 0 : index
    %c0_12 = arith.constant 0 : index
    %4 = vector.load %arg5[%c0_9, %c0_10, %c0_11, %c0_12] : memref<2x3x8x1xf32, #tpu.memory_space<vmem>>, vector<2x3x8x1xf32>
    %c0_13 = arith.constant 0 : index
    %c0_14 = arith.constant 0 : index
    %c0_15 = arith.constant 0 : index
    %5 = vector.load %arg6[%c0_13, %c0_14, %c0_15] : memref<2x8x128xf32, #tpu.memory_space<vmem>>, vector<2x8x128xf32>
    %c0_16 = arith.constant 0 : index
    %c0_17 = arith.constant 0 : index
    %6 = vector.load %arg7[%c0_16, %c0_17] : memref<32x128xf32, #tpu.memory_space<vmem>>, vector<32x128xf32>
    %c0_18 = arith.constant 0 : index
    %c0_19 = arith.constant 0 : index
    %7 = vector.load %arg8[%c0_18, %c0_19] : memref<1x128xf32, #tpu.memory_space<vmem>>, vector<1x128xf32>
    %c0_20 = arith.constant 0 : index
    %c0_21 = arith.constant 0 : index
    %8 = vector.load %arg9[%c0_20, %c0_21] : memref<32x128xf32, #tpu.memory_space<vmem>>, vector<32x128xf32>
    %c0_22 = arith.constant 0 : index
    %c0_23 = arith.constant 0 : index
    %9 = vector.load %arg15[%c0_22, %c0_23] : memref<16x128xf32, #tpu.memory_space<vmem>>, vector<16x128xf32>
    %c0_24 = arith.constant 0 : index
    %c0_25 = arith.constant 0 : index
    %10 = vector.load %arg16[%c0_24, %c0_25] : memref<64x128xf32, #tpu.memory_space<vmem>>, vector<64x128xf32>
    %c0_26 = arith.constant 0 : index
    %c0_27 = arith.constant 0 : index
    %11 = vector.load %arg17[%c0_26, %c0_27] : memref<1x128xf32, #tpu.memory_space<vmem>>, vector<1x128xf32>
    %c0_28 = arith.constant 0 : index
    %c0_29 = arith.constant 0 : index
    %12 = vector.load %arg18[%c0_28, %c0_29] : memref<32x128xf32, #tpu.memory_space<vmem>>, vector<32x128xf32>
    %c0_30 = arith.constant 0 : index
    %c0_31 = arith.constant 0 : index
    %13 = vector.load %arg19[%c0_30, %c0_31] : memref<1x128xf32, #tpu.memory_space<vmem>>, vector<1x128xf32>
    %c0_32 = arith.constant 0 : index
    %c0_33 = arith.constant 0 : index
    %c0_34 = arith.constant 0 : index
    %14 = vector.load %arg14[%c0_32, %c0_33, %c0_34] : memref<3x1x32xf32, #tpu.memory_space<vmem>>, vector<3x1x32xf32>
    %15 = vector.shape_cast %2 : vector<2x8x32xf32> to vector<16x32xf32>
    %c0_35 = arith.constant 0 : index
    %c0_36 = arith.constant 0 : index
    %16 = vector.load %arg10[%c0_35, %c0_36] : memref<32x32xf32, #tpu.memory_space<vmem>>, vector<32x32xf32>
    %cst = arith.constant dense<0.000000e+00> : vector<16x32xf32>
    %17 = tpu.matmul %15, %16, %cst {dimension_numbers = #tpu.dot_dimension_numbers<[1], [0], [0], [1], [0, 0, 1, 1], [], []>} : vector<16x32xf32>, vector<32x32xf32>, vector<16x32xf32> -> vector<16x32xf32>
    %c0_37 = arith.constant 0 : index
    %c0_38 = arith.constant 0 : index
    %18 = vector.load %arg11[%c0_37, %c0_38] : memref<1x32xf32, #tpu.memory_space<vmem>>, vector<1x32xf32>
    %19 = vector.broadcast %18 : vector<1x32xf32> to vector<16x32xf32>
    %20 = arith.addf %17, %19 : vector<16x32xf32>
    %21 = vector.shape_cast %20 : vector<16x32xf32> to vector<2x8x32xf32>
    %22 = vector.shape_cast %3 : vector<2x8x32xf32> to vector<16x32xf32>
    %c0_39 = arith.constant 0 : index
    %c0_40 = arith.constant 0 : index
    %23 = vector.load %arg12[%c0_39, %c0_40] : memref<32x64xf32, #tpu.memory_space<vmem>>, vector<32x64xf32>
    %cst_41 = arith.constant dense<0.000000e+00> : vector<16x64xf32>
    %24 = tpu.matmul %22, %23, %cst_41 {dimension_numbers = #tpu.dot_dimension_numbers<[1], [0], [0], [1], [0, 0, 1, 1], [], []>} : vector<16x32xf32>, vector<32x64xf32>, vector<16x64xf32> -> vector<16x64xf32>
    %c0_42 = arith.constant 0 : index
    %c0_43 = arith.constant 0 : index
    %25 = vector.load %arg13[%c0_42, %c0_43] : memref<1x64xf32, #tpu.memory_space<vmem>>, vector<1x64xf32>
    %26 = vector.broadcast %25 : vector<1x64xf32> to vector<16x64xf32>
    %27 = arith.addf %24, %26 : vector<16x64xf32>
    %28 = vector.extract_strided_slice %27 {offsets = [0, 0], sizes = [16, 32], strides = [1, 1]} : vector<16x64xf32> to vector<16x32xf32>
    %29 = vector.shape_cast %28 : vector<16x32xf32> to vector<2x8x32xf32>
    %30 = vector.extract_strided_slice %27 {offsets = [0, 32], sizes = [16, 32], strides = [1, 1]} : vector<16x64xf32> to vector<16x32xf32>
    %31 = vector.shape_cast %30 : vector<16x32xf32> to vector<2x8x32xf32>
    %32 = vector.shape_cast %21 : vector<2x8x32xf32> to vector<2x1x8x32xf32>
    %33 = vector.shape_cast %29 : vector<2x8x32xf32> to vector<2x1x8x32xf32>
    %34 = vector.shape_cast %31 : vector<2x8x32xf32> to vector<2x1x8x32xf32>
    %35 = tpu.concatenate %32, %33, %34 in 1 : vector<2x1x8x32xf32>, vector<2x1x8x32xf32>, vector<2x1x8x32xf32> -> vector<2x3x8x32xf32>
    %c0_44 = arith.constant 0 : index
    %c0_45 = arith.constant 0 : index
    %c0_46 = arith.constant 0 : index
    %36 = vector.load %arg0[%c0_44, %c0_45, %c0_46] : memref<2x8x16xf32, #tpu.memory_space<vmem>>, vector<2x8x16xf32>
    %37 = vector.shape_cast %36 : vector<2x8x16xf32> to vector<16x16xf32>
    %cst_47 = arith.constant dense<0.000000e+00> : vector<16x128xf32>
    %38 = tpu.matmul %37, %9, %cst_47 {dimension_numbers = #tpu.dot_dimension_numbers<[1], [0], [0], [1], [0, 0, 1, 1], [], []>} : vector<16x16xf32>, vector<16x128xf32>, vector<16x128xf32> -> vector<16x128xf32>
    %39 = vector.broadcast %11 : vector<1x128xf32> to vector<16x128xf32>
    %40 = arith.addf %38, %39 : vector<16x128xf32>
    %41 = vector.shape_cast %40 : vector<16x128xf32> to vector<2x8x128xf32>
    %cst_48 = arith.constant dense<0.000000e+00> : vector<2x128xf32>
    %42 = tpu.matmul %0, %6, %cst_48 {dimension_numbers = #tpu.dot_dimension_numbers<[1], [0], [0], [1], [0, 0, 1, 1], [], []>} : vector<2x32xf32>, vector<32x128xf32>, vector<2x128xf32> -> vector<2x128xf32>
    %43 = vector.broadcast %7 : vector<1x128xf32> to vector<2x128xf32>
    %44 = arith.addf %42, %43 : vector<2x128xf32>
    %cst_49 = arith.constant dense<0.000000e+00> : vector<2x128xf32>
    %45 = tpu.matmul %0, %8, %cst_49 {dimension_numbers = #tpu.dot_dimension_numbers<[1], [0], [0], [1], [0, 0, 1, 1], [], []>} : vector<2x32xf32>, vector<32x128xf32>, vector<2x128xf32> -> vector<2x128xf32>
    %46 = vector.extract_strided_slice %44 {offsets = [0, 0], sizes = [2, 32], strides = [1, 1]} : vector<2x128xf32> to vector<2x32xf32>
    %47 = vector.extract_strided_slice %44 {offsets = [0, 32], sizes = [2, 32], strides = [1, 1]} : vector<2x128xf32> to vector<2x32xf32>
    %48 = vector.extract_strided_slice %44 {offsets = [0, 64], sizes = [2, 32], strides = [1, 1]} : vector<2x128xf32> to vector<2x32xf32>
    %49 = vector.shape_cast %46 : vector<2x32xf32> to vector<2x1x32xf32>
    %50 = vector.shape_cast %47 : vector<2x32xf32> to vector<2x1x32xf32>
    %51 = vector.shape_cast %48 : vector<2x32xf32> to vector<2x1x32xf32>
    %52 = tpu.concatenate %49, %50, %51 in 1 : vector<2x1x32xf32>, vector<2x1x32xf32>, vector<2x1x32xf32> -> vector<2x3x32xf32>
    %53 = vector.shape_cast %52 : vector<2x3x32xf32> to vector<2x3x1x32xf32>
    %54 = vector.broadcast %53 : vector<2x3x1x32xf32> to vector<2x3x8x32xf32>
    %55 = arith.addf %35, %54 : vector<2x3x8x32xf32>
    %56 = math.tanh %55 : vector<2x3x8x32xf32>
    %57 = vector.shape_cast %14 : vector<3x1x32xf32> to vector<1x3x1x32xf32>
    %58 = vector.broadcast %57 : vector<1x3x1x32xf32> to vector<2x3x8x32xf32>
    %59 = arith.mulf %56, %58 : vector<2x3x8x32xf32>
    %cst_50 = arith.constant dense<0.000000e+00> : vector<2x3x8xf32>
    %60 = vector.multi_reduction <add>, %59, %cst_50 [3] : vector<2x3x8x32xf32> to vector<2x3x8xf32>
    %61 = vector.shape_cast %60 : vector<2x3x8xf32> to vector<2x3x8x1xf32>
    %62 = arith.addf %61, %4 : vector<2x3x8x1xf32>
    %cst_51 = arith.constant dense<0xFF800000> : vector<2x3x1xf32>
    %63 = vector.multi_reduction <maximumf>, %62, %cst_51 [2] : vector<2x3x8x1xf32> to vector<2x3x1xf32>
    %64 = vector.shape_cast %63 : vector<2x3x1xf32> to vector<2x3x1x1xf32>
    %65 = vector.broadcast %64 : vector<2x3x1x1xf32> to vector<2x3x8x1xf32>
    %66 = arith.subf %62, %65 : vector<2x3x8x1xf32>
    %67 = math.exp %66 : vector<2x3x8x1xf32>
    %cst_52 = arith.constant dense<0.000000e+00> : vector<2x3x1xf32>
    %68 = vector.multi_reduction <add>, %67, %cst_52 [2] : vector<2x3x8x1xf32> to vector<2x3x1xf32>
    %69 = vector.shape_cast %68 : vector<2x3x1xf32> to vector<2x3x1x1xf32>
    %70 = vector.broadcast %69 : vector<2x3x1x1xf32> to vector<2x3x8x1xf32>
    %71 = arith.divf %67, %70 : vector<2x3x8x1xf32>
    %72 = vector.extract_strided_slice %71 {offsets = [0, 0, 0, 0], sizes = [2, 1, 8, 1], strides = [1, 1, 1, 1]} : vector<2x3x8x1xf32> to vector<2x1x8x1xf32>
    %73 = vector.shape_cast %72 : vector<2x1x8x1xf32> to vector<2x8x1xf32>
    %74 = vector.broadcast %73 : vector<2x8x1xf32> to vector<2x8x32xf32>
    %75 = arith.mulf %74, %2 : vector<2x8x32xf32>
    %cst_53 = arith.constant dense<0.000000e+00> : vector<2x32xf32>
    %76 = vector.multi_reduction <add>, %75, %cst_53 [1] : vector<2x8x32xf32> to vector<2x32xf32>
    %77 = vector.extract_strided_slice %71 {offsets = [0, 1, 0, 0], sizes = [2, 1, 8, 1], strides = [1, 1, 1, 1]} : vector<2x3x8x1xf32> to vector<2x1x8x1xf32>
    %78 = vector.shape_cast %77 : vector<2x1x8x1xf32> to vector<2x8x1xf32>
    %79 = vector.broadcast %78 : vector<2x8x1xf32> to vector<2x8x32xf32>
    %80 = arith.mulf %79, %3 : vector<2x8x32xf32>
    %cst_54 = arith.constant dense<0.000000e+00> : vector<2x32xf32>
    %81 = vector.multi_reduction <add>, %80, %cst_54 [1] : vector<2x8x32xf32> to vector<2x32xf32>
    %82 = vector.extract_strided_slice %71 {offsets = [0, 2, 0, 0], sizes = [2, 1, 8, 1], strides = [1, 1, 1, 1]} : vector<2x3x8x1xf32> to vector<2x1x8x1xf32>
    %83 = vector.shape_cast %82 : vector<2x1x8x1xf32> to vector<2x8x1xf32>
    %84 = vector.broadcast %83 : vector<2x8x1xf32> to vector<2x8x128xf32>
    %85 = arith.mulf %84, %5 : vector<2x8x128xf32>
    %cst_55 = arith.constant dense<0.000000e+00> : vector<2x128xf32>
    %86 = vector.multi_reduction <add>, %85, %cst_55 [1] : vector<2x8x128xf32> to vector<2x128xf32>
    %87 = vector.extract_strided_slice %44 {offsets = [0, 96], sizes = [2, 1], strides = [1, 1]} : vector<2x128xf32> to vector<2x1xf32>
    %88 = arith.negf %87 : vector<2x1xf32>
    %89 = math.exp %88 : vector<2x1xf32>
    %cst_56 = arith.constant 1.000000e+00 : f32
    %90 = vector.broadcast %cst_56 : f32 to vector<2x1xf32>
    %91 = arith.addf %90, %89 : vector<2x1xf32>
    %92 = arith.divf %90, %91 : vector<2x1xf32>
    %93 = tpu.concatenate %76, %81 in 1 : vector<2x32xf32>, vector<2x32xf32> -> vector<2x64xf32>
    %cst_57 = arith.constant dense<0.000000e+00> : vector<2x128xf32>
    %94 = tpu.matmul %93, %10, %cst_57 {dimension_numbers = #tpu.dot_dimension_numbers<[1], [0], [0], [1], [0, 0, 1, 1], [], []>} : vector<2x64xf32>, vector<64x128xf32>, vector<2x128xf32> -> vector<2x128xf32>
    %95 = arith.addf %94, %45 : vector<2x128xf32>
    %96 = vector.extract_strided_slice %41 {offsets = [0, 0, 0], sizes = [2, 1, 128], strides = [1, 1, 1]} : vector<2x8x128xf32> to vector<2x1x128xf32>
    %97 = vector.shape_cast %96 : vector<2x1x128xf32> to vector<2x128xf32>
    %98 = arith.addf %95, %97 : vector<2x128xf32>
    %99 = arith.negf %98 : vector<2x128xf32>
    %100 = math.exp %99 : vector<2x128xf32>
    %cst_58 = arith.constant 1.000000e+00 : f32
    %101 = vector.broadcast %cst_58 : f32 to vector<2x128xf32>
    %102 = arith.addf %101, %100 : vector<2x128xf32>
    %103 = arith.divf %101, %102 : vector<2x128xf32>
    %104 = math.tanh %98 : vector<2x128xf32>
    %105 = vector.extract_strided_slice %103 {offsets = [0, 0], sizes = [2, 32], strides = [1, 1]} : vector<2x128xf32> to vector<2x32xf32>
    %106 = vector.extract_strided_slice %103 {offsets = [0, 32], sizes = [2, 32], strides = [1, 1]} : vector<2x128xf32> to vector<2x32xf32>
    %107 = vector.extract_strided_slice %104 {offsets = [0, 64], sizes = [2, 32], strides = [1, 1]} : vector<2x128xf32> to vector<2x32xf32>
    %108 = vector.extract_strided_slice %103 {offsets = [0, 96], sizes = [2, 32], strides = [1, 1]} : vector<2x128xf32> to vector<2x32xf32>
    %109 = arith.mulf %106, %1 : vector<2x32xf32>
    %110 = arith.mulf %105, %107 : vector<2x32xf32>
    %111 = arith.addf %109, %110 : vector<2x32xf32>
    %112 = math.tanh %111 : vector<2x32xf32>
    %113 = arith.mulf %108, %112 : vector<2x32xf32>
    %cst_59 = arith.constant dense<0.000000e+00> : vector<2x128xf32>
    %114 = tpu.matmul %113, %12, %cst_59 {dimension_numbers = #tpu.dot_dimension_numbers<[1], [0], [0], [1], [0, 0, 1, 1], [], []>} : vector<2x32xf32>, vector<32x128xf32>, vector<2x128xf32> -> vector<2x128xf32>
    %115 = vector.broadcast %13 : vector<1x128xf32> to vector<2x128xf32>
    %116 = arith.addf %114, %115 : vector<2x128xf32>
    %cst_60 = arith.constant dense<0xFF800000> : vector<2xf32>
    %117 = vector.multi_reduction <maximumf>, %116, %cst_60 [1] : vector<2x128xf32> to vector<2xf32>
    %118 = vector.shape_cast %117 : vector<2xf32> to vector<2x1xf32>
    %119 = vector.broadcast %118 : vector<2x1xf32> to vector<2x128xf32>
    %120 = arith.subf %116, %119 : vector<2x128xf32>
    %121 = math.exp %120 : vector<2x128xf32>
    %cst_61 = arith.constant dense<0.000000e+00> : vector<2xf32>
    %122 = vector.multi_reduction <add>, %121, %cst_61 [1] : vector<2x128xf32> to vector<2xf32>
    %123 = vector.shape_cast %122 : vector<2xf32> to vector<2x1xf32>
    %124 = vector.broadcast %123 : vector<2x1xf32> to vector<2x128xf32>
    %125 = arith.divf %121, %124 : vector<2x128xf32>
    %126 = vector.broadcast %92 : vector<2x1xf32> to vector<2x128xf32>
    %127 = arith.mulf %126, %125 : vector<2x128xf32>
    %cst_62 = arith.constant 1.000000e+00 : f32
    %128 = vector.broadcast %cst_62 : f32 to vector<2x1xf32>
    %129 = arith.subf %128, %92 : vector<2x1xf32>
    %130 = vector.broadcast %129 : vector<2x1xf32> to vector<2x128xf32>
    %131 = arith.mulf %130, %86 : vector<2x128xf32>
    %132 = arith.addf %127, %131 : vector<2x128xf32>
    %c0_63 = arith.constant 0 : index
    %c0_64 = arith.constant 0 : index
    %c0_65 = arith.constant 0 : index
    %133 = vector.load %arg20[%c0_63, %c0_64, %c0_65] : memref<2x8x128xf32, #tpu.memory_space<vmem>>, vector<2x1x128xf32>
    %134 = vector.shape_cast %133 : vector<2x1x128xf32> to vector<2x128xf32>
    %135 = vector.shape_cast %132 : vector<2x128xf32> to vector<2x1x128xf32>
    tpu.vector_store %arg20[%c0_63, %c0_64, %c0_65], %135 {strides = array<i32>} : memref<2x8x128xf32, #tpu.memory_space<vmem>>, vector<2x1x128xf32>,
    %cst_66 = arith.constant dense<0.000000e+00> : vector<2x128xf32>
    %136 = tpu.matmul %113, %6, %cst_66 {dimension_numbers = #tpu.dot_dimension_numbers<[1], [0], [0], [1], [0, 0, 1, 1], [], []>} : vector<2x32xf32>, vector<32x128xf32>, vector<2x128xf32> -> vector<2x128xf32>
    %137 = vector.broadcast %7 : vector<1x128xf32> to vector<2x128xf32>
    %138 = arith.addf %136, %137 : vector<2x128xf32>
    %cst_67 = arith.constant dense<0.000000e+00> : vector<2x128xf32>
    %139 = tpu.matmul %113, %8, %cst_67 {dimension_numbers = #tpu.dot_dimension_numbers<[1], [0], [0], [1], [0, 0, 1, 1], [], []>} : vector<2x32xf32>, vector<32x128xf32>, vector<2x128xf32> -> vector<2x128xf32>
    %140 = vector.extract_strided_slice %138 {offsets = [0, 0], sizes = [2, 32], strides = [1, 1]} : vector<2x128xf32> to vector<2x32xf32>
    %141 = vector.extract_strided_slice %138 {offsets = [0, 32], sizes = [2, 32], strides = [1, 1]} : vector<2x128xf32> to vector<2x32xf32>
    %142 = vector.extract_strided_slice %138 {offsets = [0, 64], sizes = [2, 32], strides = [1, 1]} : vector<2x128xf32> to vector<2x32xf32>
    %143 = vector.shape_cast %140 : vector<2x32xf32> to vector<2x1x32xf32>
    %144 = vector.shape_cast %141 : vector<2x32xf32> to vector<2x1x32xf32>
    %145 = vector.shape_cast %142 : vector<2x32xf32> to vector<2x1x32xf32>
    %146 = tpu.concatenate %143, %144, %145 in 1 : vector<2x1x32xf32>, vector<2x1x32xf32>, vector<2x1x32xf32> -> vector<2x3x32xf32>
    %147 = vector.shape_cast %146 : vector<2x3x32xf32> to vector<2x3x1x32xf32>
    %148 = vector.broadcast %147 : vector<2x3x1x32xf32> to vector<2x3x8x32xf32>
    %149 = arith.addf %35, %148 : vector<2x3x8x32xf32>
    %150 = math.tanh %149 : vector<2x3x8x32xf32>
    %151 = vector.shape_cast %14 : vector<3x1x32xf32> to vector<1x3x1x32xf32>
    %152 = vector.broadcast %151 : vector<1x3x1x32xf32> to vector<2x3x8x32xf32>
    %153 = arith.mulf %150, %152 : vector<2x3x8x32xf32>
    %cst_68 = arith.constant dense<0.000000e+00> : vector<2x3x8xf32>
    %154 = vector.multi_reduction <add>, %153, %cst_68 [3] : vector<2x3x8x32xf32> to vector<2x3x8xf32>
    %155 = vector.shape_cast %154 : vector<2x3x8xf32> to vector<2x3x8x1xf32>
    %156 = arith.addf %155, %4 : vector<2x3x8x1xf32>
    %cst_69 = arith.constant dense<0xFF800000> : vector<2x3x1xf32>
    %157 = vector.multi_reduction <maximumf>, %156, %cst_69 [2] : vector<2x3x8x1xf32> to vector<2x3x1xf32>
    %158 = vector.shape_cast %157 : vector<2x3x1xf32> to vector<2x3x1x1xf32>
    %159 = vector.broadcast %158 : vector<2x3x1x1xf32> to vector<2x3x8x1xf32>
    %160 = arith.subf %156, %159 : vector<2x3x8x1xf32>
    %161 = math.exp %160 : vector<2x3x8x1xf32>
    %cst_70 = arith.constant dense<0.000000e+00> : vector<2x3x1xf32>
    %162 = vector.multi_reduction <add>, %161, %cst_70 [2] : vector<2x3x8x1xf32> to vector<2x3x1xf32>
    %163 = vector.shape_cast %162 : vector<2x3x1xf32> to vector<2x3x1x1xf32>
    %164 = vector.broadcast %163 : vector<2x3x1x1xf32> to vector<2x3x8x1xf32>
    %165 = arith.divf %161, %164 : vector<2x3x8x1xf32>
    %166 = vector.extract_strided_slice %165 {offsets = [0, 0, 0, 0], sizes = [2, 1, 8, 1], strides = [1, 1, 1, 1]} : vector<2x3x8x1xf32> to vector<2x1x8x1xf32>
    %167 = vector.shape_cast %166 : vector<2x1x8x1xf32> to vector<2x8x1xf32>
    %168 = vector.broadcast %167 : vector<2x8x1xf32> to vector<2x8x32xf32>
    %169 = arith.mulf %168, %2 : vector<2x8x32xf32>
    %cst_71 = arith.constant dense<0.000000e+00> : vector<2x32xf32>
    %170 = vector.multi_reduction <add>, %169, %cst_71 [1] : vector<2x8x32xf32> to vector<2x32xf32>
    %171 = vector.extract_strided_slice %165 {offsets = [0, 1, 0, 0], sizes = [2, 1, 8, 1], strides = [1, 1, 1, 1]} : vector<2x3x8x1xf32> to vector<2x1x8x1xf32>
    %172 = vector.shape_cast %171 : vector<2x1x8x1xf32> to vector<2x8x1xf32>
    %173 = vector.broadcast %172 : vector<2x8x1xf32> to vector<2x8x32xf32>
    %174 = arith.mulf %173, %3 : vector<2x8x32xf32>
    %cst_72 = arith.constant dense<0.000000e+00> : vector<2x32xf32>
    %175 = vector.multi_reduction <add>, %174, %cst_72 [1] : vector<2x8x32xf32> to vector<2x32xf32>
    %176 = vector.extract_strided_slice %165 {offsets = [0, 2, 0, 0], sizes = [2, 1, 8, 1], strides = [1, 1, 1, 1]} : vector<2x3x8x1xf32> to vector<2x1x8x1xf32>
    %177 = vector.shape_cast %176 : vector<2x1x8x1xf32> to vector<2x8x1xf32>
    %178 = vector.broadcast %177 : vector<2x8x1xf32> to vector<2x8x128xf32>
    %179 = arith.mulf %178, %5 : vector<2x8x128xf32>
    %cst_73 = arith.constant dense<0.000000e+00> : vector<2x128xf32>
    %180 = vector.multi_reduction <add>, %179, %cst_73 [1] : vector<2x8x128xf32> to vector<2x128xf32>
    %181 = vector.extract_strided_slice %138 {offsets = [0, 96], sizes = [2, 1], strides = [1, 1]} : vector<2x128xf32> to vector<2x1xf32>
    %182 = arith.negf %181 : vector<2x1xf32>
    %183 = math.exp %182 : vector<2x1xf32>
    %cst_74 = arith.constant 1.000000e+00 : f32
    %184 = vector.broadcast %cst_74 : f32 to vector<2x1xf32>
    %185 = arith.addf %184, %183 : vector<2x1xf32>
    %186 = arith.divf %184, %185 : vector<2x1xf32>
    %187 = tpu.concatenate %170, %175 in 1 : vector<2x32xf32>, vector<2x32xf32> -> vector<2x64xf32>
    %cst_75 = arith.constant dense<0.000000e+00> : vector<2x128xf32>
    %188 = tpu.matmul %187, %10, %cst_75 {dimension_numbers = #tpu.dot_dimension_numbers<[1], [0], [0], [1], [0, 0, 1, 1], [], []>} : vector<2x64xf32>, vector<64x128xf32>, vector<2x128xf32> -> vector<2x128xf32>
    %189 = arith.addf %188, %139 : vector<2x128xf32>
    %190 = vector.extract_strided_slice %41 {offsets = [0, 1, 0], sizes = [2, 1, 128], strides = [1, 1, 1]} : vector<2x8x128xf32> to vector<2x1x128xf32>
    %191 = vector.shape_cast %190 : vector<2x1x128xf32> to vector<2x128xf32>
    %192 = arith.addf %189, %191 : vector<2x128xf32>
    %193 = arith.negf %192 : vector<2x128xf32>
    %194 = math.exp %193 : vector<2x128xf32>
    %cst_76 = arith.constant 1.000000e+00 : f32
    %195 = vector.broadcast %cst_76 : f32 to vector<2x128xf32>
    %196 = arith.addf %195, %194 : vector<2x128xf32>
    %197 = arith.divf %195, %196 : vector<2x128xf32>
    %198 = math.tanh %192 : vector<2x128xf32>
    %199 = vector.extract_strided_slice %197 {offsets = [0, 0], sizes = [2, 32], strides = [1, 1]} : vector<2x128xf32> to vector<2x32xf32>
    %200 = vector.extract_strided_slice %197 {offsets = [0, 32], sizes = [2, 32], strides = [1, 1]} : vector<2x128xf32> to vector<2x32xf32>
    %201 = vector.extract_strided_slice %198 {offsets = [0, 64], sizes = [2, 32], strides = [1, 1]} : vector<2x128xf32> to vector<2x32xf32>
    %202 = vector.extract_strided_slice %197 {offsets = [0, 96], sizes = [2, 32], strides = [1, 1]} : vector<2x128xf32> to vector<2x32xf32>
    %203 = arith.mulf %200, %111 : vector<2x32xf32>
    %204 = arith.mulf %199, %201 : vector<2x32xf32>
    %205 = arith.addf %203, %204 : vector<2x32xf32>
    %206 = math.tanh %205 : vector<2x32xf32>
    %207 = arith.mulf %202, %206 : vector<2x32xf32>
    %cst_77 = arith.constant dense<0.000000e+00> : vector<2x128xf32>
    %208 = tpu.matmul %207, %12, %cst_77 {dimension_numbers = #tpu.dot_dimension_numbers<[1], [0], [0], [1], [0, 0, 1, 1], [], []>} : vector<2x32xf32>, vector<32x128xf32>, vector<2x128xf32> -> vector<2x128xf32>
    %209 = vector.broadcast %13 : vector<1x128xf32> to vector<2x128xf32>
    %210 = arith.addf %208, %209 : vector<2x128xf32>
    %cst_78 = arith.constant dense<0xFF800000> : vector<2xf32>
    %211 = vector.multi_reduction <maximumf>, %210, %cst_78 [1] : vector<2x128xf32> to vector<2xf32>
    %212 = vector.shape_cast %211 : vector<2xf32> to vector<2x1xf32>
    %213 = vector.broadcast %212 : vector<2x1xf32> to vector<2x128xf32>
    %214 = arith.subf %210, %213 : vector<2x128xf32>
    %215 = math.exp %214 : vector<2x128xf32>
    %cst_79 = arith.constant dense<0.000000e+00> : vector<2xf32>
    %216 = vector.multi_reduction <add>, %215, %cst_79 [1] : vector<2x128xf32> to vector<2xf32>
    %217 = vector.shape_cast %216 : vector<2xf32> to vector<2x1xf32>
    %218 = vector.broadcast %217 : vector<2x1xf32> to vector<2x128xf32>
    %219 = arith.divf %215, %218 : vector<2x128xf32>
    %220 = vector.broadcast %186 : vector<2x1xf32> to vector<2x128xf32>
    %221 = arith.mulf %220, %219 : vector<2x128xf32>
    %cst_80 = arith.constant 1.000000e+00 : f32
    %222 = vector.broadcast %cst_80 : f32 to vector<2x1xf32>
    %223 = arith.subf %222, %186 : vector<2x1xf32>
    %224 = vector.broadcast %223 : vector<2x1xf32> to vector<2x128xf32>
    %225 = arith.mulf %224, %180 : vector<2x128xf32>
    %226 = arith.addf %221, %225 : vector<2x128xf32>
    %c0_81 = arith.constant 0 : index
    %c1 = arith.constant 1 : index
    %c0_82 = arith.constant 0 : index
    %227 = vector.load %arg20[%c0_81, %c1, %c0_82] : memref<2x8x128xf32, #tpu.memory_space<vmem>>, vector<2x1x128xf32>
    %228 = vector.shape_cast %227 : vector<2x1x128xf32> to vector<2x128xf32>
    %229 = vector.shape_cast %226 : vector<2x128xf32> to vector<2x1x128xf32>
    tpu.vector_store %arg20[%c0_81, %c1, %c0_82], %229 {strides = array<i32>} : memref<2x8x128xf32, #tpu.memory_space<vmem>>, vector<2x1x128xf32>,
    %cst_83 = arith.constant dense<0.000000e+00> : vector<2x128xf32>
    %230 = tpu.matmul %207, %6, %cst_83 {dimension_numbers = #tpu.dot_dimension_numbers<[1], [0], [0], [1], [0, 0, 1, 1], [], []>} : vector<2x32xf32>, vector<32x128xf32>, vector<2x128xf32> -> vector<2x128xf32>
    %231 = vector.broadcast %7 : vector<1x128xf32> to vector<2x128xf32>
    %232 = arith.addf %230, %231 : vector<2x128xf32>
    %cst_84 = arith.constant dense<0.000000e+00> : vector<2x128xf32>
    %233 = tpu.matmul %207, %8, %cst_84 {dimension_numbers = #tpu.dot_dimension_numbers<[1], [0], [0], [1], [0, 0, 1, 1], [], []>} : vector<2x32xf32>, vector<32x128xf32>, vector<2x128xf32> -> vector<2x128xf32>
    %234 = vector.extract_strided_slice %232 {offsets = [0, 0], sizes = [2, 32], strides = [1, 1]} : vector<2x128xf32> to vector<2x32xf32>
    %235 = vector.extract_strided_slice %232 {offsets = [0, 32], sizes = [2, 32], strides = [1, 1]} : vector<2x128xf32> to vector<2x32xf32>
    %236 = vector.extract_strided_slice %232 {offsets = [0, 64], sizes = [2, 32], strides = [1, 1]} : vector<2x128xf32> to vector<2x32xf32>
    %237 = vector.shape_cast %234 : vector<2x32xf32> to vector<2x1x32xf32>
    %238 = vector.shape_cast %235 : vector<2x32xf32> to vector<2x1x32xf32>
    %239 = vector.shape_cast %236 : vector<2x32xf32> to vector<2x1x32xf32>
    %240 = tpu.concatenate %237, %238, %239 in 1 : vector<2x1x32xf32>, vector<2x1x32xf32>, vector<2x1x32xf32> -> vector<2x3x32xf32>
    %241 = vector.shape_cast %240 : vector<2x3x32xf32> to vector<2x3x1x32xf32>
    %242 = vector.broadcast %241 : vector<2x3x1x32xf32> to vector<2x3x8x32xf32>
    %243 = arith.addf %35, %242 : vector<2x3x8x32xf32>
    %244 = math.tanh %243 : vector<2x3x8x32xf32>
    %245 = vector.shape_cast %14 : vector<3x1x32xf32> to vector<1x3x1x32xf32>
    %246 = vector.broadcast %245 : vector<1x3x1x32xf32> to vector<2x3x8x32xf32>
    %247 = arith.mulf %244, %246 : vector<2x3x8x32xf32>
    %cst_85 = arith.constant dense<0.000000e+00> : vector<2x3x8xf32>
    %248 = vector.multi_reduction <add>, %247, %cst_85 [3] : vector<2x3x8x32xf32> to vector<2x3x8xf32>
    %249 = vector.shape_cast %248 : vector<2x3x8xf32> to vector<2x3x8x1xf32>
    %250 = arith.addf %249, %4 : vector<2x3x8x1xf32>
    %cst_86 = arith.constant dense<0xFF800000> : vector<2x3x1xf32>
    %251 = vector.multi_reduction <maximumf>, %250, %cst_86 [2] : vector<2x3x8x1xf32> to vector<2x3x1xf32>
    %252 = vector.shape_cast %251 : vector<2x3x1xf32> to vector<2x3x1x1xf32>
    %253 = vector.broadcast %252 : vector<2x3x1x1xf32> to vector<2x3x8x1xf32>
    %254 = arith.subf %250, %253 : vector<2x3x8x1xf32>
    %255 = math.exp %254 : vector<2x3x8x1xf32>
    %cst_87 = arith.constant dense<0.000000e+00> : vector<2x3x1xf32>
    %256 = vector.multi_reduction <add>, %255, %cst_87 [2] : vector<2x3x8x1xf32> to vector<2x3x1xf32>
    %257 = vector.shape_cast %256 : vector<2x3x1xf32> to vector<2x3x1x1xf32>
    %258 = vector.broadcast %257 : vector<2x3x1x1xf32> to vector<2x3x8x1xf32>
    %259 = arith.divf %255, %258 : vector<2x3x8x1xf32>
    %260 = vector.extract_strided_slice %259 {offsets = [0, 0, 0, 0], sizes = [2, 1, 8, 1], strides = [1, 1, 1, 1]} : vector<2x3x8x1xf32> to vector<2x1x8x1xf32>
    %261 = vector.shape_cast %260 : vector<2x1x8x1xf32> to vector<2x8x1xf32>
    %262 = vector.broadcast %261 : vector<2x8x1xf32> to vector<2x8x32xf32>
    %263 = arith.mulf %262, %2 : vector<2x8x32xf32>
    %cst_88 = arith.constant dense<0.000000e+00> : vector<2x32xf32>
    %264 = vector.multi_reduction <add>, %263, %cst_88 [1] : vector<2x8x32xf32> to vector<2x32xf32>
    %265 = vector.extract_strided_slice %259 {offsets = [0, 1, 0, 0], sizes = [2, 1, 8, 1], strides = [1, 1, 1, 1]} : vector<2x3x8x1xf32> to vector<2x1x8x1xf32>
    %266 = vector.shape_cast %265 : vector<2x1x8x1xf32> to vector<2x8x1xf32>
    %267 = vector.broadcast %266 : vector<2x8x1xf32> to vector<2x8x32xf32>
    %268 = arith.mulf %267, %3 : vector<2x8x32xf32>
    %cst_89 = arith.constant dense<0.000000e+00> : vector<2x32xf32>
    %269 = vector.multi_reduction <add>, %268, %cst_89 [1] : vector<2x8x32xf32> to vector<2x32xf32>
    %270 = vector.extract_strided_slice %259 {offsets = [0, 2, 0, 0], sizes = [2, 1, 8, 1], strides = [1, 1, 1, 1]} : vector<2x3x8x1xf32> to vector<2x1x8x1xf32>
    %271 = vector.shape_cast %270 : vector<2x1x8x1xf32> to vector<2x8x1xf32>
    %272 = vector.broadcast %271 : vector<2x8x1xf32> to vector<2x8x128xf32>
    %273 = arith.mulf %272, %5 : vector<2x8x128xf32>
    %cst_90 = arith.constant dense<0.000000e+00> : vector<2x128xf32>
    %274 = vector.multi_reduction <add>, %273, %cst_90 [1] : vector<2x8x128xf32> to vector<2x128xf32>
    %275 = vector.extract_strided_slice %232 {offsets = [0, 96], sizes = [2, 1], strides = [1, 1]} : vector<2x128xf32> to vector<2x1xf32>
    %276 = arith.negf %275 : vector<2x1xf32>
    %277 = math.exp %276 : vector<2x1xf32>
    %cst_91 = arith.constant 1.000000e+00 : f32
    %278 = vector.broadcast %cst_91 : f32 to vector<2x1xf32>
    %279 = arith.addf %278, %277 : vector<2x1xf32>
    %280 = arith.divf %278, %279 : vector<2x1xf32>
    %281 = tpu.concatenate %264, %269 in 1 : vector<2x32xf32>, vector<2x32xf32> -> vector<2x64xf32>
    %cst_92 = arith.constant dense<0.000000e+00> : vector<2x128xf32>
    %282 = tpu.matmul %281, %10, %cst_92 {dimension_numbers = #tpu.dot_dimension_numbers<[1], [0], [0], [1], [0, 0, 1, 1], [], []>} : vector<2x64xf32>, vector<64x128xf32>, vector<2x128xf32> -> vector<2x128xf32>
    %283 = arith.addf %282, %233 : vector<2x128xf32>
    %284 = vector.extract_strided_slice %41 {offsets = [0, 2, 0], sizes = [2, 1, 128], strides = [1, 1, 1]} : vector<2x8x128xf32> to vector<2x1x128xf32>
    %285 = vector.shape_cast %284 : vector<2x1x128xf32> to vector<2x128xf32>
    %286 = arith.addf %283, %285 : vector<2x128xf32>
    %287 = arith.negf %286 : vector<2x128xf32>
    %288 = math.exp %287 : vector<2x128xf32>
    %cst_93 = arith.constant 1.000000e+00 : f32
    %289 = vector.broadcast %cst_93 : f32 to vector<2x128xf32>
    %290 = arith.addf %289, %288 : vector<2x128xf32>
    %291 = arith.divf %289, %290 : vector<2x128xf32>
    %292 = math.tanh %286 : vector<2x128xf32>
    %293 = vector.extract_strided_slice %291 {offsets = [0, 0], sizes = [2, 32], strides = [1, 1]} : vector<2x128xf32> to vector<2x32xf32>
    %294 = vector.extract_strided_slice %291 {offsets = [0, 32], sizes = [2, 32], strides = [1, 1]} : vector<2x128xf32> to vector<2x32xf32>
    %295 = vector.extract_strided_slice %292 {offsets = [0, 64], sizes = [2, 32], strides = [1, 1]} : vector<2x128xf32> to vector<2x32xf32>
    %296 = vector.extract_strided_slice %291 {offsets = [0, 96], sizes = [2, 32], strides = [1, 1]} : vector<2x128xf32> to vector<2x32xf32>
    %297 = arith.mulf %294, %205 : vector<2x32xf32>
    %298 = arith.mulf %293, %295 : vector<2x32xf32>
    %299 = arith.addf %297, %298 : vector<2x32xf32>
    %300 = math.tanh %299 : vector<2x32xf32>
    %301 = arith.mulf %296, %300 : vector<2x32xf32>
    %cst_94 = arith.constant dense<0.000000e+00> : vector<2x128xf32>
    %302 = tpu.matmul %301, %12, %cst_94 {dimension_numbers = #tpu.dot_dimension_numbers<[1], [0], [0], [1], [0, 0, 1, 1], [], []>} : vector<2x32xf32>, vector<32x128xf32>, vector<2x128xf32> -> vector<2x128xf32>
    %303 = vector.broadcast %13 : vector<1x128xf32> to vector<2x128xf32>
    %304 = arith.addf %302, %303 : vector<2x128xf32>
    %cst_95 = arith.constant dense<0xFF800000> : vector<2xf32>
    %305 = vector.multi_reduction <maximumf>, %304, %cst_95 [1] : vector<2x128xf32> to vector<2xf32>
    %306 = vector.shape_cast %305 : vector<2xf32> to vector<2x1xf32>
    %307 = vector.broadcast %306 : vector<2x1xf32> to vector<2x128xf32>
    %308 = arith.subf %304, %307 : vector<2x128xf32>
    %309 = math.exp %308 : vector<2x128xf32>
    %cst_96 = arith.constant dense<0.000000e+00> : vector<2xf32>
    %310 = vector.multi_reduction <add>, %309, %cst_96 [1] : vector<2x128xf32> to vector<2xf32>
    %311 = vector.shape_cast %310 : vector<2xf32> to vector<2x1xf32>
    %312 = vector.broadcast %311 : vector<2x1xf32> to vector<2x128xf32>
    %313 = arith.divf %309, %312 : vector<2x128xf32>
    %314 = vector.broadcast %280 : vector<2x1xf32> to vector<2x128xf32>
    %315 = arith.mulf %314, %313 : vector<2x128xf32>
    %cst_97 = arith.constant 1.000000e+00 : f32
    %316 = vector.broadcast %cst_97 : f32 to vector<2x1xf32>
    %317 = arith.subf %316, %280 : vector<2x1xf32>
    %318 = vector.broadcast %317 : vector<2x1xf32> to vector<2x128xf32>
    %319 = arith.mulf %318, %274 : vector<2x128xf32>
    %320 = arith.addf %315, %319 : vector<2x128xf32>
    %c0_98 = arith.constant 0 : index
    %c2 = arith.constant 2 : index
    %c0_99 = arith.constant 0 : index
    %321 = vector.load %arg20[%c0_98, %c2, %c0_99] : memref<2x8x128xf32, #tpu.memory_space<vmem>>, vector<2x1x128xf32>
    %322 = vector.shape_cast %321 : vector<2x1x128xf32> to vector<2x128xf32>
    %323 = vector.shape_cast %320 : vector<2x128xf32> to vector<2x1x128xf32>
    tpu.vector_store %arg20[%c0_98, %c2, %c0_99], %323 {strides = array<i32>} : memref<2x8x128xf32, #tpu.memory_space<vmem>>, vector<2x1x128xf32>,
    %cst_100 = arith.constant dense<0.000000e+00> : vector<2x128xf32>
    %324 = tpu.matmul %301, %6, %cst_100 {dimension_numbers = #tpu.dot_dimension_numbers<[1], [0], [0], [1], [0, 0, 1, 1], [], []>} : vector<2x32xf32>, vector<32x128xf32>, vector<2x128xf32> -> vector<2x128xf32>
    %325 = vector.broadcast %7 : vector<1x128xf32> to vector<2x128xf32>
    %326 = arith.addf %324, %325 : vector<2x128xf32>
    %cst_101 = arith.constant dense<0.000000e+00> : vector<2x128xf32>
    %327 = tpu.matmul %301, %8, %cst_101 {dimension_numbers = #tpu.dot_dimension_numbers<[1], [0], [0], [1], [0, 0, 1, 1], [], []>} : vector<2x32xf32>, vector<32x128xf32>, vector<2x128xf32> -> vector<2x128xf32>
    %328 = vector.extract_strided_slice %326 {offsets = [0, 0], sizes = [2, 32], strides = [1, 1]} : vector<2x128xf32> to vector<2x32xf32>
    %329 = vector.extract_strided_slice %326 {offsets = [0, 32], sizes = [2, 32], strides = [1, 1]} : vector<2x128xf32> to vector<2x32xf32>
    %330 = vector.extract_strided_slice %326 {offsets = [0, 64], sizes = [2, 32], strides = [1, 1]} : vector<2x128xf32> to vector<2x32xf32>
    %331 = vector.shape_cast %328 : vector<2x32xf32> to vector<2x1x32xf32>
    %332 = vector.shape_cast %329 : vector<2x32xf32> to vector<2x1x32xf32>
    %333 = vector.shape_cast %330 : vector<2x32xf32> to vector<2x1x32xf32>
    %334 = tpu.concatenate %331, %332, %333 in 1 : vector<2x1x32xf32>, vector<2x1x32xf32>, vector<2x1x32xf32> -> vector<2x3x32xf32>
    %335 = vector.shape_cast %334 : vector<2x3x32xf32> to vector<2x3x1x32xf32>
    %336 = vector.broadcast %335 : vector<2x3x1x32xf32> to vector<2x3x8x32xf32>
    %337 = arith.addf %35, %336 : vector<2x3x8x32xf32>
    %338 = math.tanh %337 : vector<2x3x8x32xf32>
    %339 = vector.shape_cast %14 : vector<3x1x32xf32> to vector<1x3x1x32xf32>
    %340 = vector.broadcast %339 : vector<1x3x1x32xf32> to vector<2x3x8x32xf32>
    %341 = arith.mulf %338, %340 : vector<2x3x8x32xf32>
    %cst_102 = arith.constant dense<0.000000e+00> : vector<2x3x8xf32>
    %342 = vector.multi_reduction <add>, %341, %cst_102 [3] : vector<2x3x8x32xf32> to vector<2x3x8xf32>
    %343 = vector.shape_cast %342 : vector<2x3x8xf32> to vector<2x3x8x1xf32>
    %344 = arith.addf %343, %4 : vector<2x3x8x1xf32>
    %cst_103 = arith.constant dense<0xFF800000> : vector<2x3x1xf32>
    %345 = vector.multi_reduction <maximumf>, %344, %cst_103 [2] : vector<2x3x8x1xf32> to vector<2x3x1xf32>
    %346 = vector.shape_cast %345 : vector<2x3x1xf32> to vector<2x3x1x1xf32>
    %347 = vector.broadcast %346 : vector<2x3x1x1xf32> to vector<2x3x8x1xf32>
    %348 = arith.subf %344, %347 : vector<2x3x8x1xf32>
    %349 = math.exp %348 : vector<2x3x8x1xf32>
    %cst_104 = arith.constant dense<0.000000e+00> : vector<2x3x1xf32>
    %350 = vector.multi_reduction <add>, %349, %cst_104 [2] : vector<2x3x8x1xf32> to vector<2x3x1xf32>
    %351 = vector.shape_cast %350 : vector<2x3x1xf32> to vector<2x3x1x1xf32>
    %352 = vector.broadcast %351 : vector<2x3x1x1xf32> to vector<2x3x8x1xf32>
    %353 = arith.divf %349, %352 : vector<2x3x8x1xf32>
    %354 = vector.extract_strided_slice %353 {offsets = [0, 0, 0, 0], sizes = [2, 1, 8, 1], strides = [1, 1, 1, 1]} : vector<2x3x8x1xf32> to vector<2x1x8x1xf32>
    %355 = vector.shape_cast %354 : vector<2x1x8x1xf32> to vector<2x8x1xf32>
    %356 = vector.broadcast %355 : vector<2x8x1xf32> to vector<2x8x32xf32>
    %357 = arith.mulf %356, %2 : vector<2x8x32xf32>
    %cst_105 = arith.constant dense<0.000000e+00> : vector<2x32xf32>
    %358 = vector.multi_reduction <add>, %357, %cst_105 [1] : vector<2x8x32xf32> to vector<2x32xf32>
    %359 = vector.extract_strided_slice %353 {offsets = [0, 1, 0, 0], sizes = [2, 1, 8, 1], strides = [1, 1, 1, 1]} : vector<2x3x8x1xf32> to vector<2x1x8x1xf32>
    %360 = vector.shape_cast %359 : vector<2x1x8x1xf32> to vector<2x8x1xf32>
    %361 = vector.broadcast %360 : vector<2x8x1xf32> to vector<2x8x32xf32>
    %362 = arith.mulf %361, %3 : vector<2x8x32xf32>
    %cst_106 = arith.constant dense<0.000000e+00> : vector<2x32xf32>
    %363 = vector.multi_reduction <add>, %362, %cst_106 [1] : vector<2x8x32xf32> to vector<2x32xf32>
    %364 = vector.extract_strided_slice %353 {offsets = [0, 2, 0, 0], sizes = [2, 1, 8, 1], strides = [1, 1, 1, 1]} : vector<2x3x8x1xf32> to vector<2x1x8x1xf32>
    %365 = vector.shape_cast %364 : vector<2x1x8x1xf32> to vector<2x8x1xf32>
    %366 = vector.broadcast %365 : vector<2x8x1xf32> to vector<2x8x128xf32>
    %367 = arith.mulf %366, %5 : vector<2x8x128xf32>
    %cst_107 = arith.constant dense<0.000000e+00> : vector<2x128xf32>
    %368 = vector.multi_reduction <add>, %367, %cst_107 [1] : vector<2x8x128xf32> to vector<2x128xf32>
    %369 = vector.extract_strided_slice %326 {offsets = [0, 96], sizes = [2, 1], strides = [1, 1]} : vector<2x128xf32> to vector<2x1xf32>
    %370 = arith.negf %369 : vector<2x1xf32>
    %371 = math.exp %370 : vector<2x1xf32>
    %cst_108 = arith.constant 1.000000e+00 : f32
    %372 = vector.broadcast %cst_108 : f32 to vector<2x1xf32>
    %373 = arith.addf %372, %371 : vector<2x1xf32>
    %374 = arith.divf %372, %373 : vector<2x1xf32>
    %375 = tpu.concatenate %358, %363 in 1 : vector<2x32xf32>, vector<2x32xf32> -> vector<2x64xf32>
    %cst_109 = arith.constant dense<0.000000e+00> : vector<2x128xf32>
    %376 = tpu.matmul %375, %10, %cst_109 {dimension_numbers = #tpu.dot_dimension_numbers<[1], [0], [0], [1], [0, 0, 1, 1], [], []>} : vector<2x64xf32>, vector<64x128xf32>, vector<2x128xf32> -> vector<2x128xf32>
    %377 = arith.addf %376, %327 : vector<2x128xf32>
    %378 = vector.extract_strided_slice %41 {offsets = [0, 3, 0], sizes = [2, 1, 128], strides = [1, 1, 1]} : vector<2x8x128xf32> to vector<2x1x128xf32>
    %379 = vector.shape_cast %378 : vector<2x1x128xf32> to vector<2x128xf32>
    %380 = arith.addf %377, %379 : vector<2x128xf32>
    %381 = arith.negf %380 : vector<2x128xf32>
    %382 = math.exp %381 : vector<2x128xf32>
    %cst_110 = arith.constant 1.000000e+00 : f32
    %383 = vector.broadcast %cst_110 : f32 to vector<2x128xf32>
    %384 = arith.addf %383, %382 : vector<2x128xf32>
    %385 = arith.divf %383, %384 : vector<2x128xf32>
    %386 = math.tanh %380 : vector<2x128xf32>
    %387 = vector.extract_strided_slice %385 {offsets = [0, 0], sizes = [2, 32], strides = [1, 1]} : vector<2x128xf32> to vector<2x32xf32>
    %388 = vector.extract_strided_slice %385 {offsets = [0, 32], sizes = [2, 32], strides = [1, 1]} : vector<2x128xf32> to vector<2x32xf32>
    %389 = vector.extract_strided_slice %386 {offsets = [0, 64], sizes = [2, 32], strides = [1, 1]} : vector<2x128xf32> to vector<2x32xf32>
    %390 = vector.extract_strided_slice %385 {offsets = [0, 96], sizes = [2, 32], strides = [1, 1]} : vector<2x128xf32> to vector<2x32xf32>
    %391 = arith.mulf %388, %299 : vector<2x32xf32>
    %392 = arith.mulf %387, %389 : vector<2x32xf32>
    %393 = arith.addf %391, %392 : vector<2x32xf32>
    %394 = math.tanh %393 : vector<2x32xf32>
    %395 = arith.mulf %390, %394 : vector<2x32xf32>
    %cst_111 = arith.constant dense<0.000000e+00> : vector<2x128xf32>
    %396 = tpu.matmul %395, %12, %cst_111 {dimension_numbers = #tpu.dot_dimension_numbers<[1], [0], [0], [1], [0, 0, 1, 1], [], []>} : vector<2x32xf32>, vector<32x128xf32>, vector<2x128xf32> -> vector<2x128xf32>
    %397 = vector.broadcast %13 : vector<1x128xf32> to vector<2x128xf32>
    %398 = arith.addf %396, %397 : vector<2x128xf32>
    %cst_112 = arith.constant dense<0xFF800000> : vector<2xf32>
    %399 = vector.multi_reduction <maximumf>, %398, %cst_112 [1] : vector<2x128xf32> to vector<2xf32>
    %400 = vector.shape_cast %399 : vector<2xf32> to vector<2x1xf32>
    %401 = vector.broadcast %400 : vector<2x1xf32> to vector<2x128xf32>
    %402 = arith.subf %398, %401 : vector<2x128xf32>
    %403 = math.exp %402 : vector<2x128xf32>
    %cst_113 = arith.constant dense<0.000000e+00> : vector<2xf32>
    %404 = vector.multi_reduction <add>, %403, %cst_113 [1] : vector<2x128xf32> to vector<2xf32>
    %405 = vector.shape_cast %404 : vector<2xf32> to vector<2x1xf32>
    %406 = vector.broadcast %405 : vector<2x1xf32> to vector<2x128xf32>
    %407 = arith.divf %403, %406 : vector<2x128xf32>
    %408 = vector.broadcast %374 : vector<2x1xf32> to vector<2x128xf32>
    %409 = arith.mulf %408, %407 : vector<2x128xf32>
    %cst_114 = arith.constant 1.000000e+00 : f32
    %410 = vector.broadcast %cst_114 : f32 to vector<2x1xf32>
    %411 = arith.subf %410, %374 : vector<2x1xf32>
    %412 = vector.broadcast %411 : vector<2x1xf32> to vector<2x128xf32>
    %413 = arith.mulf %412, %368 : vector<2x128xf32>
    %414 = arith.addf %409, %413 : vector<2x128xf32>
    %c0_115 = arith.constant 0 : index
    %c3 = arith.constant 3 : index
    %c0_116 = arith.constant 0 : index
    %415 = vector.load %arg20[%c0_115, %c3, %c0_116] : memref<2x8x128xf32, #tpu.memory_space<vmem>>, vector<2x1x128xf32>
    %416 = vector.shape_cast %415 : vector<2x1x128xf32> to vector<2x128xf32>
    %417 = vector.shape_cast %414 : vector<2x128xf32> to vector<2x1x128xf32>
    tpu.vector_store %arg20[%c0_115, %c3, %c0_116], %417 {strides = array<i32>} : memref<2x8x128xf32, #tpu.memory_space<vmem>>, vector<2x1x128xf32>,
    %cst_117 = arith.constant dense<0.000000e+00> : vector<2x128xf32>
    %418 = tpu.matmul %395, %6, %cst_117 {dimension_numbers = #tpu.dot_dimension_numbers<[1], [0], [0], [1], [0, 0, 1, 1], [], []>} : vector<2x32xf32>, vector<32x128xf32>, vector<2x128xf32> -> vector<2x128xf32>
    %419 = vector.broadcast %7 : vector<1x128xf32> to vector<2x128xf32>
    %420 = arith.addf %418, %419 : vector<2x128xf32>
    %cst_118 = arith.constant dense<0.000000e+00> : vector<2x128xf32>
    %421 = tpu.matmul %395, %8, %cst_118 {dimension_numbers = #tpu.dot_dimension_numbers<[1], [0], [0], [1], [0, 0, 1, 1], [], []>} : vector<2x32xf32>, vector<32x128xf32>, vector<2x128xf32> -> vector<2x128xf32>
    %422 = vector.extract_strided_slice %420 {offsets = [0, 0], sizes = [2, 32], strides = [1, 1]} : vector<2x128xf32> to vector<2x32xf32>
    %423 = vector.extract_strided_slice %420 {offsets = [0, 32], sizes = [2, 32], strides = [1, 1]} : vector<2x128xf32> to vector<2x32xf32>
    %424 = vector.extract_strided_slice %420 {offsets = [0, 64], sizes = [2, 32], strides = [1, 1]} : vector<2x128xf32> to vector<2x32xf32>
    %425 = vector.shape_cast %422 : vector<2x32xf32> to vector<2x1x32xf32>
    %426 = vector.shape_cast %423 : vector<2x32xf32> to vector<2x1x32xf32>
    %427 = vector.shape_cast %424 : vector<2x32xf32> to vector<2x1x32xf32>
    %428 = tpu.concatenate %425, %426, %427 in 1 : vector<2x1x32xf32>, vector<2x1x32xf32>, vector<2x1x32xf32> -> vector<2x3x32xf32>
    %429 = vector.shape_cast %428 : vector<2x3x32xf32> to vector<2x3x1x32xf32>
    %430 = vector.broadcast %429 : vector<2x3x1x32xf32> to vector<2x3x8x32xf32>
    %431 = arith.addf %35, %430 : vector<2x3x8x32xf32>
    %432 = math.tanh %431 : vector<2x3x8x32xf32>
    %433 = vector.shape_cast %14 : vector<3x1x32xf32> to vector<1x3x1x32xf32>
    %434 = vector.broadcast %433 : vector<1x3x1x32xf32> to vector<2x3x8x32xf32>
    %435 = arith.mulf %432, %434 : vector<2x3x8x32xf32>
    %cst_119 = arith.constant dense<0.000000e+00> : vector<2x3x8xf32>
    %436 = vector.multi_reduction <add>, %435, %cst_119 [3] : vector<2x3x8x32xf32> to vector<2x3x8xf32>
    %437 = vector.shape_cast %436 : vector<2x3x8xf32> to vector<2x3x8x1xf32>
    %438 = arith.addf %437, %4 : vector<2x3x8x1xf32>
    %cst_120 = arith.constant dense<0xFF800000> : vector<2x3x1xf32>
    %439 = vector.multi_reduction <maximumf>, %438, %cst_120 [2] : vector<2x3x8x1xf32> to vector<2x3x1xf32>
    %440 = vector.shape_cast %439 : vector<2x3x1xf32> to vector<2x3x1x1xf32>
    %441 = vector.broadcast %440 : vector<2x3x1x1xf32> to vector<2x3x8x1xf32>
    %442 = arith.subf %438, %441 : vector<2x3x8x1xf32>
    %443 = math.exp %442 : vector<2x3x8x1xf32>
    %cst_121 = arith.constant dense<0.000000e+00> : vector<2x3x1xf32>
    %444 = vector.multi_reduction <add>, %443, %cst_121 [2] : vector<2x3x8x1xf32> to vector<2x3x1xf32>
    %445 = vector.shape_cast %444 : vector<2x3x1xf32> to vector<2x3x1x1xf32>
    %446 = vector.broadcast %445 : vector<2x3x1x1xf32> to vector<2x3x8x1xf32>
    %447 = arith.divf %443, %446 : vector<2x3x8x1xf32>
    %448 = vector.extract_strided_slice %447 {offsets = [0, 0, 0, 0], sizes = [2, 1, 8, 1], strides = [1, 1, 1, 1]} : vector<2x3x8x1xf32> to vector<2x1x8x1xf32>
    %449 = vector.shape_cast %448 : vector<2x1x8x1xf32> to vector<2x8x1xf32>
    %450 = vector.broadcast %449 : vector<2x8x1xf32> to vector<2x8x32xf32>
    %451 = arith.mulf %450, %2 : vector<2x8x32xf32>
    %cst_122 = arith.constant dense<0.000000e+00> : vector<2x32xf32>
    %452 = vector.multi_reduction <add>, %451, %cst_122 [1] : vector<2x8x32xf32> to vector<2x32xf32>
    %453 = vector.extract_strided_slice %447 {offsets = [0, 1, 0, 0], sizes = [2, 1, 8, 1], strides = [1, 1, 1, 1]} : vector<2x3x8x1xf32> to vector<2x1x8x1xf32>
    %454 = vector.shape_cast %453 : vector<2x1x8x1xf32> to vector<2x8x1xf32>
    %455 = vector.broadcast %454 : vector<2x8x1xf32> to vector<2x8x32xf32>
    %456 = arith.mulf %455, %3 : vector<2x8x32xf32>
    %cst_123 = arith.constant dense<0.000000e+00> : vector<2x32xf32>
    %457 = vector.multi_reduction <add>, %456, %cst_123 [1] : vector<2x8x32xf32> to vector<2x32xf32>
    %458 = vector.extract_strided_slice %447 {offsets = [0, 2, 0, 0], sizes = [2, 1, 8, 1], strides = [1, 1, 1, 1]} : vector<2x3x8x1xf32> to vector<2x1x8x1xf32>
    %459 = vector.shape_cast %458 : vector<2x1x8x1xf32> to vector<2x8x1xf32>
    %460 = vector.broadcast %459 : vector<2x8x1xf32> to vector<2x8x128xf32>
    %461 = arith.mulf %460, %5 : vector<2x8x128xf32>
    %cst_124 = arith.constant dense<0.000000e+00> : vector<2x128xf32>
    %462 = vector.multi_reduction <add>, %461, %cst_124 [1] : vector<2x8x128xf32> to vector<2x128xf32>
    %463 = vector.extract_strided_slice %420 {offsets = [0, 96], sizes = [2, 1], strides = [1, 1]} : vector<2x128xf32> to vector<2x1xf32>
    %464 = arith.negf %463 : vector<2x1xf32>
    %465 = math.exp %464 : vector<2x1xf32>
    %cst_125 = arith.constant 1.000000e+00 : f32
    %466 = vector.broadcast %cst_125 : f32 to vector<2x1xf32>
    %467 = arith.addf %466, %465 : vector<2x1xf32>
    %468 = arith.divf %466, %467 : vector<2x1xf32>
    %469 = tpu.concatenate %452, %457 in 1 : vector<2x32xf32>, vector<2x32xf32> -> vector<2x64xf32>
    %cst_126 = arith.constant dense<0.000000e+00> : vector<2x128xf32>
    %470 = tpu.matmul %469, %10, %cst_126 {dimension_numbers = #tpu.dot_dimension_numbers<[1], [0], [0], [1], [0, 0, 1, 1], [], []>} : vector<2x64xf32>, vector<64x128xf32>, vector<2x128xf32> -> vector<2x128xf32>
    %471 = arith.addf %470, %421 : vector<2x128xf32>
    %472 = vector.extract_strided_slice %41 {offsets = [0, 4, 0], sizes = [2, 1, 128], strides = [1, 1, 1]} : vector<2x8x128xf32> to vector<2x1x128xf32>
    %473 = vector.shape_cast %472 : vector<2x1x128xf32> to vector<2x128xf32>
    %474 = arith.addf %471, %473 : vector<2x128xf32>
    %475 = arith.negf %474 : vector<2x128xf32>
    %476 = math.exp %475 : vector<2x128xf32>
    %cst_127 = arith.constant 1.000000e+00 : f32
    %477 = vector.broadcast %cst_127 : f32 to vector<2x128xf32>
    %478 = arith.addf %477, %476 : vector<2x128xf32>
    %479 = arith.divf %477, %478 : vector<2x128xf32>
    %480 = math.tanh %474 : vector<2x128xf32>
    %481 = vector.extract_strided_slice %479 {offsets = [0, 0], sizes = [2, 32], strides = [1, 1]} : vector<2x128xf32> to vector<2x32xf32>
    %482 = vector.extract_strided_slice %479 {offsets = [0, 32], sizes = [2, 32], strides = [1, 1]} : vector<2x128xf32> to vector<2x32xf32>
    %483 = vector.extract_strided_slice %480 {offsets = [0, 64], sizes = [2, 32], strides = [1, 1]} : vector<2x128xf32> to vector<2x32xf32>
    %484 = vector.extract_strided_slice %479 {offsets = [0, 96], sizes = [2, 32], strides = [1, 1]} : vector<2x128xf32> to vector<2x32xf32>
    %485 = arith.mulf %482, %393 : vector<2x32xf32>
    %486 = arith.mulf %481, %483 : vector<2x32xf32>
    %487 = arith.addf %485, %486 : vector<2x32xf32>
    %488 = math.tanh %487 : vector<2x32xf32>
    %489 = arith.mulf %484, %488 : vector<2x32xf32>
    %cst_128 = arith.constant dense<0.000000e+00> : vector<2x128xf32>
    %490 = tpu.matmul %489, %12, %cst_128 {dimension_numbers = #tpu.dot_dimension_numbers<[1], [0], [0], [1], [0, 0, 1, 1], [], []>} : vector<2x32xf32>, vector<32x128xf32>, vector<2x128xf32> -> vector<2x128xf32>
    %491 = vector.broadcast %13 : vector<1x128xf32> to vector<2x128xf32>
    %492 = arith.addf %490, %491 : vector<2x128xf32>
    %cst_129 = arith.constant dense<0xFF800000> : vector<2xf32>
    %493 = vector.multi_reduction <maximumf>, %492, %cst_129 [1] : vector<2x128xf32> to vector<2xf32>
    %494 = vector.shape_cast %493 : vector<2xf32> to vector<2x1xf32>
    %495 = vector.broadcast %494 : vector<2x1xf32> to vector<2x128xf32>
    %496 = arith.subf %492, %495 : vector<2x128xf32>
    %497 = math.exp %496 : vector<2x128xf32>
    %cst_130 = arith.constant dense<0.000000e+00> : vector<2xf32>
    %498 = vector.multi_reduction <add>, %497, %cst_130 [1] : vector<2x128xf32> to vector<2xf32>
    %499 = vector.shape_cast %498 : vector<2xf32> to vector<2x1xf32>
    %500 = vector.broadcast %499 : vector<2x1xf32> to vector<2x128xf32>
    %501 = arith.divf %497, %500 : vector<2x128xf32>
    %502 = vector.broadcast %468 : vector<2x1xf32> to vector<2x128xf32>
    %503 = arith.mulf %502, %501 : vector<2x128xf32>
    %cst_131 = arith.constant 1.000000e+00 : f32
    %504 = vector.broadcast %cst_131 : f32 to vector<2x1xf32>
    %505 = arith.subf %504, %468 : vector<2x1xf32>
    %506 = vector.broadcast %505 : vector<2x1xf32> to vector<2x128xf32>
    %507 = arith.mulf %506, %462 : vector<2x128xf32>
    %508 = arith.addf %503, %507 : vector<2x128xf32>
    %c0_132 = arith.constant 0 : index
    %c4 = arith.constant 4 : index
    %c0_133 = arith.constant 0 : index
    %509 = vector.load %arg20[%c0_132, %c4, %c0_133] : memref<2x8x128xf32, #tpu.memory_space<vmem>>, vector<2x1x128xf32>
    %510 = vector.shape_cast %509 : vector<2x1x128xf32> to vector<2x128xf32>
    %511 = vector.shape_cast %508 : vector<2x128xf32> to vector<2x1x128xf32>
    tpu.vector_store %arg20[%c0_132, %c4, %c0_133], %511 {strides = array<i32>} : memref<2x8x128xf32, #tpu.memory_space<vmem>>, vector<2x1x128xf32>,
    %cst_134 = arith.constant dense<0.000000e+00> : vector<2x128xf32>
    %512 = tpu.matmul %489, %6, %cst_134 {dimension_numbers = #tpu.dot_dimension_numbers<[1], [0], [0], [1], [0, 0, 1, 1], [], []>} : vector<2x32xf32>, vector<32x128xf32>, vector<2x128xf32> -> vector<2x128xf32>
    %513 = vector.broadcast %7 : vector<1x128xf32> to vector<2x128xf32>
    %514 = arith.addf %512, %513 : vector<2x128xf32>
    %cst_135 = arith.constant dense<0.000000e+00> : vector<2x128xf32>
    %515 = tpu.matmul %489, %8, %cst_135 {dimension_numbers = #tpu.dot_dimension_numbers<[1], [0], [0], [1], [0, 0, 1, 1], [], []>} : vector<2x32xf32>, vector<32x128xf32>, vector<2x128xf32> -> vector<2x128xf32>
    %516 = vector.extract_strided_slice %514 {offsets = [0, 0], sizes = [2, 32], strides = [1, 1]} : vector<2x128xf32> to vector<2x32xf32>
    %517 = vector.extract_strided_slice %514 {offsets = [0, 32], sizes = [2, 32], strides = [1, 1]} : vector<2x128xf32> to vector<2x32xf32>
    %518 = vector.extract_strided_slice %514 {offsets = [0, 64], sizes = [2, 32], strides = [1, 1]} : vector<2x128xf32> to vector<2x32xf32>
    %519 = vector.shape_cast %516 : vector<2x32xf32> to vector<2x1x32xf32>
    %520 = vector.shape_cast %517 : vector<2x32xf32> to vector<2x1x32xf32>
    %521 = vector.shape_cast %518 : vector<2x32xf32> to vector<2x1x32xf32>
    %522 = tpu.concatenate %519, %520, %521 in 1 : vector<2x1x32xf32>, vector<2x1x32xf32>, vector<2x1x32xf32> -> vector<2x3x32xf32>
    %523 = vector.shape_cast %522 : vector<2x3x32xf32> to vector<2x3x1x32xf32>
    %524 = vector.broadcast %523 : vector<2x3x1x32xf32> to vector<2x3x8x32xf32>
    %525 = arith.addf %35, %524 : vector<2x3x8x32xf32>
    %526 = math.tanh %525 : vector<2x3x8x32xf32>
    %527 = vector.shape_cast %14 : vector<3x1x32xf32> to vector<1x3x1x32xf32>
    %528 = vector.broadcast %527 : vector<1x3x1x32xf32> to vector<2x3x8x32xf32>
    %529 = arith.mulf %526, %528 : vector<2x3x8x32xf32>
    %cst_136 = arith.constant dense<0.000000e+00> : vector<2x3x8xf32>
    %530 = vector.multi_reduction <add>, %529, %cst_136 [3] : vector<2x3x8x32xf32> to vector<2x3x8xf32>
    %531 = vector.shape_cast %530 : vector<2x3x8xf32> to vector<2x3x8x1xf32>
    %532 = arith.addf %531, %4 : vector<2x3x8x1xf32>
    %cst_137 = arith.constant dense<0xFF800000> : vector<2x3x1xf32>
    %533 = vector.multi_reduction <maximumf>, %532, %cst_137 [2] : vector<2x3x8x1xf32> to vector<2x3x1xf32>
    %534 = vector.shape_cast %533 : vector<2x3x1xf32> to vector<2x3x1x1xf32>
    %535 = vector.broadcast %534 : vector<2x3x1x1xf32> to vector<2x3x8x1xf32>
    %536 = arith.subf %532, %535 : vector<2x3x8x1xf32>
    %537 = math.exp %536 : vector<2x3x8x1xf32>
    %cst_138 = arith.constant dense<0.000000e+00> : vector<2x3x1xf32>
    %538 = vector.multi_reduction <add>, %537, %cst_138 [2] : vector<2x3x8x1xf32> to vector<2x3x1xf32>
    %539 = vector.shape_cast %538 : vector<2x3x1xf32> to vector<2x3x1x1xf32>
    %540 = vector.broadcast %539 : vector<2x3x1x1xf32> to vector<2x3x8x1xf32>
    %541 = arith.divf %537, %540 : vector<2x3x8x1xf32>
    %542 = vector.extract_strided_slice %541 {offsets = [0, 0, 0, 0], sizes = [2, 1, 8, 1], strides = [1, 1, 1, 1]} : vector<2x3x8x1xf32> to vector<2x1x8x1xf32>
    %543 = vector.shape_cast %542 : vector<2x1x8x1xf32> to vector<2x8x1xf32>
    %544 = vector.broadcast %543 : vector<2x8x1xf32> to vector<2x8x32xf32>
    %545 = arith.mulf %544, %2 : vector<2x8x32xf32>
    %cst_139 = arith.constant dense<0.000000e+00> : vector<2x32xf32>
    %546 = vector.multi_reduction <add>, %545, %cst_139 [1] : vector<2x8x32xf32> to vector<2x32xf32>
    %547 = vector.extract_strided_slice %541 {offsets = [0, 1, 0, 0], sizes = [2, 1, 8, 1], strides = [1, 1, 1, 1]} : vector<2x3x8x1xf32> to vector<2x1x8x1xf32>
    %548 = vector.shape_cast %547 : vector<2x1x8x1xf32> to vector<2x8x1xf32>
    %549 = vector.broadcast %548 : vector<2x8x1xf32> to vector<2x8x32xf32>
    %550 = arith.mulf %549, %3 : vector<2x8x32xf32>
    %cst_140 = arith.constant dense<0.000000e+00> : vector<2x32xf32>
    %551 = vector.multi_reduction <add>, %550, %cst_140 [1] : vector<2x8x32xf32> to vector<2x32xf32>
    %552 = vector.extract_strided_slice %541 {offsets = [0, 2, 0, 0], sizes = [2, 1, 8, 1], strides = [1, 1, 1, 1]} : vector<2x3x8x1xf32> to vector<2x1x8x1xf32>
    %553 = vector.shape_cast %552 : vector<2x1x8x1xf32> to vector<2x8x1xf32>
    %554 = vector.broadcast %553 : vector<2x8x1xf32> to vector<2x8x128xf32>
    %555 = arith.mulf %554, %5 : vector<2x8x128xf32>
    %cst_141 = arith.constant dense<0.000000e+00> : vector<2x128xf32>
    %556 = vector.multi_reduction <add>, %555, %cst_141 [1] : vector<2x8x128xf32> to vector<2x128xf32>
    %557 = vector.extract_strided_slice %514 {offsets = [0, 96], sizes = [2, 1], strides = [1, 1]} : vector<2x128xf32> to vector<2x1xf32>
    %558 = arith.negf %557 : vector<2x1xf32>
    %559 = math.exp %558 : vector<2x1xf32>
    %cst_142 = arith.constant 1.000000e+00 : f32
    %560 = vector.broadcast %cst_142 : f32 to vector<2x1xf32>
    %561 = arith.addf %560, %559 : vector<2x1xf32>
    %562 = arith.divf %560, %561 : vector<2x1xf32>
    %563 = tpu.concatenate %546, %551 in 1 : vector<2x32xf32>, vector<2x32xf32> -> vector<2x64xf32>
    %cst_143 = arith.constant dense<0.000000e+00> : vector<2x128xf32>
    %564 = tpu.matmul %563, %10, %cst_143 {dimension_numbers = #tpu.dot_dimension_numbers<[1], [0], [0], [1], [0, 0, 1, 1], [], []>} : vector<2x64xf32>, vector<64x128xf32>, vector<2x128xf32> -> vector<2x128xf32>
    %565 = arith.addf %564, %515 : vector<2x128xf32>
    %566 = vector.extract_strided_slice %41 {offsets = [0, 5, 0], sizes = [2, 1, 128], strides = [1, 1, 1]} : vector<2x8x128xf32> to vector<2x1x128xf32>
    %567 = vector.shape_cast %566 : vector<2x1x128xf32> to vector<2x128xf32>
    %568 = arith.addf %565, %567 : vector<2x128xf32>
    %569 = arith.negf %568 : vector<2x128xf32>
    %570 = math.exp %569 : vector<2x128xf32>
    %cst_144 = arith.constant 1.000000e+00 : f32
    %571 = vector.broadcast %cst_144 : f32 to vector<2x128xf32>
    %572 = arith.addf %571, %570 : vector<2x128xf32>
    %573 = arith.divf %571, %572 : vector<2x128xf32>
    %574 = math.tanh %568 : vector<2x128xf32>
    %575 = vector.extract_strided_slice %573 {offsets = [0, 0], sizes = [2, 32], strides = [1, 1]} : vector<2x128xf32> to vector<2x32xf32>
    %576 = vector.extract_strided_slice %573 {offsets = [0, 32], sizes = [2, 32], strides = [1, 1]} : vector<2x128xf32> to vector<2x32xf32>
    %577 = vector.extract_strided_slice %574 {offsets = [0, 64], sizes = [2, 32], strides = [1, 1]} : vector<2x128xf32> to vector<2x32xf32>
    %578 = vector.extract_strided_slice %573 {offsets = [0, 96], sizes = [2, 32], strides = [1, 1]} : vector<2x128xf32> to vector<2x32xf32>
    %579 = arith.mulf %576, %487 : vector<2x32xf32>
    %580 = arith.mulf %575, %577 : vector<2x32xf32>
    %581 = arith.addf %579, %580 : vector<2x32xf32>
    %582 = math.tanh %581 : vector<2x32xf32>
    %583 = arith.mulf %578, %582 : vector<2x32xf32>
    %cst_145 = arith.constant dense<0.000000e+00> : vector<2x128xf32>
    %584 = tpu.matmul %583, %12, %cst_145 {dimension_numbers = #tpu.dot_dimension_numbers<[1], [0], [0], [1], [0, 0, 1, 1], [], []>} : vector<2x32xf32>, vector<32x128xf32>, vector<2x128xf32> -> vector<2x128xf32>
    %585 = vector.broadcast %13 : vector<1x128xf32> to vector<2x128xf32>
    %586 = arith.addf %584, %585 : vector<2x128xf32>
    %cst_146 = arith.constant dense<0xFF800000> : vector<2xf32>
    %587 = vector.multi_reduction <maximumf>, %586, %cst_146 [1] : vector<2x128xf32> to vector<2xf32>
    %588 = vector.shape_cast %587 : vector<2xf32> to vector<2x1xf32>
    %589 = vector.broadcast %588 : vector<2x1xf32> to vector<2x128xf32>
    %590 = arith.subf %586, %589 : vector<2x128xf32>
    %591 = math.exp %590 : vector<2x128xf32>
    %cst_147 = arith.constant dense<0.000000e+00> : vector<2xf32>
    %592 = vector.multi_reduction <add>, %591, %cst_147 [1] : vector<2x128xf32> to vector<2xf32>
    %593 = vector.shape_cast %592 : vector<2xf32> to vector<2x1xf32>
    %594 = vector.broadcast %593 : vector<2x1xf32> to vector<2x128xf32>
    %595 = arith.divf %591, %594 : vector<2x128xf32>
    %596 = vector.broadcast %562 : vector<2x1xf32> to vector<2x128xf32>
    %597 = arith.mulf %596, %595 : vector<2x128xf32>
    %cst_148 = arith.constant 1.000000e+00 : f32
    %598 = vector.broadcast %cst_148 : f32 to vector<2x1xf32>
    %599 = arith.subf %598, %562 : vector<2x1xf32>
    %600 = vector.broadcast %599 : vector<2x1xf32> to vector<2x128xf32>
    %601 = arith.mulf %600, %556 : vector<2x128xf32>
    %602 = arith.addf %597, %601 : vector<2x128xf32>
    %c0_149 = arith.constant 0 : index
    %c5 = arith.constant 5 : index
    %c0_150 = arith.constant 0 : index
    %603 = vector.load %arg20[%c0_149, %c5, %c0_150] : memref<2x8x128xf32, #tpu.memory_space<vmem>>, vector<2x1x128xf32>
    %604 = vector.shape_cast %603 : vector<2x1x128xf32> to vector<2x128xf32>
    %605 = vector.shape_cast %602 : vector<2x128xf32> to vector<2x1x128xf32>
    tpu.vector_store %arg20[%c0_149, %c5, %c0_150], %605 {strides = array<i32>} : memref<2x8x128xf32, #tpu.memory_space<vmem>>, vector<2x1x128xf32>,
    %cst_151 = arith.constant dense<0.000000e+00> : vector<2x128xf32>
    %606 = tpu.matmul %583, %6, %cst_151 {dimension_numbers = #tpu.dot_dimension_numbers<[1], [0], [0], [1], [0, 0, 1, 1], [], []>} : vector<2x32xf32>, vector<32x128xf32>, vector<2x128xf32> -> vector<2x128xf32>
    %607 = vector.broadcast %7 : vector<1x128xf32> to vector<2x128xf32>
    %608 = arith.addf %606, %607 : vector<2x128xf32>
    %cst_152 = arith.constant dense<0.000000e+00> : vector<2x128xf32>
    %609 = tpu.matmul %583, %8, %cst_152 {dimension_numbers = #tpu.dot_dimension_numbers<[1], [0], [0], [1], [0, 0, 1, 1], [], []>} : vector<2x32xf32>, vector<32x128xf32>, vector<2x128xf32> -> vector<2x128xf32>
    %610 = vector.extract_strided_slice %608 {offsets = [0, 0], sizes = [2, 32], strides = [1, 1]} : vector<2x128xf32> to vector<2x32xf32>
    %611 = vector.extract_strided_slice %608 {offsets = [0, 32], sizes = [2, 32], strides = [1, 1]} : vector<2x128xf32> to vector<2x32xf32>
    %612 = vector.extract_strided_slice %608 {offsets = [0, 64], sizes = [2, 32], strides = [1, 1]} : vector<2x128xf32> to vector<2x32xf32>
    %613 = vector.shape_cast %610 : vector<2x32xf32> to vector<2x1x32xf32>
    %614 = vector.shape_cast %611 : vector<2x32xf32> to vector<2x1x32xf32>
    %615 = vector.shape_cast %612 : vector<2x32xf32> to vector<2x1x32xf32>
    %616 = tpu.concatenate %613, %614, %615 in 1 : vector<2x1x32xf32>, vector<2x1x32xf32>, vector<2x1x32xf32> -> vector<2x3x32xf32>
    %617 = vector.shape_cast %616 : vector<2x3x32xf32> to vector<2x3x1x32xf32>
    %618 = vector.broadcast %617 : vector<2x3x1x32xf32> to vector<2x3x8x32xf32>
    %619 = arith.addf %35, %618 : vector<2x3x8x32xf32>
    %620 = math.tanh %619 : vector<2x3x8x32xf32>
    %621 = vector.shape_cast %14 : vector<3x1x32xf32> to vector<1x3x1x32xf32>
    %622 = vector.broadcast %621 : vector<1x3x1x32xf32> to vector<2x3x8x32xf32>
    %623 = arith.mulf %620, %622 : vector<2x3x8x32xf32>
    %cst_153 = arith.constant dense<0.000000e+00> : vector<2x3x8xf32>
    %624 = vector.multi_reduction <add>, %623, %cst_153 [3] : vector<2x3x8x32xf32> to vector<2x3x8xf32>
    %625 = vector.shape_cast %624 : vector<2x3x8xf32> to vector<2x3x8x1xf32>
    %626 = arith.addf %625, %4 : vector<2x3x8x1xf32>
    %cst_154 = arith.constant dense<0xFF800000> : vector<2x3x1xf32>
    %627 = vector.multi_reduction <maximumf>, %626, %cst_154 [2] : vector<2x3x8x1xf32> to vector<2x3x1xf32>
    %628 = vector.shape_cast %627 : vector<2x3x1xf32> to vector<2x3x1x1xf32>
    %629 = vector.broadcast %628 : vector<2x3x1x1xf32> to vector<2x3x8x1xf32>
    %630 = arith.subf %626, %629 : vector<2x3x8x1xf32>
    %631 = math.exp %630 : vector<2x3x8x1xf32>
    %cst_155 = arith.constant dense<0.000000e+00> : vector<2x3x1xf32>
    %632 = vector.multi_reduction <add>, %631, %cst_155 [2] : vector<2x3x8x1xf32> to vector<2x3x1xf32>
    %633 = vector.shape_cast %632 : vector<2x3x1xf32> to vector<2x3x1x1xf32>
    %634 = vector.broadcast %633 : vector<2x3x1x1xf32> to vector<2x3x8x1xf32>
    %635 = arith.divf %631, %634 : vector<2x3x8x1xf32>
    %636 = vector.extract_strided_slice %635 {offsets = [0, 0, 0, 0], sizes = [2, 1, 8, 1], strides = [1, 1, 1, 1]} : vector<2x3x8x1xf32> to vector<2x1x8x1xf32>
    %637 = vector.shape_cast %636 : vector<2x1x8x1xf32> to vector<2x8x1xf32>
    %638 = vector.broadcast %637 : vector<2x8x1xf32> to vector<2x8x32xf32>
    %639 = arith.mulf %638, %2 : vector<2x8x32xf32>
    %cst_156 = arith.constant dense<0.000000e+00> : vector<2x32xf32>
    %640 = vector.multi_reduction <add>, %639, %cst_156 [1] : vector<2x8x32xf32> to vector<2x32xf32>
    %641 = vector.extract_strided_slice %635 {offsets = [0, 1, 0, 0], sizes = [2, 1, 8, 1], strides = [1, 1, 1, 1]} : vector<2x3x8x1xf32> to vector<2x1x8x1xf32>
    %642 = vector.shape_cast %641 : vector<2x1x8x1xf32> to vector<2x8x1xf32>
    %643 = vector.broadcast %642 : vector<2x8x1xf32> to vector<2x8x32xf32>
    %644 = arith.mulf %643, %3 : vector<2x8x32xf32>
    %cst_157 = arith.constant dense<0.000000e+00> : vector<2x32xf32>
    %645 = vector.multi_reduction <add>, %644, %cst_157 [1] : vector<2x8x32xf32> to vector<2x32xf32>
    %646 = vector.extract_strided_slice %635 {offsets = [0, 2, 0, 0], sizes = [2, 1, 8, 1], strides = [1, 1, 1, 1]} : vector<2x3x8x1xf32> to vector<2x1x8x1xf32>
    %647 = vector.shape_cast %646 : vector<2x1x8x1xf32> to vector<2x8x1xf32>
    %648 = vector.broadcast %647 : vector<2x8x1xf32> to vector<2x8x128xf32>
    %649 = arith.mulf %648, %5 : vector<2x8x128xf32>
    %cst_158 = arith.constant dense<0.000000e+00> : vector<2x128xf32>
    %650 = vector.multi_reduction <add>, %649, %cst_158 [1] : vector<2x8x128xf32> to vector<2x128xf32>
    %651 = vector.extract_strided_slice %608 {offsets = [0, 96], sizes = [2, 1], strides = [1, 1]} : vector<2x128xf32> to vector<2x1xf32>
    %652 = arith.negf %651 : vector<2x1xf32>
    %653 = math.exp %652 : vector<2x1xf32>
    %cst_159 = arith.constant 1.000000e+00 : f32
    %654 = vector.broadcast %cst_159 : f32 to vector<2x1xf32>
    %655 = arith.addf %654, %653 : vector<2x1xf32>
    %656 = arith.divf %654, %655 : vector<2x1xf32>
    %657 = tpu.concatenate %640, %645 in 1 : vector<2x32xf32>, vector<2x32xf32> -> vector<2x64xf32>
    %cst_160 = arith.constant dense<0.000000e+00> : vector<2x128xf32>
    %658 = tpu.matmul %657, %10, %cst_160 {dimension_numbers = #tpu.dot_dimension_numbers<[1], [0], [0], [1], [0, 0, 1, 1], [], []>} : vector<2x64xf32>, vector<64x128xf32>, vector<2x128xf32> -> vector<2x128xf32>
    %659 = arith.addf %658, %609 : vector<2x128xf32>
    %660 = vector.extract_strided_slice %41 {offsets = [0, 6, 0], sizes = [2, 1, 128], strides = [1, 1, 1]} : vector<2x8x128xf32> to vector<2x1x128xf32>
    %661 = vector.shape_cast %660 : vector<2x1x128xf32> to vector<2x128xf32>
    %662 = arith.addf %659, %661 : vector<2x128xf32>
    %663 = arith.negf %662 : vector<2x128xf32>
    %664 = math.exp %663 : vector<2x128xf32>
    %cst_161 = arith.constant 1.000000e+00 : f32
    %665 = vector.broadcast %cst_161 : f32 to vector<2x128xf32>
    %666 = arith.addf %665, %664 : vector<2x128xf32>
    %667 = arith.divf %665, %666 : vector<2x128xf32>
    %668 = math.tanh %662 : vector<2x128xf32>
    %669 = vector.extract_strided_slice %667 {offsets = [0, 0], sizes = [2, 32], strides = [1, 1]} : vector<2x128xf32> to vector<2x32xf32>
    %670 = vector.extract_strided_slice %667 {offsets = [0, 32], sizes = [2, 32], strides = [1, 1]} : vector<2x128xf32> to vector<2x32xf32>
    %671 = vector.extract_strided_slice %668 {offsets = [0, 64], sizes = [2, 32], strides = [1, 1]} : vector<2x128xf32> to vector<2x32xf32>
    %672 = vector.extract_strided_slice %667 {offsets = [0, 96], sizes = [2, 32], strides = [1, 1]} : vector<2x128xf32> to vector<2x32xf32>
    %673 = arith.mulf %670, %581 : vector<2x32xf32>
    %674 = arith.mulf %669, %671 : vector<2x32xf32>
    %675 = arith.addf %673, %674 : vector<2x32xf32>
    %676 = math.tanh %675 : vector<2x32xf32>
    %677 = arith.mulf %672, %676 : vector<2x32xf32>
    %cst_162 = arith.constant dense<0.000000e+00> : vector<2x128xf32>
    %678 = tpu.matmul %677, %12, %cst_162 {dimension_numbers = #tpu.dot_dimension_numbers<[1], [0], [0], [1], [0, 0, 1, 1], [], []>} : vector<2x32xf32>, vector<32x128xf32>, vector<2x128xf32> -> vector<2x128xf32>
    %679 = vector.broadcast %13 : vector<1x128xf32> to vector<2x128xf32>
    %680 = arith.addf %678, %679 : vector<2x128xf32>
    %cst_163 = arith.constant dense<0xFF800000> : vector<2xf32>
    %681 = vector.multi_reduction <maximumf>, %680, %cst_163 [1] : vector<2x128xf32> to vector<2xf32>
    %682 = vector.shape_cast %681 : vector<2xf32> to vector<2x1xf32>
    %683 = vector.broadcast %682 : vector<2x1xf32> to vector<2x128xf32>
    %684 = arith.subf %680, %683 : vector<2x128xf32>
    %685 = math.exp %684 : vector<2x128xf32>
    %cst_164 = arith.constant dense<0.000000e+00> : vector<2xf32>
    %686 = vector.multi_reduction <add>, %685, %cst_164 [1] : vector<2x128xf32> to vector<2xf32>
    %687 = vector.shape_cast %686 : vector<2xf32> to vector<2x1xf32>
    %688 = vector.broadcast %687 : vector<2x1xf32> to vector<2x128xf32>
    %689 = arith.divf %685, %688 : vector<2x128xf32>
    %690 = vector.broadcast %656 : vector<2x1xf32> to vector<2x128xf32>
    %691 = arith.mulf %690, %689 : vector<2x128xf32>
    %cst_165 = arith.constant 1.000000e+00 : f32
    %692 = vector.broadcast %cst_165 : f32 to vector<2x1xf32>
    %693 = arith.subf %692, %656 : vector<2x1xf32>
    %694 = vector.broadcast %693 : vector<2x1xf32> to vector<2x128xf32>
    %695 = arith.mulf %694, %650 : vector<2x128xf32>
    %696 = arith.addf %691, %695 : vector<2x128xf32>
    %c0_166 = arith.constant 0 : index
    %c6 = arith.constant 6 : index
    %c0_167 = arith.constant 0 : index
    %697 = vector.load %arg20[%c0_166, %c6, %c0_167] : memref<2x8x128xf32, #tpu.memory_space<vmem>>, vector<2x1x128xf32>
    %698 = vector.shape_cast %697 : vector<2x1x128xf32> to vector<2x128xf32>
    %699 = vector.shape_cast %696 : vector<2x128xf32> to vector<2x1x128xf32>
    tpu.vector_store %arg20[%c0_166, %c6, %c0_167], %699 {strides = array<i32>} : memref<2x8x128xf32, #tpu.memory_space<vmem>>, vector<2x1x128xf32>,
    %cst_168 = arith.constant dense<0.000000e+00> : vector<2x128xf32>
    %700 = tpu.matmul %677, %6, %cst_168 {dimension_numbers = #tpu.dot_dimension_numbers<[1], [0], [0], [1], [0, 0, 1, 1], [], []>} : vector<2x32xf32>, vector<32x128xf32>, vector<2x128xf32> -> vector<2x128xf32>
    %701 = vector.broadcast %7 : vector<1x128xf32> to vector<2x128xf32>
    %702 = arith.addf %700, %701 : vector<2x128xf32>
    %cst_169 = arith.constant dense<0.000000e+00> : vector<2x128xf32>
    %703 = tpu.matmul %677, %8, %cst_169 {dimension_numbers = #tpu.dot_dimension_numbers<[1], [0], [0], [1], [0, 0, 1, 1], [], []>} : vector<2x32xf32>, vector<32x128xf32>, vector<2x128xf32> -> vector<2x128xf32>
    %704 = vector.extract_strided_slice %702 {offsets = [0, 0], sizes = [2, 32], strides = [1, 1]} : vector<2x128xf32> to vector<2x32xf32>
    %705 = vector.extract_strided_slice %702 {offsets = [0, 32], sizes = [2, 32], strides = [1, 1]} : vector<2x128xf32> to vector<2x32xf32>
    %706 = vector.extract_strided_slice %702 {offsets = [0, 64], sizes = [2, 32], strides = [1, 1]} : vector<2x128xf32> to vector<2x32xf32>
    %707 = vector.shape_cast %704 : vector<2x32xf32> to vector<2x1x32xf32>
    %708 = vector.shape_cast %705 : vector<2x32xf32> to vector<2x1x32xf32>
    %709 = vector.shape_cast %706 : vector<2x32xf32> to vector<2x1x32xf32>
    %710 = tpu.concatenate %707, %708, %709 in 1 : vector<2x1x32xf32>, vector<2x1x32xf32>, vector<2x1x32xf32> -> vector<2x3x32xf32>
    %711 = vector.shape_cast %710 : vector<2x3x32xf32> to vector<2x3x1x32xf32>
    %712 = vector.broadcast %711 : vector<2x3x1x32xf32> to vector<2x3x8x32xf32>
    %713 = arith.addf %35, %712 : vector<2x3x8x32xf32>
    %714 = math.tanh %713 : vector<2x3x8x32xf32>
    %715 = vector.shape_cast %14 : vector<3x1x32xf32> to vector<1x3x1x32xf32>
    %716 = vector.broadcast %715 : vector<1x3x1x32xf32> to vector<2x3x8x32xf32>
    %717 = arith.mulf %714, %716 : vector<2x3x8x32xf32>
    %cst_170 = arith.constant dense<0.000000e+00> : vector<2x3x8xf32>
    %718 = vector.multi_reduction <add>, %717, %cst_170 [3] : vector<2x3x8x32xf32> to vector<2x3x8xf32>
    %719 = vector.shape_cast %718 : vector<2x3x8xf32> to vector<2x3x8x1xf32>
    %720 = arith.addf %719, %4 : vector<2x3x8x1xf32>
    %cst_171 = arith.constant dense<0xFF800000> : vector<2x3x1xf32>
    %721 = vector.multi_reduction <maximumf>, %720, %cst_171 [2] : vector<2x3x8x1xf32> to vector<2x3x1xf32>
    %722 = vector.shape_cast %721 : vector<2x3x1xf32> to vector<2x3x1x1xf32>
    %723 = vector.broadcast %722 : vector<2x3x1x1xf32> to vector<2x3x8x1xf32>
    %724 = arith.subf %720, %723 : vector<2x3x8x1xf32>
    %725 = math.exp %724 : vector<2x3x8x1xf32>
    %cst_172 = arith.constant dense<0.000000e+00> : vector<2x3x1xf32>
    %726 = vector.multi_reduction <add>, %725, %cst_172 [2] : vector<2x3x8x1xf32> to vector<2x3x1xf32>
    %727 = vector.shape_cast %726 : vector<2x3x1xf32> to vector<2x3x1x1xf32>
    %728 = vector.broadcast %727 : vector<2x3x1x1xf32> to vector<2x3x8x1xf32>
    %729 = arith.divf %725, %728 : vector<2x3x8x1xf32>
    %730 = vector.extract_strided_slice %729 {offsets = [0, 0, 0, 0], sizes = [2, 1, 8, 1], strides = [1, 1, 1, 1]} : vector<2x3x8x1xf32> to vector<2x1x8x1xf32>
    %731 = vector.shape_cast %730 : vector<2x1x8x1xf32> to vector<2x8x1xf32>
    %732 = vector.broadcast %731 : vector<2x8x1xf32> to vector<2x8x32xf32>
    %733 = arith.mulf %732, %2 : vector<2x8x32xf32>
    %cst_173 = arith.constant dense<0.000000e+00> : vector<2x32xf32>
    %734 = vector.multi_reduction <add>, %733, %cst_173 [1] : vector<2x8x32xf32> to vector<2x32xf32>
    %735 = vector.extract_strided_slice %729 {offsets = [0, 1, 0, 0], sizes = [2, 1, 8, 1], strides = [1, 1, 1, 1]} : vector<2x3x8x1xf32> to vector<2x1x8x1xf32>
    %736 = vector.shape_cast %735 : vector<2x1x8x1xf32> to vector<2x8x1xf32>
    %737 = vector.broadcast %736 : vector<2x8x1xf32> to vector<2x8x32xf32>
    %738 = arith.mulf %737, %3 : vector<2x8x32xf32>
    %cst_174 = arith.constant dense<0.000000e+00> : vector<2x32xf32>
    %739 = vector.multi_reduction <add>, %738, %cst_174 [1] : vector<2x8x32xf32> to vector<2x32xf32>
    %740 = vector.extract_strided_slice %729 {offsets = [0, 2, 0, 0], sizes = [2, 1, 8, 1], strides = [1, 1, 1, 1]} : vector<2x3x8x1xf32> to vector<2x1x8x1xf32>
    %741 = vector.shape_cast %740 : vector<2x1x8x1xf32> to vector<2x8x1xf32>
    %742 = vector.broadcast %741 : vector<2x8x1xf32> to vector<2x8x128xf32>
    %743 = arith.mulf %742, %5 : vector<2x8x128xf32>
    %cst_175 = arith.constant dense<0.000000e+00> : vector<2x128xf32>
    %744 = vector.multi_reduction <add>, %743, %cst_175 [1] : vector<2x8x128xf32> to vector<2x128xf32>
    %745 = vector.extract_strided_slice %702 {offsets = [0, 96], sizes = [2, 1], strides = [1, 1]} : vector<2x128xf32> to vector<2x1xf32>
    %746 = arith.negf %745 : vector<2x1xf32>
    %747 = math.exp %746 : vector<2x1xf32>
    %cst_176 = arith.constant 1.000000e+00 : f32
    %748 = vector.broadcast %cst_176 : f32 to vector<2x1xf32>
    %749 = arith.addf %748, %747 : vector<2x1xf32>
    %750 = arith.divf %748, %749 : vector<2x1xf32>
    %751 = tpu.concatenate %734, %739 in 1 : vector<2x32xf32>, vector<2x32xf32> -> vector<2x64xf32>
    %cst_177 = arith.constant dense<0.000000e+00> : vector<2x128xf32>
    %752 = tpu.matmul %751, %10, %cst_177 {dimension_numbers = #tpu.dot_dimension_numbers<[1], [0], [0], [1], [0, 0, 1, 1], [], []>} : vector<2x64xf32>, vector<64x128xf32>, vector<2x128xf32> -> vector<2x128xf32>
    %753 = arith.addf %752, %703 : vector<2x128xf32>
    %754 = vector.extract_strided_slice %41 {offsets = [0, 7, 0], sizes = [2, 1, 128], strides = [1, 1, 1]} : vector<2x8x128xf32> to vector<2x1x128xf32>
    %755 = vector.shape_cast %754 : vector<2x1x128xf32> to vector<2x128xf32>
    %756 = arith.addf %753, %755 : vector<2x128xf32>
    %757 = arith.negf %756 : vector<2x128xf32>
    %758 = math.exp %757 : vector<2x128xf32>
    %cst_178 = arith.constant 1.000000e+00 : f32
    %759 = vector.broadcast %cst_178 : f32 to vector<2x128xf32>
    %760 = arith.addf %759, %758 : vector<2x128xf32>
    %761 = arith.divf %759, %760 : vector<2x128xf32>
    %762 = math.tanh %756 : vector<2x128xf32>
    %763 = vector.extract_strided_slice %761 {offsets = [0, 0], sizes = [2, 32], strides = [1, 1]} : vector<2x128xf32> to vector<2x32xf32>
    %764 = vector.extract_strided_slice %761 {offsets = [0, 32], sizes = [2, 32], strides = [1, 1]} : vector<2x128xf32> to vector<2x32xf32>
    %765 = vector.extract_strided_slice %762 {offsets = [0, 64], sizes = [2, 32], strides = [1, 1]} : vector<2x128xf32> to vector<2x32xf32>
    %766 = vector.extract_strided_slice %761 {offsets = [0, 96], sizes = [2, 32], strides = [1, 1]} : vector<2x128xf32> to vector<2x32xf32>
    %767 = arith.mulf %764, %675 : vector<2x32xf32>
    %768 = arith.mulf %763, %765 : vector<2x32xf32>
    %769 = arith.addf %767, %768 : vector<2x32xf32>
    %770 = math.tanh %769 : vector<2x32xf32>
    %771 = arith.mulf %766, %770 : vector<2x32xf32>
    %cst_179 = arith.constant dense<0.000000e+00> : vector<2x128xf32>
    %772 = tpu.matmul %771, %12, %cst_179 {dimension_numbers = #tpu.dot_dimension_numbers<[1], [0], [0], [1], [0, 0, 1, 1], [], []>} : vector<2x32xf32>, vector<32x128xf32>, vector<2x128xf32> -> vector<2x128xf32>
    %773 = vector.broadcast %13 : vector<1x128xf32> to vector<2x128xf32>
    %774 = arith.addf %772, %773 : vector<2x128xf32>
    %cst_180 = arith.constant dense<0xFF800000> : vector<2xf32>
    %775 = vector.multi_reduction <maximumf>, %774, %cst_180 [1] : vector<2x128xf32> to vector<2xf32>
    %776 = vector.shape_cast %775 : vector<2xf32> to vector<2x1xf32>
    %777 = vector.broadcast %776 : vector<2x1xf32> to vector<2x128xf32>
    %778 = arith.subf %774, %777 : vector<2x128xf32>
    %779 = math.exp %778 : vector<2x128xf32>
    %cst_181 = arith.constant dense<0.000000e+00> : vector<2xf32>
    %780 = vector.multi_reduction <add>, %779, %cst_181 [1] : vector<2x128xf32> to vector<2xf32>
    %781 = vector.shape_cast %780 : vector<2xf32> to vector<2x1xf32>
    %782 = vector.broadcast %781 : vector<2x1xf32> to vector<2x128xf32>
    %783 = arith.divf %779, %782 : vector<2x128xf32>
    %784 = vector.broadcast %750 : vector<2x1xf32> to vector<2x128xf32>
    %785 = arith.mulf %784, %783 : vector<2x128xf32>
    %cst_182 = arith.constant 1.000000e+00 : f32
    %786 = vector.broadcast %cst_182 : f32 to vector<2x1xf32>
    %787 = arith.subf %786, %750 : vector<2x1xf32>
    %788 = vector.broadcast %787 : vector<2x1xf32> to vector<2x128xf32>
    %789 = arith.mulf %788, %744 : vector<2x128xf32>
    %790 = arith.addf %785, %789 : vector<2x128xf32>
    %c0_183 = arith.constant 0 : index
    %c7 = arith.constant 7 : index
    %c0_184 = arith.constant 0 : index
    %791 = vector.load %arg20[%c0_183, %c7, %c0_184] : memref<2x8x128xf32, #tpu.memory_space<vmem>>, vector<2x1x128xf32>
    %792 = vector.shape_cast %791 : vector<2x1x128xf32> to vector<2x128xf32>
    %793 = vector.shape_cast %790 : vector<2x128xf32> to vector<2x1x128xf32>
    tpu.vector_store %arg20[%c0_183, %c7, %c0_184], %793 {strides = array<i32>} : memref<2x8x128xf32, #tpu.memory_space<vmem>>, vector<2x1x128xf32>,
    %c0_185 = arith.constant 0 : index
    %c0_186 = arith.constant 0 : index
    %794 = vector.load %arg21[%c0_185, %c0_186] : memref<2x32xf32, #tpu.memory_space<vmem>>, vector<2x32xf32>
    tpu.vector_store %arg21[%c0_185, %c0_186], %771 {strides = array<i32>} : memref<2x32xf32, #tpu.memory_space<vmem>>, vector<2x32xf32>,
    %c0_187 = arith.constant 0 : index
    %c0_188 = arith.constant 0 : index
    %795 = vector.load %arg22[%c0_187, %c0_188] : memref<2x32xf32, #tpu.memory_space<vmem>>, vector<2x32xf32>
    tpu.vector_store %arg22[%c0_187, %c0_188], %769 {strides = array<i32>} : memref<2x32xf32, #tpu.memory_space<vmem>>, vector<2x32xf32>,
    return
  }
}

</mosaic_0001>

<bundles_post_ra>
// kernel: _lambda_.1
= control target key start
LH: loop header
LB: loop body
LE: loop exit
PB: predicated region body
PF: predicated region fallthrough
CT: control target
= control target key end

     0   :  { %s8067_s0 = inlined_call_operand.vmem [shape: f32[2,8,16], index: 0, kind: input, shape index: {}]   ;;  %s8068_s1 = inlined_call_operand.vmem [shape: f32[2,32], index: 1, kind: input, shape index: {}]   ;;  %s8069_s2 = inlined_call_operand.vmem [shape: f32[2,32], index: 2, kind: input, shape index: {}]   ;;  %s8070_s3 = inlined_call_operand.hbm [shape: f32[2,8,32], index: 3, kind: input, shape index: {}]   ;;  %s8071_s4 = inlined_call_operand.hbm [shape: f32[2,8,32], index: 4, kind: input, shape index: {}]   ;;  %s8072_s5 = inlined_call_operand.vmem [shape: f32[2,3,8,1], index: 5, kind: input, shape index: {}]   ;;  %s8073_s6 = inlined_call_operand.vmem [shape: f32[2,8,128], index: 6, kind: input, shape index: {}]   ;;  %s8074_s7 = inlined_call_operand.hbm [shape: f32[32,128], index: 7, kind: input, shape index: {}]   ;;  %s8075_s8 = inlined_call_operand.vmem [shape: f32[1,128], index: 8, kind: input, shape index: {}]   ;;  %s8076_s9 = inlined_call_operand.hbm [shape: f32[32,128], index: 9, kind: input, shape index: {}]   ;;  %s8077_s10 = inlined_call_operand.hbm [shape: f32[32,32], index: 10, kind: input, shape index: {}]   ;;  %s8078_s11 = inlined_call_operand.vmem [shape: f32[1,32], index: 11, kind: input, shape index: {}]   ;;  %s8079_s12 = inlined_call_operand.hbm [shape: f32[32,64], index: 12, kind: input, shape index: {}]   ;;  %s8080_s13 = inlined_call_operand.vmem [shape: f32[1,64], index: 13, kind: input, shape index: {}]   ;;  %s8081_s14 = inlined_call_operand.vmem [shape: f32[3,1,32], index: 14, kind: input, shape index: {}]   ;;  %s8082_s15 = inlined_call_operand.hbm [shape: f32[16,128], index: 15, kind: input, shape index: {}]   ;;  %s8083_s16 = inlined_call_operand.vmem [shape: f32[64,128], index: 16, kind: input, shape index: {}]   ;;  %s8084_s17 = inlined_call_operand.vmem [shape: f32[1,128], index: 17, kind: input, shape index: {}]   ;;  %s8085_s18 = inlined_call_operand.hbm [shape: f32[32,128], index: 18, kind: input, shape index: {}]   ;;  %s8086_s19 = inlined_call_operand.vmem [shape: f32[1,128], index: 19, kind: input, shape index: {}]   ;;  %s8087_s20 = inlined_call_operand.hbm [shape: f32[2,8,128], index: 20, kind: output, shape index: {0}]   ;;  %s8088_s21 = inlined_call_operand.hbm [shape: f32[2,32], index: 21, kind: output, shape index: {1}]   ;;  %s8089_s22 = inlined_call_operand.hbm [shape: f32[2,32], index: 22, kind: output, shape index: {2}]  }
   0x1   :  { %8102 = sst [smem:[#allocation36_spill]] %s8067_s0 }
   0x2   :  { %8103 = sst [smem:[#allocation37_spill]] %s8068_s1 }
   0x3   :  { %8104 = sst [smem:[#allocation38_spill]] %s8069_s2 }
   0x4   :  { %8105 = sst [smem:[#allocation39_spill]] %s8070_s3 }
   0x5   :  { %8106 = sst [smem:[#allocation40_spill]] %s8071_s4 }
   0x6   :  { %8107 = sst [smem:[#allocation41_spill]] %s8072_s5 }
   0x7   :  { %8108 = sst [smem:[#allocation42_spill]] %s8073_s6 }
   0x8   :  { %28 = vsyncpa [#allocation3], 0 }
   0x9   :  { %29 = vsyncpa [#allocation6], 0 }
   0xa   :  { %30 = vsyncpa [#allocation9], 0 }
   0xb   :  { %31 = vsyncpa [#allocation12], 0 }
   0xc   :  { %32 = vsyncpa [#allocation15], 0 }
   0xd   :  { %33 = vsyncpa [#allocation4], 0 }
   0xe   :  { %34 = vsyncpa [#allocation18], 0  ;;  %s8109_s29 = sld [smem:[#allocation40_spill]]  ;;  %s5756_s4 = smov [#allocation5]  }
   0xf   :  { %s60_s0 = sshll.u32 %s5756_s4, 4  ;;  %s90_s5 = sshll.u32 %s8076_s9, 4  ;;  %s61_s0 = int_to_ptr.vmem [resolvable:$true] %s60_s0  ;;  %s91_s5 = int_to_ptr.hbm [resolvable:$true] %s90_s5 }
  0x10   :  { %s5757_s24 = smov 128   ;;  %s5758_s6 = smov 8  }
  0x11   :  { %s5759_s25 = smov [#allocation8]   ;;  %s118_s3 = sshll.u32 %s8079_s12, 4  ;;  %s119_s3 = int_to_ptr.hbm [resolvable:$true] %s118_s3 }
  0x12   :  { %s92_s26 = sshll.u32 %s5759_s25, 4  ;;  %s5760_s23 = smov [#allocation11]   ;;  %s93_s26 = int_to_ptr.vmem [resolvable:$true] %s92_s26 }
  0x13   :  { %98 = dma.hbm_to_vmem [thread:$0]  %s91_s5, 512, %s93_s26, [#allocation9], %s5757_s24, %s5757_s24, %s5758_s6  }
  0x14   :  { %s58_s30 = sshll.u32 %s8109_s29, 4  ;;  %s8110_s29 = sld [smem:[#allocation39_spill]]  ;;  %s59_s30 = int_to_ptr.hbm [resolvable:$true] %s58_s30 }
  0x15   :  { %66 = dma.hbm_to_vmem [thread:$0]  %s59_s30, 256, %s61_s0, [#allocation6], %s5757_s24, %s5757_s24, %s5758_s6  }
  0x16   :  { %s120_s1 = sshll.u32 %s5760_s23, 4  ;;  %s5761_s30 = smov [#allocation2]   ;;  %s121_s1 = int_to_ptr.vmem [resolvable:$true] %s120_s1 }
  0x17   :  { %126 = dma.hbm_to_vmem [thread:$0]  %s119_s3, 512, %s121_s1, [#allocation12], %s5757_s24, %s5757_s24, %s5758_s6  }
  0x18   :  { %s47_s12 = sshll.u32 %s5761_s30, 4  ;;  %s75_s2 = sshll.u32 %s8074_s7, 4  ;;  %s48_s12 = int_to_ptr.vmem [resolvable:$true] %s47_s12  ;;  %s76_s2 = int_to_ptr.hbm [resolvable:$true] %s75_s2 }
  0x19   :  { %s103_s27 = sshll.u32 %s8077_s10, 4  ;;  %s5762_s9 = smov [#allocation7]   ;;  %s104_s27 = int_to_ptr.hbm [resolvable:$true] %s103_s27 }
  0x1a   :  { %s45_s4 = sshll.u32 %s8110_s29, 4  ;;  %s77_s28 = sshll.u32 %s5762_s9, 4  ;;  %s46_s4 = int_to_ptr.hbm [resolvable:$true] %s45_s4  ;;  %s78_s28 = int_to_ptr.vmem [resolvable:$true] %s77_s28 }
  0x1b   :  { %53 = dma.hbm_to_vmem [thread:$0]  %s46_s4, 256, %s48_s12, [#allocation3], %s5757_s24, %s5757_s24, %s5758_s6  }
  0x1c   :  { %83 = dma.hbm_to_vmem [thread:$0]  %s76_s2, 512, %s78_s28, [#allocation6], %s5757_s24, %s5757_s24, %s5758_s6  }
  0x1d   :  { %s5763_s3 = smov [#allocation10]   ;;  %s135_s1 = sshll.u32 %s8082_s15, 4  ;;  %s136_s1 = int_to_ptr.hbm [resolvable:$true] %s135_s1 }
  0x1e   :  { %s105_s7 = sshll.u32 %s5763_s3, 4  ;;  %s152_s30 = sshll.u32 %s8085_s18, 4  ;;  %s106_s7 = int_to_ptr.vmem [resolvable:$true] %s105_s7  ;;  %s153_s30 = int_to_ptr.hbm [resolvable:$true] %s152_s30 }
  0x1f   :  { %111 = dma.hbm_to_vmem [thread:$0]  %s104_s27, 512, %s106_s7, [#allocation9], %s5757_s24, %s5757_s24, %s5758_s6  }
  0x20   :  { %s5764_s12 = smov [#allocation13]   ;;  %s5765_s25 = smov [#allocation14]  }
  0x21   :  { %s137_s0 = sshll.u32 %s5764_s12, 4  ;;  %s154_s15 = sshll.u32 %s5765_s25, 4  ;;  %s138_s0 = int_to_ptr.vmem [resolvable:$true] %s137_s0  ;;  %s155_s15 = int_to_ptr.vmem [resolvable:$true] %s154_s15 }
  0x22   :  { %143 = dma.hbm_to_vmem [thread:$0]  %s136_s1, 256, %s138_s0, [#allocation12], %s5757_s24, %s5757_s24, %s5758_s6  }
  0x23   :  { %160 = dma.hbm_to_vmem [thread:$0]  %s153_s30, 512, %s155_s15, [#allocation15], %s5757_s24, %s5757_s24, %s5758_s6  }
  0x24   :  { %5742 = dma.done.wait [#allocation3], 256  }
  0x25   :  { %5743 = vsyncadd [#allocation3], 4294967040 }
  0x26   :  { %5744 = dma.done.wait [#allocation6], 768  }
  0x27   :  { %5745 = vsyncadd [#allocation6], 4294966528 }
  0x28   :  { %5746 = dma.done.wait [#allocation9], 1024  }
  0x29   :  { %5747 = vsyncadd [#allocation9], 4294966272 }
  0x2a   :  { %5748 = dma.done.wait [#allocation12], 768  }
  0x2b   :  { %5749 = vsyncadd [#allocation12], 4294966528 }
  0x2c   :  { %5750 = dma.done.wait [#allocation15], 512  }
  0x2d   :  { %5751 = vsyncadd [#allocation15], 4294966784  ;;  %v5937_v0 = vld [vmem:[#allocation7 + $0x18] sm:$0xff]  ;;  %v5939_v1 = vld [vmem:[#allocation7 + $0x10] sm:$0xff]  ;;  %s8111_s5 = sld [smem:[#allocation37_spill]]  ;;  %vm245_vm0 = vcmask 261120  }
  0x2e   :  { %373 = vmatpush.msra.mxu3 %v5937_v0  ;;  %v5942_v2 = vld [vmem:[#allocation7 + $0x8] sm:$0xff]  ;;  %v240_v3 = vld [vmem:[#allocation10 + $0x18] sm:$0xff]  ;;  %v5944_v4 = vld [vmem:[#allocation7] sm:$0xff]  ;;  %s5766_s9 = smov 64   ;;  %s5767_s28 = smov 96   ;;  %vm418_vm1 = vcmask 1040384  }
  0x2f   :  { %264 = vmatpush.msra.mxu0 %v240_v3  ;;  %v239_v5 = vld [vmem:[#allocation10 + $0x10] sm:$0xff]  ;;  %v278_v6 = vld [vmem:[#allocation11 + $0x18] sm:$0xff]  ;;  %v238_v8 = vld [vmem:[#allocation10 + $0x8] sm:$0xff]  ;;  %vm421_vm2 = vcmask 1041408   ;;  %s8113_s12 = sld [smem:[#allocation41_spill]]  ;;  %vm493_vm3 = vcmask 7168  }
  0x30   :  { %374 = vmatpush.msra.mxu3 %v5939_v1  ;;  %301 = vmatpush.msra.mxu1 %v278_v6  ;;  %v277_v9 = vld [vmem:[#allocation11 + $0x10] sm:$0xff]  ;;  %v237_v10 = vld [vmem:[#allocation10] sm:$0xff]  ;;  %v276_v11 = vld [vmem:[#allocation11 + $0x8] sm:$0xff]  ;;  %s8114_s3 = sld [smem:[#allocation36_spill]]  ;;  %s5769_s7 = smov 32  }
  0x31   :  { %265 = vmatpush.msra.mxu0 %v239_v5  ;;  %v5952_v12 = vld [vmem:[#allocation2] sm:$0xff]  ;;  %v5955_v14 = vld [vmem:[#allocation5] sm:$0xff]  ;;  %v5968_v15 = vld [vmem:[#allocation2 + $0x8] sm:$0xff]  ;;  %s8134_s15 = sld [smem:[#allocation42_spill]]  ;;  %s4858_s29 = sshll.u32 %s8088_s21, 4  ;;  %s4859_s29 = int_to_ptr.hbm [resolvable:$true] %s4858_s29 }
  0x32   :  { %v275_v13 = vld [vmem:[#allocation11] sm:$0xff]  ;;  %375 = vmatpush.msra.mxu3 %v5942_v2  ;;  %302 = vmatpush.msra.mxu1 %v277_v9  ;;  %v5972_v16 = vld [vmem:[#allocation5 + $0x8] sm:$0xff]  ;;  %s5771_s23 = smov [#allocation17]   ;;  %s5772_s21 = smov [#allocation19]  }
  0x33   :  { %v5950_v7 = vld [vmem:[%s8111_s5] sm:$0x3]  ;;  %266 = vmatpush.msra.mxu0 %v238_v8  ;;  %s4869_s10 = sshll.u32 %s8089_s22, 4  ;;  %s5773_s22 = smov [#allocation16]   ;;  %s4870_s10 = int_to_ptr.hbm [resolvable:$true] %s4869_s10 }
  0x34   :  { %376 = vmatpush.msra.mxu3 %v5944_v4  ;;  %303 = vmatpush.msra.mxu1 %v276_v11  ;;  %v5979_v17 = vld [vmem:[%s8075_s8] ss:$0 sm:$0xff]  ;;  %v6027_v49 = vld [vmem:[%s8081_s14 + $0x1] ss:$0 sm:$0xff]  ;;  %s4844_s30 = sshll.u32 %s8087_s20, 4  ;;  %s4845_s30 = int_to_ptr.hbm [resolvable:$true] %s4844_s30 }
  0x35   :  { %4898 = vmatmul.msk.f32.vlgmr.msra.gmra.mxu3 %vm245_vm0, %v5950_v7  ;;  %267 = vmatpush.msra.mxu0 %v237_v10  ;;  %v4975_v24 = vld [vmem:[%s8078_s11] ss:$0 sm:$0xff]  ;;  %v6047_v8 = vld [vmem:[%s8113_s12 + $0x8] sm:$0xff]  ;;  %s8115_s11 = sld [smem:[#allocation38_spill]] }
  0x36   :  { %4892 = vmatmul.msk.f32.vlgmr.msra.gmra.mxu0 %vm245_vm0, %v5952_v12  ;;  %304 = vmatpush.msra.mxu1 %v275_v13  ;;  %v4976_v26 = vld [vmem:[%s8080_s13] ss:$0 sm:$0xff]  ;;  %s4867_s13 = sshll.u32 %s5772_s21, 4  ;;  %s4868_s13 = int_to_ptr.vmem [resolvable:$true] %s4867_s13 }
  0x37   :  { %4894 = vmatmul.msk.f32.vlgmr.msra.gmra.mxu1 %vm245_vm0, %v5955_v14  ;;  %v6018_v45 = vld [vmem:[%s8081_s14] ss:$0 sm:$0xff] }
  0x38   :  { %1506 = vmatpush.msrb.mxu1 %v5937_v0  ;;  %v6042_v5 = vld [vmem:[%s8113_s12] sm:$0xff] }
  0x3a   :  { %1507 = vmatpush.msrb.mxu1 %v5939_v1 }
  0x3c   :  { %1508 = vmatpush.msrb.mxu1 %v5942_v2 }
  0x3e   :  { %1509 = vmatpush.msrb.mxu1 %v5944_v4  ;;  %4893 = vmatmul.msk.f32.gmra.mxu0 %vm245_vm0, %v5968_v15 }
  0x3f   :  { %4895 = vmatmul.msk.f32.gmra.mxu1 %vm245_vm0, %v5972_v16 }
  0xb3   :  { %v269_v23 = vpop.f32.mrf.mxu0 }
  0xb4   :  { %v306_v25 = vpop.f32.mrf.mxu1  ;;  %v5998_v30 = vadd.f32 %v4975_v24, %v269_v23  ;;  %v6056_v23 = vld [vmem:[%s8113_s12 + $0x18] sm:$0xff] }
  0xb5   :  { %v6005_v34 = vadd.f32 %v4976_v26, %v306_v25 }
  0xb8   :  { %v378_v18 = vpop.f32.mrf.mxu3 }
  0xb9   :  { %v5982_v19 = vadd.f32 %v5979_v17, %v378_v18 }
  0xbb   :  { %8112 = vst [vmem:[#allocation27_spill] sm:$0xff] %v5982_v19  ;;  %v404_v20 = vperm.slane %v5982_v19, 0  ;;  %v402_v21 = vrot.slane %v5982_v19, 1  ;;  %v272_v37 = vpop.f32.mrf.mxu0 }
  0xbc   :  { %v309_v38 = vpop.f32.mrf.mxu1  ;;  %v6010_v43 = vadd.f32 %v4975_v24, %v272_v37 }
  0xbd   :  { %412 = vrot.lane.b32.xlu1 %v404_v20, %s5766_s9  ;;  %406 = vrot.lane.b32.xlu0 %v404_v20, %s5767_s28  ;;  %v405_v22 = vperm.slane %v402_v21, 0  ;;  %v6022_v48 = vadd.f32 %v4976_v26, %v309_v38 }
  0xc5   :  { %414 = vrot.lane.b32.xlu1 %v405_v22, %s5766_s9  ;;  %408 = vrot.lane.b32.xlu0 %v405_v22, %s5767_s28 }
 0x12f   :  { %v413_v27 = vpop.permute.xlu1 %412  ;;  %v407_v28 = vpop.permute.xlu0 %406 }
 0x130   :  { %v419_v29 = vsel %vm418_vm1, %v5982_v19, %v407_v28 }
 0x131   :  { %v6001_v31 = vsel %vm421_vm2, %v419_v29, %v413_v27  ;;  %v6061_v27 = vld [vmem:[%s8113_s12 + $0x20] sm:$0xff] }
 0x132   :  { %v426_v32 = vrot.slane %v6001_v31, 1  ;;  %v430_v33 = vperm.slane %v6001_v31, 0 }
 0x134   :  { %v431_v35 = vperm.slane %v426_v32, 0  ;;  %v442_v36 = vadd.f32 %v430_v33, %v5998_v30 }
 0x136   :  { %4982 = vtanh.f32 %v442_v36  ;;  %v443_v39 = vadd.f32 %v431_v35, %v6005_v34 }
 0x137   :  { %v415_v40 = vpop.permute.xlu1 %414  ;;  %v409_v41 = vpop.permute.xlu0 %408 }
 0x138   :  { %v420_v42 = vsel %vm418_vm1, %v402_v21, %v409_v41  ;;  %4984 = vtanh.f32 %v443_v39 }
 0x139   :  { %v6013_v44 = vsel %vm421_vm2, %v420_v42, %v415_v40 }
 0x13a   :  { %v428_v46 = vrot.slane %v6013_v44, 1  ;;  %v433_v47 = vperm.slane %v6013_v44, 0 }
 0x13c   :  { %v4983_v50 = vpop.eup %4982  ;;  %v434_v51 = vperm.slane %v428_v46, 0  ;;  %v445_v52 = vadd.f32 %v433_v47, %v6010_v43 }
 0x13d   :  { %v463_v53 = vmul.f32 %v4983_v50, %v6018_v45 }
 0x13e   :  { %v4985_v54 = vpop.eup %4984  ;;  %4986 = vtanh.f32 %v445_v52  ;;  %v446_v55 = vadd.f32 %v434_v51, %v6022_v48 }
 0x13f   :  { %v469_v56 = vsel %vm245_vm0, %v463_v53, 0.0  ;;  %v464_v57 = vmul.f32 %v4985_v54, %v6027_v49 }
 0x140   :  { %470 = vadd.xlane.f32.xlu0 %v469_v56  ;;  %4988 = vtanh.f32 %v446_v55 }
 0x141   :  { %v472_v58 = vsel %vm245_vm0, %v464_v57, 0.0 }
 0x142   :  { %473 = vadd.xlane.f32.xlu2 %v472_v58 }
 0x144   :  { %v4987_v59 = vpop.eup %4986 }
 0x145   :  { %v466_v60 = vmul.f32 %v4987_v59, %v6018_v45 }
 0x146   :  { %v4989_v61 = vpop.eup %4988 }
 0x147   :  { %v478_v62 = vsel %vm245_vm0, %v466_v60, 0.0  ;;  %v467_v63 = vmul.f32 %v4989_v61, %v6027_v49  ;;  %v8093_v61 = vmov 0  }
 0x148   :  { %479 = vadd.xlane.f32.xlu1 %v478_v62  ;;  %4964 = vset.pattern.permute.xlu2 %v8093_v61 }
 0x149   :  { %v481_v3 = vsel %vm245_vm0, %v467_v63, 0.0  ;;  %4966 = vset.pattern.permute.xlu0 %v8093_v61  ;;  %4965 = vset.pattern.permute.xlu1 %v8093_v61 }
 0x14a   :  { %482 = vadd.xlane.f32.xlu2 %v481_v3 }
 0x1b3   :  { %v471_v6 = vpop.xlane.xlu0 %470 }
 0x1b4   :  { %v487_v9 = vadd.f32 %v471_v6, %v6042_v5 }
 0x1b5   :  { %v474_v10 = vpop.xlane.xlu2 %473 }
 0x1b6   :  { %v494_v11 = vsel %vm493_vm3, %v487_v9, -inf  ;;  %v488_v13 = vadd.f32 %v474_v10, %v6047_v8 }
 0x1b7   :  { %v495_v18 = vrot.slane %v494_v11, 4 }
 0x1b8   :  { %v501_v20 = vsel %vm493_vm3, %v488_v13, -inf }
 0x1b9   :  { %v496_v21 = vmax.f32 %v494_v11, %v495_v18  ;;  %v502_v22 = vrot.slane %v501_v20, 4 }
 0x1bb   :  { %v497_v24 = vrot.slane %v496_v21, 2  ;;  %v503_v25 = vmax.f32 %v501_v20, %v502_v22  ;;  %v480_v26 = vpop.xlane.xlu1 %479 }
 0x1bc   :  { %v490_v28 = vadd.f32 %v480_v26, %v6056_v23 }
 0x1bd   :  { %v498_v29 = vmax.f32 %v496_v21, %v497_v24  ;;  %v504_v32 = vrot.slane %v503_v25, 2  ;;  %v483_v33 = vpop.xlane.xlu2 %482 }
 0x1be   :  { %v515_v35 = vsel %vm493_vm3, %v490_v28, -inf  ;;  %v491_v36 = vadd.f32 %v483_v33, %v6061_v27 }
 0x1bf   :  { %v499_v37 = vrot.slane %v498_v29, 1  ;;  %v505_v38 = vmax.f32 %v503_v25, %v504_v32  ;;  %v516_v39 = vrot.slane %v515_v35, 4 }
 0x1c0   :  { %v522_v40 = vsel %vm493_vm3, %v491_v36, -inf }
 0x1c1   :  { %v500_v41 = vmax.f32 %v498_v29, %v499_v37  ;;  %v506_v42 = vrot.slane %v505_v38, 1  ;;  %v517_v46 = vmax.f32 %v515_v35, %v516_v39  ;;  %v523_v47 = vrot.slane %v522_v40, 4 }
 0x1c3   :  { %v536_v50 = vsub.f32 %v487_v9, %v500_v41  ;;  %v507_v51 = vmax.f32 %v505_v38, %v506_v42  ;;  %v518_v52 = vrot.slane %v517_v46, 2  ;;  %v524_v53 = vmax.f32 %v522_v40, %v523_v47 }
 0x1c5   :  { %v542_v54 = vmul.f32 1.442695, %v536_v50  ;;  %v537_v55 = vsub.f32 %v488_v13, %v507_v51  ;;  %v519_v56 = vmax.f32 %v517_v46, %v518_v52  ;;  %v525_v57 = vrot.slane %v524_v53, 2 }
 0x1c7   :  { %4990 = vpow2.f32 %v542_v54  ;;  %v544_v58 = vmul.f32 1.442695, %v537_v55  ;;  %v520_v59 = vrot.slane %v519_v56, 1  ;;  %v526_v60 = vmax.f32 %v524_v53, %v525_v57 }
 0x1c9   :  { %4992 = vpow2.f32 %v544_v58  ;;  %v521_v62 = vmax.f32 %v519_v56, %v520_v59  ;;  %v527_v63 = vrot.slane %v526_v60, 1 }
 0x1cb   :  { %v539_v3 = vsub.f32 %v490_v28, %v521_v62  ;;  %v528_v6 = vmax.f32 %v526_v60, %v527_v63 }
 0x1cd   :  { %v6070_v9 = vpop.eup %4990  ;;  %v548_v10 = vmul.f32 1.442695, %v539_v3  ;;  %v540_v11 = vsub.f32 %v491_v36, %v528_v6 }
 0x1ce   :  { %v554_v13 = vsel %vm493_vm3, %v6070_v9, 0.0 }
 0x1cf   :  { %v4993_v18 = vpop.eup %4992  ;;  %v555_v20 = vrot.slane %v554_v13, 4  ;;  %4994 = vpow2.f32 %v548_v10  ;;  %v550_v21 = vmul.f32 1.442695, %v540_v11 }
 0x1d0   :  { %v561_v22 = vsel %vm493_vm3, %v4993_v18, 0.0 }
 0x1d1   :  { %v556_v24 = vadd.f32 %v555_v20, %v554_v13  ;;  %v562_v25 = vrot.slane %v561_v22, 4  ;;  %4996 = vpow2.f32 %v550_v21 }
 0x1d3   :  { %v557_v26 = vrot.slane %v556_v24, 2  ;;  %v563_v29 = vadd.f32 %v562_v25, %v561_v22 }
 0x1d5   :  { %v6075_v28 = vpop.eup %4994  ;;  %v558_v32 = vadd.f32 %v557_v26, %v556_v24  ;;  %v564_v33 = vrot.slane %v563_v29, 2 }
 0x1d6   :  { %v575_v35 = vsel %vm493_vm3, %v6075_v28, 0.0 }
 0x1d7   :  { %v6079_v36 = vpop.eup %4996  ;;  %v559_v37 = vrot.slane %v558_v32, 1  ;;  %v565_v38 = vadd.f32 %v564_v33, %v563_v29  ;;  %v576_v39 = vrot.slane %v575_v35, 4 }
 0x1d8   :  { %v582_v40 = vsel %vm493_vm3, %v6079_v36, 0.0 }
 0x1d9   :  { %v566_v41 = vrot.slane %v565_v38, 1  ;;  %v577_v42 = vadd.f32 %v576_v39, %v575_v35  ;;  %v583_v46 = vrot.slane %v582_v40, 4  ;;  %v6083_v47 = vadd.f32 %v559_v37, %v558_v32 }
 0x1db   :  { %v567_v50 = vadd.f32 %v566_v41, %v565_v38  ;;  %v578_v51 = vrot.slane %v577_v42, 2  ;;  %v584_v52 = vadd.f32 %v583_v46, %v582_v40  ;;  %vm601_vm13 = vweird.f32 %v6083_v47 }
 0x1dd   :  { %4998 = vrcp.f32 %v567_v50  ;;  %v579_v53 = vadd.f32 %v578_v51, %v577_v42  ;;  %v585_v54 = vrot.slane %v584_v52, 2  ;;  %v622_v6 = vand.u32 2147483648, %v567_v50 }
 0x1de   :  { %5000 = vrcp.f32 %v6083_v47  ;;  %v620_v11 = vand.u32 2147483647, %v567_v50  ;;  %vm616_vm5 = vweird.f32 %v567_v50 }
 0x1df   :  { %v580_v55 = vrot.slane %v579_v53, 1  ;;  %v586_v56 = vadd.f32 %v585_v54, %v584_v52  ;;  %v623_v22 = vor.u32 1.1754944e-38, %v622_v6 }
 0x1e0   :  { %vm621_vm7 = vcmp.eq.f32.partialorder %v620_v11, 8.507059e+37 }
 0x1e1   :  { %v587_v57 = vrot.slane %v586_v56, 1  ;;  %v6086_v59 = vadd.f32 %v580_v55, %v579_v53  ;;  %v605_v55 = vand.u32 2147483647, %v6083_v47 }
 0x1e3   :  { %v4999_v58 = vpop.eup %4998  ;;  %v588_v60 = vadd.f32 %v587_v57, %v586_v56  ;;  %vm606_vm15 = vcmp.eq.f32.partialorder %v605_v55, 8.507059e+37 }
 0x1e4   :  { %v612_v62 = vmul.f32 %v4999_v58, %v567_v50  ;;  %v5001_v63 = vpop.eup %5000  ;;  %vm617_vm4 = vweird.f32 %v4999_v58 }
 0x1e5   :  { %5002 = vrcp.f32 %v588_v60  ;;  %v597_v13 = vmul.f32 %v5001_v63, %v6083_v47  ;;  %vm618_vm6 = vmor %vm616_vm5, %vm617_vm4  ;;  %v665_v37 = vand.u32 2147483647, %v588_v60  ;;  %v667_v38 = vand.u32 2147483648, %v588_v60 }
 0x1e6   :  { %v613_v3 = vsub.f32 1.0, %v612_v62  ;;  %5004 = vrcp.f32 %v6086_v59  ;;  %vm661_vm9 = vweird.f32 %v588_v60  ;;  %vm602_vm11 = vweird.f32 %v5001_v63 }
 0x1e7   :  { %v598_v26 = vsub.f32 1.0, %v597_v13  ;;  %v668_v46 = vor.u32 1.1754944e-38, %v667_v38  ;;  %vm666_vm12 = vcmp.eq.f32.partialorder %v665_v37, 8.507059e+37  ;;  %vm603_vm14 = vmor %vm601_vm13, %vm602_vm11  ;;  %vm646_vm5 = vweird.f32 %v6086_v59  ;;  %v6129_v38 = vld [vmem:[%s8083_s16 + $0x28] sm:$0xff] }
 0x1e8   :  { %v614_v10 = vmul.f32 %v4999_v58, %v613_v3  ;;  %v652_v3 = vand.u32 2147483648, %v6086_v59 }
 0x1e9   :  { %v599_v40 = vmul.f32 %v5001_v63, %v598_v26  ;;  %v6110_v26 = vld [vmem:[#allocation8 + $0x18] sm:$0xff] }
 0x1ea   :  { %v615_v20 = vadd.f32 %v4999_v58, %v614_v10  ;;  %v653_v10 = vor.u32 1.1754944e-38, %v652_v3  ;;  %393 = vmatpush.msrb.mxu3 %v6110_v26 }
 0x1eb   :  { %v5003_v21 = vpop.eup %5002  ;;  %v600_v51 = vadd.f32 %v5001_v63, %v599_v40 }
 0x1ec   :  { %v619_v24 = vsel %vm618_vm6, %v4999_v58, %v615_v20  ;;  %v657_v25 = vmul.f32 %v5003_v21, %v588_v60  ;;  %v5005_v29 = vpop.eup %5004  ;;  %vm662_vm8 = vweird.f32 %v5003_v21 }
 0x1ed   :  { %v624_v32 = vsel %vm621_vm7, %v623_v22, %v619_v24  ;;  %v642_v41 = vmul.f32 %v5005_v29, %v6086_v59  ;;  %vm663_vm10 = vmor %vm661_vm9, %vm662_vm8  ;;  %v604_v56 = vsel %vm603_vm14, %v5001_v63, %v600_v51  ;;  %vm647_vm4 = vweird.f32 %v5005_v29  ;;  %v218_v24 = vld [vmem:[#allocation13] sm:$0xff]  ;;  %v6149_v51 = vld [vmem:[%s8083_s16 + $0x18] sm:$0xff] }
 0x1ee   :  { %v625_v33 = vmul.f32 %v4993_v18, %v624_v32  ;;  %v658_v35 = vsub.f32 1.0, %v657_v25  ;;  %v607_v18 = vand.u32 2147483648, %v6083_v47  ;;  %vm648_vm6 = vmor %vm646_vm5, %vm647_vm4  ;;  %vm325_vm8 = vcmask 130048   ;;  %v6119_v32 = vld [vmem:[%s8083_s16 + $0x30] sm:$0xff] }
 0x1ef   :  { %v643_v52 = vsub.f32 1.0, %v642_v41  ;;  %vm783_vm9 = vcmask 1041409  }
 0x1f0   :  { %714 = vperm.xlu2 %4964, %v625_v33   ;;  %v659_v39 = vmul.f32 %v5003_v21, %v658_v35  ;;  %v608_v58 = vor.u32 1.1754944e-38, %v607_v18  ;;  %v6121_v33 = vld [vmem:[#allocation8 + $0x8] sm:$0xff] }
 0x1f1   :  { %v644_v57 = vmul.f32 %v5005_v29, %v643_v52 }
 0x1f2   :  { %v660_v42 = vadd.f32 %v5003_v21, %v659_v39  ;;  %v609_v60 = vsel %vm606_vm15, %v608_v58, %v604_v56  ;;  %v6131_v39 = vld [vmem:[#allocation8] sm:$0xff] }
 0x1f3   :  { %v645_v62 = vadd.f32 %v5005_v29, %v644_v57  ;;  %v610_v6 = vmul.f32 %v6070_v9, %v609_v60  ;;  %v219_v9 = vld [vmem:[#allocation13 + $0x8] sm:$0xff]  ;;  %v6173_v56 = vld [vmem:[%s8083_s16] sm:$0xff] }
 0x1f4   :  { %v664_v50 = vsel %vm663_vm10, %v5003_v21, %v660_v42  ;;  %346 = vmatpush.msra.mxu2 %v219_v9  ;;  %v321_v42 = vld [vmem:[%s8114_s3 + $0x8] sm:$0xff]  ;;  %vm793_vm10 = vcmask 523264  }
 0x1f5   :  { %v669_v53 = vsel %vm666_vm12, %v668_v46, %v664_v50  ;;  %v649_v47 = vsel %vm648_vm6, %v5005_v29, %v645_v62 }
 0x1f6   :  { %v670_v54 = vmul.f32 %v6079_v36, %v669_v53  ;;  %v650_v36 = vand.u32 2147483647, %v6086_v59  ;;  %v320_v59 = vld [vmem:[%s8114_s3] sm:$0xff]  ;;  %347 = vmatpush.msra.mxu2 %v218_v24  ;;  %v6159_v53 = vld [vmem:[%s8083_s16 + $0x10] sm:$0xff] }
 0x1f7   :  { %4896 = vmatmul.msk.f32.vlgmr.msra.gmra.mxu2 %vm325_vm8, %v320_v59 }
 0x1f8   :  { %719 = vperm.xlu2 %4964, %v670_v54   ;;  %vm651_vm7 = vcmp.eq.f32.partialorder %v650_v36, 8.507059e+37  ;;  %v196_v36 = vld [vmem:[%s8115_s11] sm:$0x3]  ;;  %s4856_s11 = sshll.u32 %s5771_s23, 4  ;;  %s4857_s11 = int_to_ptr.vmem [resolvable:$true] %s4856_s11 }
 0x1f9   :  { %v654_v63 = vsel %vm651_vm7, %v653_v10, %v649_v47 }
 0x1fa   :  { %v655_v11 = vmul.f32 %v6075_v28, %v654_v63  ;;  %v6108_v28 = vld [vmem:[%s8083_s16 + $0x38] sm:$0xff] }
 0x1fb   :  { %805 = vmatpush.msrb.mxu2 %v6108_v28 }
 0x1fd   :  { %806 = vmatpush.msrb.mxu2 %v6119_v32 }
 0x1ff   :  { %807 = vmatpush.msrb.mxu2 %v6129_v38 }
 0x200   :  { %688 = vperm.xlu2 %4964, %v610_v6   ;;  %4897 = vmatmul.msk.f32.gmra.mxu2 %vm325_vm8, %v321_v42  ;;  %v4979_v42 = vld [vmem:[%s8084_s17] ss:$0 sm:$0xff] }
 0x208   :  { %693 = vperm.xlu2 %4964, %v655_v11  }
 0x210   :  { %844 = vrot.lane.b32.xlu2 %v196_v36, %s5769_s7 }
 0x24a   :  { %v715_v13 = vpop.permute.xlu2 %714 }
 0x24b   :  { %v722_v20 = vmul.f32 %v715_v13, %v5955_v14  ;;  %v6113_v14 = vld [vmem:[#allocation8 + $0x10] sm:$0xff] }
 0x24c   :  { %394 = vmatpush.msrb.mxu3 %v6113_v14 }
 0x24d   :  { %v724_v21 = vsel %vm245_vm0, %v722_v20, 0.0 }
 0x24e   :  { %v725_v22 = vrot.slane %v724_v21, 4  ;;  %395 = vmatpush.msrb.mxu3 %v6121_v33 }
 0x250   :  { %v726_v25 = vadd.f32 %v725_v22, %v724_v21  ;;  %396 = vmatpush.msrb.mxu3 %v6131_v39 }
 0x251   :  { %4899 = vmatmul.msk.f32.vlgmr.msrb.gmra.mxu3 %vm245_vm0, %v5950_v7  ;;  %v6166_v7 = vld [vmem:[%s8083_s16 + $0x8] sm:$0xff] }
 0x252   :  { %v720_v29 = vpop.permute.xlu2 %719  ;;  %v727_v37 = vrot.slane %v726_v25, 2  ;;  %971 = vmatpush.msra.mxu3 %v6110_v26 }
 0x253   :  { %v723_v35 = vmul.f32 %v720_v29, %v5972_v16  ;;  %v6139_v16 = vld [vmem:[%s8083_s16 + $0x20] sm:$0xff] }
 0x254   :  { %v728_v46 = vadd.f32 %v727_v37, %v726_v25  ;;  %808 = vmatpush.msrb.mxu2 %v6139_v16  ;;  %972 = vmatpush.msra.mxu3 %v6113_v14 }
 0x255   :  { %v731_v40 = vsel %vm245_vm0, %v723_v35, 0.0 }
 0x256   :  { %v732_v41 = vrot.slane %v731_v40, 4  ;;  %809 = vmatpush.msrb.mxu2 %v6149_v51  ;;  %v729_v54 = vrot.slane %v728_v46, 1  ;;  %973 = vmatpush.msra.mxu3 %v6121_v33 }
 0x258   :  { %v733_v50 = vadd.f32 %v732_v41, %v731_v40  ;;  %810 = vmatpush.msrb.mxu2 %v6159_v53  ;;  %974 = vmatpush.msra.mxu3 %v6131_v39  ;;  %v730_v57 = vadd.f32 %v729_v54, %v728_v46 }
 0x25a   :  { %v734_v52 = vrot.slane %v733_v50, 2  ;;  %811 = vmatpush.msrb.mxu2 %v6166_v7  ;;  %1526 = vmatpush.msrb.mxu3 %v6110_v26  ;;  %v689_v62 = vpop.permute.xlu2 %688 }
 0x25b   :  { %v696_v47 = vmul.f32 %v689_v62, %v5952_v12 }
 0x25c   :  { %v735_v18 = vadd.f32 %v734_v52, %v733_v50  ;;  %812 = vmatpush.msrb.mxu2 %v6173_v56  ;;  %1527 = vmatpush.msrb.mxu3 %v6113_v14 }
 0x25d   :  { %v698_v63 = vsel %vm245_vm0, %v696_v47, 0.0 }
 0x25e   :  { %v736_v55 = vrot.slane %v735_v18, 1  ;;  %951 = vmatpush.msra.mxu2 %v5937_v0  ;;  %1528 = vmatpush.msrb.mxu3 %v6121_v33  ;;  %v699_v13 = vrot.slane %v698_v63, 4 }
 0x260   :  { %v737_v58 = vadd.f32 %v736_v55, %v735_v18  ;;  %952 = vmatpush.msra.mxu2 %v5939_v1  ;;  %1529 = vmatpush.msrb.mxu3 %v6131_v39  ;;  %v700_v21 = vadd.f32 %v699_v13, %v698_v63 }
 0x262   :  { %v788_v60 = vsel %vm783_vm9, %v737_v58, %v730_v57  ;;  %953 = vmatpush.msra.mxu2 %v5942_v2  ;;  %v694_v3 = vpop.permute.xlu2 %693  ;;  %v701_v9 = vrot.slane %v700_v21, 2 }
 0x263   :  { %789 = vrot.lane.b32.xlu0 %v788_v60, %s5769_s7  ;;  %v697_v6 = vmul.f32 %v694_v3, %v5968_v15 }
 0x264   :  { %954 = vmatpush.msra.mxu2 %v5944_v4  ;;  %v702_v15 = vadd.f32 %v701_v9, %v700_v21 }
 0x265   :  { %v705_v10 = vsel %vm245_vm0, %v697_v6, 0.0 }
 0x266   :  { %v706_v11 = vrot.slane %v705_v10, 4  ;;  %v703_v25 = vrot.slane %v702_v15, 1 }
 0x268   :  { %v707_v20 = vadd.f32 %v706_v11, %v705_v10  ;;  %v704_v35 = vadd.f32 %v703_v25, %v702_v15 }
 0x26a   :  { %v708_v22 = vrot.slane %v707_v20, 2 }
 0x26c   :  { %v709_v24 = vadd.f32 %v708_v22, %v707_v20 }
 0x26e   :  { %v710_v59 = vrot.slane %v709_v24, 1 }
 0x270   :  { %v711_v29 = vadd.f32 %v710_v59, %v709_v24 }
 0x272   :  { %v784_v12 = vsel %vm783_vm9, %v711_v29, %v704_v35 }
 0x27a   :  { %v349_v41 = vpop.f32.mrf.mxu2 }
 0x27b   :  { %v350_v50 = vadd.f32 %v4979_v42, %v349_v41 }
 0x27d   :  { %v1381_v18 = vrot.slane %v350_v50, 1  ;;  %v1936_v54 = vrot.slane %v350_v50, 2  ;;  %v2492_v57 = vrot.slane %v350_v50, 3  ;;  %v3048_v60 = vrot.slane %v350_v50, 4 }
 0x27e   :  { %v3604_v3 = vrot.slane %v350_v50, 5  ;;  %v4160_v10 = vrot.slane %v350_v50, 6  ;;  %v4716_v20 = vrot.slane %v350_v50, 7 }
 0x283   :  { %v352_v46 = vpop.f32.mrf.mxu2 }
 0x284   :  { %v353_v52 = vadd.f32 %v4979_v42, %v352_v46 }
 0x286   :  { %v1937_v55 = vrot.slane %v353_v52, 1  ;;  %v2493_v58 = vrot.slane %v353_v52, 2  ;;  %v3049_v62 = vrot.slane %v353_v52, 3  ;;  %v6211_v6 = vsel %vm783_vm9, %v353_v52, %v1381_v18 }
 0x287   :  { %v3605_v47 = vrot.slane %v353_v52, 4  ;;  %v4161_v13 = vrot.slane %v353_v52, 5  ;;  %v4717_v22 = vrot.slane %v353_v52, 6  ;;  %v819_v59 = vrot.slane %v353_v52, 7 }
 0x288   :  { %v6214_v36 = vsel %vm783_vm9, %v1937_v55, %v1936_v54  ;;  %v6217_v63 = vsel %vm783_vm9, %v2493_v58, %v2492_v57  ;;  %v6220_v11 = vsel %vm783_vm9, %v3049_v62, %v3048_v60 }
 0x289   :  { %v6223_v21 = vsel %vm783_vm9, %v3605_v47, %v3604_v3  ;;  %v6226_v9 = vsel %vm783_vm9, %v4161_v13, %v4160_v10  ;;  %v6229_v24 = vsel %vm783_vm9, %v4717_v22, %v4716_v20  ;;  %v820_v35 = vsel %vm783_vm9, %v819_v59, %v350_v50  ;;  %v845_v10 = vpop.permute.xlu2 %844  ;;  %v6238_v59 = vld [vmem:[#allocation14 + $0x18] sm:$0xff] }
 0x28a   :  { %884 = vmatpush.msrb.mxu0 %v6238_v59  ;;  %1995 = vmatpush.msra.mxu1 %v6238_v59 }
 0x2d4   :  { %v398_v15 = vpop.f32.mrf.mxu3 }
 0x2d5   :  { %v790_v37 = vpop.permute.xlu0 %789 }
 0x2d6   :  { %v792_v40 = vsel %vm245_vm0, %v784_v12, %v790_v37 }
 0x2d7   :  { %4901 = vmatmul.msk.f32.vlgmr.msrb.gmra.mxu2 %vm793_vm10, %v792_v40 }
 0x2d8   :  { %1369 = vmatpush.msrb.mxu2 %v6108_v28 }
 0x2da   :  { %1370 = vmatpush.msrb.mxu2 %v6119_v32 }
 0x2dc   :  { %1371 = vmatpush.msrb.mxu2 %v6129_v38 }
 0x2de   :  { %1372 = vmatpush.msrb.mxu2 %v6139_v16 }
 0x2e0   :  { %1373 = vmatpush.msrb.mxu2 %v6149_v51 }
 0x2e2   :  { %1374 = vmatpush.msrb.mxu2 %v6159_v53 }
 0x2e4   :  { %1375 = vmatpush.msrb.mxu2 %v6166_v7 }
 0x2e6   :  { %1376 = vmatpush.msrb.mxu2 %v6173_v56 }
 0x35a   :  { %v814_v25 = vpop.f32.mrf.mxu2 }
 0x35b   :  { %v815_v29 = vadd.f32 %v814_v25, %v398_v15  ;;  %v6240_v25 = vld [vmem:[#allocation14 + $0x10] sm:$0xff] }
 0x35c   :  { %885 = vmatpush.msrb.mxu0 %v6240_v25  ;;  %1996 = vmatpush.msra.mxu1 %v6240_v25 }
 0x35d   :  { %v822_v12 = vadd.f32 %v820_v35, %v815_v29  ;;  %v6244_v29 = vld [vmem:[#allocation14 + $0x8] sm:$0xff]  ;;  %v6248_v35 = vld [vmem:[#allocation14] sm:$0xff] }
 0x35e   :  { %886 = vmatpush.msrb.mxu0 %v6244_v29  ;;  %1997 = vmatpush.msra.mxu1 %v6244_v29 }
 0x35f   :  { %5006 = vtanh.f32 %v822_v12  ;;  %v4902_v40 = vmul.f32 -1.442695, %v822_v12 }
 0x360   :  { %887 = vmatpush.msrb.mxu0 %v6248_v35  ;;  %1998 = vmatpush.msra.mxu1 %v6248_v35 }
 0x361   :  { %5008 = vpow2.f32 %v4902_v40 }
 0x362   :  { %1439 = vmatpush.msra.mxu0 %v6238_v59 }
 0x364   :  { %1440 = vmatpush.msra.mxu0 %v6240_v25 }
 0x365   :  { %v5007_v37 = vpop.eup %5006 }
 0x366   :  { %849 = vrot.lane.b32.xlu1 %v5007_v37, %s5766_s9  ;;  %1441 = vmatpush.msra.mxu0 %v6244_v29 }
 0x367   :  { %v5009_v41 = vpop.eup %5008 }
 0x368   :  { %v826_v42 = vadd.f32 1.0, %v5009_v41  ;;  %1442 = vmatpush.msra.mxu0 %v6248_v35 }
 0x36a   :  { %5010 = vrcp.f32 %v826_v42  ;;  %v838_v52 = vand.u32 2147483648, %v826_v42  ;;  %vm832_vm12 = vweird.f32 %v826_v42  ;;  %v836_v58 = vand.u32 2147483647, %v826_v42 }
 0x36c   :  { %v839_v60 = vor.u32 1.1754944e-38, %v838_v52  ;;  %vm837_vm14 = vcmp.eq.f32.partialorder %v836_v58, 8.507059e+37 }
 0x370   :  { %v5011_v46 = vpop.eup %5010 }
 0x371   :  { %v828_v18 = vmul.f32 %v5011_v46, %v826_v42  ;;  %vm833_vm11 = vweird.f32 %v5011_v46 }
 0x372   :  { %vm834_vm13 = vmor %vm832_vm12, %vm833_vm11 }
 0x373   :  { %v829_v54 = vsub.f32 1.0, %v828_v18 }
 0x375   :  { %v830_v55 = vmul.f32 %v5011_v46, %v829_v54 }
 0x377   :  { %v831_v57 = vadd.f32 %v5011_v46, %v830_v55 }
 0x379   :  { %v835_v50 = vsel %vm834_vm13, %v5011_v46, %v831_v57 }
 0x37a   :  { %v840_v62 = vsel %vm837_vm14, %v839_v60, %v835_v50 }
 0x37b   :  { %v847_v13 = vmul.f32 %v845_v10, %v840_v62 }
 0x3d8   :  { %v850_v3 = vpop.permute.xlu1 %849 }
 0x3d9   :  { %v852_v47 = vmul.f32 %v850_v3, %v840_v62 }
 0x3db   :  { %854 = vrot.lane.b32.xlu2 %v852_v47, %s5769_s7 }
 0x435   :  { %v855_v20 = vpop.permute.xlu2 %854 }
 0x436   :  { %v6234_v22 = vadd.f32 %v855_v20, %v847_v13 }
 0x438   :  { %5012 = vtanh.f32 %v6234_v22 }
 0x43e   :  { %v5013_v15 = vpop.eup %5012 }
 0x43f   :  { %860 = vrot.lane.b32.xlu0 %v5013_v15, %s5766_s9 }
 0x4b1   :  { %v861_v12 = vpop.permute.xlu0 %860 }
 0x4b2   :  { %v863_v37 = vmul.f32 %v861_v12, %v840_v62 }
 0x4b4   :  { %868 = vrot.lane.b32.xlu2 %v863_v37, %s5769_s7 }
 0x50e   :  { %v869_v40 = vpop.permute.xlu2 %868 }
 0x50f   :  { %4903 = vmatmul.msk.f32.vlgmr.msrb.gmra.mxu0 %vm245_vm0, %v869_v40  ;;  %4904 = vmatmul.msk.f32.vlgmr.msra.gmra.mxu2 %vm245_vm0, %v869_v40 }
 0x510   :  { %4905 = vmatmul.msk.f32.vlgmr.msra.gmra.mxu3 %vm245_vm0, %v869_v40  ;;  %1924 = vmatpush.msrb.mxu0 %v6108_v28 }
 0x511   :  { %2062 = vmatpush.msra.mxu3 %v5937_v0  ;;  %2082 = vmatpush.msra.mxu2 %v6110_v26 }
 0x512   :  { %1925 = vmatpush.msrb.mxu0 %v6119_v32 }
 0x513   :  { %2063 = vmatpush.msra.mxu3 %v5939_v1  ;;  %2083 = vmatpush.msra.mxu2 %v6113_v14 }
 0x514   :  { %1926 = vmatpush.msrb.mxu0 %v6129_v38 }
 0x515   :  { %2064 = vmatpush.msra.mxu3 %v5942_v2  ;;  %2084 = vmatpush.msra.mxu2 %v6121_v33 }
 0x516   :  { %1927 = vmatpush.msrb.mxu0 %v6139_v16 }
 0x517   :  { %2065 = vmatpush.msra.mxu3 %v5944_v4  ;;  %2085 = vmatpush.msra.mxu2 %v6131_v39 }
 0x518   :  { %1928 = vmatpush.msrb.mxu0 %v6149_v51 }
 0x51a   :  { %1929 = vmatpush.msrb.mxu0 %v6159_v53 }
 0x51c   :  { %1930 = vmatpush.msrb.mxu0 %v6166_v7 }
 0x51e   :  { %1931 = vmatpush.msrb.mxu0 %v6173_v56 }
 0x592   :  { %v956_v0 = vpop.f32.mrf.mxu2 }
 0x593   :  { %v6279_v1 = vadd.f32 %v5979_v17, %v956_v0 }
 0x595   :  { %8116 = vst [vmem:[#allocation28_spill] sm:$0xff] %v6279_v1  ;;  %v982_v2 = vperm.slane %v6279_v1, 0  ;;  %v980_v41 = vrot.slane %v6279_v1, 1 }
 0x597   :  { %990 = vrot.lane.b32.xlu2 %v982_v2, %s5766_s9  ;;  %984 = vrot.lane.b32.xlu1 %v982_v2, %s5767_s28  ;;  %v983_v4 = vperm.slane %v980_v41, 0 }
 0x599   :  { %986 = vrot.lane.b32.xlu0 %v983_v4, %s5767_s28 }
 0x59f   :  { %992 = vrot.lane.b32.xlu1 %v983_v4, %s5766_s9 }
 0x5f1   :  { %v991_v46 = vpop.permute.xlu2 %990 }
 0x609   :  { %v985_v42 = vpop.permute.xlu1 %984 }
 0x60a   :  { %v996_v18 = vsel %vm418_vm1, %v6279_v1, %v985_v42 }
 0x60b   :  { %v6290_v17 = vsel %vm421_vm2, %v996_v18, %v991_v46  ;;  %v987_v58 = vpop.permute.xlu0 %986 }
 0x60c   :  { %v1002_v54 = vrot.slane %v6290_v17, 1  ;;  %v1006_v55 = vperm.slane %v6290_v17, 0  ;;  %v997_v60 = vsel %vm418_vm1, %v980_v41, %v987_v58 }
 0x60e   :  { %v1007_v57 = vperm.slane %v1002_v54, 0  ;;  %v1018_v52 = vadd.f32 %v1006_v55, %v5998_v30 }
 0x610   :  { %v1019_v50 = vadd.f32 %v1007_v57, %v6005_v34  ;;  %5014 = vtanh.f32 %v1018_v52 }
 0x611   :  { %v993_v62 = vpop.permute.xlu1 %992 }
 0x612   :  { %5016 = vtanh.f32 %v1019_v50  ;;  %v6298_v3 = vsel %vm421_vm2, %v997_v60, %v993_v62 }
 0x613   :  { %v1004_v47 = vrot.slane %v6298_v3, 1  ;;  %v1009_v10 = vperm.slane %v6298_v3, 0 }
 0x615   :  { %v1010_v13 = vperm.slane %v1004_v47, 0  ;;  %v1021_v20 = vadd.f32 %v1009_v10, %v6010_v43 }
 0x616   :  { %v5015_v15 = vpop.eup %5014 }
 0x617   :  { %v1022_v12 = vadd.f32 %v1010_v13, %v6022_v48  ;;  %5018 = vtanh.f32 %v1021_v20  ;;  %v1030_v37 = vmul.f32 %v5015_v15, %v6018_v45 }
 0x618   :  { %v5017_v40 = vpop.eup %5016 }
 0x619   :  { %5020 = vtanh.f32 %v1022_v12  ;;  %v1036_v0 = vsel %vm245_vm0, %v1030_v37, 0.0  ;;  %v1031_v2 = vmul.f32 %v5017_v40, %v6027_v49 }
 0x61a   :  { %1037 = vadd.xlane.f32.xlu1 %v1036_v0 }
 0x61b   :  { %v1039_v41 = vsel %vm245_vm0, %v1031_v2, 0.0 }
 0x61c   :  { %1040 = vadd.xlane.f32.xlu0 %v1039_v41 }
 0x61d   :  { %v5019_v4 = vpop.eup %5018 }
 0x61e   :  { %v1033_v46 = vmul.f32 %v5019_v4, %v6018_v45 }
 0x61f   :  { %v5021_v42 = vpop.eup %5020 }
 0x620   :  { %v1034_v18 = vmul.f32 %v5021_v42, %v6027_v49  ;;  %v1045_v55 = vsel %vm245_vm0, %v1033_v46, 0.0 }
 0x622   :  { %v1048_v54 = vsel %vm245_vm0, %v1034_v18, 0.0 }
 0x623   :  { %1049 = vadd.xlane.f32.xlu2 %v1048_v54 }
 0x624   :  { %1046 = vadd.xlane.f32.xlu0 %v1045_v55 }
 0x68d   :  { %v1038_v57 = vpop.xlane.xlu1 %1037 }
 0x68e   :  { %v1054_v52 = vadd.f32 %v1038_v57, %v6042_v5 }
 0x68f   :  { %v1041_v58 = vpop.xlane.xlu0 %1040 }
 0x690   :  { %v1060_v50 = vsel %vm493_vm3, %v1054_v52, -inf  ;;  %v1055_v60 = vadd.f32 %v1041_v58, %v6047_v8 }
 0x691   :  { %v1061_v62 = vrot.slane %v1060_v50, 4 }
 0x692   :  { %v1067_v47 = vsel %vm493_vm3, %v1055_v60, -inf }
 0x693   :  { %v1062_v45 = vmax.f32 %v1060_v50, %v1061_v62  ;;  %v1068_v10 = vrot.slane %v1067_v47, 4 }
 0x695   :  { %v1063_v49 = vrot.slane %v1062_v45, 2  ;;  %v1069_v13 = vmax.f32 %v1067_v47, %v1068_v10 }
 0x696   :  { %v1050_v20 = vpop.xlane.xlu2 %1049 }
 0x697   :  { %v1064_v15 = vmax.f32 %v1062_v45, %v1063_v49  ;;  %v1070_v12 = vrot.slane %v1069_v13, 2  ;;  %v1058_v37 = vadd.f32 %v1050_v20, %v6061_v27  ;;  %v1047_v40 = vpop.xlane.xlu0 %1046 }
 0x698   :  { %v1057_v5 = vadd.f32 %v1047_v40, %v6056_v23 }
 0x699   :  { %v1065_v0 = vrot.slane %v1064_v15, 1  ;;  %v1071_v2 = vmax.f32 %v1069_v13, %v1070_v12  ;;  %v1088_v41 = vsel %vm493_vm3, %v1058_v37, -inf }
 0x69a   :  { %v1089_v8 = vrot.slane %v1088_v41, 4  ;;  %v1081_v4 = vsel %vm493_vm3, %v1057_v5, -inf }
 0x69b   :  { %v1066_v42 = vmax.f32 %v1064_v15, %v1065_v0  ;;  %v1072_v46 = vrot.slane %v1071_v2, 1  ;;  %v1082_v18 = vrot.slane %v1081_v4, 4 }
 0x69c   :  { %v1090_v54 = vmax.f32 %v1088_v41, %v1089_v8 }
 0x69d   :  { %v1102_v55 = vsub.f32 %v1054_v52, %v1066_v42  ;;  %v1073_v57 = vmax.f32 %v1071_v2, %v1072_v46  ;;  %v1083_v58 = vmax.f32 %v1081_v4, %v1082_v18 }
 0x69e   :  { %v1091_v50 = vrot.slane %v1090_v54, 2 }
 0x69f   :  { %v1108_v62 = vmul.f32 1.442695, %v1102_v55  ;;  %v1103_v27 = vsub.f32 %v1055_v60, %v1073_v57  ;;  %v1084_v47 = vrot.slane %v1083_v58, 2 }
 0x6a0   :  { %v1092_v45 = vmax.f32 %v1090_v54, %v1091_v50 }
 0x6a1   :  { %5022 = vpow2.f32 %v1108_v62  ;;  %v1110_v23 = vmul.f32 1.442695, %v1103_v27  ;;  %v1085_v10 = vmax.f32 %v1083_v58, %v1084_v47 }
 0x6a2   :  { %v1093_v49 = vrot.slane %v1092_v45, 1 }
 0x6a3   :  { %5024 = vpow2.f32 %v1110_v23  ;;  %v1086_v13 = vrot.slane %v1085_v10, 1 }
 0x6a4   :  { %v1094_v20 = vmax.f32 %v1092_v45, %v1093_v49 }
 0x6a5   :  { %v1087_v12 = vmax.f32 %v1085_v10, %v1086_v13 }
 0x6a6   :  { %v1106_v15 = vsub.f32 %v1058_v37, %v1094_v20 }
 0x6a7   :  { %v6320_v40 = vpop.eup %5022  ;;  %v1105_v0 = vsub.f32 %v1057_v5, %v1087_v12 }
 0x6a8   :  { %v1120_v52 = vsel %vm493_vm3, %v6320_v40, 0.0  ;;  %v1116_v2 = vmul.f32 1.442695, %v1106_v15 }
 0x6a9   :  { %v6324_v41 = vpop.eup %5024  ;;  %v1121_v60 = vrot.slane %v1120_v52, 4  ;;  %v1114_v8 = vmul.f32 1.442695, %v1105_v0 }
 0x6aa   :  { %v1127_v4 = vsel %vm493_vm3, %v6324_v41, 0.0  ;;  %5026 = vpow2.f32 %v1116_v2 }
 0x6ab   :  { %v1122_v42 = vadd.f32 %v1121_v60, %v1120_v52  ;;  %v1128_v46 = vrot.slane %v1127_v4, 4  ;;  %5028 = vpow2.f32 %v1114_v8 }
 0x6ad   :  { %v1123_v18 = vrot.slane %v1122_v42, 2  ;;  %v1129_v37 = vadd.f32 %v1128_v46, %v1127_v4 }
 0x6af   :  { %v1124_v54 = vadd.f32 %v1123_v18, %v1122_v42  ;;  %v1130_v55 = vrot.slane %v1129_v37, 2 }
 0x6b0   :  { %v6328_v5 = vpop.eup %5026 }
 0x6b1   :  { %v6330_v57 = vpop.eup %5028  ;;  %v1125_v58 = vrot.slane %v1124_v54, 1  ;;  %v1131_v50 = vadd.f32 %v1130_v55, %v1129_v37  ;;  %v1148_v62 = vsel %vm493_vm3, %v6328_v5, 0.0 }
 0x6b2   :  { %v1149_v27 = vrot.slane %v1148_v62, 4  ;;  %v1141_v47 = vsel %vm493_vm3, %v6330_v57, 0.0 }
 0x6b3   :  { %v1126_v45 = vadd.f32 %v1125_v58, %v1124_v54  ;;  %v1132_v23 = vrot.slane %v1131_v50, 1  ;;  %v1142_v10 = vrot.slane %v1141_v47, 4 }
 0x6b4   :  { %v1150_v49 = vadd.f32 %v1149_v27, %v1148_v62 }
 0x6b5   :  { %5030 = vrcp.f32 %v1126_v45  ;;  %v1133_v13 = vadd.f32 %v1132_v23, %v1131_v50  ;;  %v1143_v20 = vadd.f32 %v1142_v10, %v1141_v47  ;;  %v1173_v55 = vand.u32 2147483648, %v1126_v45 }
 0x6b6   :  { %v1151_v12 = vrot.slane %v1150_v49, 2  ;;  %v1171_v50 = vand.u32 2147483647, %v1126_v45  ;;  %vm1167_vm4 = vweird.f32 %v1126_v45 }
 0x6b7   :  { %5032 = vrcp.f32 %v1133_v13  ;;  %v1144_v15 = vrot.slane %v1143_v20, 2  ;;  %v1188_v27 = vand.u32 2147483648, %v1133_v13  ;;  %v1186_v10 = vand.u32 2147483647, %v1133_v13 }
 0x6b8   :  { %v1152_v0 = vadd.f32 %v1151_v12, %v1150_v49  ;;  %v1174_v49 = vor.u32 1.1754944e-38, %v1173_v55  ;;  %vm1172_vm7 = vcmp.eq.f32.partialorder %v1171_v50, 8.507059e+37  ;;  %vm1182_vm8 = vweird.f32 %v1133_v13 }
 0x6b9   :  { %v1145_v52 = vadd.f32 %v1144_v15, %v1143_v20  ;;  %vm1187_vm12 = vcmp.eq.f32.partialorder %v1186_v10, 8.507059e+37 }
 0x6ba   :  { %v1153_v2 = vrot.slane %v1152_v0, 1 }
 0x6bb   :  { %v5031_v60 = vpop.eup %5030  ;;  %v1146_v8 = vrot.slane %v1145_v52, 1 }
 0x6bc   :  { %v1154_v4 = vadd.f32 %v1153_v2, %v1152_v0  ;;  %v1163_v42 = vmul.f32 %v5031_v60, %v1126_v45  ;;  %vm1168_vm15 = vweird.f32 %v5031_v60  ;;  %v1189_v2 = vor.u32 1.1754944e-38, %v1188_v27 }
 0x6bd   :  { %v5033_v46 = vpop.eup %5032  ;;  %v1147_v18 = vadd.f32 %v1146_v8, %v1145_v52  ;;  %vm1169_vm6 = vmor %vm1167_vm4, %vm1168_vm15 }
 0x6be   :  { %5034 = vrcp.f32 %v1154_v4  ;;  %v1164_v37 = vsub.f32 1.0, %v1163_v42  ;;  %v1178_v54 = vmul.f32 %v5033_v46, %v1133_v13  ;;  %vm1183_vm5 = vweird.f32 %v5033_v46 }
 0x6bf   :  { %5036 = vrcp.f32 %v1147_v18  ;;  %vm1184_vm11 = vmor %vm1182_vm8, %vm1183_vm5  ;;  %v1231_v13 = vand.u32 2147483647, %v1154_v4  ;;  %v1216_v27 = vand.u32 2147483647, %v1147_v18  ;;  %vm1227_vm15 = vweird.f32 %v1154_v4 }
 0x6c0   :  { %v1165_v58 = vmul.f32 %v5031_v60, %v1164_v37  ;;  %v1179_v62 = vsub.f32 1.0, %v1178_v54  ;;  %vm1212_vm5 = vweird.f32 %v1147_v18 }
 0x6c1   :  { %vm1217_vm8 = vcmp.eq.f32.partialorder %v1216_v27, 8.507059e+37 }
 0x6c2   :  { %v1166_v47 = vadd.f32 %v5031_v60, %v1165_v58  ;;  %v1180_v23 = vmul.f32 %v5033_v46, %v1179_v62  ;;  %v1233_v62 = vand.u32 2147483648, %v1154_v4 }
 0x6c4   :  { %v5035_v20 = vpop.eup %5034  ;;  %v1170_v12 = vsel %vm1169_vm6, %v5031_v60, %v1166_v47  ;;  %v1181_v15 = vadd.f32 %v5033_v46, %v1180_v23  ;;  %v1218_v47 = vand.u32 2147483648, %v1147_v18  ;;  %vm1232_vm6 = vcmp.eq.f32.partialorder %v1231_v13, 8.507059e+37 }
 0x6c5   :  { %v5037_v0 = vpop.eup %5036  ;;  %v1175_v52 = vsel %vm1172_vm7, %v1174_v49, %v1170_v12  ;;  %v1223_v8 = vmul.f32 %v5035_v20, %v1154_v4  ;;  %vm1228_vm13 = vweird.f32 %v5035_v20  ;;  %v6340_v4 = vld [vmem:[#allocation5] sm:$0xff] }
 0x6c6   :  { %v1176_v42 = vmul.f32 %v6320_v40, %v1175_v52  ;;  %v1185_v45 = vsel %vm1184_vm11, %v5033_v46, %v1181_v15  ;;  %v1208_v37 = vmul.f32 %v5037_v0, %v1147_v18  ;;  %vm1213_vm14 = vweird.f32 %v5037_v0  ;;  %vm1229_vm4 = vmor %vm1227_vm15, %vm1228_vm13 }
 0x6c7   :  { %v1190_v54 = vsel %vm1187_vm12, %v1189_v2, %v1185_v45  ;;  %v1224_v58 = vsub.f32 1.0, %v1223_v8  ;;  %v1234_v40 = vor.u32 1.1754944e-38, %v1233_v62  ;;  %vm1214_vm7 = vmor %vm1212_vm5, %vm1213_vm14 }
 0x6c8   :  { %1254 = vperm.xlu0 %4966, %v1176_v42   ;;  %v1191_v55 = vmul.f32 %v6324_v41, %v1190_v54  ;;  %v1209_v60 = vsub.f32 1.0, %v1208_v37  ;;  %v1219_v41 = vor.u32 1.1754944e-38, %v1218_v47 }
 0x6c9   :  { %v1225_v50 = vmul.f32 %v5035_v20, %v1224_v58  ;;  %v6344_v58 = vld [vmem:[#allocation5 + $0x8] sm:$0xff] }
 0x6ca   :  { %1280 = vperm.xlu2 %4964, %v1191_v55   ;;  %v1210_v23 = vmul.f32 %v5037_v0, %v1209_v60 }
 0x6cb   :  { %v1226_v49 = vadd.f32 %v5035_v20, %v1225_v50 }
 0x6cc   :  { %v1211_v46 = vadd.f32 %v5037_v0, %v1210_v23 }
 0x6cd   :  { %v1230_v10 = vsel %vm1229_vm4, %v5035_v20, %v1226_v49 }
 0x6ce   :  { %v1235_v12 = vsel %vm1232_vm6, %v1234_v40, %v1230_v10  ;;  %v1215_v15 = vsel %vm1214_vm7, %v5037_v0, %v1211_v46 }
 0x6cf   :  { %v1236_v52 = vmul.f32 %v6328_v5, %v1235_v12  ;;  %v1220_v2 = vsel %vm1217_vm8, %v1219_v41, %v1215_v15  ;;  %v6350_v41 = vld [vmem:[#allocation2] sm:$0xff]  ;;  %v6353_v15 = vld [vmem:[#allocation2 + $0x8] sm:$0xff] }
 0x6d0   :  { %v1221_v8 = vmul.f32 %v6330_v57, %v1220_v2 }
 0x6d1   :  { %1285 = vperm.xlu1 %4965, %v1236_v52  }
 0x6d2   :  { %1259 = vperm.xlu2 %4964, %v1221_v8  }
 0x724   :  { %v1281_v42 = vpop.permute.xlu2 %1280 }
 0x725   :  { %v1288_v45 = vmul.f32 %v6340_v4, %v1281_v42 }
 0x727   :  { %v1290_v18 = vsel %vm245_vm0, %v1288_v45, 0.0 }
 0x728   :  { %v1291_v20 = vrot.slane %v1290_v18, 4 }
 0x72a   :  { %v1292_v37 = vadd.f32 %v1291_v20, %v1290_v18 }
 0x72c   :  { %v1293_v5 = vrot.slane %v1292_v37, 2  ;;  %v1260_v10 = vpop.permute.xlu2 %1259 }
 0x72d   :  { %v1263_v52 = vmul.f32 %v6353_v15, %v1260_v10 }
 0x72e   :  { %v1294_v62 = vadd.f32 %v1293_v5, %v1292_v37 }
 0x72f   :  { %v1271_v8 = vsel %vm245_vm0, %v1263_v52, 0.0 }
 0x730   :  { %v1295_v47 = vrot.slane %v1294_v62, 1  ;;  %v1272_v45 = vrot.slane %v1271_v8, 4 }
 0x732   :  { %v1296_v27 = vadd.f32 %v1295_v47, %v1294_v62  ;;  %v1273_v20 = vadd.f32 %v1272_v45, %v1271_v8 }
 0x73a   :  { %v1255_v46 = vpop.permute.xlu0 %1254 }
 0x73b   :  { %v1262_v12 = vmul.f32 %v6350_v41, %v1255_v46  ;;  %v976_v46 = vpop.f32.mrf.mxu3 }
 0x73d   :  { %v1264_v2 = vsel %vm245_vm0, %v1262_v12, 0.0 }
 0x73e   :  { %v1265_v42 = vrot.slane %v1264_v2, 4 }
 0x740   :  { %v1266_v18 = vadd.f32 %v1265_v42, %v1264_v2 }
 0x742   :  { %v1267_v37 = vrot.slane %v1266_v18, 2 }
 0x743   :  { %v1286_v54 = vpop.permute.xlu1 %1285 }
 0x744   :  { %v1289_v0 = vmul.f32 %v6344_v58, %v1286_v54  ;;  %v1274_v54 = vrot.slane %v1273_v20, 2 }
 0x746   :  { %v1297_v55 = vsel %vm245_vm0, %v1289_v0, 0.0  ;;  %v1268_v0 = vadd.f32 %v1267_v37, %v1266_v18  ;;  %v1275_v5 = vadd.f32 %v1274_v54, %v1273_v20 }
 0x747   :  { %v1298_v57 = vrot.slane %v1297_v55, 4 }
 0x749   :  { %v1299_v60 = vadd.f32 %v1298_v57, %v1297_v55  ;;  %v1269_v55 = vrot.slane %v1268_v0, 1  ;;  %v1276_v57 = vrot.slane %v1275_v5, 1 }
 0x74b   :  { %v1300_v50 = vrot.slane %v1299_v60, 2  ;;  %v1270_v62 = vadd.f32 %v1269_v55, %v1268_v0 }
 0x74d   :  { %v1301_v13 = vadd.f32 %v1300_v50, %v1299_v60  ;;  %v1277_v60 = vadd.f32 %v1276_v57, %v1275_v5 }
 0x74f   :  { %v1302_v23 = vrot.slane %v1301_v13, 1 }
 0x751   :  { %v1303_v49 = vadd.f32 %v1302_v23, %v1301_v13  ;;  %v1349_v13 = vsel %vm783_vm9, %v1277_v60, %v1270_v62  ;;  %v6361_v23 = vld [vmem:[#allocation7 + $0x18] sm:$0xff] }
 0x753   :  { %v1353_v40 = vsel %vm783_vm9, %v1303_v49, %v1296_v27  ;;  %v6364_v27 = vld [vmem:[#allocation7 + $0x10] sm:$0xff]  ;;  %v6367_v49 = vld [vmem:[#allocation7 + $0x8] sm:$0xff] }
 0x754   :  { %1354 = vrot.lane.b32.xlu1 %v1353_v40, %s5769_s7  ;;  %v6370_v40 = vld [vmem:[#allocation7] sm:$0xff] }
 0x7c6   :  { %v1355_v50 = vpop.permute.xlu1 %1354 }
 0x7c7   :  { %v1357_v47 = vsel %vm245_vm0, %v1349_v13, %v1355_v50 }
 0x7c8   :  { %4907 = vmatmul.msk.f32.vlgmr.msrb.gmra.mxu2 %vm793_vm10, %v1357_v47 }
 0x7c9   :  { %2618 = vmatpush.msrb.mxu2 %v6361_v23 }
 0x7cb   :  { %2619 = vmatpush.msrb.mxu2 %v6364_v27 }
 0x7cd   :  { %2620 = vmatpush.msrb.mxu2 %v6367_v49 }
 0x7cf   :  { %2621 = vmatpush.msrb.mxu2 %v6370_v40 }
 0x84b   :  { %v1378_v10 = vpop.f32.mrf.mxu2 }
 0x84c   :  { %v1379_v12 = vadd.f32 %v1378_v10, %v976_v46 }
 0x84e   :  { %v1384_v52 = vadd.f32 %v6211_v6, %v1379_v12 }
 0x850   :  { %5038 = vtanh.f32 %v1384_v52  ;;  %v4908_v8 = vmul.f32 -1.442695, %v1384_v52 }
 0x852   :  { %5040 = vpow2.f32 %v4908_v8 }
 0x856   :  { %v5039_v2 = vpop.eup %5038 }
 0x857   :  { %1407 = vrot.lane.b32.xlu2 %v5039_v2, %s5766_s9 }
 0x858   :  { %v5041_v42 = vpop.eup %5040 }
 0x859   :  { %v1388_v45 = vadd.f32 1.0, %v5041_v42 }
 0x85b   :  { %5042 = vrcp.f32 %v1388_v45  ;;  %v1400_v5 = vand.u32 2147483648, %v1388_v45  ;;  %vm1394_vm12 = vweird.f32 %v1388_v45  ;;  %v1398_v55 = vand.u32 2147483647, %v1388_v45 }
 0x85d   :  { %v1401_v57 = vor.u32 1.1754944e-38, %v1400_v5  ;;  %vm1399_vm14 = vcmp.eq.f32.partialorder %v1398_v55, 8.507059e+37  ;;  %v6435_v5 = vld [vmem:[%s8081_s14] ss:$0 sm:$0xff] }
 0x861   :  { %v5043_v18 = vpop.eup %5042 }
 0x862   :  { %v1390_v20 = vmul.f32 %v5043_v18, %v1388_v45  ;;  %vm1395_vm11 = vweird.f32 %v5043_v18 }
 0x863   :  { %vm1396_vm13 = vmor %vm1394_vm12, %vm1395_vm11 }
 0x864   :  { %v1391_v37 = vsub.f32 1.0, %v1390_v20 }
 0x866   :  { %v1392_v54 = vmul.f32 %v5043_v18, %v1391_v37 }
 0x868   :  { %v1393_v0 = vadd.f32 %v5043_v18, %v1392_v54 }
 0x86a   :  { %v1397_v6 = vsel %vm1396_vm13, %v5043_v18, %v1393_v0 }
 0x86b   :  { %v1402_v60 = vsel %vm1399_vm14, %v1401_v57, %v1397_v6 }
 0x86c   :  { %v1405_v13 = vmul.f32 %v1402_v60, %v6234_v22 }
 0x8b1   :  { %v1408_v62 = vpop.permute.xlu2 %1407 }
 0x8b2   :  { %v1410_v50 = vmul.f32 %v1408_v62, %v1402_v60  ;;  %v6442_v62 = vld [vmem:[%s8081_s14 + $0x1] ss:$0 sm:$0xff] }
 0x8b4   :  { %1412 = vrot.lane.b32.xlu1 %v1410_v50, %s5769_s7 }
 0x926   :  { %v1413_v47 = vpop.permute.xlu1 %1412 }
 0x927   :  { %v6377_v46 = vadd.f32 %v1413_v47, %v1405_v13 }
 0x929   :  { %5044 = vtanh.f32 %v6377_v46 }
 0x92f   :  { %v5045_v10 = vpop.eup %5044 }
 0x930   :  { %1418 = vrot.lane.b32.xlu2 %v5045_v10, %s5766_s9 }
 0x98a   :  { %v1419_v12 = vpop.permute.xlu2 %1418 }
 0x98b   :  { %v1421_v52 = vmul.f32 %v1419_v12, %v1402_v60 }
 0x98d   :  { %1423 = vrot.lane.b32.xlu1 %v1421_v52, %s5769_s7 }
 0x9ff   :  { %v1424_v2 = vpop.permute.xlu1 %1423 }
 0xa00   :  { %4909 = vmatmul.msk.f32.vlgmr.msra.gmra.mxu0 %vm245_vm0, %v1424_v2  ;;  %4910 = vmatmul.msk.f32.vlgmr.msrb.gmra.mxu1 %vm245_vm0, %v1424_v2 }
 0xa01   :  { %4911 = vmatmul.msk.f32.vlgmr.msrb.gmra.mxu3 %vm245_vm0, %v1424_v2  ;;  %2480 = vmatpush.msrb.mxu1 %v6108_v28 }
 0xa02   :  { %2551 = vmatpush.msrb.mxu3 %v6238_v59  ;;  %2638 = vmatpush.msra.mxu0 %v6110_v26  ;;  %v6404_v26 = vld [vmem:[%s8075_s8] ss:$0 sm:$0xff] }
 0xa03   :  { %2481 = vmatpush.msrb.mxu1 %v6119_v32 }
 0xa04   :  { %2552 = vmatpush.msrb.mxu3 %v6240_v25  ;;  %2639 = vmatpush.msra.mxu0 %v6113_v14 }
 0xa05   :  { %2482 = vmatpush.msrb.mxu1 %v6129_v38 }
 0xa06   :  { %2553 = vmatpush.msrb.mxu3 %v6244_v29  ;;  %2640 = vmatpush.msra.mxu0 %v6121_v33 }
 0xa07   :  { %2483 = vmatpush.msrb.mxu1 %v6139_v16 }
 0xa08   :  { %2554 = vmatpush.msrb.mxu3 %v6248_v35  ;;  %2641 = vmatpush.msra.mxu0 %v6131_v39 }
 0xa09   :  { %2484 = vmatpush.msrb.mxu1 %v6149_v51 }
 0xa0b   :  { %2485 = vmatpush.msrb.mxu1 %v6159_v53 }
 0xa0d   :  { %2486 = vmatpush.msrb.mxu1 %v6166_v7 }
 0xa0f   :  { %2487 = vmatpush.msrb.mxu1 %v6173_v56 }
 0xa7d   :  { %v1511_v28 = vpop.f32.mrf.mxu1 }
 0xa7e   :  { %v6407_v14 = vadd.f32 %v6404_v26, %v1511_v28 }
 0xa80   :  { %8117 = vst [vmem:[#allocation29_spill] sm:$0xff] %v6407_v14  ;;  %v1537_v32 = vperm.slane %v6407_v14, 0  ;;  %v1535_v33 = vrot.slane %v6407_v14, 1 }
 0xa82   :  { %1545 = vrot.lane.b32.xlu1 %v1537_v32, %s5766_s9  ;;  %1539 = vrot.lane.b32.xlu0 %v1537_v32, %s5767_s28  ;;  %v1538_v38 = vperm.slane %v1535_v33, 0  ;;  %v6453_v32 = vld [vmem:[%s8113_s12] sm:$0xff] }
 0xa84   :  { %1541 = vrot.lane.b32.xlu2 %v1538_v38, %s5767_s28 }
 0xa8a   :  { %1547 = vrot.lane.b32.xlu0 %v1538_v38, %s5766_s9 }
 0xade   :  { %v1542_v22 = vpop.permute.xlu2 %1541 }
 0xadf   :  { %v1552_v35 = vsel %vm418_vm1, %v1535_v33, %v1542_v22 }
 0xaf4   :  { %v1546_v39 = vpop.permute.xlu1 %1545  ;;  %v1540_v16 = vpop.permute.xlu0 %1539 }
 0xaf5   :  { %v1551_v51 = vsel %vm418_vm1, %v6407_v14, %v1540_v16  ;;  %v6460_v16 = vld [vmem:[%s8113_s12 + $0x8] sm:$0xff] }
 0xaf6   :  { %v6418_v53 = vsel %vm421_vm2, %v1551_v51, %v1546_v39 }
 0xaf7   :  { %v1557_v7 = vrot.slane %v6418_v53, 1  ;;  %v1561_v56 = vperm.slane %v6418_v53, 0 }
 0xaf9   :  { %v1562_v59 = vperm.slane %v1557_v7, 0  ;;  %v1573_v25 = vadd.f32 %v1561_v56, %v5998_v30 }
 0xafb   :  { %v1574_v29 = vadd.f32 %v1562_v59, %v6005_v34  ;;  %5046 = vtanh.f32 %v1573_v25 }
 0xafc   :  { %v1548_v8 = vpop.permute.xlu0 %1547 }
 0xafd   :  { %5048 = vtanh.f32 %v1574_v29  ;;  %v6426_v42 = vsel %vm421_vm2, %v1552_v35, %v1548_v8 }
 0xafe   :  { %v1559_v45 = vrot.slane %v6426_v42, 1  ;;  %v1564_v18 = vperm.slane %v6426_v42, 0 }
 0xb00   :  { %v1565_v20 = vperm.slane %v1559_v45, 0  ;;  %v1576_v37 = vadd.f32 %v1564_v18, %v6010_v43  ;;  %v6467_v18 = vld [vmem:[%s8113_s12 + $0x20] sm:$0xff] }
 0xb01   :  { %v5047_v54 = vpop.eup %5046 }
 0xb02   :  { %v1577_v0 = vadd.f32 %v1565_v20, %v6022_v48  ;;  %5050 = vtanh.f32 %v1576_v37  ;;  %v1585_v55 = vmul.f32 %v6435_v5, %v5047_v54  ;;  %v6473_v54 = vld [vmem:[%s8113_s12 + $0x18] sm:$0xff] }
 0xb03   :  { %v5049_v6 = vpop.eup %5048 }
 0xb04   :  { %5052 = vtanh.f32 %v1577_v0  ;;  %v1591_v57 = vsel %vm245_vm0, %v1585_v55, 0.0  ;;  %v1586_v60 = vmul.f32 %v6442_v62, %v5049_v6 }
 0xb05   :  { %1592 = vadd.xlane.f32.xlu0 %v1591_v57 }
 0xb06   :  { %v1594_v50 = vsel %vm245_vm0, %v1586_v60, 0.0 }
 0xb07   :  { %1595 = vadd.xlane.f32.xlu2 %v1594_v50 }
 0xb08   :  { %v5051_v13 = vpop.eup %5050 }
 0xb09   :  { %v1588_v10 = vmul.f32 %v6435_v5, %v5051_v13 }
 0xb0a   :  { %v5053_v47 = vpop.eup %5052 }
 0xb0b   :  { %v1589_v12 = vmul.f32 %v6442_v62, %v5053_v47  ;;  %v1600_v2 = vsel %vm245_vm0, %v1588_v10, 0.0 }
 0xb0d   :  { %v1603_v52 = vsel %vm245_vm0, %v1589_v12, 0.0 }
 0xb0e   :  { %1604 = vadd.xlane.f32.xlu1 %v1603_v52 }
 0xb0f   :  { %1601 = vadd.xlane.f32.xlu2 %v1600_v2 }
 0xb78   :  { %v1593_v28 = vpop.xlane.xlu0 %1592 }
 0xb79   :  { %v1609_v33 = vadd.f32 %v6453_v32, %v1593_v28 }
 0xb7a   :  { %v1596_v38 = vpop.xlane.xlu2 %1595 }
 0xb7b   :  { %v1615_v39 = vsel %vm493_vm3, %v1609_v33, -inf  ;;  %v1610_v51 = vadd.f32 %v6460_v16, %v1596_v38 }
 0xb7c   :  { %v1616_v7 = vrot.slane %v1615_v39, 4 }
 0xb7d   :  { %v1622_v56 = vsel %vm493_vm3, %v1610_v51, -inf }
 0xb7e   :  { %v1617_v22 = vmax.f32 %v1615_v39, %v1616_v7  ;;  %v1623_v59 = vrot.slane %v1622_v56, 4 }
 0xb80   :  { %v1618_v25 = vrot.slane %v1617_v22, 2  ;;  %v1624_v29 = vmax.f32 %v1622_v56, %v1623_v59 }
 0xb81   :  { %v1605_v35 = vpop.xlane.xlu1 %1604 }
 0xb82   :  { %v1619_v8 = vmax.f32 %v1617_v22, %v1618_v25  ;;  %v1625_v45 = vrot.slane %v1624_v29, 2  ;;  %v1613_v20 = vadd.f32 %v6467_v18, %v1605_v35  ;;  %v1602_v37 = vpop.xlane.xlu2 %1601 }
 0xb83   :  { %v1612_v0 = vadd.f32 %v6473_v54, %v1602_v37 }
 0xb84   :  { %v1620_v55 = vrot.slane %v1619_v8, 1  ;;  %v1626_v6 = vmax.f32 %v1624_v29, %v1625_v45  ;;  %v1643_v57 = vsel %vm493_vm3, %v1613_v20, -inf }
 0xb85   :  { %v1644_v60 = vrot.slane %v1643_v57, 4  ;;  %v1636_v50 = vsel %vm493_vm3, %v1612_v0, -inf }
 0xb86   :  { %v1621_v13 = vmax.f32 %v1619_v8, %v1620_v55  ;;  %v1627_v47 = vrot.slane %v1626_v6, 1  ;;  %v1637_v10 = vrot.slane %v1636_v50, 4 }
 0xb87   :  { %v1645_v12 = vmax.f32 %v1643_v57, %v1644_v60 }
 0xb88   :  { %v1657_v52 = vsub.f32 %v1609_v33, %v1621_v13  ;;  %v1628_v2 = vmax.f32 %v1626_v6, %v1627_v47  ;;  %v1638_v28 = vmax.f32 %v1636_v50, %v1637_v10 }
 0xb89   :  { %v1646_v38 = vrot.slane %v1645_v12, 2 }
 0xb8a   :  { %v1663_v39 = vmul.f32 1.442695, %v1657_v52  ;;  %v1658_v7 = vsub.f32 %v1610_v51, %v1628_v2  ;;  %v1639_v56 = vrot.slane %v1638_v28, 2 }
 0xb8b   :  { %v1647_v22 = vmax.f32 %v1645_v12, %v1646_v38 }
 0xb8c   :  { %5054 = vpow2.f32 %v1663_v39  ;;  %v1665_v59 = vmul.f32 1.442695, %v1658_v7  ;;  %v1640_v25 = vmax.f32 %v1638_v28, %v1639_v56 }
 0xb8d   :  { %v1648_v29 = vrot.slane %v1647_v22, 1 }
 0xb8e   :  { %5056 = vpow2.f32 %v1665_v59  ;;  %v1641_v35 = vrot.slane %v1640_v25, 1 }
 0xb8f   :  { %v1649_v45 = vmax.f32 %v1647_v22, %v1648_v29 }
 0xb90   :  { %v1642_v37 = vmax.f32 %v1640_v25, %v1641_v35 }
 0xb91   :  { %v1661_v8 = vsub.f32 %v1613_v20, %v1649_v45 }
 0xb92   :  { %v6478_v55 = vpop.eup %5054  ;;  %v1660_v57 = vsub.f32 %v1612_v0, %v1642_v37 }
 0xb93   :  { %v1675_v33 = vsel %vm493_vm3, %v6478_v55, 0.0  ;;  %v1671_v6 = vmul.f32 1.442695, %v1661_v8 }
 0xb94   :  { %v6482_v60 = vpop.eup %5056  ;;  %v1676_v51 = vrot.slane %v1675_v33, 4  ;;  %v1669_v50 = vmul.f32 1.442695, %v1660_v57 }
 0xb95   :  { %v1682_v13 = vsel %vm493_vm3, %v6482_v60, 0.0  ;;  %5058 = vpow2.f32 %v1671_v6 }
 0xb96   :  { %v1677_v47 = vadd.f32 %v1676_v51, %v1675_v33  ;;  %v1683_v10 = vrot.slane %v1682_v13, 4  ;;  %5060 = vpow2.f32 %v1669_v50 }
 0xb98   :  { %v1678_v12 = vrot.slane %v1677_v47, 2  ;;  %v1684_v20 = vadd.f32 %v1683_v10, %v1682_v13 }
 0xb9a   :  { %v1679_v52 = vadd.f32 %v1678_v12, %v1677_v47  ;;  %v1685_v2 = vrot.slane %v1684_v20, 2 }
 0xb9b   :  { %v6486_v0 = vpop.eup %5058 }
 0xb9c   :  { %v6488_v28 = vpop.eup %5060  ;;  %v1680_v38 = vrot.slane %v1679_v52, 1  ;;  %v1686_v39 = vadd.f32 %v1685_v2, %v1684_v20  ;;  %v1703_v7 = vsel %vm493_vm3, %v6486_v0, 0.0 }
 0xb9d   :  { %v1704_v56 = vrot.slane %v1703_v7, 4  ;;  %v1696_v22 = vsel %vm493_vm3, %v6488_v28, 0.0 }
 0xb9e   :  { %v1681_v59 = vadd.f32 %v1680_v38, %v1679_v52  ;;  %v1687_v25 = vrot.slane %v1686_v39, 1  ;;  %v1697_v29 = vrot.slane %v1696_v22, 4 }
 0xb9f   :  { %v1705_v35 = vadd.f32 %v1704_v56, %v1703_v7 }
 0xba0   :  { %5062 = vrcp.f32 %v1681_v59  ;;  %v1688_v45 = vadd.f32 %v1687_v25, %v1686_v39  ;;  %v1698_v37 = vadd.f32 %v1697_v29, %v1696_v22  ;;  %v1728_v38 = vand.u32 2147483648, %v1681_v59 }
 0xba1   :  { %v1706_v8 = vrot.slane %v1705_v35, 2  ;;  %v1726_v39 = vand.u32 2147483647, %v1681_v59  ;;  %vm1722_vm4 = vweird.f32 %v1681_v59 }
 0xba2   :  { %5064 = vrcp.f32 %v1688_v45  ;;  %v1699_v57 = vrot.slane %v1698_v37, 2  ;;  %v1743_v22 = vand.u32 2147483648, %v1688_v45  ;;  %vm1737_vm8 = vweird.f32 %v1688_v45 }
 0xba3   :  { %v1707_v33 = vadd.f32 %v1706_v8, %v1705_v35  ;;  %v1741_v35 = vand.u32 2147483647, %v1688_v45  ;;  %vm1727_vm7 = vcmp.eq.f32.partialorder %v1726_v39, 8.507059e+37 }
 0xba4   :  { %v1700_v6 = vadd.f32 %v1699_v57, %v1698_v37  ;;  %v1729_v37 = vor.u32 1.1754944e-38, %v1728_v38 }
 0xba5   :  { %v1708_v51 = vrot.slane %v1707_v33, 1  ;;  %vm1742_vm12 = vcmp.eq.f32.partialorder %v1741_v35, 8.507059e+37 }
 0xba6   :  { %v5063_v50 = vpop.eup %5062  ;;  %v1701_v13 = vrot.slane %v1700_v6, 1 }
 0xba7   :  { %v1709_v47 = vadd.f32 %v1708_v51, %v1707_v33  ;;  %v1718_v10 = vmul.f32 %v5063_v50, %v1681_v59  ;;  %vm1723_vm15 = vweird.f32 %v5063_v50 }
 0xba8   :  { %v5065_v12 = vpop.eup %5064  ;;  %v1702_v20 = vadd.f32 %v1701_v13, %v1700_v6  ;;  %vm1724_vm6 = vmor %vm1722_vm4, %vm1723_vm15  ;;  %v1744_v13 = vor.u32 1.1754944e-38, %v1743_v22 }
 0xba9   :  { %5066 = vrcp.f32 %v1709_v47  ;;  %v1719_v52 = vsub.f32 1.0, %v1718_v10  ;;  %v1733_v2 = vmul.f32 %v5065_v12, %v1688_v45  ;;  %vm1738_vm5 = vweird.f32 %v5065_v12 }
 0xbaa   :  { %5068 = vrcp.f32 %v1702_v20  ;;  %vm1739_vm11 = vmor %vm1737_vm8, %vm1738_vm5  ;;  %v1788_v61 = vand.u32 2147483648, %v1709_v47  ;;  %v1786_v45 = vand.u32 2147483647, %v1709_v47  ;;  %vm1782_vm14 = vweird.f32 %v1709_v47 }
 0xbab   :  { %v1720_v7 = vmul.f32 %v5063_v50, %v1719_v52  ;;  %v1734_v56 = vsub.f32 1.0, %v1733_v2 }
 0xbac   :  { %v1789_v22 = vor.u32 1.1754944e-38, %v1788_v61  ;;  %vm1787_vm4 = vcmp.eq.f32.partialorder %v1786_v45, 8.507059e+37 }
 0xbad   :  { %v1721_v25 = vadd.f32 %v5063_v50, %v1720_v7  ;;  %v1735_v29 = vmul.f32 %v5065_v12, %v1734_v56 }
 0xbaf   :  { %v5067_v8 = vpop.eup %5066  ;;  %v1725_v57 = vsel %vm1724_vm6, %v5063_v50, %v1721_v25  ;;  %v1736_v33 = vadd.f32 %v5065_v12, %v1735_v29  ;;  %vm1767_vm6 = vweird.f32 %v1702_v20 }
 0xbb0   :  { %v5069_v6 = vpop.eup %5068  ;;  %v1730_v51 = vsel %vm1727_vm7, %v1729_v37, %v1725_v57  ;;  %v1778_v10 = vmul.f32 %v5067_v8, %v1709_v47  ;;  %vm1783_vm13 = vweird.f32 %v5067_v8  ;;  %v1773_v37 = vand.u32 2147483648, %v1702_v20 }
 0xbb1   :  { %v1731_v52 = vmul.f32 %v6478_v55, %v1730_v51  ;;  %v1740_v59 = vsel %vm1739_vm11, %v5065_v12, %v1736_v33  ;;  %v1763_v2 = vmul.f32 %v5069_v6, %v1702_v20  ;;  %vm1784_vm15 = vmor %vm1782_vm14, %vm1783_vm13  ;;  %vm1768_vm5 = vweird.f32 %v5069_v6 }
 0xbb2   :  { %v1745_v7 = vsel %vm1742_vm12, %v1744_v13, %v1740_v59  ;;  %v1779_v56 = vsub.f32 1.0, %v1778_v10  ;;  %vm1769_vm7 = vmor %vm1767_vm6, %vm1768_vm5  ;;  %v1774_v51 = vor.u32 1.1754944e-38, %v1773_v37 }
 0xbb3   :  { %1809 = vperm.xlu2 %4964, %v1731_v52   ;;  %v1746_v38 = vmul.f32 %v6482_v60, %v1745_v7  ;;  %v1764_v50 = vsub.f32 1.0, %v1763_v2  ;;  %v1771_v60 = vand.u32 2147483647, %v1702_v20 }
 0xbb4   :  { %v1780_v39 = vmul.f32 %v5067_v8, %v1779_v56 }
 0xbb5   :  { %1835 = vperm.xlu1 %4965, %v1746_v38   ;;  %v1765_v25 = vmul.f32 %v5069_v6, %v1764_v50  ;;  %vm1772_vm8 = vcmp.eq.f32.partialorder %v1771_v60, 8.507059e+37 }
 0xbb6   :  { %v1781_v29 = vadd.f32 %v5067_v8, %v1780_v39 }
 0xbb7   :  { %v1766_v12 = vadd.f32 %v5069_v6, %v1765_v25 }
 0xbb8   :  { %v1785_v55 = vsel %vm1784_vm15, %v5067_v8, %v1781_v29 }
 0xbb9   :  { %v1790_v35 = vsel %vm1787_vm4, %v1789_v22, %v1785_v55  ;;  %v1770_v33 = vsel %vm1769_vm7, %v5069_v6, %v1766_v12 }
 0xbba   :  { %v1791_v57 = vmul.f32 %v6486_v0, %v1790_v35  ;;  %v1775_v13 = vsel %vm1772_vm8, %v1774_v51, %v1770_v33 }
 0xbbb   :  { %v1776_v47 = vmul.f32 %v6488_v28, %v1775_v13 }
 0xbbc   :  { %1840 = vperm.xlu0 %4966, %v1791_v57  }
 0xbc4   :  { %1814 = vperm.xlu0 %4966, %v1776_v47  }
 0xc0d   :  { %v1810_v55 = vpop.permute.xlu2 %1809 }
 0xc0e   :  { %v1817_v12 = vmul.f32 %v6350_v41, %v1810_v55 }
 0xc10   :  { %v1819_v37 = vsel %vm245_vm0, %v1817_v12, 0.0 }
 0xc11   :  { %v1820_v60 = vrot.slane %v1819_v37, 4 }
 0xc13   :  { %v1821_v51 = vadd.f32 %v1820_v60, %v1819_v37 }
 0xc15   :  { %v1822_v47 = vrot.slane %v1821_v51, 2 }
 0xc27   :  { %v1836_v61 = vpop.permute.xlu1 %1835 }
 0xc28   :  { %v1843_v8 = vmul.f32 %v6340_v4, %v1836_v61 }
 0xc2a   :  { %v1845_v10 = vsel %vm245_vm0, %v1843_v8, 0.0  ;;  %v1823_v8 = vadd.f32 %v1822_v47, %v1821_v51 }
 0xc2b   :  { %v1846_v52 = vrot.slane %v1845_v10, 4 }
 0xc2d   :  { %v1847_v59 = vadd.f32 %v1846_v52, %v1845_v10  ;;  %v1824_v52 = vrot.slane %v1823_v8, 1 }
 0xc2e   :  { %v1841_v2 = vpop.permute.xlu0 %1840 }
 0xc2f   :  { %v1844_v0 = vmul.f32 %v6344_v58, %v1841_v2  ;;  %v1848_v20 = vrot.slane %v1847_v59, 2  ;;  %v1825_v2 = vadd.f32 %v1824_v52, %v1823_v8  ;;  %v6540_v8 = vld [vmem:[#allocation8 + $0x18] sm:$0xff]  ;;  %v6549_v52 = vld [vmem:[#allocation14 + $0x10] sm:$0xff] }
 0xc31   :  { %v1852_v7 = vsel %vm245_vm0, %v1844_v0, 0.0  ;;  %v1849_v56 = vadd.f32 %v1848_v20, %v1847_v59  ;;  %v6515_v20 = vpop.f32.mrf.mxu0 }
 0xc32   :  { %v1853_v6 = vrot.slane %v1852_v7, 4  ;;  %8118 = vst [vmem:[#allocation30_spill] sm:$0xff] %v6515_v20 }
 0xc33   :  { %v1850_v28 = vrot.slane %v1849_v56, 1 }
 0xc34   :  { %v1854_v38 = vadd.f32 %v1853_v6, %v1852_v7  ;;  %v1531_v6 = vpop.f32.mrf.mxu3 }
 0xc35   :  { %v1851_v25 = vadd.f32 %v1850_v28, %v1849_v56 }
 0xc36   :  { %v1855_v50 = vrot.slane %v1854_v38, 2  ;;  %v1815_v22 = vpop.permute.xlu0 %1814 }
 0xc37   :  { %v1818_v58 = vmul.f32 %v6353_v15, %v1815_v22 }
 0xc38   :  { %v1856_v39 = vadd.f32 %v1855_v50, %v1854_v38 }
 0xc39   :  { %v1826_v35 = vsel %vm245_vm0, %v1818_v58, 0.0  ;;  %v6517_v7 = vpop.f32.mrf.mxu0 }
 0xc3a   :  { %v1857_v45 = vrot.slane %v1856_v39, 1  ;;  %v1827_v57 = vrot.slane %v1826_v35, 4 }
 0xc3c   :  { %v1858_v29 = vadd.f32 %v1857_v45, %v1856_v39  ;;  %v1828_v33 = vadd.f32 %v1827_v57, %v1826_v35 }
 0xc3e   :  { %v1908_v4 = vsel %vm783_vm9, %v1858_v29, %v1851_v25  ;;  %v1829_v13 = vrot.slane %v1828_v33, 2 }
 0xc3f   :  { %1909 = vrot.lane.b32.xlu1 %v1908_v4, %s5769_s7 }
 0xc40   :  { %v1830_v61 = vadd.f32 %v1829_v13, %v1828_v33 }
 0xc42   :  { %v1831_v10 = vrot.slane %v1830_v61, 1 }
 0xc44   :  { %v1832_v59 = vadd.f32 %v1831_v10, %v1830_v61  ;;  %v6537_v61 = vld [vmem:[#allocation14 + $0x18] sm:$0xff]  ;;  %v6546_v10 = vld [vmem:[%s8083_s16 + $0x30] sm:$0xff] }
 0xc46   :  { %v1904_v15 = vsel %vm783_vm9, %v1832_v59, %v1825_v2  ;;  %v6552_v59 = vld [vmem:[#allocation8 + $0x10] sm:$0xff]  ;;  %v6558_v2 = vld [vmem:[%s8083_s16 + $0x28] sm:$0xff] }
 0xcb1   :  { %v1910_v0 = vpop.permute.xlu1 %1909 }
 0xcb2   :  { %v1912_v41 = vsel %vm245_vm0, %v1904_v15, %v1910_v0  ;;  %v6561_v0 = vld [vmem:[#allocation14 + $0x8] sm:$0xff]  ;;  %v6564_v15 = vld [vmem:[#allocation8 + $0x8] sm:$0xff] }
 0xcb3   :  { %4913 = vmatmul.msk.f32.vlgmr.msrb.gmra.mxu0 %vm793_vm10, %v1912_v41  ;;  %v6570_v41 = vld [vmem:[%s8083_s16 + $0x20] sm:$0xff] }
 0xcb4   :  { %3174 = vmatpush.msrb.mxu0 %v6361_v23 }
 0xcb6   :  { %3175 = vmatpush.msrb.mxu0 %v6364_v27 }
 0xcb8   :  { %3176 = vmatpush.msrb.mxu0 %v6367_v49 }
 0xcba   :  { %3177 = vmatpush.msrb.mxu0 %v6370_v40 }
 0xd30   :  { %v1933_v56 = vpop.f32.mrf.mxu0 }
 0xd31   :  { %v1934_v38 = vadd.f32 %v1933_v56, %v1531_v6  ;;  %v6573_v6 = vld [vmem:[#allocation14] sm:$0xff]  ;;  %v6576_v56 = vld [vmem:[#allocation8] sm:$0xff] }
 0xd33   :  { %v1940_v50 = vadd.f32 %v6214_v36, %v1934_v38  ;;  %v6582_v38 = vld [vmem:[%s8083_s16 + $0x18] sm:$0xff] }
 0xd35   :  { %5070 = vtanh.f32 %v1940_v50  ;;  %v4914_v23 = vmul.f32 -1.442695, %v1940_v50  ;;  %v6588_v50 = vld [vmem:[%s8083_s16 + $0x10] sm:$0xff] }
 0xd37   :  { %5072 = vpow2.f32 %v4914_v23  ;;  %v6600_v23 = vld [vmem:[%s8083_s16] sm:$0xff] }
 0xd3b   :  { %v5071_v39 = vpop.eup %5070 }
 0xd3c   :  { %1963 = vrot.lane.b32.xlu2 %v5071_v39, %s5766_s9  ;;  %v6594_v39 = vld [vmem:[%s8083_s16 + $0x8] sm:$0xff] }
 0xd3d   :  { %v5073_v27 = vpop.eup %5072 }
 0xd3e   :  { %v1944_v28 = vadd.f32 1.0, %v5073_v27 }
 0xd40   :  { %5074 = vrcp.f32 %v1944_v28  ;;  %v1956_v4 = vand.u32 2147483648, %v1944_v28  ;;  %vm1950_vm12 = vweird.f32 %v1944_v28  ;;  %v1954_v22 = vand.u32 2147483647, %v1944_v28 }
 0xd42   :  { %v1957_v55 = vor.u32 1.1754944e-38, %v1956_v4  ;;  %vm1955_vm14 = vcmp.eq.f32.partialorder %v1954_v22, 8.507059e+37 }
 0xd46   :  { %v5075_v49 = vpop.eup %5074 }
 0xd47   :  { %v1946_v40 = vmul.f32 %v5075_v49, %v1944_v28  ;;  %vm1951_vm11 = vweird.f32 %v5075_v49 }
 0xd48   :  { %vm1952_vm13 = vmor %vm1950_vm12, %vm1951_vm11 }
 0xd49   :  { %v1947_v45 = vsub.f32 1.0, %v1946_v40 }
 0xd4b   :  { %v1948_v25 = vmul.f32 %v5075_v49, %v1947_v45 }
 0xd4d   :  { %v1949_v29 = vadd.f32 %v5075_v49, %v1948_v25 }
 0xd4f   :  { %v1953_v36 = vsel %vm1952_vm13, %v5075_v49, %v1949_v29 }
 0xd50   :  { %v1958_v12 = vsel %vm1955_vm14, %v1957_v55, %v1953_v36 }
 0xd51   :  { %v1961_v37 = vmul.f32 %v1958_v12, %v6377_v46  ;;  %v6534_v46 = vld [vmem:[%s8083_s16 + $0x38] sm:$0xff] }
 0xd96   :  { %v1964_v58 = vpop.permute.xlu2 %1963 }
 0xd97   :  { %v1966_v35 = vmul.f32 %v1964_v58, %v1958_v12 }
 0xd99   :  { %1968 = vrot.lane.b32.xlu0 %v1966_v35, %s5769_s7 }
 0xe0b   :  { %v1969_v57 = vpop.permute.xlu0 %1968 }
 0xe0c   :  { %v6523_v60 = vadd.f32 %v1969_v57, %v1961_v37 }
 0xe0e   :  { %5076 = vtanh.f32 %v6523_v60 }
 0xe14   :  { %v5077_v33 = vpop.eup %5076 }
 0xe15   :  { %1974 = vrot.lane.b32.xlu1 %v5077_v33, %s5766_s9 }
 0xe87   :  { %v1975_v51 = vpop.permute.xlu1 %1974 }
 0xe88   :  { %v1977_v13 = vmul.f32 %v1975_v51, %v1958_v12 }
 0xe8a   :  { %1979 = vrot.lane.b32.xlu2 %v1977_v13, %s5769_s7 }
 0xee4   :  { %v1980_v47 = vpop.permute.xlu2 %1979 }
 0xee5   :  { %4915 = vmatmul.msk.f32.vlgmr.msra.gmra.mxu1 %vm245_vm0, %v1980_v47  ;;  %4916 = vmatmul.msk.f32.vlgmr.msra.gmra.mxu3 %vm245_vm0, %v1980_v47 }
 0xee6   :  { %4917 = vmatmul.msk.f32.vlgmr.msra.gmra.mxu2 %vm245_vm0, %v1980_v47  ;;  %3036 = vmatpush.msra.mxu3 %v6534_v46 }
 0xee7   :  { %3107 = vmatpush.msra.mxu2 %v6537_v61  ;;  %3194 = vmatpush.msra.mxu1 %v6540_v8 }
 0xee8   :  { %3037 = vmatpush.msra.mxu3 %v6546_v10 }
 0xee9   :  { %3108 = vmatpush.msra.mxu2 %v6549_v52  ;;  %3195 = vmatpush.msra.mxu1 %v6552_v59 }
 0xeea   :  { %3038 = vmatpush.msra.mxu3 %v6558_v2 }
 0xeeb   :  { %3109 = vmatpush.msra.mxu2 %v6561_v0  ;;  %3196 = vmatpush.msra.mxu1 %v6564_v15 }
 0xeec   :  { %3039 = vmatpush.msra.mxu3 %v6570_v41 }
 0xeed   :  { %3110 = vmatpush.msra.mxu2 %v6573_v6  ;;  %3197 = vmatpush.msra.mxu1 %v6576_v56 }
 0xeee   :  { %3040 = vmatpush.msra.mxu3 %v6582_v38 }
 0xef0   :  { %3041 = vmatpush.msra.mxu3 %v6588_v50 }
 0xef2   :  { %3042 = vmatpush.msra.mxu3 %v6594_v39 }
 0xef4   :  { %3043 = vmatpush.msra.mxu3 %v6600_v23 }
 0xf68   :  { %v2067_v27 = vpop.f32.mrf.mxu3 }
 0xf69   :  { %v6604_v28 = vadd.f32 %v6404_v26, %v2067_v27 }
 0xf6b   :  { %8119 = vst [vmem:[#allocation31_spill] sm:$0xff] %v6604_v28  ;;  %v2093_v49 = vperm.slane %v6604_v28, 0  ;;  %v2091_v40 = vrot.slane %v6604_v28, 1 }
 0xf6d   :  { %2101 = vrot.lane.b32.xlu2 %v2093_v49, %s5766_s9  ;;  %2095 = vrot.lane.b32.xlu0 %v2093_v49, %s5767_s28  ;;  %v2094_v45 = vperm.slane %v2091_v40, 0 }
 0xf6f   :  { %2097 = vrot.lane.b32.xlu1 %v2094_v45, %s5767_s28 }
 0xf75   :  { %2103 = vrot.lane.b32.xlu0 %v2094_v45, %s5766_s9 }
 0xfc7   :  { %v2102_v29 = vpop.permute.xlu2 %2101 }
 0xfdf   :  { %v2096_v25 = vpop.permute.xlu0 %2095 }
 0xfe0   :  { %v2107_v4 = vsel %vm418_vm1, %v6604_v28, %v2096_v25 }
 0xfe1   :  { %v6615_v26 = vsel %vm421_vm2, %v2107_v4, %v2102_v29  ;;  %v2098_v12 = vpop.permute.xlu1 %2097 }
 0xfe2   :  { %v2113_v22 = vrot.slane %v6615_v26, 1  ;;  %v2117_v36 = vperm.slane %v6615_v26, 0  ;;  %v2108_v37 = vsel %vm418_vm1, %v2091_v40, %v2098_v12 }
 0xfe4   :  { %v2118_v55 = vperm.slane %v2113_v22, 0  ;;  %v2129_v58 = vadd.f32 %v2117_v36, %v5998_v30 }
 0xfe6   :  { %v2130_v35 = vadd.f32 %v2118_v55, %v6005_v34  ;;  %5078 = vtanh.f32 %v2129_v58 }
 0xfe7   :  { %v2104_v57 = vpop.permute.xlu0 %2103 }
 0xfe8   :  { %5080 = vtanh.f32 %v2130_v35  ;;  %v6623_v33 = vsel %vm421_vm2, %v2108_v37, %v2104_v57 }
 0xfe9   :  { %v2115_v51 = vrot.slane %v6623_v33, 1  ;;  %v2120_v13 = vperm.slane %v6623_v33, 0 }
 0xfeb   :  { %v2121_v47 = vperm.slane %v2115_v51, 0  ;;  %v2132_v27 = vadd.f32 %v2120_v13, %v6010_v43 }
 0xfec   :  { %v5079_v49 = vpop.eup %5078 }
 0xfed   :  { %v2133_v45 = vadd.f32 %v2121_v47, %v6022_v48  ;;  %5082 = vtanh.f32 %v2132_v27  ;;  %v2141_v25 = vmul.f32 %v6435_v5, %v5079_v49 }
 0xfee   :  { %v5081_v29 = vpop.eup %5080 }
 0xfef   :  { %5084 = vtanh.f32 %v2133_v45  ;;  %v2147_v40 = vsel %vm245_vm0, %v2141_v25, 0.0  ;;  %v2142_v4 = vmul.f32 %v6442_v62, %v5081_v29 }
 0xff0   :  { %2148 = vadd.xlane.f32.xlu0 %v2147_v40 }
 0xff1   :  { %v2150_v22 = vsel %vm245_vm0, %v2142_v4, 0.0 }
 0xff2   :  { %2151 = vadd.xlane.f32.xlu1 %v2150_v22 }
 0xff3   :  { %v5083_v36 = vpop.eup %5082 }
 0xff4   :  { %v2144_v58 = vmul.f32 %v6435_v5, %v5083_v36 }
 0xff5   :  { %v5085_v55 = vpop.eup %5084 }
 0xff6   :  { %v2145_v12 = vmul.f32 %v6442_v62, %v5085_v55  ;;  %v2156_v37 = vsel %vm245_vm0, %v2144_v58, 0.0 }
 0xff8   :  { %v2159_v35 = vsel %vm245_vm0, %v2145_v12, 0.0 }
 0xff9   :  { %2160 = vadd.xlane.f32.xlu2 %v2159_v35 }
 0xffa   :  { %2157 = vadd.xlane.f32.xlu1 %v2156_v37 }
0x1063   :  { %v2149_v57 = vpop.xlane.xlu0 %2148 }
0x1064   :  { %v2165_v51 = vadd.f32 %v6453_v32, %v2149_v57 }
0x1065   :  { %v2152_v13 = vpop.xlane.xlu1 %2151 }
0x1066   :  { %v2171_v47 = vsel %vm493_vm3, %v2165_v51, -inf  ;;  %v2166_v27 = vadd.f32 %v6460_v16, %v2152_v13 }
0x1067   :  { %v2172_v49 = vrot.slane %v2171_v47, 4 }
0x1068   :  { %v2178_v45 = vsel %vm493_vm3, %v2166_v27, -inf }
0x1069   :  { %v2173_v5 = vmax.f32 %v2171_v47, %v2172_v49  ;;  %v2179_v25 = vrot.slane %v2178_v45, 4 }
0x106b   :  { %v2174_v62 = vrot.slane %v2173_v5, 2  ;;  %v2180_v29 = vmax.f32 %v2178_v45, %v2179_v25 }
0x106c   :  { %v2161_v40 = vpop.xlane.xlu2 %2160 }
0x106d   :  { %v2175_v4 = vmax.f32 %v2173_v5, %v2174_v62  ;;  %v2181_v22 = vrot.slane %v2180_v29, 2  ;;  %v2169_v36 = vadd.f32 %v6467_v18, %v2161_v40  ;;  %v2158_v55 = vpop.xlane.xlu1 %2157 }
0x106e   :  { %v2168_v32 = vadd.f32 %v6473_v54, %v2158_v55 }
0x106f   :  { %v2176_v58 = vrot.slane %v2175_v4, 1  ;;  %v2182_v12 = vmax.f32 %v2180_v29, %v2181_v22  ;;  %v2199_v35 = vsel %vm493_vm3, %v2169_v36, -inf }
0x1070   :  { %v2200_v16 = vrot.slane %v2199_v35, 4  ;;  %v2192_v37 = vsel %vm493_vm3, %v2168_v32, -inf }
0x1071   :  { %v2177_v57 = vmax.f32 %v2175_v4, %v2176_v58  ;;  %v2183_v13 = vrot.slane %v2182_v12, 1  ;;  %v2193_v47 = vrot.slane %v2192_v37, 4 }
0x1072   :  { %v2201_v49 = vmax.f32 %v2199_v35, %v2200_v16 }
0x1073   :  { %v2213_v45 = vsub.f32 %v2165_v51, %v2177_v57  ;;  %v2184_v25 = vmax.f32 %v2182_v12, %v2183_v13  ;;  %v2194_v5 = vmax.f32 %v2192_v37, %v2193_v47 }
0x1074   :  { %v2202_v62 = vrot.slane %v2201_v49, 2 }
0x1075   :  { %v2219_v28 = vmul.f32 1.442695, %v2213_v45  ;;  %v2214_v18 = vsub.f32 %v2166_v27, %v2184_v25  ;;  %v2195_v40 = vrot.slane %v2194_v5, 2 }
0x1076   :  { %v2203_v14 = vmax.f32 %v2201_v49, %v2202_v62 }
0x1077   :  { %5086 = vpow2.f32 %v2219_v28  ;;  %v2221_v54 = vmul.f32 1.442695, %v2214_v18  ;;  %v2196_v29 = vmax.f32 %v2194_v5, %v2195_v40 }
0x1078   :  { %v2204_v22 = vrot.slane %v2203_v14, 1 }
0x1079   :  { %5088 = vpow2.f32 %v2221_v54  ;;  %v2197_v55 = vrot.slane %v2196_v29, 1 }
0x107a   :  { %v2205_v1 = vmax.f32 %v2203_v14, %v2204_v22 }
0x107b   :  { %v2198_v19 = vmax.f32 %v2196_v29, %v2197_v55 }
0x107c   :  { %v2217_v4 = vsub.f32 %v2169_v36, %v2205_v1 }
0x107d   :  { %v6645_v58 = vpop.eup %5086  ;;  %v2216_v35 = vsub.f32 %v2168_v32, %v2198_v19 }
0x107e   :  { %v2231_v51 = vsel %vm493_vm3, %v6645_v58, 0.0  ;;  %v2227_v12 = vmul.f32 1.442695, %v2217_v4 }
0x107f   :  { %v6649_v16 = vpop.eup %5088  ;;  %v2232_v27 = vrot.slane %v2231_v51, 4  ;;  %v2225_v37 = vmul.f32 1.442695, %v2216_v35 }
0x1080   :  { %v2238_v28 = vsel %vm493_vm3, %v6649_v16, 0.0  ;;  %5090 = vpow2.f32 %v2227_v12 }
0x1081   :  { %v2233_v57 = vadd.f32 %v2232_v27, %v2231_v51  ;;  %v2239_v13 = vrot.slane %v2238_v28, 4  ;;  %5092 = vpow2.f32 %v2225_v37 }
0x1083   :  { %v2234_v14 = vrot.slane %v2233_v57, 2  ;;  %v2240_v1 = vadd.f32 %v2239_v13, %v2238_v28 }
0x1085   :  { %v2235_v36 = vadd.f32 %v2234_v14, %v2233_v57  ;;  %v2241_v47 = vrot.slane %v2240_v1, 2 }
0x1086   :  { %v6653_v19 = vpop.eup %5090 }
0x1087   :  { %v6655_v32 = vpop.eup %5092  ;;  %v2236_v49 = vrot.slane %v2235_v36, 1  ;;  %v2242_v45 = vadd.f32 %v2241_v47, %v2240_v1  ;;  %v2259_v25 = vsel %vm493_vm3, %v6653_v19, 0.0 }
0x1088   :  { %v2260_v5 = vrot.slane %v2259_v25, 4  ;;  %v2252_v62 = vsel %vm493_vm3, %v6655_v32, 0.0 }
0x1089   :  { %v2237_v18 = vadd.f32 %v2236_v49, %v2235_v36  ;;  %v2243_v40 = vrot.slane %v2242_v45, 1  ;;  %v2253_v54 = vrot.slane %v2252_v62, 4 }
0x108a   :  { %v2261_v29 = vadd.f32 %v2260_v5, %v2259_v25 }
0x108b   :  { %5094 = vrcp.f32 %v2237_v18  ;;  %v2244_v22 = vadd.f32 %v2243_v40, %v2242_v45  ;;  %v2254_v55 = vadd.f32 %v2253_v54, %v2252_v62  ;;  %v2284_v49 = vand.u32 2147483648, %v2237_v18 }
0x108c   :  { %v2262_v4 = vrot.slane %v2261_v29, 2  ;;  %v2282_v45 = vand.u32 2147483647, %v2237_v18  ;;  %vm2278_vm4 = vweird.f32 %v2237_v18 }
0x108d   :  { %5096 = vrcp.f32 %v2244_v22  ;;  %v2255_v35 = vrot.slane %v2254_v55, 2  ;;  %v2299_v62 = vand.u32 2147483648, %v2244_v22  ;;  %vm2293_vm8 = vweird.f32 %v2244_v22 }
0x108e   :  { %v2263_v51 = vadd.f32 %v2262_v4, %v2261_v29  ;;  %v2297_v29 = vand.u32 2147483647, %v2244_v22  ;;  %vm2283_vm7 = vcmp.eq.f32.partialorder %v2282_v45, 8.507059e+37 }
0x108f   :  { %v2256_v12 = vadd.f32 %v2255_v35, %v2254_v55  ;;  %v2285_v55 = vor.u32 1.1754944e-38, %v2284_v49 }
0x1090   :  { %v2264_v27 = vrot.slane %v2263_v51, 1  ;;  %vm2298_vm12 = vcmp.eq.f32.partialorder %v2297_v29, 8.507059e+37 }
0x1091   :  { %v5095_v37 = vpop.eup %5094  ;;  %v2257_v28 = vrot.slane %v2256_v12, 1 }
0x1092   :  { %v2265_v57 = vadd.f32 %v2264_v27, %v2263_v51  ;;  %v2274_v13 = vmul.f32 %v5095_v37, %v2237_v18  ;;  %vm2279_vm15 = vweird.f32 %v5095_v37 }
0x1093   :  { %v5097_v14 = vpop.eup %5096  ;;  %v2258_v1 = vadd.f32 %v2257_v28, %v2256_v12  ;;  %vm2280_vm6 = vmor %vm2278_vm4, %vm2279_vm15  ;;  %v2300_v28 = vor.u32 1.1754944e-38, %v2299_v62 }
0x1094   :  { %5098 = vrcp.f32 %v2265_v57  ;;  %v2275_v36 = vsub.f32 1.0, %v2274_v13  ;;  %v2289_v47 = vmul.f32 %v5097_v14, %v2244_v22  ;;  %vm2294_vm5 = vweird.f32 %v5097_v14 }
0x1095   :  { %5100 = vrcp.f32 %v2258_v1  ;;  %vm2295_vm11 = vmor %vm2293_vm8, %vm2294_vm5  ;;  %v2344_v20 = vand.u32 2147483648, %v2265_v57  ;;  %v2342_v22 = vand.u32 2147483647, %v2265_v57  ;;  %v2327_v62 = vand.u32 2147483647, %v2258_v1 }
0x1096   :  { %v2276_v25 = vmul.f32 %v5095_v37, %v2275_v36  ;;  %v2290_v5 = vsub.f32 1.0, %v2289_v47  ;;  %vm2338_vm15 = vweird.f32 %v2265_v57  ;;  %vm2323_vm5 = vweird.f32 %v2258_v1 }
0x1097   :  { %vm2328_vm8 = vcmp.eq.f32.partialorder %v2327_v62, 8.507059e+37 }
0x1098   :  { %v2277_v40 = vadd.f32 %v5095_v37, %v2276_v25  ;;  %v2291_v54 = vmul.f32 %v5097_v14, %v2290_v5 }
0x109a   :  { %v5099_v4 = vpop.eup %5098  ;;  %v2281_v35 = vsel %vm2280_vm6, %v5095_v37, %v2277_v40  ;;  %v2292_v51 = vadd.f32 %v5097_v14, %v2291_v54  ;;  %v2329_v40 = vand.u32 2147483648, %v2258_v1  ;;  %vm2343_vm6 = vcmp.eq.f32.partialorder %v2342_v22, 8.507059e+37 }
0x109b   :  { %v5101_v12 = vpop.eup %5100  ;;  %v2286_v27 = vsel %vm2283_vm7, %v2285_v55, %v2281_v35  ;;  %v2334_v13 = vmul.f32 %v5099_v4, %v2265_v57  ;;  %vm2339_vm13 = vweird.f32 %v5099_v4  ;;  %v6665_v57 = vld [vmem:[#allocation5] sm:$0xff] }
0x109c   :  { %v2287_v36 = vmul.f32 %v6645_v58, %v2286_v27  ;;  %v2296_v18 = vsel %vm2295_vm11, %v5097_v14, %v2292_v51  ;;  %v2319_v47 = vmul.f32 %v5101_v12, %v2258_v1  ;;  %vm2324_vm14 = vweird.f32 %v5101_v12  ;;  %vm2340_vm4 = vmor %vm2338_vm15, %vm2339_vm13 }
0x109d   :  { %v2301_v25 = vsel %vm2298_vm12, %v2300_v28, %v2296_v18  ;;  %v2335_v5 = vsub.f32 1.0, %v2334_v13  ;;  %v2345_v58 = vor.u32 1.1754944e-38, %v2344_v20  ;;  %vm2325_vm7 = vmor %vm2323_vm5, %vm2324_vm14 }
0x109e   :  { %2365 = vperm.xlu1 %4965, %v2287_v36   ;;  %v2302_v49 = vmul.f32 %v6649_v16, %v2301_v25  ;;  %v2320_v37 = vsub.f32 1.0, %v2319_v47  ;;  %v2330_v16 = vor.u32 1.1754944e-38, %v2329_v40  ;;  %v6669_v25 = vld [vmem:[#allocation5 + $0x8] sm:$0xff] }
0x109f   :  { %v2336_v45 = vmul.f32 %v5099_v4, %v2335_v5 }
0x10a0   :  { %2391 = vperm.xlu2 %4964, %v2302_v49   ;;  %v2321_v54 = vmul.f32 %v5101_v12, %v2320_v37 }
0x10a1   :  { %v2337_v55 = vadd.f32 %v5099_v4, %v2336_v45 }
0x10a2   :  { %v2322_v14 = vadd.f32 %v5101_v12, %v2321_v54 }
0x10a3   :  { %v2341_v29 = vsel %vm2340_vm4, %v5099_v4, %v2337_v55 }
0x10a4   :  { %v2346_v35 = vsel %vm2343_vm6, %v2345_v58, %v2341_v29  ;;  %v2326_v51 = vsel %vm2325_vm7, %v5101_v12, %v2322_v14 }
0x10a5   :  { %v2347_v27 = vmul.f32 %v6653_v19, %v2346_v35  ;;  %v2331_v28 = vsel %vm2328_vm8, %v2330_v16, %v2326_v51  ;;  %v6675_v16 = vld [vmem:[#allocation2] sm:$0xff]  ;;  %v6678_v51 = vld [vmem:[#allocation2 + $0x8] sm:$0xff] }
0x10a6   :  { %v2332_v13 = vmul.f32 %v6655_v32, %v2331_v28 }
0x10a7   :  { %2396 = vperm.xlu0 %4966, %v2347_v27  }
0x10a8   :  { %2370 = vperm.xlu2 %4964, %v2332_v13  }
0x10fa   :  { %v2392_v36 = vpop.permute.xlu2 %2391 }
0x10fb   :  { %v2399_v20 = vmul.f32 %v6665_v57, %v2392_v36 }
0x10fd   :  { %v2401_v1 = vsel %vm245_vm0, %v2399_v20, 0.0 }
0x10fe   :  { %v2402_v4 = vrot.slane %v2401_v1, 4 }
0x1100   :  { %v2403_v18 = vadd.f32 %v2402_v4, %v2401_v1 }
0x1102   :  { %v2404_v19 = vrot.slane %v2403_v18, 2  ;;  %v2371_v29 = vpop.permute.xlu2 %2370 }
0x1103   :  { %v2374_v27 = vmul.f32 %v6678_v51, %v2371_v29  ;;  %v2087_v29 = vpop.f32.mrf.mxu2 }
0x1104   :  { %v2405_v49 = vadd.f32 %v2404_v19, %v2403_v18 }
0x1105   :  { %v2382_v13 = vsel %vm245_vm0, %v2374_v27, 0.0 }
0x1106   :  { %v2406_v22 = vrot.slane %v2405_v49, 1  ;;  %v2383_v20 = vrot.slane %v2382_v13, 4 }
0x1108   :  { %v2407_v62 = vadd.f32 %v2406_v22, %v2405_v49  ;;  %v2384_v4 = vadd.f32 %v2383_v20, %v2382_v13 }
0x1110   :  { %v2366_v14 = vpop.permute.xlu1 %2365 }
0x1111   :  { %v2373_v35 = vmul.f32 %v6675_v16, %v2366_v14  ;;  %v6698_v14 = vpop.f32.mrf.mxu1 }
0x1112   :  { %8120 = vst [vmem:[#allocation32_spill] sm:$0xff] %v6698_v14 }
0x1113   :  { %v2375_v28 = vsel %vm245_vm0, %v2373_v35, 0.0 }
0x1114   :  { %v2376_v36 = vrot.slane %v2375_v28, 4 }
0x1116   :  { %v2377_v1 = vadd.f32 %v2376_v36, %v2375_v28 }
0x1118   :  { %v2378_v18 = vrot.slane %v2377_v1, 2 }
0x1119   :  { %v2397_v47 = vpop.permute.xlu0 %2396 }
0x111a   :  { %v2400_v12 = vmul.f32 %v6669_v25, %v2397_v47  ;;  %v2385_v47 = vrot.slane %v2384_v4, 2 }
0x111c   :  { %v2408_v5 = vsel %vm245_vm0, %v2400_v12, 0.0  ;;  %v2379_v12 = vadd.f32 %v2378_v18, %v2377_v1  ;;  %v2386_v19 = vadd.f32 %v2385_v47, %v2384_v4 }
0x111d   :  { %v2409_v32 = vrot.slane %v2408_v5, 4 }
0x111f   :  { %v2410_v37 = vadd.f32 %v2409_v32, %v2408_v5  ;;  %v2380_v5 = vrot.slane %v2379_v12, 1  ;;  %v2387_v32 = vrot.slane %v2386_v19, 1 }
0x1121   :  { %v2411_v45 = vrot.slane %v2410_v37, 2  ;;  %v2381_v49 = vadd.f32 %v2380_v5, %v2379_v12 }
0x1123   :  { %v2412_v40 = vadd.f32 %v2411_v45, %v2410_v37  ;;  %v2388_v37 = vadd.f32 %v2387_v32, %v2386_v19 }
0x1125   :  { %v2413_v54 = vrot.slane %v2412_v40, 1  ;;  %v2460_v22 = vsel %vm783_vm9, %v2388_v37, %v2381_v49 }
0x1127   :  { %v2414_v55 = vadd.f32 %v2413_v54, %v2412_v40  ;;  %v6686_v54 = vld [vmem:[#allocation7 + $0x18] sm:$0xff] }
0x1129   :  { %v2464_v58 = vsel %vm783_vm9, %v2414_v55, %v2407_v62  ;;  %v6689_v62 = vld [vmem:[#allocation7 + $0x10] sm:$0xff]  ;;  %v6692_v55 = vld [vmem:[#allocation7 + $0x8] sm:$0xff] }
0x112a   :  { %2465 = vrot.lane.b32.xlu0 %v2464_v58, %s5769_s7  ;;  %v6695_v58 = vld [vmem:[#allocation7] sm:$0xff] }
0x119c   :  { %v2466_v45 = vpop.permute.xlu0 %2465 }
0x119d   :  { %v2468_v40 = vsel %vm245_vm0, %v2460_v22, %v2466_v45 }
0x119e   :  { %4919 = vmatmul.msk.f32.vlgmr.msrb.gmra.mxu1 %vm793_vm10, %v2468_v40 }
0x119f   :  { %3730 = vmatpush.msrb.mxu1 %v6686_v54 }
0x11a1   :  { %3731 = vmatpush.msrb.mxu1 %v6689_v62 }
0x11a3   :  { %3732 = vmatpush.msrb.mxu1 %v6692_v55 }
0x11a5   :  { %3733 = vmatpush.msrb.mxu1 %v6695_v58 }
0x121b   :  { %v2489_v35 = vpop.f32.mrf.mxu1 }
0x121c   :  { %v2490_v27 = vadd.f32 %v2489_v35, %v2087_v29 }
0x121e   :  { %v2496_v28 = vadd.f32 %v6217_v63, %v2490_v27 }
0x1220   :  { %5102 = vtanh.f32 %v2496_v28  ;;  %v4920_v36 = vmul.f32 -1.442695, %v2496_v28 }
0x1222   :  { %5104 = vpow2.f32 %v4920_v36 }
0x1226   :  { %v5103_v13 = vpop.eup %5102 }
0x1227   :  { %2519 = vrot.lane.b32.xlu2 %v5103_v13, %s5766_s9 }
0x1228   :  { %v5105_v20 = vpop.eup %5104 }
0x1229   :  { %v2500_v1 = vadd.f32 1.0, %v5105_v20 }
0x122b   :  { %5106 = vrcp.f32 %v2500_v1  ;;  %v2512_v5 = vand.u32 2147483648, %v2500_v1  ;;  %vm2506_vm12 = vweird.f32 %v2500_v1  ;;  %v2510_v32 = vand.u32 2147483647, %v2500_v1 }
0x122d   :  { %v2513_v49 = vor.u32 1.1754944e-38, %v2512_v5  ;;  %vm2511_vm14 = vcmp.eq.f32.partialorder %v2510_v32, 8.507059e+37  ;;  %v6762_v32 = vld [vmem:[%s8081_s14] ss:$0 sm:$0xff] }
0x1231   :  { %v5107_v4 = vpop.eup %5106 }
0x1232   :  { %v2502_v18 = vmul.f32 %v5107_v4, %v2500_v1  ;;  %vm2507_vm11 = vweird.f32 %v5107_v4 }
0x1233   :  { %vm2508_vm13 = vmor %vm2506_vm12, %vm2507_vm11 }
0x1234   :  { %v2503_v47 = vsub.f32 1.0, %v2502_v18 }
0x1236   :  { %v2504_v12 = vmul.f32 %v5107_v4, %v2503_v47 }
0x1238   :  { %v2505_v19 = vadd.f32 %v5107_v4, %v2504_v12 }
0x123a   :  { %v2509_v63 = vsel %vm2508_vm13, %v5107_v4, %v2505_v19 }
0x123b   :  { %v2514_v45 = vsel %vm2511_vm14, %v2513_v49, %v2509_v63 }
0x123c   :  { %v2517_v40 = vmul.f32 %v2514_v45, %v6523_v60 }
0x1281   :  { %v2520_v37 = vpop.permute.xlu2 %2519 }
0x1282   :  { %v2522_v22 = vmul.f32 %v2520_v37, %v2514_v45 }
0x1284   :  { %2524 = vrot.lane.b32.xlu0 %v2522_v22, %s5769_s7 }
0x12f6   :  { %v2525_v29 = vpop.permute.xlu0 %2524 }
0x12f7   :  { %v6704_v35 = vadd.f32 %v2525_v29, %v2517_v40 }
0x12f9   :  { %5108 = vtanh.f32 %v6704_v35 }
0x12ff   :  { %v5109_v27 = vpop.eup %5108 }
0x1300   :  { %2530 = vrot.lane.b32.xlu1 %v5109_v27, %s5766_s9 }
0x1372   :  { %v2531_v28 = vpop.permute.xlu1 %2530 }
0x1373   :  { %v2533_v13 = vmul.f32 %v2531_v28, %v2514_v45  ;;  %v6769_v45 = vld [vmem:[%s8081_s14 + $0x1] ss:$0 sm:$0xff] }
0x1375   :  { %2535 = vrot.lane.b32.xlu2 %v2533_v13, %s5769_s7 }
0x13cf   :  { %v2536_v36 = vpop.permute.xlu2 %2535 }
0x13d0   :  { %4921 = vmatmul.msk.f32.vlgmr.msrb.gmra.mxu3 %vm245_vm0, %v2536_v36  ;;  %4922 = vmatmul.msk.f32.vlgmr.msrb.gmra.mxu2 %vm245_vm0, %v2536_v36 }
0x13d1   :  { %4923 = vmatmul.msk.f32.vlgmr.msra.gmra.mxu0 %vm245_vm0, %v2536_v36  ;;  %3592 = vmatpush.msrb.mxu2 %v6534_v46  ;;  %v6731_v46 = vld [vmem:[%s8075_s8] ss:$0 sm:$0xff] }
0x13d2   :  { %3663 = vmatpush.msra.mxu0 %v6537_v61  ;;  %3750 = vmatpush.msrb.mxu3 %v6540_v8 }
0x13d3   :  { %3593 = vmatpush.msrb.mxu2 %v6546_v10 }
0x13d4   :  { %3664 = vmatpush.msra.mxu0 %v6549_v52  ;;  %3751 = vmatpush.msrb.mxu3 %v6552_v59 }
0x13d5   :  { %3594 = vmatpush.msrb.mxu2 %v6558_v2 }
0x13d6   :  { %3665 = vmatpush.msra.mxu0 %v6561_v0  ;;  %3752 = vmatpush.msrb.mxu3 %v6564_v15 }
0x13d7   :  { %3595 = vmatpush.msrb.mxu2 %v6570_v41 }
0x13d8   :  { %3666 = vmatpush.msra.mxu0 %v6573_v6  ;;  %3753 = vmatpush.msrb.mxu3 %v6576_v56 }
0x13d9   :  { %3596 = vmatpush.msrb.mxu2 %v6582_v38 }
0x13db   :  { %3597 = vmatpush.msrb.mxu2 %v6588_v50 }
0x13dd   :  { %3598 = vmatpush.msrb.mxu2 %v6594_v39 }
0x13df   :  { %3599 = vmatpush.msrb.mxu2 %v6600_v23 }
0x1453   :  { %v2623_v60 = vpop.f32.mrf.mxu2 }
0x1454   :  { %v6734_v61 = vadd.f32 %v6731_v46, %v2623_v60 }
0x1456   :  { %8121 = vst [vmem:[#allocation33_spill] sm:$0xff] %v6734_v61  ;;  %v2649_v8 = vperm.slane %v6734_v61, 0  ;;  %v2647_v10 = vrot.slane %v6734_v61, 1 }
0x1458   :  { %2657 = vrot.lane.b32.xlu2 %v2649_v8, %s5766_s9  ;;  %2651 = vrot.lane.b32.xlu0 %v2649_v8, %s5767_s28  ;;  %v2650_v52 = vperm.slane %v2647_v10, 0 }
0x145a   :  { %2653 = vrot.lane.b32.xlu1 %v2650_v52, %s5767_s28 }
0x1460   :  { %2659 = vrot.lane.b32.xlu0 %v2650_v52, %s5766_s9 }
0x14b2   :  { %v2658_v2 = vpop.permute.xlu2 %2657 }
0x14ca   :  { %v2652_v59 = vpop.permute.xlu0 %2651 }
0x14cb   :  { %v2663_v0 = vsel %vm418_vm1, %v6734_v61, %v2652_v59 }
0x14cc   :  { %v6745_v15 = vsel %vm421_vm2, %v2663_v0, %v2658_v2  ;;  %v2654_v50 = vpop.permute.xlu1 %2653  ;;  %v6787_v0 = vld [vmem:[%s8113_s12 + $0x8] sm:$0xff] }
0x14cd   :  { %v2669_v41 = vrot.slane %v6745_v15, 1  ;;  %v2673_v6 = vperm.slane %v6745_v15, 0  ;;  %v2664_v23 = vsel %vm418_vm1, %v2647_v10, %v2654_v50  ;;  %v6780_v10 = vld [vmem:[%s8113_s12] sm:$0xff] }
0x14cf   :  { %v2674_v56 = vperm.slane %v2669_v41, 0  ;;  %v2685_v38 = vadd.f32 %v2673_v6, %v5998_v30 }
0x14d1   :  { %v2686_v39 = vadd.f32 %v2674_v56, %v6005_v34  ;;  %5110 = vtanh.f32 %v2685_v38 }
0x14d2   :  { %v2660_v20 = vpop.permute.xlu0 %2659 }
0x14d3   :  { %5112 = vtanh.f32 %v2686_v39  ;;  %v6753_v1 = vsel %vm421_vm2, %v2664_v23, %v2660_v20 }
0x14d4   :  { %v2671_v4 = vrot.slane %v6753_v1, 1  ;;  %v2676_v18 = vperm.slane %v6753_v1, 0 }
0x14d6   :  { %v2677_v47 = vperm.slane %v2671_v4, 0  ;;  %v2688_v12 = vadd.f32 %v2676_v18, %v6010_v43 }
0x14d7   :  { %v5111_v19 = vpop.eup %5110 }
0x14d8   :  { %v2689_v5 = vadd.f32 %v2677_v47, %v6022_v48  ;;  %5114 = vtanh.f32 %v2688_v12  ;;  %v2697_v63 = vmul.f32 %v6762_v32, %v5111_v19  ;;  %v6794_v47 = vld [vmem:[%s8113_s12 + $0x20] sm:$0xff] }
0x14d9   :  { %v5113_v49 = vpop.eup %5112 }
0x14da   :  { %5116 = vtanh.f32 %v2689_v5  ;;  %v2703_v37 = vsel %vm245_vm0, %v2697_v63, 0.0  ;;  %v2698_v22 = vmul.f32 %v6769_v45, %v5113_v49  ;;  %v6800_v5 = vld [vmem:[%s8113_s12 + $0x18] sm:$0xff] }
0x14db   :  { %2704 = vadd.xlane.f32.xlu0 %v2703_v37 }
0x14dc   :  { %v2706_v40 = vsel %vm245_vm0, %v2698_v22, 0.0 }
0x14dd   :  { %2707 = vadd.xlane.f32.xlu1 %v2706_v40 }
0x14de   :  { %v5115_v29 = vpop.eup %5114 }
0x14df   :  { %v2700_v28 = vmul.f32 %v6762_v32, %v5115_v29 }
0x14e0   :  { %v5117_v27 = vpop.eup %5116 }
0x14e1   :  { %v2701_v13 = vmul.f32 %v6769_v45, %v5117_v27  ;;  %v2712_v60 = vsel %vm245_vm0, %v2700_v28, 0.0 }
0x14e3   :  { %v2715_v36 = vsel %vm245_vm0, %v2701_v13, 0.0 }
0x14e4   :  { %2716 = vadd.xlane.f32.xlu2 %v2715_v36 }
0x14e5   :  { %2713 = vadd.xlane.f32.xlu1 %v2712_v60 }
0x154e   :  { %v2705_v8 = vpop.xlane.xlu0 %2704 }
0x154f   :  { %v2721_v52 = vadd.f32 %v6780_v10, %v2705_v8 }
0x1550   :  { %v2708_v59 = vpop.xlane.xlu1 %2707 }
0x1551   :  { %v2727_v2 = vsel %vm493_vm3, %v2721_v52, -inf  ;;  %v2722_v41 = vadd.f32 %v6787_v0, %v2708_v59 }
0x1552   :  { %v2728_v6 = vrot.slane %v2727_v2, 4 }
0x1553   :  { %v2734_v56 = vsel %vm493_vm3, %v2722_v41, -inf }
0x1554   :  { %v2729_v38 = vmax.f32 %v2727_v2, %v2728_v6  ;;  %v2735_v50 = vrot.slane %v2734_v56, 4 }
0x1556   :  { %v2730_v39 = vrot.slane %v2729_v38, 2  ;;  %v2736_v23 = vmax.f32 %v2734_v56, %v2735_v50 }
0x1557   :  { %v2717_v20 = vpop.xlane.xlu2 %2716 }
0x1558   :  { %v2731_v4 = vmax.f32 %v2729_v38, %v2730_v39  ;;  %v2737_v18 = vrot.slane %v2736_v23, 2  ;;  %v2725_v12 = vadd.f32 %v6794_v47, %v2717_v20  ;;  %v2714_v19 = vpop.xlane.xlu1 %2713 }
0x1559   :  { %v2724_v63 = vadd.f32 %v6800_v5, %v2714_v19 }
0x155a   :  { %v2732_v49 = vrot.slane %v2731_v4, 1  ;;  %v2738_v37 = vmax.f32 %v2736_v23, %v2737_v18  ;;  %v2755_v22 = vsel %vm493_vm3, %v2725_v12, -inf }
0x155b   :  { %v2756_v40 = vrot.slane %v2755_v22, 4  ;;  %v2748_v29 = vsel %vm493_vm3, %v2724_v63, -inf }
0x155c   :  { %v2733_v27 = vmax.f32 %v2731_v4, %v2732_v49  ;;  %v2739_v28 = vrot.slane %v2738_v37, 1  ;;  %v2749_v13 = vrot.slane %v2748_v29, 4 }
0x155d   :  { %v2757_v36 = vmax.f32 %v2755_v22, %v2756_v40 }
0x155e   :  { %v2769_v60 = vsub.f32 %v2721_v52, %v2733_v27  ;;  %v2740_v8 = vmax.f32 %v2738_v37, %v2739_v28  ;;  %v2750_v59 = vmax.f32 %v2748_v29, %v2749_v13 }
0x155f   :  { %v2758_v2 = vrot.slane %v2757_v36, 2 }
0x1560   :  { %v2775_v6 = vmul.f32 1.442695, %v2769_v60  ;;  %v2770_v56 = vsub.f32 %v2722_v41, %v2740_v8  ;;  %v2751_v38 = vrot.slane %v2750_v59, 2 }
0x1561   :  { %v2759_v50 = vmax.f32 %v2757_v36, %v2758_v2 }
0x1562   :  { %5118 = vpow2.f32 %v2775_v6  ;;  %v2777_v39 = vmul.f32 1.442695, %v2770_v56  ;;  %v2752_v23 = vmax.f32 %v2750_v59, %v2751_v38 }
0x1563   :  { %v2760_v20 = vrot.slane %v2759_v50, 1 }
0x1564   :  { %5120 = vpow2.f32 %v2777_v39  ;;  %v2753_v18 = vrot.slane %v2752_v23, 1 }
0x1565   :  { %v2761_v19 = vmax.f32 %v2759_v50, %v2760_v20 }
0x1566   :  { %v2754_v61 = vmax.f32 %v2752_v23, %v2753_v18 }
0x1567   :  { %v2773_v4 = vsub.f32 %v2725_v12, %v2761_v19 }
0x1568   :  { %v6805_v49 = vpop.eup %5118  ;;  %v2772_v22 = vsub.f32 %v2724_v63, %v2754_v61 }
0x1569   :  { %v2787_v52 = vsel %vm493_vm3, %v6805_v49, 0.0  ;;  %v2783_v37 = vmul.f32 1.442695, %v2773_v4 }
0x156a   :  { %v6809_v40 = vpop.eup %5120  ;;  %v2788_v41 = vrot.slane %v2787_v52, 4  ;;  %v2781_v29 = vmul.f32 1.442695, %v2772_v22 }
0x156b   :  { %v2794_v27 = vsel %vm493_vm3, %v6809_v40, 0.0  ;;  %5122 = vpow2.f32 %v2783_v37 }
0x156c   :  { %v2789_v28 = vadd.f32 %v2788_v41, %v2787_v52  ;;  %v2795_v13 = vrot.slane %v2794_v27, 4  ;;  %5124 = vpow2.f32 %v2781_v29 }
0x156e   :  { %v2790_v36 = vrot.slane %v2789_v28, 2  ;;  %v2796_v12 = vadd.f32 %v2795_v13, %v2794_v27 }
0x1570   :  { %v2791_v60 = vadd.f32 %v2790_v36, %v2789_v28  ;;  %v2797_v8 = vrot.slane %v2796_v12, 2 }
0x1571   :  { %v6813_v61 = vpop.eup %5122 }
0x1572   :  { %v6815_v63 = vpop.eup %5124  ;;  %v2792_v59 = vrot.slane %v2791_v60, 1  ;;  %v2798_v2 = vadd.f32 %v2797_v8, %v2796_v12  ;;  %v2815_v6 = vsel %vm493_vm3, %v6813_v61, 0.0 }
0x1573   :  { %v2816_v56 = vrot.slane %v2815_v6, 4  ;;  %v2808_v38 = vsel %vm493_vm3, %v6815_v63, 0.0 }
0x1574   :  { %v2793_v50 = vadd.f32 %v2792_v59, %v2791_v60  ;;  %v2799_v39 = vrot.slane %v2798_v2, 1  ;;  %v2809_v23 = vrot.slane %v2808_v38, 4 }
0x1575   :  { %v2817_v20 = vadd.f32 %v2816_v56, %v2815_v6 }
0x1576   :  { %5126 = vrcp.f32 %v2793_v50  ;;  %v2800_v18 = vadd.f32 %v2799_v39, %v2798_v2  ;;  %v2810_v19 = vadd.f32 %v2809_v23, %v2808_v38  ;;  %v2840_v59 = vand.u32 2147483648, %v2793_v50 }
0x1577   :  { %v2818_v4 = vrot.slane %v2817_v20, 2  ;;  %v2838_v2 = vand.u32 2147483647, %v2793_v50  ;;  %vm2834_vm4 = vweird.f32 %v2793_v50 }
0x1578   :  { %5128 = vrcp.f32 %v2800_v18  ;;  %v2811_v22 = vrot.slane %v2810_v19, 2  ;;  %v2855_v38 = vand.u32 2147483648, %v2800_v18  ;;  %vm2849_vm8 = vweird.f32 %v2800_v18 }
0x1579   :  { %v2819_v52 = vadd.f32 %v2818_v4, %v2817_v20  ;;  %v2853_v20 = vand.u32 2147483647, %v2800_v18  ;;  %vm2839_vm7 = vcmp.eq.f32.partialorder %v2838_v2, 8.507059e+37 }
0x157a   :  { %v2812_v37 = vadd.f32 %v2811_v22, %v2810_v19  ;;  %v2841_v19 = vor.u32 1.1754944e-38, %v2840_v59 }
0x157b   :  { %v2820_v41 = vrot.slane %v2819_v52, 1  ;;  %vm2854_vm12 = vcmp.eq.f32.partialorder %v2853_v20, 8.507059e+37 }
0x157c   :  { %v5127_v29 = vpop.eup %5126  ;;  %v2813_v27 = vrot.slane %v2812_v37, 1 }
0x157d   :  { %v2821_v28 = vadd.f32 %v2820_v41, %v2819_v52  ;;  %v2830_v13 = vmul.f32 %v5127_v29, %v2793_v50  ;;  %vm2835_vm15 = vweird.f32 %v5127_v29 }
0x157e   :  { %v5129_v36 = vpop.eup %5128  ;;  %v2814_v12 = vadd.f32 %v2813_v27, %v2812_v37  ;;  %vm2836_vm6 = vmor %vm2834_vm4, %vm2835_vm15  ;;  %v2856_v27 = vor.u32 1.1754944e-38, %v2855_v38 }
0x157f   :  { %5130 = vrcp.f32 %v2821_v28  ;;  %v2831_v60 = vsub.f32 1.0, %v2830_v13  ;;  %v2845_v8 = vmul.f32 %v5129_v36, %v2800_v18  ;;  %vm2850_vm5 = vweird.f32 %v5129_v36 }
0x1580   :  { %5132 = vrcp.f32 %v2814_v12  ;;  %vm2851_vm11 = vmor %vm2849_vm8, %vm2850_vm5  ;;  %v2900_v14 = vand.u32 2147483648, %v2821_v28  ;;  %v2898_v18 = vand.u32 2147483647, %v2821_v28  ;;  %vm2894_vm14 = vweird.f32 %v2821_v28 }
0x1581   :  { %v2832_v6 = vmul.f32 %v5127_v29, %v2831_v60  ;;  %v2846_v56 = vsub.f32 1.0, %v2845_v8 }
0x1582   :  { %v2901_v38 = vor.u32 1.1754944e-38, %v2900_v14  ;;  %vm2899_vm4 = vcmp.eq.f32.partialorder %v2898_v18, 8.507059e+37 }
0x1583   :  { %v2833_v39 = vadd.f32 %v5127_v29, %v2832_v6  ;;  %v2847_v23 = vmul.f32 %v5129_v36, %v2846_v56 }
0x1585   :  { %v5131_v4 = vpop.eup %5130  ;;  %v2837_v22 = vsel %vm2836_vm6, %v5127_v29, %v2833_v39  ;;  %v2848_v52 = vadd.f32 %v5129_v36, %v2847_v23  ;;  %vm2879_vm6 = vweird.f32 %v2814_v12 }
0x1586   :  { %v5133_v37 = vpop.eup %5132  ;;  %v2842_v41 = vsel %vm2839_vm7, %v2841_v19, %v2837_v22  ;;  %v2890_v13 = vmul.f32 %v5131_v4, %v2821_v28  ;;  %vm2895_vm13 = vweird.f32 %v5131_v4  ;;  %v2885_v19 = vand.u32 2147483648, %v2814_v12 }
0x1587   :  { %v2843_v60 = vmul.f32 %v6805_v49, %v2842_v41  ;;  %v2852_v50 = vsel %vm2851_vm11, %v5129_v36, %v2848_v52  ;;  %v2875_v8 = vmul.f32 %v5133_v37, %v2814_v12  ;;  %vm2896_vm15 = vmor %vm2894_vm14, %vm2895_vm13  ;;  %vm2880_vm5 = vweird.f32 %v5133_v37 }
0x1588   :  { %v2857_v6 = vsel %vm2854_vm12, %v2856_v27, %v2852_v50  ;;  %v2891_v56 = vsub.f32 1.0, %v2890_v13  ;;  %vm2881_vm7 = vmor %vm2879_vm6, %vm2880_vm5  ;;  %v2886_v41 = vor.u32 1.1754944e-38, %v2885_v19 }
0x1589   :  { %2921 = vperm.xlu1 %4965, %v2843_v60   ;;  %v2858_v59 = vmul.f32 %v6809_v40, %v2857_v6  ;;  %v2876_v29 = vsub.f32 1.0, %v2875_v8  ;;  %v2883_v40 = vand.u32 2147483647, %v2814_v12 }
0x158a   :  { %v2892_v2 = vmul.f32 %v5131_v4, %v2891_v56 }
0x158b   :  { %2947 = vperm.xlu2 %4964, %v2858_v59   ;;  %v2877_v39 = vmul.f32 %v5133_v37, %v2876_v29  ;;  %vm2884_vm8 = vcmp.eq.f32.partialorder %v2883_v40, 8.507059e+37 }
0x158c   :  { %v2893_v23 = vadd.f32 %v5131_v4, %v2892_v2 }
0x158d   :  { %v2878_v36 = vadd.f32 %v5133_v37, %v2877_v39 }
0x158e   :  { %v2897_v49 = vsel %vm2896_vm15, %v5131_v4, %v2893_v23 }
0x158f   :  { %v2902_v20 = vsel %vm2899_vm4, %v2901_v38, %v2897_v49  ;;  %v2882_v52 = vsel %vm2881_vm7, %v5133_v37, %v2878_v36 }
0x1590   :  { %v2903_v22 = vmul.f32 %v6813_v61, %v2902_v20  ;;  %v2887_v27 = vsel %vm2884_vm8, %v2886_v41, %v2882_v52 }
0x1591   :  { %v2888_v28 = vmul.f32 %v6815_v63, %v2887_v27 }
0x1592   :  { %2952 = vperm.xlu0 %4966, %v2903_v22  }
0x159a   :  { %2926 = vperm.xlu0 %4966, %v2888_v28  }
0x15e5   :  { %v2948_v14 = vpop.permute.xlu2 %2947 }
0x15e6   :  { %v2955_v4 = vmul.f32 %v6665_v57, %v2948_v14 }
0x15e8   :  { %v2957_v13 = vsel %vm245_vm0, %v2955_v4, 0.0 }
0x15e9   :  { %v2958_v60 = vrot.slane %v2957_v13, 4 }
0x15eb   :  { %v2959_v50 = vadd.f32 %v2958_v60, %v2957_v13 }
0x15ed   :  { %v2960_v12 = vrot.slane %v2959_v50, 2 }
0x15ef   :  { %v2961_v56 = vadd.f32 %v2960_v12, %v2959_v50  ;;  %v6842_v12 = vpop.f32.mrf.mxu3 }
0x15f1   :  { %v2962_v2 = vrot.slane %v2961_v56, 1 }
0x15f3   :  { %v2963_v39 = vadd.f32 %v2962_v2, %v2961_v56 }
0x15fb   :  { %v2922_v49 = vpop.permute.xlu1 %2921 }
0x15fc   :  { %v2929_v36 = vmul.f32 %v6675_v16, %v2922_v49 }
0x15fe   :  { %v2931_v19 = vsel %vm245_vm0, %v2929_v36, 0.0 }
0x15ff   :  { %v2932_v40 = vrot.slane %v2931_v19, 4 }
0x1601   :  { %v2933_v41 = vadd.f32 %v2932_v40, %v2931_v19 }
0x1603   :  { %v2934_v28 = vrot.slane %v2933_v41, 2 }
0x1604   :  { %v2953_v8 = vpop.permute.xlu0 %2952 }
0x1605   :  { %v2956_v61 = vmul.f32 %v6669_v25, %v2953_v8  ;;  %v2935_v4 = vadd.f32 %v2934_v28, %v2933_v41  ;;  %v6862_v28 = vld [vmem:[#allocation14 + $0x18] sm:$0xff] }
0x1607   :  { %v2964_v6 = vsel %vm245_vm0, %v2956_v61, 0.0  ;;  %v2936_v60 = vrot.slane %v2935_v4, 1 }
0x1608   :  { %v2965_v37 = vrot.slane %v2964_v6, 4 }
0x1609   :  { %v2937_v8 = vadd.f32 %v2936_v60, %v2935_v4  ;;  %v6868_v4 = vld [vmem:[%s8083_s16 + $0x30] sm:$0xff] }
0x160a   :  { %v2966_v59 = vadd.f32 %v2965_v37, %v2964_v6  ;;  %v2643_v6 = vpop.f32.mrf.mxu0  ;;  %v5449_v60 = vld [vmem:[#allocation8 + $0x10] sm:$0xff] }
0x160c   :  { %v2967_v29 = vrot.slane %v2966_v59, 2  ;;  %v2927_v38 = vpop.permute.xlu0 %2926 }
0x160d   :  { %v2930_v25 = vmul.f32 %v6678_v51, %v2927_v38 }
0x160e   :  { %v2968_v63 = vadd.f32 %v2967_v29, %v2966_v59 }
0x160f   :  { %v2938_v20 = vsel %vm245_vm0, %v2930_v25, 0.0 }
0x1610   :  { %v2969_v18 = vrot.slane %v2968_v63, 1  ;;  %v2939_v22 = vrot.slane %v2938_v20, 4 }
0x1612   :  { %v2970_v23 = vadd.f32 %v2969_v18, %v2968_v63  ;;  %v2940_v52 = vadd.f32 %v2939_v22, %v2938_v20 }
0x1614   :  { %v3020_v57 = vsel %vm783_vm9, %v2970_v23, %v2963_v39  ;;  %v2941_v27 = vrot.slane %v2940_v52, 2 }
0x1615   :  { %3021 = vrot.lane.b32.xlu2 %v3020_v57, %s5769_s7 }
0x1616   :  { %v2942_v14 = vadd.f32 %v2941_v27, %v2940_v52 }
0x1618   :  { %v2943_v13 = vrot.slane %v2942_v14, 1 }
0x161a   :  { %v2944_v50 = vadd.f32 %v2943_v13, %v2942_v14  ;;  %v5446_v14 = vld [vmem:[#allocation8 + $0x18] sm:$0xff]  ;;  %v6871_v13 = vld [vmem:[#allocation14 + $0x10] sm:$0xff] }
0x161c   :  { %v3016_v51 = vsel %vm783_vm9, %v2944_v50, %v2937_v8  ;;  %v6877_v50 = vld [vmem:[%s8083_s16 + $0x28] sm:$0xff]  ;;  %v6880_v8 = vld [vmem:[#allocation14 + $0x8] sm:$0xff] }
0x166f   :  { %v3022_v61 = vpop.permute.xlu2 %3021 }
0x1670   :  { %v3024_v16 = vsel %vm245_vm0, %v3016_v51, %v3022_v61  ;;  %v5452_v61 = vld [vmem:[#allocation8 + $0x8] sm:$0xff]  ;;  %v6886_v51 = vld [vmem:[%s8083_s16 + $0x20] sm:$0xff] }
0x1671   :  { %4925 = vmatmul.msk.f32.vlgmr.msra.gmra.mxu3 %vm793_vm10, %v3024_v16  ;;  %v6889_v16 = vld [vmem:[#allocation14] sm:$0xff] }
0x1672   :  { %4286 = vmatpush.msra.mxu3 %v6686_v54 }
0x1674   :  { %4287 = vmatpush.msra.mxu3 %v6689_v62 }
0x1676   :  { %4288 = vmatpush.msra.mxu3 %v6692_v55 }
0x1678   :  { %4289 = vmatpush.msra.mxu3 %v6695_v58 }
0x16f4   :  { %v3045_v37 = vpop.f32.mrf.mxu3 }
0x16f5   :  { %v3046_v56 = vadd.f32 %v3045_v37, %v2643_v6  ;;  %v5455_v6 = vld [vmem:[#allocation8] sm:$0xff]  ;;  %v6895_v37 = vld [vmem:[%s8083_s16 + $0x18] sm:$0xff] }
0x16f7   :  { %v3052_v59 = vadd.f32 %v6220_v11, %v3046_v56  ;;  %v6901_v56 = vld [vmem:[%s8083_s16 + $0x10] sm:$0xff] }
0x16f9   :  { %5134 = vtanh.f32 %v3052_v59  ;;  %v4926_v2 = vmul.f32 -1.442695, %v3052_v59  ;;  %v6907_v59 = vld [vmem:[%s8083_s16 + $0x8] sm:$0xff] }
0x16fb   :  { %5136 = vpow2.f32 %v4926_v2 }
0x16ff   :  { %v5135_v29 = vpop.eup %5134 }
0x1700   :  { %3075 = vrot.lane.b32.xlu1 %v5135_v29, %s5766_s9  ;;  %v6913_v29 = vld [vmem:[%s8083_s16] sm:$0xff] }
0x1701   :  { %v5137_v54 = vpop.eup %5136 }
0x1702   :  { %v3056_v63 = vadd.f32 1.0, %v5137_v54 }
0x1704   :  { %5138 = vrcp.f32 %v3056_v63  ;;  %v3068_v23 = vand.u32 2147483648, %v3056_v63  ;;  %vm3062_vm12 = vweird.f32 %v3056_v63  ;;  %v3066_v57 = vand.u32 2147483647, %v3056_v63 }
0x1706   :  { %v3069_v38 = vor.u32 1.1754944e-38, %v3068_v23  ;;  %vm3067_vm14 = vcmp.eq.f32.partialorder %v3066_v57, 8.507059e+37 }
0x170a   :  { %v5139_v62 = vpop.eup %5138 }
0x170b   :  { %v3058_v55 = vmul.f32 %v5139_v62, %v3056_v63  ;;  %vm3063_vm11 = vweird.f32 %v5139_v62 }
0x170c   :  { %vm3064_vm13 = vmor %vm3062_vm12, %vm3063_vm11 }
0x170d   :  { %v3059_v18 = vsub.f32 1.0, %v3058_v55 }
0x170f   :  { %v3060_v58 = vmul.f32 %v5139_v62, %v3059_v18 }
0x1711   :  { %v3061_v39 = vadd.f32 %v5139_v62, %v3060_v58 }
0x1713   :  { %v3065_v11 = vsel %vm3064_vm13, %v5139_v62, %v3061_v39 }
0x1714   :  { %v3070_v25 = vsel %vm3067_vm14, %v3069_v38, %v3065_v11 }
0x1715   :  { %v3073_v20 = vmul.f32 %v3070_v25, %v6704_v35  ;;  %v6859_v35 = vld [vmem:[%s8083_s16 + $0x38] sm:$0xff] }
0x1772   :  { %v3076_v49 = vpop.permute.xlu1 %3075 }
0x1773   :  { %v3078_v36 = vmul.f32 %v3076_v49, %v3070_v25 }
0x1775   :  { %3080 = vrot.lane.b32.xlu0 %v3078_v36, %s5769_s7 }
0x17e7   :  { %v3081_v19 = vpop.permute.xlu0 %3080 }
0x17e8   :  { %v6848_v22 = vadd.f32 %v3081_v19, %v3073_v20 }
0x17ea   :  { %5140 = vtanh.f32 %v6848_v22 }
0x17f0   :  { %v5141_v40 = vpop.eup %5140 }
0x17f1   :  { %3086 = vrot.lane.b32.xlu2 %v5141_v40, %s5766_s9 }
0x184b   :  { %v3087_v52 = vpop.permute.xlu2 %3086 }
0x184c   :  { %v3089_v41 = vmul.f32 %v3087_v52, %v3070_v25 }
0x184e   :  { %3091 = vrot.lane.b32.xlu1 %v3089_v41, %s5769_s7 }
0x18c0   :  { %v3092_v27 = vpop.permute.xlu1 %3091 }
0x18c1   :  { %4927 = vmatmul.msk.f32.vlgmr.msra.gmra.mxu2 %vm245_vm0, %v3092_v27  ;;  %4928 = vmatmul.msk.f32.vlgmr.msrb.gmra.mxu0 %vm245_vm0, %v3092_v27 }
0x18c2   :  { %4929 = vmatmul.msk.f32.vlgmr.msra.gmra.mxu1 %vm245_vm0, %v3092_v27  ;;  %4148 = vmatpush.msrb.mxu0 %v6859_v35 }
0x18c3   :  { %4219 = vmatpush.msra.mxu1 %v6862_v28  ;;  %4306 = vmatpush.msra.mxu2 %v5446_v14 }
0x18c4   :  { %4149 = vmatpush.msrb.mxu0 %v6868_v4 }
0x18c5   :  { %4220 = vmatpush.msra.mxu1 %v6871_v13  ;;  %4307 = vmatpush.msra.mxu2 %v5449_v60 }
0x18c6   :  { %4150 = vmatpush.msrb.mxu0 %v6877_v50 }
0x18c7   :  { %4221 = vmatpush.msra.mxu1 %v6880_v8  ;;  %4308 = vmatpush.msra.mxu2 %v5452_v61 }
0x18c8   :  { %4151 = vmatpush.msrb.mxu0 %v6886_v51 }
0x18c9   :  { %4222 = vmatpush.msra.mxu1 %v6889_v16  ;;  %4309 = vmatpush.msra.mxu2 %v5455_v6 }
0x18ca   :  { %4152 = vmatpush.msrb.mxu0 %v6895_v37 }
0x18cc   :  { %4153 = vmatpush.msrb.mxu0 %v6901_v56 }
0x18ce   :  { %4154 = vmatpush.msrb.mxu0 %v6907_v59 }
0x18d0   :  { %4155 = vmatpush.msrb.mxu0 %v6913_v29 }
0x193e   :  { %v3179_v2 = vpop.f32.mrf.mxu0 }
0x193f   :  { %v6917_v54 = vadd.f32 %v6731_v46, %v3179_v2 }
0x1941   :  { %8122 = vst [vmem:[#allocation34_spill] sm:$0xff] %v6917_v54  ;;  %v3205_v63 = vperm.slane %v6917_v54, 0  ;;  %v3203_v62 = vrot.slane %v6917_v54, 1 }
0x1943   :  { %3213 = vrot.lane.b32.xlu1 %v3205_v63, %s5766_s9  ;;  %3207 = vrot.lane.b32.xlu0 %v3205_v63, %s5767_s28  ;;  %v3206_v55 = vperm.slane %v3203_v62, 0 }
0x1945   :  { %3209 = vrot.lane.b32.xlu2 %v3206_v55, %s5767_s28 }
0x194b   :  { %3215 = vrot.lane.b32.xlu0 %v3206_v55, %s5766_s9 }
0x199f   :  { %v3210_v11 = vpop.permute.xlu2 %3209 }
0x19a0   :  { %v3220_v36 = vsel %vm418_vm1, %v3203_v62, %v3210_v11 }
0x19b5   :  { %v3214_v18 = vpop.permute.xlu1 %3213  ;;  %v3208_v58 = vpop.permute.xlu0 %3207 }
0x19b6   :  { %v3219_v39 = vsel %vm418_vm1, %v6917_v54, %v3208_v58 }
0x19b7   :  { %v6928_v46 = vsel %vm421_vm2, %v3219_v39, %v3214_v18 }
0x19b8   :  { %v3225_v23 = vrot.slane %v6928_v46, 1  ;;  %v3229_v57 = vperm.slane %v6928_v46, 0 }
0x19ba   :  { %v3230_v38 = vperm.slane %v3225_v23, 0  ;;  %v3241_v49 = vadd.f32 %v3229_v57, %v5998_v30 }
0x19bc   :  { %v3242_v25 = vadd.f32 %v3230_v38, %v6005_v34  ;;  %5142 = vtanh.f32 %v3241_v49 }
0x19bd   :  { %v3216_v20 = vpop.permute.xlu0 %3215 }
0x19be   :  { %5144 = vtanh.f32 %v3242_v25  ;;  %v6936_v19 = vsel %vm421_vm2, %v3220_v36, %v3216_v20 }
0x19bf   :  { %v3227_v40 = vrot.slane %v6936_v19, 1  ;;  %v3232_v52 = vperm.slane %v6936_v19, 0 }
0x19c1   :  { %v3233_v41 = vperm.slane %v3227_v40, 0  ;;  %v3244_v27 = vadd.f32 %v3232_v52, %v6010_v43 }
0x19c2   :  { %v5143_v14 = vpop.eup %5142 }
0x19c3   :  { %v3245_v60 = vadd.f32 %v3233_v41, %v6022_v48  ;;  %5146 = vtanh.f32 %v3244_v27  ;;  %v3253_v61 = vmul.f32 %v6762_v32, %v5143_v14 }
0x19c4   :  { %v5145_v6 = vpop.eup %5144 }
0x19c5   :  { %5148 = vtanh.f32 %v3245_v60  ;;  %v3259_v2 = vsel %vm245_vm0, %v3253_v61, 0.0  ;;  %v3254_v63 = vmul.f32 %v6769_v45, %v5145_v6 }
0x19c6   :  { %3260 = vadd.xlane.f32.xlu0 %v3259_v2 }
0x19c7   :  { %v3262_v62 = vsel %vm245_vm0, %v3254_v63, 0.0 }
0x19c8   :  { %3263 = vadd.xlane.f32.xlu2 %v3262_v62 }
0x19c9   :  { %v5147_v55 = vpop.eup %5146 }
0x19ca   :  { %v3256_v58 = vmul.f32 %v6762_v32, %v5147_v55 }
0x19cb   :  { %v5149_v18 = vpop.eup %5148 }
0x19cc   :  { %v3257_v39 = vmul.f32 %v6769_v45, %v5149_v18  ;;  %v3268_v57 = vsel %vm245_vm0, %v3256_v58, 0.0 }
0x19ce   :  { %v3271_v23 = vsel %vm245_vm0, %v3257_v39, 0.0 }
0x19cf   :  { %3272 = vadd.xlane.f32.xlu1 %v3271_v23 }
0x19d0   :  { %3269 = vadd.xlane.f32.xlu2 %v3268_v57 }
0x1a39   :  { %v3261_v11 = vpop.xlane.xlu0 %3260 }
0x1a3a   :  { %v3277_v38 = vadd.f32 %v6780_v10, %v3261_v11 }
0x1a3b   :  { %v3264_v49 = vpop.xlane.xlu2 %3263 }
0x1a3c   :  { %v3283_v25 = vsel %vm493_vm3, %v3277_v38, -inf  ;;  %v3278_v36 = vadd.f32 %v6787_v0, %v3264_v49 }
0x1a3d   :  { %v3284_v20 = vrot.slane %v3283_v25, 4 }
0x1a3e   :  { %v3290_v40 = vsel %vm493_vm3, %v3278_v36, -inf }
0x1a3f   :  { %v3285_v32 = vmax.f32 %v3283_v25, %v3284_v20  ;;  %v3291_v52 = vrot.slane %v3290_v40, 4 }
0x1a41   :  { %v3286_v45 = vrot.slane %v3285_v32, 2  ;;  %v3292_v41 = vmax.f32 %v3290_v40, %v3291_v52 }
0x1a42   :  { %v3273_v27 = vpop.xlane.xlu1 %3272 }
0x1a43   :  { %v3287_v14 = vmax.f32 %v3285_v32, %v3286_v45  ;;  %v3293_v60 = vrot.slane %v3292_v41, 2  ;;  %v3281_v61 = vadd.f32 %v6794_v47, %v3273_v27  ;;  %v3270_v6 = vpop.xlane.xlu2 %3269 }
0x1a44   :  { %v3280_v10 = vadd.f32 %v6800_v5, %v3270_v6 }
0x1a45   :  { %v3288_v2 = vrot.slane %v3287_v14, 1  ;;  %v3294_v63 = vmax.f32 %v3292_v41, %v3293_v60  ;;  %v3311_v62 = vsel %vm493_vm3, %v3281_v61, -inf }
0x1a46   :  { %v3312_v0 = vrot.slane %v3311_v62, 4  ;;  %v3304_v55 = vsel %vm493_vm3, %v3280_v10, -inf }
0x1a47   :  { %v3289_v18 = vmax.f32 %v3287_v14, %v3288_v2  ;;  %v3295_v58 = vrot.slane %v3294_v63, 1  ;;  %v3305_v39 = vrot.slane %v3304_v55, 4 }
0x1a48   :  { %v3313_v23 = vmax.f32 %v3311_v62, %v3312_v0 }
0x1a49   :  { %v3325_v57 = vsub.f32 %v3277_v38, %v3289_v18  ;;  %v3296_v11 = vmax.f32 %v3294_v63, %v3295_v58  ;;  %v3306_v49 = vmax.f32 %v3304_v55, %v3305_v39 }
0x1a4a   :  { %v3314_v25 = vrot.slane %v3313_v23, 2 }
0x1a4b   :  { %v3331_v20 = vmul.f32 1.442695, %v3325_v57  ;;  %v3326_v47 = vsub.f32 %v3278_v36, %v3296_v11  ;;  %v3307_v40 = vrot.slane %v3306_v49, 2 }
0x1a4c   :  { %v3315_v32 = vmax.f32 %v3313_v23, %v3314_v25 }
0x1a4d   :  { %5150 = vpow2.f32 %v3331_v20  ;;  %v3333_v5 = vmul.f32 1.442695, %v3326_v47  ;;  %v3308_v52 = vmax.f32 %v3306_v49, %v3307_v40 }
0x1a4e   :  { %v3316_v45 = vrot.slane %v3315_v32, 1 }
0x1a4f   :  { %5152 = vpow2.f32 %v3333_v5  ;;  %v3309_v41 = vrot.slane %v3308_v52, 1 }
0x1a50   :  { %v3317_v27 = vmax.f32 %v3315_v32, %v3316_v45 }
0x1a51   :  { %v3310_v60 = vmax.f32 %v3308_v52, %v3309_v41 }
0x1a52   :  { %v3329_v14 = vsub.f32 %v3281_v61, %v3317_v27 }
0x1a53   :  { %v6958_v6 = vpop.eup %5150  ;;  %v3328_v2 = vsub.f32 %v3280_v10, %v3310_v60 }
0x1a54   :  { %v3343_v38 = vsel %vm493_vm3, %v6958_v6, 0.0  ;;  %v3339_v63 = vmul.f32 1.442695, %v3329_v14 }
0x1a55   :  { %v6962_v62 = vpop.eup %5152  ;;  %v3344_v36 = vrot.slane %v3343_v38, 4  ;;  %v3337_v0 = vmul.f32 1.442695, %v3328_v2 }
0x1a56   :  { %v3350_v55 = vsel %vm493_vm3, %v6962_v62, 0.0  ;;  %5154 = vpow2.f32 %v3339_v63 }
0x1a57   :  { %v3345_v18 = vadd.f32 %v3344_v36, %v3343_v38  ;;  %v3351_v58 = vrot.slane %v3350_v55, 4  ;;  %5156 = vpow2.f32 %v3337_v0 }
0x1a59   :  { %v3346_v39 = vrot.slane %v3345_v18, 2  ;;  %v3352_v61 = vadd.f32 %v3351_v58, %v3350_v55 }
0x1a5b   :  { %v3347_v23 = vadd.f32 %v3346_v39, %v3345_v18  ;;  %v3353_v57 = vrot.slane %v3352_v61, 2 }
0x1a5c   :  { %v6966_v10 = vpop.eup %5154 }
0x1a5d   :  { %v6968_v11 = vpop.eup %5156  ;;  %v3348_v49 = vrot.slane %v3347_v23, 1  ;;  %v3354_v25 = vadd.f32 %v3353_v57, %v3352_v61  ;;  %v3371_v20 = vsel %vm493_vm3, %v6966_v10, 0.0 }
0x1a5e   :  { %v3372_v47 = vrot.slane %v3371_v20, 4  ;;  %v3364_v40 = vsel %vm493_vm3, %v6968_v11, 0.0 }
0x1a5f   :  { %v3349_v32 = vadd.f32 %v3348_v49, %v3347_v23  ;;  %v3355_v5 = vrot.slane %v3354_v25, 1  ;;  %v3365_v52 = vrot.slane %v3364_v40, 4 }
0x1a60   :  { %v3373_v45 = vadd.f32 %v3372_v47, %v3371_v20 }
0x1a61   :  { %5158 = vrcp.f32 %v3349_v32  ;;  %v3356_v41 = vadd.f32 %v3355_v5, %v3354_v25  ;;  %v3366_v27 = vadd.f32 %v3365_v52, %v3364_v40  ;;  %v3396_v57 = vand.u32 2147483648, %v3349_v32 }
0x1a62   :  { %v3374_v60 = vrot.slane %v3373_v45, 2  ;;  %v3394_v25 = vand.u32 2147483647, %v3349_v32  ;;  %vm3390_vm4 = vweird.f32 %v3349_v32 }
0x1a63   :  { %5160 = vrcp.f32 %v3356_v41  ;;  %v3367_v14 = vrot.slane %v3366_v27, 2  ;;  %v3411_v47 = vand.u32 2147483648, %v3356_v41  ;;  %v3409_v52 = vand.u32 2147483647, %v3356_v41 }
0x1a64   :  { %v3375_v2 = vadd.f32 %v3374_v60, %v3373_v45  ;;  %v3397_v45 = vor.u32 1.1754944e-38, %v3396_v57  ;;  %vm3395_vm7 = vcmp.eq.f32.partialorder %v3394_v25, 8.507059e+37  ;;  %vm3405_vm8 = vweird.f32 %v3356_v41 }
0x1a65   :  { %v3368_v38 = vadd.f32 %v3367_v14, %v3366_v27  ;;  %vm3410_vm12 = vcmp.eq.f32.partialorder %v3409_v52, 8.507059e+37 }
0x1a66   :  { %v3376_v63 = vrot.slane %v3375_v2, 1 }
0x1a67   :  { %v5159_v36 = vpop.eup %5158  ;;  %v3369_v0 = vrot.slane %v3368_v38, 1 }
0x1a68   :  { %v3377_v55 = vadd.f32 %v3376_v63, %v3375_v2  ;;  %v3386_v18 = vmul.f32 %v5159_v36, %v3349_v32  ;;  %vm3391_vm15 = vweird.f32 %v5159_v36  ;;  %v3412_v63 = vor.u32 1.1754944e-38, %v3411_v47 }
0x1a69   :  { %v5161_v58 = vpop.eup %5160  ;;  %v3370_v39 = vadd.f32 %v3369_v0, %v3368_v38  ;;  %vm3392_vm6 = vmor %vm3390_vm4, %vm3391_vm15 }
0x1a6a   :  { %5162 = vrcp.f32 %v3377_v55  ;;  %v3387_v61 = vsub.f32 1.0, %v3386_v18  ;;  %v3401_v23 = vmul.f32 %v5161_v58, %v3356_v41  ;;  %vm3406_vm5 = vweird.f32 %v5161_v58 }
0x1a6b   :  { %5164 = vrcp.f32 %v3370_v39  ;;  %vm3407_vm11 = vmor %vm3405_vm8, %vm3406_vm5  ;;  %v3454_v41 = vand.u32 2147483647, %v3377_v55  ;;  %vm3450_vm14 = vweird.f32 %v3377_v55 }
0x1a6c   :  { %v3388_v49 = vmul.f32 %v5159_v36, %v3387_v61  ;;  %v3402_v20 = vsub.f32 1.0, %v3401_v23 }
0x1a6d   :  { %vm3455_vm4 = vcmp.eq.f32.partialorder %v3454_v41, 8.507059e+37 }
0x1a6e   :  { %v3389_v40 = vadd.f32 %v5159_v36, %v3388_v49  ;;  %v3403_v5 = vmul.f32 %v5161_v58, %v3402_v20  ;;  %v3456_v20 = vand.u32 2147483648, %v3377_v55 }
0x1a70   :  { %v5163_v27 = vpop.eup %5162  ;;  %v3393_v60 = vsel %vm3392_vm6, %v5159_v36, %v3389_v40  ;;  %v3404_v14 = vadd.f32 %v5161_v58, %v3403_v5  ;;  %v3457_v47 = vor.u32 1.1754944e-38, %v3456_v20  ;;  %vm3435_vm6 = vweird.f32 %v3370_v39 }
0x1a71   :  { %v5165_v2 = vpop.eup %5164  ;;  %v3398_v38 = vsel %vm3395_vm7, %v3397_v45, %v3393_v60  ;;  %v3446_v0 = vmul.f32 %v5163_v27, %v3377_v55  ;;  %vm3451_vm13 = vweird.f32 %v5163_v27  ;;  %v3441_v45 = vand.u32 2147483648, %v3370_v39 }
0x1a72   :  { %v3399_v18 = vmul.f32 %v6958_v6, %v3398_v38  ;;  %v3408_v32 = vsel %vm3407_vm11, %v5161_v58, %v3404_v14  ;;  %v3431_v61 = vmul.f32 %v5165_v2, %v3370_v39  ;;  %vm3452_vm15 = vmor %vm3450_vm14, %vm3451_vm13  ;;  %vm3436_vm5 = vweird.f32 %v5165_v2 }
0x1a73   :  { %v3413_v23 = vsel %vm3410_vm12, %v3412_v63, %v3408_v32  ;;  %v3447_v49 = vsub.f32 1.0, %v3446_v0  ;;  %vm3437_vm7 = vmor %vm3435_vm6, %vm3436_vm5  ;;  %v3442_v38 = vor.u32 1.1754944e-38, %v3441_v45 }
0x1a74   :  { %3477 = vperm.xlu2 %4964, %v3399_v18   ;;  %v3414_v57 = vmul.f32 %v6962_v62, %v3413_v23  ;;  %v3432_v36 = vsub.f32 1.0, %v3431_v61  ;;  %v3439_v62 = vand.u32 2147483647, %v3370_v39  ;;  %v6982_v39 = vld [vmem:[#allocation5 + $0x8] sm:$0xff] }
0x1a75   :  { %v3448_v25 = vmul.f32 %v5163_v27, %v3447_v49 }
0x1a76   :  { %3503 = vperm.xlu1 %4965, %v3414_v57   ;;  %v3433_v40 = vmul.f32 %v5165_v2, %v3432_v36  ;;  %vm3440_vm8 = vcmp.eq.f32.partialorder %v3439_v62, 8.507059e+37 }
0x1a77   :  { %v3449_v5 = vadd.f32 %v5163_v27, %v3448_v25 }
0x1a78   :  { %v3434_v58 = vadd.f32 %v5165_v2, %v3433_v40 }
0x1a79   :  { %v3453_v6 = vsel %vm3452_vm15, %v5163_v27, %v3449_v5  ;;  %v6978_v27 = vld [vmem:[#allocation5] sm:$0xff] }
0x1a7a   :  { %v3458_v52 = vsel %vm3455_vm4, %v3457_v47, %v3453_v6  ;;  %v3438_v14 = vsel %vm3437_vm7, %v5165_v2, %v3434_v58 }
0x1a7b   :  { %v3459_v60 = vmul.f32 %v6966_v10, %v3458_v52  ;;  %v3443_v63 = vsel %vm3440_vm8, %v3442_v38, %v3438_v14  ;;  %v6991_v14 = vld [vmem:[#allocation2] sm:$0xff] }
0x1a7c   :  { %v3444_v55 = vmul.f32 %v6968_v11, %v3443_v63 }
0x1a7d   :  { %3508 = vperm.xlu0 %4966, %v3459_v60   ;;  %v6988_v60 = vld [vmem:[#allocation2 + $0x8] sm:$0xff] }
0x1a85   :  { %3482 = vperm.xlu0 %4966, %v3444_v55  }
0x1ace   :  { %v3478_v45 = vpop.permute.xlu2 %3477 }
0x1acf   :  { %v3485_v38 = vmul.f32 %v6991_v14, %v3478_v45 }
0x1ad1   :  { %v3487_v55 = vsel %vm245_vm0, %v3485_v38, 0.0 }
0x1ae8   :  { %v3504_v0 = vpop.permute.xlu1 %3503 }
0x1ae9   :  { %v3511_v18 = vmul.f32 %v6978_v27, %v3504_v0 }
0x1aeb   :  { %v3513_v32 = vsel %vm245_vm0, %v3511_v18, 0.0  ;;  %v3488_v18 = vrot.slane %v3487_v55, 4 }
0x1aec   :  { %v3514_v61 = vrot.slane %v3513_v32, 4 }
0x1aee   :  { %v3515_v10 = vadd.f32 %v3514_v61, %v3513_v32  ;;  %v3489_v61 = vadd.f32 %v3488_v18, %v3487_v55 }
0x1aef   :  { %v3509_v23 = vpop.permute.xlu0 %3508 }
0x1af0   :  { %v3512_v2 = vmul.f32 %v6982_v39, %v3509_v23  ;;  %v3516_v49 = vrot.slane %v3515_v10, 2  ;;  %v3490_v23 = vrot.slane %v3489_v61, 2 }
0x1af2   :  { %v3520_v57 = vsel %vm245_vm0, %v3512_v2, 0.0  ;;  %v3517_v11 = vadd.f32 %v3516_v49, %v3515_v10  ;;  %v3491_v49 = vadd.f32 %v3490_v23, %v3489_v61 }
0x1af3   :  { %v3521_v20 = vrot.slane %v3520_v57, 4 }
0x1af4   :  { %v3518_v41 = vrot.slane %v3517_v11, 1 }
0x1af5   :  { %v3522_v36 = vadd.f32 %v3521_v20, %v3520_v57  ;;  %v3492_v20 = vrot.slane %v3491_v49, 1 }
0x1af6   :  { %v3519_v47 = vadd.f32 %v3518_v41, %v3517_v11 }
0x1af7   :  { %v3523_v25 = vrot.slane %v3522_v36, 2  ;;  %v3483_v52 = vpop.permute.xlu0 %3482 }
0x1af8   :  { %v3486_v62 = vmul.f32 %v6988_v60, %v3483_v52 }
0x1af9   :  { %v3524_v40 = vadd.f32 %v3523_v25, %v3522_v36  ;;  %v3493_v36 = vadd.f32 %v3492_v20, %v3491_v49 }
0x1afa   :  { %v3494_v63 = vsel %vm245_vm0, %v3486_v62, 0.0 }
0x1afb   :  { %v3525_v5 = vrot.slane %v3524_v40, 1  ;;  %v3495_v0 = vrot.slane %v3494_v63, 4 }
0x1afd   :  { %v3526_v6 = vadd.f32 %v3525_v5, %v3524_v40  ;;  %v3496_v32 = vadd.f32 %v3495_v0, %v3494_v63  ;;  %v6999_v5 = vpop.f32.mrf.mxu2 }
0x1aff   :  { %v3576_v58 = vsel %vm783_vm9, %v3526_v6, %v3519_v47  ;;  %v3497_v10 = vrot.slane %v3496_v32, 2  ;;  %v3199_v47 = vpop.f32.mrf.mxu1 }
0x1b00   :  { %3577 = vrot.lane.b32.xlu1 %v3576_v58, %s5769_s7 }
0x1b01   :  { %v3498_v2 = vadd.f32 %v3497_v10, %v3496_v32 }
0x1b03   :  { %v3499_v57 = vrot.slane %v3498_v2, 1 }
0x1b05   :  { %v3500_v11 = vadd.f32 %v3499_v57, %v3498_v2 }
0x1b07   :  { %v3572_v41 = vsel %vm783_vm9, %v3500_v11, %v3493_v36 }
0x1b72   :  { %v3578_v25 = vpop.permute.xlu1 %3577 }
0x1b73   :  { %v3580_v40 = vsel %vm245_vm0, %v3572_v41, %v3578_v25 }
0x1b74   :  { %4931 = vmatmul.msk.f32.vlgmr.msrb.gmra.mxu2 %vm793_vm10, %v3580_v40 }
0x1bf7   :  { %v3601_v6 = vpop.f32.mrf.mxu2 }
0x1bf8   :  { %v3602_v58 = vadd.f32 %v3601_v6, %v3199_v47 }
0x1bfa   :  { %v3608_v52 = vadd.f32 %v6223_v21, %v3602_v58 }
0x1bfc   :  { %5166 = vtanh.f32 %v3608_v52  ;;  %v4932_v62 = vmul.f32 -1.442695, %v3608_v52 }
0x1bfe   :  { %5168 = vpow2.f32 %v4932_v62 }
0x1c02   :  { %v5167_v45 = vpop.eup %5166 }
0x1c03   :  { %3631 = vrot.lane.b32.xlu2 %v5167_v45, %s5766_s9 }
0x1c04   :  { %v5169_v38 = vpop.eup %5168 }
0x1c05   :  { %v3612_v63 = vadd.f32 1.0, %v5169_v38 }
0x1c07   :  { %5170 = vrcp.f32 %v3612_v63  ;;  %v3624_v10 = vand.u32 2147483648, %v3612_v63  ;;  %vm3618_vm12 = vweird.f32 %v3612_v63  ;;  %v3622_v23 = vand.u32 2147483647, %v3612_v63 }
0x1c09   :  { %v3625_v2 = vor.u32 1.1754944e-38, %v3624_v10  ;;  %vm3623_vm14 = vcmp.eq.f32.partialorder %v3622_v23, 8.507059e+37  ;;  %v7059_v23 = vld [vmem:[%s8081_s14] ss:$0 sm:$0xff] }
0x1c0d   :  { %v5171_v55 = vpop.eup %5170 }
0x1c0e   :  { %v3614_v0 = vmul.f32 %v5171_v55, %v3612_v63  ;;  %vm3619_vm11 = vweird.f32 %v5171_v55 }
0x1c0f   :  { %vm3620_vm13 = vmor %vm3618_vm12, %vm3619_vm11 }
0x1c10   :  { %v3615_v18 = vsub.f32 1.0, %v3614_v0 }
0x1c12   :  { %v3616_v32 = vmul.f32 %v5171_v55, %v3615_v18 }
0x1c14   :  { %v3617_v61 = vadd.f32 %v5171_v55, %v3616_v32 }
0x1c16   :  { %v3621_v21 = vsel %vm3620_vm13, %v5171_v55, %v3617_v61 }
0x1c17   :  { %v3626_v57 = vsel %vm3623_vm14, %v3625_v2, %v3621_v21 }
0x1c18   :  { %v3629_v11 = vmul.f32 %v3626_v57, %v6848_v22 }
0x1c5d   :  { %v3632_v49 = vpop.permute.xlu2 %3631 }
0x1c5e   :  { %v3634_v20 = vmul.f32 %v3632_v49, %v3626_v57 }
0x1c60   :  { %3636 = vrot.lane.b32.xlu0 %v3634_v20, %s5769_s7 }
0x1cd2   :  { %v3637_v36 = vpop.permute.xlu0 %3636 }
0x1cd3   :  { %v7005_v25 = vadd.f32 %v3637_v36, %v3629_v11 }
0x1cd5   :  { %5172 = vtanh.f32 %v7005_v25 }
0x1cdb   :  { %v5173_v41 = vpop.eup %5172 }
0x1cdc   :  { %3642 = vrot.lane.b32.xlu1 %v5173_v41, %s5766_s9 }
0x1d4e   :  { %v3643_v40 = vpop.permute.xlu1 %3642 }
0x1d4f   :  { %v3645_v47 = vmul.f32 %v3643_v40, %v3626_v57  ;;  %v7066_v57 = vld [vmem:[%s8081_s14 + $0x1] ss:$0 sm:$0xff] }
0x1d51   :  { %3647 = vrot.lane.b32.xlu2 %v3645_v47, %s5769_s7 }
0x1dab   :  { %v3648_v6 = vpop.permute.xlu2 %3647 }
0x1dac   :  { %4933 = vmatmul.msk.f32.vlgmr.msra.gmra.mxu0 %vm245_vm0, %v3648_v6  ;;  %4934 = vmatmul.msk.f32.vlgmr.msrb.gmra.mxu1 %vm245_vm0, %v3648_v6 }
0x1dad   :  { %4935 = vmatmul.msk.f32.vlgmr.msrb.gmra.mxu3 %vm245_vm0, %v3648_v6  ;;  %4704 = vmatpush.msrb.mxu1 %v6859_v35  ;;  %v7028_v35 = vld [vmem:[%s8075_s8] ss:$0 sm:$0xff] }
0x1dae   :  { %4775 = vmatpush.msrb.mxu3 %v6862_v28 }
0x1daf   :  { %4705 = vmatpush.msrb.mxu1 %v6868_v4 }
0x1db0   :  { %4776 = vmatpush.msrb.mxu3 %v6871_v13 }
0x1db1   :  { %4706 = vmatpush.msrb.mxu1 %v6877_v50 }
0x1db2   :  { %4777 = vmatpush.msrb.mxu3 %v6880_v8 }
0x1db3   :  { %4707 = vmatpush.msrb.mxu1 %v6886_v51 }
0x1db4   :  { %4778 = vmatpush.msrb.mxu3 %v6889_v16 }
0x1db5   :  { %4708 = vmatpush.msrb.mxu1 %v6895_v37 }
0x1db7   :  { %4709 = vmatpush.msrb.mxu1 %v6901_v56 }
0x1db9   :  { %4710 = vmatpush.msrb.mxu1 %v6907_v59 }
0x1dbb   :  { %4711 = vmatpush.msrb.mxu1 %v6913_v29 }
0x1e29   :  { %v3735_v22 = vpop.f32.mrf.mxu1 }
0x1e2a   :  { %v7031_v28 = vadd.f32 %v7028_v35, %v3735_v22 }
0x1e2c   :  { %8123 = vst [vmem:[#allocation35_spill] sm:$0xff] %v7031_v28  ;;  %v3761_v4 = vperm.slane %v7031_v28, 0  ;;  %v3759_v13 = vrot.slane %v7031_v28, 1 }
0x1e2e   :  { %3769 = vrot.lane.b32.xlu2 %v3761_v4, %s5766_s9  ;;  %3763 = vrot.lane.b32.xlu0 %v3761_v4, %s5767_s28  ;;  %v3762_v50 = vperm.slane %v3759_v13, 0 }
0x1e30   :  { %3765 = vrot.lane.b32.xlu1 %v3762_v50, %s5767_s28 }
0x1e36   :  { %3771 = vrot.lane.b32.xlu0 %v3762_v50, %s5766_s9 }
0x1e88   :  { %v3770_v51 = vpop.permute.xlu2 %3769 }
0x1ea0   :  { %v3764_v8 = vpop.permute.xlu0 %3763 }
0x1ea1   :  { %v3775_v16 = vsel %vm418_vm1, %v7031_v28, %v3764_v8 }
0x1ea2   :  { %v7042_v37 = vsel %vm421_vm2, %v3775_v16, %v3770_v51  ;;  %v3766_v52 = vpop.permute.xlu1 %3765  ;;  %v7084_v16 = vld [vmem:[%s8113_s12 + $0x8] sm:$0xff] }
0x1ea3   :  { %v3781_v56 = vrot.slane %v7042_v37, 1  ;;  %v3785_v59 = vperm.slane %v7042_v37, 0  ;;  %v3776_v62 = vsel %vm418_vm1, %v3759_v13, %v3766_v52  ;;  %v7077_v13 = vld [vmem:[%s8113_s12] sm:$0xff] }
0x1ea5   :  { %v3786_v29 = vperm.slane %v3781_v56, 0  ;;  %v3797_v58 = vadd.f32 %v3785_v59, %v5998_v30 }
0x1ea7   :  { %v3798_v45 = vadd.f32 %v3786_v29, %v6005_v34  ;;  %5174 = vtanh.f32 %v3797_v58 }
0x1ea8   :  { %v3772_v38 = vpop.permute.xlu0 %3771 }
0x1ea9   :  { %5176 = vtanh.f32 %v3798_v45  ;;  %v7050_v63 = vsel %vm421_vm2, %v3776_v62, %v3772_v38 }
0x1eaa   :  { %v3783_v55 = vrot.slane %v7050_v63, 1  ;;  %v3788_v0 = vperm.slane %v7050_v63, 0 }
0x1eac   :  { %v3789_v18 = vperm.slane %v3783_v55, 0  ;;  %v3800_v32 = vadd.f32 %v3788_v0, %v6010_v43 }
0x1ead   :  { %v5175_v61 = vpop.eup %5174 }
0x1eae   :  { %v3801_v10 = vadd.f32 %v3789_v18, %v6022_v48  ;;  %5178 = vtanh.f32 %v3800_v32  ;;  %v3809_v21 = vmul.f32 %v7059_v23, %v5175_v61  ;;  %v7091_v18 = vld [vmem:[%s8113_s12 + $0x20] sm:$0xff] }
0x1eaf   :  { %v5177_v2 = vpop.eup %5176 }
0x1eb0   :  { %5180 = vtanh.f32 %v3801_v10  ;;  %v3815_v49 = vsel %vm245_vm0, %v3809_v21, 0.0  ;;  %v3810_v20 = vmul.f32 %v7066_v57, %v5177_v2  ;;  %v7097_v10 = vld [vmem:[%s8113_s12 + $0x18] sm:$0xff] }
0x1eb1   :  { %3816 = vadd.xlane.f32.xlu0 %v3815_v49 }
0x1eb2   :  { %v3818_v11 = vsel %vm245_vm0, %v3810_v20, 0.0 }
0x1eb3   :  { %3819 = vadd.xlane.f32.xlu1 %v3818_v11 }
0x1eb4   :  { %v5179_v36 = vpop.eup %5178 }
0x1eb5   :  { %v3812_v40 = vmul.f32 %v7059_v23, %v5179_v36 }
0x1eb6   :  { %v5181_v41 = vpop.eup %5180 }
0x1eb7   :  { %v3813_v47 = vmul.f32 %v7066_v57, %v5181_v41  ;;  %v3824_v22 = vsel %vm245_vm0, %v3812_v40, 0.0 }
0x1eb9   :  { %v3827_v6 = vsel %vm245_vm0, %v3813_v47, 0.0 }
0x1eba   :  { %3828 = vadd.xlane.f32.xlu2 %v3827_v6 }
0x1ebb   :  { %3825 = vadd.xlane.f32.xlu1 %v3824_v22 }
0x1f24   :  { %v3817_v4 = vpop.xlane.xlu0 %3816 }
0x1f25   :  { %v3833_v50 = vadd.f32 %v7077_v13, %v3817_v4 }
0x1f26   :  { %v3820_v8 = vpop.xlane.xlu1 %3819 }
0x1f27   :  { %v3839_v51 = vsel %vm493_vm3, %v3833_v50, -inf  ;;  %v3834_v56 = vadd.f32 %v7084_v16, %v3820_v8 }
0x1f28   :  { %v3840_v59 = vrot.slane %v3839_v51, 4 }
0x1f29   :  { %v3846_v29 = vsel %vm493_vm3, %v3834_v56, -inf }
0x1f2a   :  { %v3841_v58 = vmax.f32 %v3839_v51, %v3840_v59  ;;  %v3847_v52 = vrot.slane %v3846_v29, 4 }
0x1f2c   :  { %v3842_v45 = vrot.slane %v3841_v58, 2  ;;  %v3848_v62 = vmax.f32 %v3846_v29, %v3847_v52 }
0x1f2d   :  { %v3829_v38 = vpop.xlane.xlu2 %3828 }
0x1f2e   :  { %v3843_v55 = vmax.f32 %v3841_v58, %v3842_v45  ;;  %v3849_v0 = vrot.slane %v3848_v62, 2  ;;  %v3837_v32 = vadd.f32 %v7091_v18, %v3829_v38  ;;  %v3826_v61 = vpop.xlane.xlu1 %3825 }
0x1f2f   :  { %v3836_v21 = vadd.f32 %v7097_v10, %v3826_v61 }
0x1f30   :  { %v3844_v2 = vrot.slane %v3843_v55, 1  ;;  %v3850_v49 = vmax.f32 %v3848_v62, %v3849_v0  ;;  %v3867_v20 = vsel %vm493_vm3, %v3837_v32, -inf }
0x1f31   :  { %v3868_v11 = vrot.slane %v3867_v20, 4  ;;  %v3860_v36 = vsel %vm493_vm3, %v3836_v21, -inf }
0x1f32   :  { %v3845_v41 = vmax.f32 %v3843_v55, %v3844_v2  ;;  %v3851_v40 = vrot.slane %v3850_v49, 1  ;;  %v3861_v47 = vrot.slane %v3860_v36, 4 }
0x1f33   :  { %v3869_v6 = vmax.f32 %v3867_v20, %v3868_v11 }
0x1f34   :  { %v3881_v22 = vsub.f32 %v3833_v50, %v3845_v41  ;;  %v3852_v4 = vmax.f32 %v3850_v49, %v3851_v40  ;;  %v3862_v8 = vmax.f32 %v3860_v36, %v3861_v47 }
0x1f35   :  { %v3870_v51 = vrot.slane %v3869_v6, 2 }
0x1f36   :  { %v3887_v59 = vmul.f32 1.442695, %v3881_v22  ;;  %v3882_v29 = vsub.f32 %v3834_v56, %v3852_v4  ;;  %v3863_v58 = vrot.slane %v3862_v8, 2 }
0x1f37   :  { %v3871_v52 = vmax.f32 %v3869_v6, %v3870_v51 }
0x1f38   :  { %5182 = vpow2.f32 %v3887_v59  ;;  %v3889_v45 = vmul.f32 1.442695, %v3882_v29  ;;  %v3864_v62 = vmax.f32 %v3862_v8, %v3863_v58 }
0x1f39   :  { %v3872_v38 = vrot.slane %v3871_v52, 1 }
0x1f3a   :  { %5184 = vpow2.f32 %v3889_v45  ;;  %v3865_v0 = vrot.slane %v3864_v62, 1 }
0x1f3b   :  { %v3873_v61 = vmax.f32 %v3871_v52, %v3872_v38 }
0x1f3c   :  { %v3866_v28 = vmax.f32 %v3864_v62, %v3865_v0 }
0x1f3d   :  { %v3885_v55 = vsub.f32 %v3837_v32, %v3873_v61 }
0x1f3e   :  { %v7102_v2 = vpop.eup %5182  ;;  %v3884_v20 = vsub.f32 %v3836_v21, %v3866_v28 }
0x1f3f   :  { %v3899_v50 = vsel %vm493_vm3, %v7102_v2, 0.0  ;;  %v3895_v49 = vmul.f32 1.442695, %v3885_v55 }
0x1f40   :  { %v7106_v11 = vpop.eup %5184  ;;  %v3900_v56 = vrot.slane %v3899_v50, 4  ;;  %v3893_v36 = vmul.f32 1.442695, %v3884_v20 }
0x1f41   :  { %v3906_v41 = vsel %vm493_vm3, %v7106_v11, 0.0  ;;  %5186 = vpow2.f32 %v3895_v49 }
0x1f42   :  { %v3901_v40 = vadd.f32 %v3900_v56, %v3899_v50  ;;  %v3907_v47 = vrot.slane %v3906_v41, 4  ;;  %5188 = vpow2.f32 %v3893_v36 }
0x1f44   :  { %v3902_v6 = vrot.slane %v3901_v40, 2  ;;  %v3908_v32 = vadd.f32 %v3907_v47, %v3906_v41 }
0x1f46   :  { %v3903_v22 = vadd.f32 %v3902_v6, %v3901_v40  ;;  %v3909_v4 = vrot.slane %v3908_v32, 2 }
0x1f47   :  { %v7110_v28 = vpop.eup %5186 }
0x1f48   :  { %v7112_v21 = vpop.eup %5188  ;;  %v3904_v8 = vrot.slane %v3903_v22, 1  ;;  %v3910_v51 = vadd.f32 %v3909_v4, %v3908_v32  ;;  %v3927_v59 = vsel %vm493_vm3, %v7110_v28, 0.0 }
0x1f49   :  { %v3928_v29 = vrot.slane %v3927_v59, 4  ;;  %v3920_v58 = vsel %vm493_vm3, %v7112_v21, 0.0 }
0x1f4a   :  { %v3905_v52 = vadd.f32 %v3904_v8, %v3903_v22  ;;  %v3911_v45 = vrot.slane %v3910_v51, 1  ;;  %v3921_v62 = vrot.slane %v3920_v58, 4 }
0x1f4b   :  { %v3929_v38 = vadd.f32 %v3928_v29, %v3927_v59 }
0x1f4c   :  { %5190 = vrcp.f32 %v3905_v52  ;;  %v3912_v0 = vadd.f32 %v3911_v45, %v3910_v51  ;;  %v3922_v61 = vadd.f32 %v3921_v62, %v3920_v58  ;;  %v3952_v8 = vand.u32 2147483648, %v3905_v52 }
0x1f4d   :  { %v3930_v55 = vrot.slane %v3929_v38, 2  ;;  %v3950_v51 = vand.u32 2147483647, %v3905_v52  ;;  %vm3946_vm4 = vweird.f32 %v3905_v52 }
0x1f4e   :  { %5192 = vrcp.f32 %v3912_v0  ;;  %v3923_v20 = vrot.slane %v3922_v61, 2  ;;  %v3967_v58 = vand.u32 2147483648, %v3912_v0  ;;  %vm3961_vm8 = vweird.f32 %v3912_v0 }
0x1f4f   :  { %v3931_v50 = vadd.f32 %v3930_v55, %v3929_v38  ;;  %v3965_v38 = vand.u32 2147483647, %v3912_v0  ;;  %vm3951_vm7 = vcmp.eq.f32.partialorder %v3950_v51, 8.507059e+37 }
0x1f50   :  { %v3924_v49 = vadd.f32 %v3923_v20, %v3922_v61  ;;  %v3953_v61 = vor.u32 1.1754944e-38, %v3952_v8 }
0x1f51   :  { %v3932_v56 = vrot.slane %v3931_v50, 1  ;;  %vm3966_vm12 = vcmp.eq.f32.partialorder %v3965_v38, 8.507059e+37 }
0x1f52   :  { %v5191_v36 = vpop.eup %5190  ;;  %v3925_v41 = vrot.slane %v3924_v49, 1 }
0x1f53   :  { %v3933_v40 = vadd.f32 %v3932_v56, %v3931_v50  ;;  %v3942_v47 = vmul.f32 %v5191_v36, %v3905_v52  ;;  %vm3947_vm15 = vweird.f32 %v5191_v36 }
0x1f54   :  { %v5193_v6 = vpop.eup %5192  ;;  %v3926_v32 = vadd.f32 %v3925_v41, %v3924_v49  ;;  %vm3948_vm6 = vmor %vm3946_vm4, %vm3947_vm15  ;;  %v3968_v41 = vor.u32 1.1754944e-38, %v3967_v58 }
0x1f55   :  { %5194 = vrcp.f32 %v3933_v40  ;;  %v3943_v22 = vsub.f32 1.0, %v3942_v47  ;;  %v3957_v4 = vmul.f32 %v5193_v6, %v3912_v0  ;;  %vm3962_vm5 = vweird.f32 %v5193_v6 }
0x1f56   :  { %5196 = vrcp.f32 %v3926_v32  ;;  %vm3963_vm11 = vmor %vm3961_vm8, %vm3962_vm5  ;;  %v4012_v54 = vand.u32 2147483648, %v3933_v40  ;;  %v4010_v0 = vand.u32 2147483647, %v3933_v40  ;;  %vm4006_vm14 = vweird.f32 %v3933_v40 }
0x1f57   :  { %v3944_v59 = vmul.f32 %v5191_v36, %v3943_v22  ;;  %v3958_v29 = vsub.f32 1.0, %v3957_v4 }
0x1f58   :  { %v4013_v58 = vor.u32 1.1754944e-38, %v4012_v54  ;;  %vm4011_vm4 = vcmp.eq.f32.partialorder %v4010_v0, 8.507059e+37 }
0x1f59   :  { %v3945_v45 = vadd.f32 %v5191_v36, %v3944_v59  ;;  %v3959_v62 = vmul.f32 %v5193_v6, %v3958_v29 }
0x1f5b   :  { %v5195_v55 = vpop.eup %5194  ;;  %v3949_v20 = vsel %vm3948_vm6, %v5191_v36, %v3945_v45  ;;  %v3960_v50 = vadd.f32 %v5193_v6, %v3959_v62  ;;  %vm3991_vm6 = vweird.f32 %v3926_v32 }
0x1f5c   :  { %v5197_v49 = vpop.eup %5196  ;;  %v3954_v56 = vsel %vm3951_vm7, %v3953_v61, %v3949_v20  ;;  %v4002_v47 = vmul.f32 %v5195_v55, %v3933_v40  ;;  %vm4007_vm13 = vweird.f32 %v5195_v55  ;;  %v3997_v61 = vand.u32 2147483648, %v3926_v32 }
0x1f5d   :  { %v3955_v22 = vmul.f32 %v7102_v2, %v3954_v56  ;;  %v3964_v52 = vsel %vm3963_vm11, %v5193_v6, %v3960_v50  ;;  %v3987_v4 = vmul.f32 %v5197_v49, %v3926_v32  ;;  %vm4008_vm15 = vmor %vm4006_vm14, %vm4007_vm13  ;;  %vm3992_vm5 = vweird.f32 %v5197_v49 }
0x1f5e   :  { %v3969_v59 = vsel %vm3966_vm12, %v3968_v41, %v3964_v52  ;;  %v4003_v29 = vsub.f32 1.0, %v4002_v47  ;;  %vm3993_vm7 = vmor %vm3991_vm6, %vm3992_vm5  ;;  %v3998_v56 = vor.u32 1.1754944e-38, %v3997_v61 }
0x1f5f   :  { %4033 = vperm.xlu1 %4965, %v3955_v22   ;;  %v3970_v8 = vmul.f32 %v7106_v11, %v3969_v59  ;;  %v3988_v36 = vsub.f32 1.0, %v3987_v4  ;;  %v3995_v11 = vand.u32 2147483647, %v3926_v32 }
0x1f60   :  { %v4004_v51 = vmul.f32 %v5195_v55, %v4003_v29 }
0x1f61   :  { %4059 = vperm.xlu2 %4964, %v3970_v8   ;;  %v3989_v45 = vmul.f32 %v5197_v49, %v3988_v36  ;;  %vm3996_vm8 = vcmp.eq.f32.partialorder %v3995_v11, 8.507059e+37 }
0x1f62   :  { %v4005_v62 = vadd.f32 %v5195_v55, %v4004_v51 }
0x1f63   :  { %v3990_v6 = vadd.f32 %v5197_v49, %v3989_v45 }
0x1f64   :  { %v4009_v2 = vsel %vm4008_vm15, %v5195_v55, %v4005_v62 }
0x1f65   :  { %v4014_v38 = vsel %vm4011_vm4, %v4013_v58, %v4009_v2  ;;  %v3994_v50 = vsel %vm3993_vm7, %v5197_v49, %v3990_v6 }
0x1f66   :  { %v4015_v20 = vmul.f32 %v7110_v28, %v4014_v38  ;;  %v3999_v41 = vsel %vm3996_vm8, %v3998_v56, %v3994_v50 }
0x1f67   :  { %v4000_v40 = vmul.f32 %v7112_v21, %v3999_v41 }
0x1f68   :  { %4064 = vperm.xlu0 %4966, %v4015_v20  }
0x1f70   :  { %4038 = vperm.xlu0 %4966, %v4000_v40  }
0x1fbb   :  { %v4060_v54 = vpop.permute.xlu2 %4059 }
0x1fbc   :  { %v4067_v55 = vmul.f32 %v6978_v27, %v4060_v54 }
0x1fbe   :  { %v4069_v47 = vsel %vm245_vm0, %v4067_v55, 0.0 }
0x1fbf   :  { %v4070_v22 = vrot.slane %v4069_v47, 4 }
0x1fc1   :  { %v4071_v52 = vadd.f32 %v4070_v22, %v4069_v47 }
0x1fc3   :  { %v4072_v32 = vrot.slane %v4071_v52, 2 }
0x1fc5   :  { %v4073_v29 = vadd.f32 %v4072_v32, %v4071_v52  ;;  %v7135_v32 = vpop.f32.mrf.mxu0 }
0x1fc7   :  { %v4074_v51 = vrot.slane %v4073_v29, 1 }
0x1fc9   :  { %v4075_v45 = vadd.f32 %v4074_v51, %v4073_v29 }
0x1fd1   :  { %v4034_v2 = vpop.permute.xlu1 %4033 }
0x1fd2   :  { %v4041_v6 = vmul.f32 %v6991_v14, %v4034_v2 }
0x1fd4   :  { %v4043_v61 = vsel %vm245_vm0, %v4041_v6, 0.0 }
0x1fd5   :  { %v4044_v11 = vrot.slane %v4043_v61, 4 }
0x1fd7   :  { %v4045_v56 = vadd.f32 %v4044_v11, %v4043_v61 }
0x1fd9   :  { %v4046_v40 = vrot.slane %v4045_v56, 2 }
0x1fda   :  { %v4065_v4 = vpop.permute.xlu0 %4064 }
0x1fdb   :  { %v4068_v28 = vmul.f32 %v6982_v39, %v4065_v4  ;;  %v4047_v55 = vadd.f32 %v4046_v40, %v4045_v56 }
0x1fdd   :  { %v4076_v59 = vsel %vm245_vm0, %v4068_v28, 0.0  ;;  %v4048_v22 = vrot.slane %v4047_v55, 1 }
0x1fde   :  { %v4077_v49 = vrot.slane %v4076_v59, 4 }
0x1fdf   :  { %v4049_v4 = vadd.f32 %v4048_v22, %v4047_v55 }
0x1fe0   :  { %v4078_v8 = vadd.f32 %v4077_v49, %v4076_v59  ;;  %v3755_v59 = vpop.f32.mrf.mxu3 }
0x1fe2   :  { %v4079_v36 = vrot.slane %v4078_v8, 2  ;;  %v4039_v58 = vpop.permute.xlu0 %4038 }
0x1fe3   :  { %v4042_v39 = vmul.f32 %v6988_v60, %v4039_v58 }
0x1fe4   :  { %v4080_v21 = vadd.f32 %v4079_v36, %v4078_v8 }
0x1fe5   :  { %v4050_v38 = vsel %vm245_vm0, %v4042_v39, 0.0 }
0x1fe6   :  { %v4081_v0 = vrot.slane %v4080_v21, 1  ;;  %v4051_v20 = vrot.slane %v4050_v38, 4 }
0x1fe8   :  { %v4082_v62 = vadd.f32 %v4081_v0, %v4080_v21  ;;  %v4052_v50 = vadd.f32 %v4051_v20, %v4050_v38 }
0x1fea   :  { %v4132_v27 = vsel %vm783_vm9, %v4082_v62, %v4075_v45  ;;  %v4053_v41 = vrot.slane %v4052_v50, 2 }
0x1feb   :  { %4133 = vrot.lane.b32.xlu2 %v4132_v27, %s5769_s7 }
0x1fec   :  { %v4054_v54 = vadd.f32 %v4053_v41, %v4052_v50 }
0x1fee   :  { %v4055_v47 = vrot.slane %v4054_v54, 1 }
0x1ff0   :  { %v4056_v52 = vadd.f32 %v4055_v47, %v4054_v54 }
0x1ff2   :  { %v4128_v60 = vsel %vm783_vm9, %v4056_v52, %v4049_v4 }
0x2045   :  { %v4134_v28 = vpop.permute.xlu2 %4133 }
0x2046   :  { %v4136_v14 = vsel %vm245_vm0, %v4128_v60, %v4134_v28 }
0x2047   :  { %4937 = vmatmul.msk.f32.vlgmr.msrb.gmra.mxu0 %vm793_vm10, %v4136_v14 }
0x20c4   :  { %v4157_v49 = vpop.f32.mrf.mxu0 }
0x20c5   :  { %v4158_v29 = vadd.f32 %v4157_v49, %v3755_v59 }
0x20c7   :  { %v4164_v8 = vadd.f32 %v6226_v9, %v4158_v29 }
0x20c9   :  { %5198 = vtanh.f32 %v4164_v8  ;;  %v4938_v51 = vmul.f32 -1.442695, %v4164_v8 }
0x20cb   :  { %5200 = vpow2.f32 %v4938_v51 }
0x20cf   :  { %v5199_v36 = vpop.eup %5198 }
0x20d0   :  { %4187 = vrot.lane.b32.xlu1 %v5199_v36, %s5766_s9 }
0x20d1   :  { %v5201_v21 = vpop.eup %5200 }
0x20d2   :  { %v4168_v0 = vadd.f32 1.0, %v5201_v21 }
0x20d4   :  { %5202 = vrcp.f32 %v4168_v0  ;;  %v4180_v39 = vand.u32 2147483648, %v4168_v0  ;;  %vm4174_vm12 = vweird.f32 %v4168_v0  ;;  %v4178_v6 = vand.u32 2147483647, %v4168_v0 }
0x20d6   :  { %v4181_v38 = vor.u32 1.1754944e-38, %v4180_v39  ;;  %vm4179_vm14 = vcmp.eq.f32.partialorder %v4178_v6, 8.507059e+37 }
0x20da   :  { %v5203_v45 = vpop.eup %5202 }
0x20db   :  { %v4170_v62 = vmul.f32 %v5203_v45, %v4168_v0  ;;  %vm4175_vm11 = vweird.f32 %v5203_v45 }
0x20dc   :  { %vm4176_vm13 = vmor %vm4174_vm12, %vm4175_vm11 }
0x20dd   :  { %v4171_v27 = vsub.f32 1.0, %v4170_v62 }
0x20df   :  { %v4172_v58 = vmul.f32 %v5203_v45, %v4171_v27 }
0x20e1   :  { %v4173_v2 = vadd.f32 %v5203_v45, %v4172_v58 }
0x20e3   :  { %v4177_v9 = vsel %vm4176_vm13, %v5203_v45, %v4173_v2 }
0x20e4   :  { %v4182_v20 = vsel %vm4179_vm14, %v4181_v38, %v4177_v9 }
0x20e5   :  { %v4185_v50 = vmul.f32 %v4182_v20, %v7005_v25 }
0x2142   :  { %v4188_v61 = vpop.permute.xlu1 %4187 }
0x2143   :  { %v4190_v11 = vmul.f32 %v4188_v61, %v4182_v20 }
0x2145   :  { %4192 = vrot.lane.b32.xlu0 %v4190_v11, %s5769_s7 }
0x21b7   :  { %v4193_v56 = vpop.permute.xlu0 %4192 }
0x21b8   :  { %v7141_v41 = vadd.f32 %v4193_v56, %v4185_v50 }
0x21ba   :  { %5204 = vtanh.f32 %v7141_v41 }
0x21c0   :  { %v5205_v40 = vpop.eup %5204 }
0x21c1   :  { %4198 = vrot.lane.b32.xlu2 %v5205_v40, %s5766_s9 }
0x221b   :  { %v4199_v54 = vpop.permute.xlu2 %4198 }
0x221c   :  { %v4201_v55 = vmul.f32 %v4199_v54, %v4182_v20 }
0x221e   :  { %4203 = vrot.lane.b32.xlu1 %v4201_v55, %s5769_s7 }
0x2290   :  { %v4204_v47 = vpop.permute.xlu1 %4203 }
0x2291   :  { %4939 = vmatmul.msk.f32.vlgmr.msra.gmra.mxu1 %vm245_vm0, %v4204_v47  ;;  %4940 = vmatmul.msk.f32.vlgmr.msra.gmra.mxu3 %vm245_vm0, %v4204_v47 }
0x2292   :  { %4941 = vmatmul.msk.f32.vlgmr.msra.gmra.mxu2 %vm245_vm0, %v4204_v47 }
0x2314   :  { %v4291_v25 = vpop.f32.mrf.mxu3 }
0x2315   :  { %v7150_v22 = vadd.f32 %v7028_v35, %v4291_v25 }
0x2317   :  { %v4317_v52 = vperm.slane %v7150_v22, 0  ;;  %v4315_v4 = vrot.slane %v7150_v22, 1 }
0x2319   :  { %4325 = vrot.lane.b32.xlu1 %v4317_v52, %s5766_s9  ;;  %4319 = vrot.lane.b32.xlu0 %v4317_v52, %s5767_s28  ;;  %v4318_v28 = vperm.slane %v4315_v4, 0 }
0x231b   :  { %4321 = vrot.lane.b32.xlu2 %v4318_v28, %s5767_s28 }
0x2321   :  { %4327 = vrot.lane.b32.xlu0 %v4318_v28, %s5766_s9 }
0x2375   :  { %v4322_v8 = vpop.permute.xlu2 %4321 }
0x2376   :  { %v4332_v0 = vsel %vm418_vm1, %v4315_v4, %v4322_v8 }
0x238b   :  { %v4326_v60 = vpop.permute.xlu1 %4325  ;;  %v4320_v14 = vpop.permute.xlu0 %4319 }
0x238c   :  { %v4331_v59 = vsel %vm418_vm1, %v7150_v22, %v4320_v14 }
0x238d   :  { %v7161_v35 = vsel %vm421_vm2, %v4331_v59, %v4326_v60 }
0x238e   :  { %v4337_v49 = vrot.slane %v7161_v35, 1  ;;  %v4341_v29 = vperm.slane %v7161_v35, 0 }
0x2390   :  { %v4342_v36 = vperm.slane %v4337_v49, 0  ;;  %v4353_v51 = vadd.f32 %v4341_v29, %v5998_v30 }
0x2392   :  { %v4354_v21 = vadd.f32 %v4342_v36, %v6005_v34  ;;  %5206 = vtanh.f32 %v4353_v51 }
0x2393   :  { %v4328_v45 = vpop.permute.xlu0 %4327 }
0x2394   :  { %5208 = vtanh.f32 %v4354_v21  ;;  %v7169_v62 = vsel %vm421_vm2, %v4332_v0, %v4328_v45 }
0x2395   :  { %v4339_v27 = vrot.slane %v7169_v62, 1  ;;  %v4344_v58 = vperm.slane %v7169_v62, 0 }
0x2397   :  { %v4345_v2 = vperm.slane %v4339_v27, 0  ;;  %v4356_v39 = vadd.f32 %v4344_v58, %v6010_v43 }
0x2398   :  { %v5207_v6 = vpop.eup %5206 }
0x2399   :  { %v4357_v30 = vadd.f32 %v4345_v2, %v6022_v48  ;;  %5210 = vtanh.f32 %v4356_v39  ;;  %v4365_v9 = vmul.f32 %v7059_v23, %v5207_v6 }
0x239a   :  { %v5209_v38 = vpop.eup %5208 }
0x239b   :  { %5212 = vtanh.f32 %v4357_v30  ;;  %v4371_v61 = vsel %vm245_vm0, %v4365_v9, 0.0  ;;  %v4366_v20 = vmul.f32 %v7066_v57, %v5209_v38 }
0x239c   :  { %4372 = vadd.xlane.f32.xlu0 %v4371_v61 }
0x239d   :  { %v4374_v11 = vsel %vm245_vm0, %v4366_v20, 0.0 }
0x239e   :  { %4375 = vadd.xlane.f32.xlu2 %v4374_v11 }
0x239f   :  { %v5211_v50 = vpop.eup %5210 }
0x23a0   :  { %v4368_v43 = vmul.f32 %v7059_v23, %v5211_v50 }
0x23a1   :  { %v5213_v56 = vpop.eup %5212 }
0x23a2   :  { %v4369_v40 = vmul.f32 %v7066_v57, %v5213_v56  ;;  %v4380_v55 = vsel %vm245_vm0, %v4368_v43, 0.0 }
0x23a4   :  { %v4383_v54 = vsel %vm245_vm0, %v4369_v40, 0.0 }
0x23a5   :  { %4384 = vadd.xlane.f32.xlu1 %v4383_v54 }
0x23a6   :  { %4381 = vadd.xlane.f32.xlu2 %v4380_v55 }
0x240f   :  { %v4373_v47 = vpop.xlane.xlu0 %4372 }
0x2410   :  { %v4389_v25 = vadd.f32 %v7077_v13, %v4373_v47 }
0x2411   :  { %v4376_v52 = vpop.xlane.xlu2 %4375 }
0x2412   :  { %v4395_v4 = vsel %vm493_vm3, %v4389_v25, -inf  ;;  %v4390_v28 = vadd.f32 %v7084_v16, %v4376_v52 }
0x2413   :  { %v4396_v60 = vrot.slane %v4395_v4, 4 }
0x2414   :  { %v4402_v14 = vsel %vm493_vm3, %v4390_v28, -inf }
0x2415   :  { %v4397_v23 = vmax.f32 %v4395_v4, %v4396_v60  ;;  %v4403_v59 = vrot.slane %v4402_v14, 4 }
0x2417   :  { %v4398_v57 = vrot.slane %v4397_v23, 2  ;;  %v4404_v49 = vmax.f32 %v4402_v14, %v4403_v59 }
0x2418   :  { %v4385_v29 = vpop.xlane.xlu1 %4384 }
0x2419   :  { %v4399_v8 = vmax.f32 %v4397_v23, %v4398_v57  ;;  %v4405_v36 = vrot.slane %v4404_v49, 2  ;;  %v4393_v51 = vadd.f32 %v7091_v18, %v4385_v29  ;;  %v4382_v21 = vpop.xlane.xlu2 %4381 }
0x241a   :  { %v4392_v13 = vadd.f32 %v7097_v10, %v4382_v21 }
0x241b   :  { %v4400_v0 = vrot.slane %v4399_v8, 1  ;;  %v4406_v45 = vmax.f32 %v4404_v49, %v4405_v36  ;;  %v4423_v27 = vsel %vm493_vm3, %v4393_v51, -inf }
0x241c   :  { %v4424_v16 = vrot.slane %v4423_v27, 4  ;;  %v4416_v58 = vsel %vm493_vm3, %v4392_v13, -inf }
0x241d   :  { %v4401_v2 = vmax.f32 %v4399_v8, %v4400_v0  ;;  %v4407_v39 = vrot.slane %v4406_v45, 1  ;;  %v4417_v6 = vrot.slane %v4416_v58, 4 }
0x241e   :  { %v4425_v30 = vmax.f32 %v4423_v27, %v4424_v16 }
0x241f   :  { %v4437_v9 = vsub.f32 %v4389_v25, %v4401_v2  ;;  %v4408_v38 = vmax.f32 %v4406_v45, %v4407_v39  ;;  %v4418_v61 = vmax.f32 %v4416_v58, %v4417_v6 }
0x2420   :  { %v4426_v20 = vrot.slane %v4425_v30, 2 }
0x2421   :  { %v4443_v11 = vmul.f32 1.442695, %v4437_v9  ;;  %v4438_v18 = vsub.f32 %v4390_v28, %v4408_v38  ;;  %v4419_v50 = vrot.slane %v4418_v61, 2 }
0x2422   :  { %v4427_v56 = vmax.f32 %v4425_v30, %v4426_v20 }
0x2423   :  { %5214 = vpow2.f32 %v4443_v11  ;;  %v4445_v10 = vmul.f32 1.442695, %v4438_v18  ;;  %v4420_v43 = vmax.f32 %v4418_v61, %v4419_v50 }
0x2424   :  { %v4428_v40 = vrot.slane %v4427_v56, 1 }
0x2425   :  { %5216 = vpow2.f32 %v4445_v10  ;;  %v4421_v54 = vrot.slane %v4420_v43, 1 }
0x2426   :  { %v4429_v55 = vmax.f32 %v4427_v56, %v4428_v40 }
0x2427   :  { %v4422_v47 = vmax.f32 %v4420_v43, %v4421_v54 }
0x2428   :  { %v4441_v52 = vsub.f32 %v4393_v51, %v4429_v55 }
0x2429   :  { %v7191_v4 = vpop.eup %5214  ;;  %v4440_v60 = vsub.f32 %v4392_v13, %v4422_v47 }
0x242a   :  { %v4455_v25 = vsel %vm493_vm3, %v7191_v4, 0.0  ;;  %v4451_v14 = vmul.f32 1.442695, %v4441_v52 }
0x242b   :  { %v7195_v23 = vpop.eup %5216  ;;  %v4456_v28 = vrot.slane %v4455_v25, 4  ;;  %v4449_v59 = vmul.f32 1.442695, %v4440_v60 }
0x242c   :  { %v4462_v57 = vsel %vm493_vm3, %v7195_v23, 0.0  ;;  %5218 = vpow2.f32 %v4451_v14 }
0x242d   :  { %v4457_v49 = vadd.f32 %v4456_v28, %v4455_v25  ;;  %v4463_v29 = vrot.slane %v4462_v57, 4  ;;  %5220 = vpow2.f32 %v4449_v59 }
0x242f   :  { %v4458_v8 = vrot.slane %v4457_v49, 2  ;;  %v4464_v36 = vadd.f32 %v4463_v29, %v4462_v57 }
0x2431   :  { %v4459_v51 = vadd.f32 %v4458_v8, %v4457_v49  ;;  %v4465_v21 = vrot.slane %v4464_v36, 2 }
0x2432   :  { %v7199_v13 = vpop.eup %5218 }
0x2433   :  { %v7201_v0 = vpop.eup %5220  ;;  %v4460_v45 = vrot.slane %v4459_v51, 1  ;;  %v4466_v27 = vadd.f32 %v4465_v21, %v4464_v36  ;;  %v4483_v16 = vsel %vm493_vm3, %v7199_v13, 0.0 }
0x2434   :  { %v4484_v58 = vrot.slane %v4483_v16, 4  ;;  %v4476_v2 = vsel %vm493_vm3, %v7201_v0, 0.0 }
0x2435   :  { %v4461_v39 = vadd.f32 %v4460_v45, %v4459_v51  ;;  %v4467_v6 = vrot.slane %v4466_v27, 1  ;;  %v4477_v30 = vrot.slane %v4476_v2, 4 }
0x2436   :  { %v4485_v9 = vadd.f32 %v4484_v58, %v4483_v16 }
0x2437   :  { %5222 = vrcp.f32 %v4461_v39  ;;  %v4468_v38 = vadd.f32 %v4467_v6, %v4466_v27  ;;  %v4478_v61 = vadd.f32 %v4477_v30, %v4476_v2  ;;  %v4508_v25 = vand.u32 2147483648, %v4461_v39 }
0x2438   :  { %v4486_v20 = vrot.slane %v4485_v9, 2  ;;  %v4506_v28 = vand.u32 2147483647, %v4461_v39  ;;  %vm4502_vm15 = vweird.f32 %v4461_v39 }
0x2439   :  { %5224 = vrcp.f32 %v4468_v38  ;;  %v4479_v11 = vrot.slane %v4478_v61, 2  ;;  %v4523_v57 = vand.u32 2147483648, %v4468_v38  ;;  %v4521_v8 = vand.u32 2147483647, %v4468_v38 }
0x243a   :  { %v4487_v18 = vadd.f32 %v4486_v20, %v4485_v9  ;;  %v4509_v36 = vor.u32 1.1754944e-38, %v4508_v25  ;;  %vm4507_vm6 = vcmp.eq.f32.partialorder %v4506_v28, 8.507059e+37  ;;  %vm4517_vm7 = vweird.f32 %v4468_v38 }
0x243b   :  { %v4480_v50 = vadd.f32 %v4479_v11, %v4478_v61  ;;  %v4524_v58 = vor.u32 1.1754944e-38, %v4523_v57  ;;  %vm4522_vm11 = vcmp.eq.f32.partialorder %v4521_v8, 8.507059e+37 }
0x243c   :  { %v4488_v56 = vrot.slane %v4487_v18, 1 }
0x243d   :  { %v5223_v10 = vpop.eup %5222  ;;  %v4481_v43 = vrot.slane %v4480_v50, 1 }
0x243e   :  { %v4489_v40 = vadd.f32 %v4488_v56, %v4487_v18  ;;  %v4498_v54 = vmul.f32 %v5223_v10, %v4461_v39  ;;  %vm4503_vm1 = vweird.f32 %v5223_v10 }
0x243f   :  { %v5225_v55 = vpop.eup %5224  ;;  %v4482_v47 = vadd.f32 %v4481_v43, %v4480_v50  ;;  %vm4504_vm5 = vmor %vm4502_vm15, %vm4503_vm1 }
0x2440   :  { %5226 = vrcp.f32 %v4489_v40  ;;  %v4499_v52 = vsub.f32 1.0, %v4498_v54  ;;  %v4513_v60 = vmul.f32 %v5225_v55, %v4468_v38  ;;  %vm4518_vm4 = vweird.f32 %v5225_v55 }
0x2441   :  { %5228 = vrcp.f32 %v4482_v47  ;;  %vm4519_vm8 = vmor %vm4517_vm7, %vm4518_vm4  ;;  %v4568_v11 = vand.u32 2147483648, %v4489_v40  ;;  %v4566_v38 = vand.u32 2147483647, %v4489_v40  ;;  %v4553_v56 = vand.u32 2147483648, %v4482_v47 }
0x2442   :  { %v4500_v14 = vmul.f32 %v5223_v10, %v4499_v52  ;;  %v4514_v59 = vsub.f32 1.0, %v4513_v60  ;;  %v4551_v43 = vand.u32 2147483647, %v4482_v47  ;;  %vm4562_vm14 = vweird.f32 %v4489_v40 }
0x2443   :  { %vm4547_vm15 = vweird.f32 %v4482_v47  ;;  %vm4567_vm4 = vcmp.eq.f32.partialorder %v4566_v38, 8.507059e+37 }
0x2444   :  { %v4501_v49 = vadd.f32 %v5223_v10, %v4500_v14  ;;  %v4515_v29 = vmul.f32 %v5225_v55, %v4514_v59 }
0x2446   :  { %v5227_v51 = vpop.eup %5226  ;;  %v4505_v21 = vsel %vm4504_vm5, %v5223_v10, %v4501_v49  ;;  %v4516_v45 = vadd.f32 %v5225_v55, %v4515_v29 }
0x2447   :  { %v5229_v27 = vpop.eup %5228  ;;  %v4510_v16 = vsel %vm4507_vm6, %v4509_v36, %v4505_v21  ;;  %v4558_v2 = vmul.f32 %v5227_v51, %v4489_v40  ;;  %vm4563_vm12 = vweird.f32 %v5227_v51  ;;  %vm4552_vm6 = vcmp.eq.f32.partialorder %v4551_v43, 8.507059e+37 }
0x2448   :  { %v4511_v6 = vmul.f32 %v7191_v4, %v4510_v16  ;;  %v4520_v39 = vsel %vm4519_vm8, %v5225_v55, %v4516_v45  ;;  %v4543_v30 = vmul.f32 %v5229_v27, %v4482_v47  ;;  %vm4548_vm13 = vweird.f32 %v5229_v27  ;;  %vm4564_vm1 = vmor %vm4562_vm14, %vm4563_vm12  ;;  %v5471_v47 = vld [vmem:[#allocation5 + $0x8] sm:$0xff] }
0x2449   :  { %v4525_v9 = vsel %vm4522_vm11, %v4524_v58, %v4520_v39  ;;  %v4559_v61 = vsub.f32 1.0, %v4558_v2  ;;  %v4569_v4 = vor.u32 1.1754944e-38, %v4568_v11  ;;  %vm4549_vm5 = vmor %vm4547_vm15, %vm4548_vm13  ;;  %v1003_v16 = vrot.slane %v6290_v17, 2 }
0x244a   :  { %4589 = vperm.xlu0 %4966, %v4511_v6   ;;  %v4526_v20 = vmul.f32 %v7195_v23, %v4525_v9  ;;  %v4544_v18 = vsub.f32 1.0, %v4543_v30  ;;  %v4554_v23 = vor.u32 1.1754944e-38, %v4553_v56  ;;  %v1558_v6 = vrot.slane %v6418_v53, 2 }
0x244b   :  { %v4560_v50 = vmul.f32 %v5227_v51, %v4559_v61  ;;  %v1560_v39 = vrot.slane %v6426_v42, 2  ;;  %v3782_v30 = vrot.slane %v7042_v37, 2  ;;  %v2116_v61 = vrot.slane %v6623_v33, 2 }
0x244c   :  { %4615 = vperm.xlu1 %4965, %v4526_v20   ;;  %v4545_v10 = vmul.f32 %v5229_v27, %v4544_v18  ;;  %v1008_v17 = vperm.slane %v1003_v16, 0  ;;  %v1563_v53 = vperm.slane %v1558_v6, 0 }
0x244d   :  { %v4561_v54 = vadd.f32 %v5227_v51, %v4560_v50  ;;  %v3787_v42 = vperm.slane %v3782_v30, 0  ;;  %v7229_v43 = vperm.slane %v2116_v61, 0 }
0x244e   :  { %v4546_v55 = vadd.f32 %v5229_v27, %v4545_v10  ;;  %v7227_v10 = vperm.slane %v1560_v39, 0 }
0x244f   :  { %v4565_v52 = vsel %vm4564_vm1, %v5227_v51, %v4561_v54 }
0x2450   :  { %v4570_v60 = vsel %vm4567_vm4, %v4569_v4, %v4565_v52  ;;  %v4550_v25 = vsel %vm4549_vm5, %v5229_v27, %v4546_v55  ;;  %v5474_v52 = vld [vmem:[#allocation2 + $0x8] sm:$0xff] }
0x2451   :  { %v4571_v14 = vmul.f32 %v7199_v13, %v4570_v60  ;;  %v4555_v28 = vsel %vm4552_vm6, %v4554_v23, %v4550_v25  ;;  %v5472_v13 = vld [vmem:[#allocation2] sm:$0xff] }
0x2452   :  { %v4556_v59 = vmul.f32 %v7201_v0, %v4555_v28  ;;  %v429_v0 = vrot.slane %v6013_v44, 2  ;;  %v2114_v44 = vrot.slane %v6615_v26, 2  ;;  %v2672_v26 = vrot.slane %v6753_v1, 2 }
0x2453   :  { %4620 = vperm.xlu2 %4964, %v4571_v14   ;;  %v3784_v1 = vrot.slane %v7050_v63, 2 }
0x2454   :  { %314 = vrot.lane.b32.xlu1 %v6005_v34, %s5767_s28  ;;  %4594 = vperm.xlu0 %4966, %v4556_v59   ;;  %v5473_v34 = vld [vmem:[#allocation5] sm:$0xff]  ;;  %v435_v11 = vperm.slane %v429_v0, 0  ;;  %v2119_v37 = vperm.slane %v2114_v44, 0  ;;  %v2678_v63 = vperm.slane %v2672_v26, 0 }
0x2455   :  { %v3790_v16 = vperm.slane %v3784_v1, 0 }
0x245c   :  { %316 = vrot.lane.b32.xlu0 %v6022_v48, %s5767_s28  ;;  %v1005_v48 = vrot.slane %v6298_v3, 2  ;;  %v3226_v3 = vrot.slane %v6928_v46, 2 }
0x245e   :  { %v1011_v56 = vperm.slane %v1005_v48, 0  ;;  %v3231_v25 = vperm.slane %v3226_v3, 0 }
0x24ad   :  { %v4621_v40 = vpop.permute.xlu2 %4620 }
0x24ae   :  { %v4624_v57 = vmul.f32 %v5471_v47, %v4621_v40  ;;  %v3228_v40 = vrot.slane %v6936_v19, 2 }
0x24b0   :  { %v4632_v49 = vsel %vm245_vm0, %v4624_v57, 0.0 }
0x24b1   :  { %v4633_v29 = vrot.slane %v4632_v49, 4 }
0x24b3   :  { %v4634_v8 = vadd.f32 %v4633_v29, %v4632_v49 }
0x24b5   :  { %v4635_v58 = vrot.slane %v4634_v8, 2 }
0x24b7   :  { %v4636_v50 = vadd.f32 %v4635_v58, %v4634_v8 }
0x24b9   :  { %v4637_v14 = vrot.slane %v4636_v50, 1 }
0x24bb   :  { %v4638_v19 = vadd.f32 %v4637_v14, %v4636_v50 }
0x24bc   :  { %v4590_v36 = vpop.permute.xlu0 %4589 }
0x24bd   :  { %v4597_v51 = vmul.f32 %v5472_v13, %v4590_v36  ;;  %v2670_v36 = vrot.slane %v6745_v15, 2  ;;  %v4340_v13 = vrot.slane %v7169_v62, 2 }
0x24be   :  { %v4616_v21 = vpop.permute.xlu1 %4615 }
0x24bf   :  { %v4599_v45 = vsel %vm245_vm0, %v4597_v51, 0.0  ;;  %v4623_v27 = vmul.f32 %v5473_v34, %v4616_v21  ;;  %v4338_v34 = vrot.slane %v7161_v35, 2  ;;  %v2675_v35 = vperm.slane %v2670_v36, 0 }
0x24c0   :  { %v4600_v2 = vrot.slane %v4599_v45, 4 }
0x24c1   :  { %v4625_v9 = vsel %vm245_vm0, %v4623_v27, 0.0  ;;  %v7248_v27 = vld [vmem:[%s8081_s14 + $0x2] ss:$0 sm:$0xff]  ;;  %s4842_s14 = sshll.u32 %s5773_s22, 4  ;;  %s4843_s14 = int_to_ptr.vmem [resolvable:$true] %s4842_s14 }
0x24c2   :  { %v4626_v20 = vrot.slane %v4625_v9, 4  ;;  %v4601_v18 = vadd.f32 %v4600_v2, %v4599_v45  ;;  %v3234_v45 = vperm.slane %v3228_v40, 0 }
0x24c4   :  { %v4627_v38 = vadd.f32 %v4626_v20, %v4625_v9  ;;  %v4602_v55 = vrot.slane %v4601_v18, 2  ;;  %v4346_v9 = vperm.slane %v4340_v13, 0 }
0x24c6   :  { %v4628_v54 = vrot.slane %v4627_v38, 2  ;;  %v7232_v33 = vpop.permute.xlu1 %314  ;;  %v4595_v4 = vpop.permute.xlu0 %4594  ;;  %v4603_v51 = vadd.f32 %v4602_v55, %v4601_v18  ;;  %v4343_v18 = vperm.slane %v4338_v34, 0 }
0x24c7   :  { %v4598_v23 = vmul.f32 %v5474_v52, %v4595_v4  ;;  %v1020_v46 = vadd.f32 %v1008_v17, %v7232_v33  ;;  %v3799_v60 = vadd.f32 %v3787_v42, %v7232_v33  ;;  %v1575_v59 = vadd.f32 %v1563_v53, %v7232_v33 }
0x24c8   :  { %v4629_v28 = vadd.f32 %v4628_v54, %v4627_v38  ;;  %v2131_v57 = vadd.f32 %v2119_v37, %v7232_v33  ;;  %v3243_v8 = vadd.f32 %v3231_v25, %v7232_v33  ;;  %v4604_v58 = vrot.slane %v4603_v51, 1 }
0x24c9   :  { %v4606_v47 = vsel %vm245_vm0, %v4598_v23, 0.0  ;;  %5230 = vtanh.f32 %v1020_v46  ;;  %v2687_v46 = vadd.f32 %v2675_v35, %v7232_v33  ;;  %v4355_v25 = vadd.f32 %v4343_v18, %v7232_v33  ;;  %v7318_v35 = vpop.f32.mrf.mxu1 }
0x24ca   :  { %v4630_v49 = vrot.slane %v4629_v28, 1  ;;  %v4607_v29 = vrot.slane %v4606_v47, 4  ;;  %5232 = vtanh.f32 %v3799_v60  ;;  %v4605_v42 = vadd.f32 %v4604_v58, %v4603_v51 }
0x24cb   :  { %5234 = vtanh.f32 %v1575_v59 }
0x24cc   :  { %v4608_v21 = vadd.f32 %v4607_v29, %v4606_v47  ;;  %v4631_v0 = vadd.f32 %v4630_v49, %v4629_v28  ;;  %5236 = vtanh.f32 %v2131_v57 }
0x24cd   :  { %5238 = vtanh.f32 %v3243_v8  ;;  %v7286_v8 = vld [vmem:[%s8086_s19] ss:$0 sm:$0xff] }
0x24ce   :  { %v4609_v15 = vrot.slane %v4608_v21, 2  ;;  %v317_v48 = vpop.permute.xlu0 %316  ;;  %v4688_v62 = vsel %vm783_vm9, %v4638_v19, %v4631_v0  ;;  %v7296_v0 = vadd.f32 %v7286_v8, %v6517_v7 }
0x24cf   :  { %4689 = vrot.lane.b32.xlu2 %v4688_v62, %s5769_s7  ;;  %v447_v2 = vadd.f32 %v435_v11, %v317_v48  ;;  %v1023_v6 = vadd.f32 %v1011_v56, %v317_v48  ;;  %v2690_v39 = vadd.f32 %v2678_v63, %v317_v48  ;;  %v5231_v30 = vpop.eup %5230  ;;  %v3246_v61 = vadd.f32 %v3234_v45, %v317_v48 }
0x24d0   :  { %v4610_v44 = vadd.f32 %v4609_v15, %v4608_v21  ;;  %v5233_v20 = vpop.eup %5232  ;;  %v7253_v17 = vmul.f32 %v5231_v30, %v7248_v27  ;;  %v3802_v3 = vadd.f32 %v3790_v16, %v317_v48  ;;  %v4358_v11 = vadd.f32 %v4346_v9, %v317_v48  ;;  %v4311_v9 = vpop.f32.mrf.mxu2 }
0x24d1   :  { %5240 = vtanh.f32 %v447_v2  ;;  %v5235_v50 = vpop.eup %5234  ;;  %v7256_v53 = vmul.f32 %v5233_v20, %v7248_v27  ;;  %v1578_v26 = vadd.f32 %v7227_v10, %v317_v48  ;;  %v2134_v52 = vadd.f32 %v7229_v43, %v317_v48 }
0x24d2   :  { %v4611_v38 = vrot.slane %v4610_v44, 1  ;;  %5242 = vtanh.f32 %v1023_v6  ;;  %v5237_v56 = vpop.eup %5236  ;;  %v7259_v37 = vmul.f32 %v5235_v50, %v7248_v27  ;;  %v427_v16 = vrot.slane %v6001_v31, 2 }
0x24d3   :  { %5244 = vtanh.f32 %v2690_v39  ;;  %v5239_v54 = vpop.eup %5238  ;;  %v7263_v55 = vmul.f32 %v5237_v56, %v7248_v27  ;;  %v1447_v7 = vsel %vm421_vm2, %v7296_v0, -inf  ;;  %v1042_v50 = vsel %vm245_vm0, %v7253_v17, 0.0 }
0x24d4   :  { %v4612_v4 = vadd.f32 %v4611_v38, %v4610_v44  ;;  %5246 = vtanh.f32 %v3246_v61  ;;  %v7267_v23 = vmul.f32 %v5239_v54, %v7248_v27  ;;  %v432_v62 = vperm.slane %v427_v16, 0 }
0x24d5   :  { %5248 = vtanh.f32 %v3802_v3  ;;  %v3821_v16 = vsel %vm245_vm0, %v7256_v53, 0.0 }
0x24d6   :  { %v4684_v60 = vsel %vm783_vm9, %v4612_v4, %v4605_v42  ;;  %5250 = vtanh.f32 %v4358_v11  ;;  %v444_v58 = vadd.f32 %v432_v62, %v7232_v33  ;;  %v2153_v62 = vsel %vm245_vm0, %v7263_v55, 0.0 }
0x24d7   :  { %v5241_v10 = vpop.eup %5240  ;;  %5252 = vtanh.f32 %v1578_v26  ;;  %v3265_v53 = vsel %vm245_vm0, %v7267_v23, 0.0 }
0x24d8   :  { %v5243_v14 = vpop.eup %5242  ;;  %v468_v28 = vmul.f32 %v5241_v10, %v7248_v27  ;;  %5254 = vtanh.f32 %v2134_v52 }
0x24d9   :  { %v5245_v59 = vpop.eup %5244  ;;  %v7274_v43 = vmul.f32 %v5243_v14, %v7248_v27  ;;  %5256 = vtanh.f32 %v2687_v46 }
0x24da   :  { %v5247_v40 = vpop.eup %5246  ;;  %v484_v1 = vsel %vm245_vm0, %v468_v28, 0.0  ;;  %v7278_v47 = vmul.f32 %v5245_v59, %v7248_v27  ;;  %5258 = vtanh.f32 %v4355_v25  ;;  %v8125_v28 = vld [vmem:[#allocation32_spill] sm:$0xff] }
0x24db   :  { %v5249_v57 = vpop.eup %5248  ;;  %485 = vadd.xlane.f32.xlu1 %v484_v1  ;;  %v7281_v49 = vmul.f32 %v5247_v40, %v7248_v27  ;;  %5260 = vtanh.f32 %v444_v58  ;;  %v7333_v59 = vadd.f32 %v7286_v8, %v8125_v28 }
0x24dc   :  { %v5251_v29 = vpop.eup %5250  ;;  %v7289_v36 = vmul.f32 %v5249_v57, %v7248_v27  ;;  %v2718_v58 = vsel %vm245_vm0, %v7278_v47, 0.0 }
0x24dd   :  { %v5253_v13 = vpop.eup %5252  ;;  %v7292_v51 = vmul.f32 %v5251_v29, %v7248_v27  ;;  %v2003_v57 = vsel %vm421_vm2, %v7333_v59, -inf }
0x24de   :  { %v5255_v21 = vpop.eup %5254  ;;  %v7299_v19 = vmul.f32 %v5253_v13, %v7248_v27  ;;  %v7339_v13 = vadd.f32 %v7286_v8, %v6842_v12  ;;  %v1597_v12 = vsel %vm245_vm0, %v7259_v37, 0.0  ;;  %v5770_v37 = vmov 96  }
0x24df   :  { %v5257_v63 = vpop.eup %5256  ;;  %v7302_v45 = vmul.f32 %v5255_v21, %v7248_v27  ;;  %4968 = vset.pattern.permute.xlu2 %v5770_v37  ;;  %4967 = vset.pattern.permute.xlu1 %v5770_v37  ;;  %v3830_v47 = vsel %vm245_vm0, %v7289_v36, 0.0  ;;  %v7378_v36 = vadd.f32 %v7286_v8, %v6999_v5 }
0x24e0   :  { %v5259_v34 = vpop.eup %5258  ;;  %v7306_v15 = vmul.f32 %v5257_v63, %v7248_v27  ;;  %v2559_v21 = vsel %vm421_vm2, %v7339_v13, -inf }
0x24e1   :  { %v7309_v48 = vmul.f32 %v5259_v34, %v7248_v27  ;;  %v5261_v2 = vpop.eup %5260 }
0x24e2   :  { %v465_v6 = vmul.f32 %v5261_v2, %v7248_v27  ;;  %v8124_v27 = vld [vmem:[#allocation30_spill] sm:$0xff] }
0x24e3   :  { %1448 = vmax.xlane.f32.xlu1 %v1447_v7  ;;  %v890_v18 = vadd.f32 %v7286_v8, %v8124_v27  ;;  %v1051_v7 = vsel %vm245_vm0, %v7274_v43, 0.0  ;;  %v3274_v43 = vsel %vm245_vm0, %v7281_v49, 0.0  ;;  %v4386_v49 = vsel %vm245_vm0, %v7292_v51, 0.0 }
0x24e4   :  { %v475_v39 = vsel %vm245_vm0, %v465_v6, 0.0  ;;  %v8126_v6 = vld [vmem:[#allocation27_spill] sm:$0xff]  ;;  %v7385_v51 = vadd.f32 %v7286_v8, %v7318_v35 }
0x24e5   :  { %v892_v3 = vsel %vm421_vm2, %v890_v18, -inf }
0x24e6   :  { %v4227_v5 = vsel %vm421_vm2, %v7385_v51, -inf }
0x24f8   :  { %476 = vadd.xlane.f32.xlu2 %v475_v39  ;;  %v4900_v39 = vmul.f32 -1.442695, %v8126_v6 }
0x2529   :  { %v4690_v31 = vpop.permute.xlu2 %4689 }
0x252a   :  { %v4692_v30 = vsel %vm245_vm0, %v4684_v60, %v4690_v31 }
0x252b   :  { %4943 = vmatmul.msk.f32.vlgmr.msrb.gmra.mxu1 %vm793_vm10, %v4692_v30 }
0x254e   :  { %v7359_v2 = vpop.xlane.xlu1 %485 }
0x2556   :  { %v1449_v55 = vpop.xlane.xlu1 %1448 }
0x25a8   :  { %v4713_v44 = vpop.f32.mrf.mxu1 }
0x25a9   :  { %v4714_v61 = vadd.f32 %v4713_v44, %v4311_v9  ;;  %v8127_v44 = vld [vmem:[#allocation28_spill] sm:$0xff] }
0x25ab   :  { %v4720_v20 = vadd.f32 %v6229_v24, %v4714_v61  ;;  %v4906_v61 = vmul.f32 -1.442695, %v8127_v44 }
0x25ad   :  { %5262 = vtanh.f32 %v4720_v20  ;;  %v4944_v38 = vmul.f32 -1.442695, %v4720_v20 }
0x25af   :  { %5264 = vpow2.f32 %v4944_v38  ;;  %v8128_v38 = vld [vmem:[#allocation29_spill] sm:$0xff] }
0x25b3   :  { %v5263_v33 = vpop.eup %5262 }
0x25b4   :  { %4743 = vrot.lane.b32.xlu0 %v5263_v33, %s5766_s9 }
0x25b5   :  { %v5265_v11 = vpop.eup %5264 }
0x25b6   :  { %v4724_v56 = vadd.f32 1.0, %v5265_v11  ;;  %v4912_v11 = vmul.f32 -1.442695, %v8128_v38 }
0x25b8   :  { %5266 = vrcp.f32 %v4724_v56  ;;  %v4736_v52 = vand.u32 2147483648, %v4724_v56  ;;  %vm4730_vm7 = vweird.f32 %v4724_v56  ;;  %v4734_v46 = vand.u32 2147483647, %v4724_v56 }
0x25ba   :  { %v4737_v25 = vor.u32 1.1754944e-38, %v4736_v52  ;;  %vm4735_vm11 = vcmp.eq.f32.partialorder %v4734_v46, 8.507059e+37 }
0x25be   :  { %v5267_v24 = vpop.eup %5266 }
0x25bf   :  { %v4726_v42 = vmul.f32 %v5267_v24, %v4724_v56  ;;  %vm4731_vm10 = vweird.f32 %v5267_v24 }
0x25c0   :  { %vm4732_vm8 = vmor %vm4730_vm7, %vm4731_vm10 }
0x25c1   :  { %v4727_v26 = vsub.f32 1.0, %v4726_v42 }
0x25c3   :  { %v4728_v54 = vmul.f32 %v5267_v24, %v4727_v26 }
0x25c5   :  { %v4729_v4 = vadd.f32 %v5267_v24, %v4728_v54 }
0x25c7   :  { %v4733_v60 = vsel %vm4732_vm8, %v5267_v24, %v4729_v4  ;;  %v8129_v24 = vld [vmem:[#allocation31_spill] sm:$0xff] }
0x25c8   :  { %v7327_v10 = vsel %vm4735_vm11, %v4737_v25, %v4733_v60  ;;  %v4918_v42 = vmul.f32 -1.442695, %v8129_v24 }
0x25c9   :  { %v4741_v23 = vmul.f32 %v7327_v10, %v7141_v41  ;;  %v3115_v41 = vsel %vm421_vm2, %v7378_v36, -inf }
0x25de   :  { %893 = vmax.xlane.f32.xlu0 %v892_v3 }
0x25e6   :  { %1043 = vadd.xlane.f32.xlu0 %v1042_v50 }
0x2626   :  { %v4744_v17 = vpop.permute.xlu0 %4743 }
0x2627   :  { %v4746_v14 = vmul.f32 %v4744_v17, %v7327_v10 }
0x2629   :  { %4748 = vrot.lane.b32.xlu1 %v4746_v14, %s5769_s7  ;;  %v1450_v14 = vsub.f32 %v7296_v0, %v1449_v55 }
0x2651   :  { %v894_v40 = vpop.xlane.xlu0 %893 }
0x2652   :  { %v895_v1 = vsub.f32 %v890_v18, %v894_v40 }
0x2653   :  { %2004 = vmax.xlane.f32.xlu1 %v2003_v57 }
0x2654   :  { %v896_v29 = vmul.f32 1.442695, %v895_v1 }
0x2656   :  { %5268 = vpow2.f32 %v896_v29  ;;  %v1451_v29 = vmul.f32 1.442695, %v1450_v14 }
0x2657   :  { %5270 = vpow2.f32 %v4900_v39 }
0x265b   :  { %2560 = vmax.xlane.f32.xlu1 %v2559_v21 }
0x265c   :  { %v7343_v63 = vpop.eup %5268 }
0x265d   :  { %v898_v34 = vsel %vm421_vm2, %v7343_v63, 0.0  ;;  %v5271_v9 = vpop.eup %5270 }
0x265e   :  { %899 = vadd.xlane.f32.xlu2 %v898_v34  ;;  %v765_v20 = vadd.f32 1.0, %v5271_v9 }
0x2660   :  { %v777_v46 = vand.u32 2147483648, %v765_v20  ;;  %vm771_vm13 = vweird.f32 %v765_v20  ;;  %v775_v60 = vand.u32 2147483647, %v765_v20 }
0x2662   :  { %v778_v1 = vor.u32 1.1754944e-38, %v777_v46  ;;  %vm776_vm1 = vcmp.eq.f32.partialorder %v775_v60, 8.507059e+37 }
0x2663   :  { %3822 = vadd.xlane.f32.xlu1 %v3821_v16 }
0x2666   :  { %1052 = vadd.xlane.f32.xlu2 %v1051_v7 }
0x266e   :  { %1598 = vadd.xlane.f32.xlu2 %v1597_v12 }
0x2676   :  { %2154 = vadd.xlane.f32.xlu2 %v2153_v62 }
0x267e   :  { %2719 = vadd.xlane.f32.xlu2 %v2718_v58  ;;  %v477_v58 = vpop.xlane.xlu2 %476 }
0x2686   :  { %3266 = vadd.xlane.f32.xlu2 %v3265_v53 }
0x268e   :  { %3275 = vadd.xlane.f32.xlu2 %v3274_v43 }
0x2696   :  { %3831 = vadd.xlane.f32.xlu2 %v3830_v47 }
0x269b   :  { %v4749_v31 = vpop.permute.xlu1 %4748 }
0x269c   :  { %v7370_v30 = vadd.f32 %v4749_v31, %v4741_v23 }
0x269e   :  { %5272 = vtanh.f32 %v7370_v30  ;;  %4387 = vadd.xlane.f32.xlu2 %v4386_v49 }
0x269f   :  { %5274 = vpow2.f32 %v4906_v61 }
0x26a0   :  { %5276 = vrcp.f32 %v765_v20 }
0x26a4   :  { %v5273_v33 = vpop.eup %5272 }
0x26a5   :  { %4754 = vrot.lane.b32.xlu0 %v5273_v33, %s5766_s9  ;;  %v5275_v27 = vpop.eup %5274 }
0x26a6   :  { %3116 = vmax.xlane.f32.xlu2 %v3115_v41  ;;  %v5277_v18 = vpop.eup %5276  ;;  %v1331_v3 = vadd.f32 1.0, %v5275_v27  ;;  %v7413_v27 = vld [vmem:[%s8113_s12 + $0x10] sm:$0xff] }
0x26a7   :  { %v767_v50 = vmul.f32 %v5277_v18, %v765_v20  ;;  %vm772_vm12 = vweird.f32 %v5277_v18 }
0x26a8   :  { %5278 = vrcp.f32 %v1331_v3  ;;  %vm773_vm14 = vmor %vm771_vm13, %vm772_vm12  ;;  %v1343_v12 = vand.u32 2147483648, %v1331_v3  ;;  %vm1337_vm4 = vweird.f32 %v1331_v3  ;;  %v1341_v62 = vand.u32 2147483647, %v1331_v3 }
0x26a9   :  { %v768_v56 = vsub.f32 1.0, %v767_v50  ;;  %5280 = vpow2.f32 %v4912_v11  ;;  %v7418_v50 = vadd.f32 %v477_v58, %v7413_v27 }
0x26aa   :  { %5282 = vpow2.f32 %v4918_v42  ;;  %v1344_v47 = vor.u32 1.1754944e-38, %v1343_v12  ;;  %vm1342_vm6 = vcmp.eq.f32.partialorder %v1341_v62, 8.507059e+37 }
0x26ab   :  { %v769_v26 = vmul.f32 %v5277_v18, %v768_v56 }
0x26ad   :  { %v770_v4 = vadd.f32 %v5277_v18, %v769_v26 }
0x26ae   :  { %4228 = vmax.xlane.f32.xlu2 %v4227_v5  ;;  %v5279_v54 = vpop.eup %5278 }
0x26af   :  { %v5281_v35 = vpop.eup %5280  ;;  %v1333_v52 = vmul.f32 %v5279_v54, %v1331_v3  ;;  %v774_v28 = vsel %vm773_vm14, %v5277_v18, %v770_v4  ;;  %vm1338_vm15 = vweird.f32 %v5279_v54  ;;  %v1606_v18 = vsel %vm245_vm0, %v7299_v19, 0.0  ;;  %v7431_v4 = vld [vmem:[%s8113_s12 + $0x28] sm:$0xff] }
0x26b0   :  { %v5283_v25 = vpop.eup %5282  ;;  %v7391_v17 = vadd.f32 1.0, %v5281_v35  ;;  %v7397_v21 = vsel %vm776_vm1, %v778_v1, %v774_v28  ;;  %vm1339_vm5 = vmor %vm1337_vm4, %vm1338_vm15  ;;  %v508_v19 = vsel %vm493_vm3, %v7418_v50, -inf  ;;  %v492_v14 = vadd.f32 %v7359_v2, %v7431_v4 }
0x26b1   :  { %v1334_v40 = vsub.f32 1.0, %v1333_v52  ;;  %v7394_v57 = vadd.f32 1.0, %v5283_v25  ;;  %v922_v16 = vsub.f32 1.0, %v7397_v21  ;;  %v509_v60 = vrot.slane %v508_v19, 4 }
0x26b2   :  { %5284 = vrcp.f32 %v7391_v17  ;;  %v1898_v38 = vand.u32 2147483648, %v7391_v17  ;;  %vm1892_vm7 = vweird.f32 %v7391_v17  ;;  %v1896_v11 = vand.u32 2147483647, %v7391_v17 }
0x26b3   :  { %v1335_v34 = vmul.f32 %v5279_v54, %v1334_v40  ;;  %5286 = vrcp.f32 %v7394_v57  ;;  %v2454_v35 = vand.u32 2147483648, %v7394_v57  ;;  %vm2448_vm13 = vweird.f32 %v7394_v57 }
0x26b4   :  { %5288 = vpow2.f32 %v1451_v29  ;;  %vm1897_vm12 = vcmp.eq.f32.partialorder %v1896_v11, 8.507059e+37  ;;  %v2452_v52 = vand.u32 2147483647, %v7394_v57  ;;  %v2162_v2 = vsel %vm245_vm0, %v7302_v45, 0.0 }
0x26b5   :  { %v1336_v0 = vadd.f32 %v5279_v54, %v1335_v34  ;;  %v2455_v28 = vor.u32 1.1754944e-38, %v2454_v35  ;;  %v529_v34 = vsel %vm493_vm3, %v492_v14, -inf }
0x26b6   :  { %vm2453_vm1 = vcmp.eq.f32.partialorder %v2452_v52, 8.507059e+37 }
0x26b7   :  { %v1340_v55 = vsel %vm1339_vm5, %v5279_v54, %v1336_v0  ;;  %v1899_v54 = vor.u32 1.1754944e-38, %v1898_v38 }
0x26b8   :  { %v5285_v7 = vpop.eup %5284  ;;  %v1345_v31 = vsel %vm1342_vm6, %v1344_v47, %v1340_v55 }
0x26b9   :  { %v5287_v53 = vpop.eup %5286  ;;  %v1888_v6 = vmul.f32 %v5285_v7, %v7391_v17  ;;  %vm1893_vm10 = vweird.f32 %v5285_v7 }
0x26ba   :  { %v7402_v39 = vpop.eup %5288  ;;  %v2444_v44 = vmul.f32 %v5287_v53, %v7394_v57  ;;  %vm1894_vm8 = vmor %vm1892_vm7, %vm1893_vm10  ;;  %vm2449_vm11 = vweird.f32 %v5287_v53  ;;  %v510_v57 = vmax.f32 %v508_v19, %v509_v60 }
0x26bb   :  { %v1453_v49 = vsel %vm421_vm2, %v7402_v39, 0.0  ;;  %v1889_v9 = vsub.f32 1.0, %v1888_v6  ;;  %vm2450_vm14 = vmor %vm2448_vm13, %vm2449_vm11 }
0x26bc   :  { %v2445_v41 = vsub.f32 1.0, %v2444_v44  ;;  %v511_v12 = vrot.slane %v510_v57, 2 }
0x26bd   :  { %v1890_v33 = vmul.f32 %v5285_v7, %v1889_v9 }
0x26be   :  { %v2446_v5 = vmul.f32 %v5287_v53, %v2445_v41  ;;  %v512_v55 = vmax.f32 %v510_v57, %v511_v12 }
0x26bf   :  { %v1891_v3 = vadd.f32 %v5285_v7, %v1890_v33 }
0x26c0   :  { %v2447_v42 = vadd.f32 %v5287_v53, %v2446_v5 }
0x26c1   :  { %v1895_v24 = vsel %vm1894_vm8, %v5285_v7, %v1891_v3  ;;  %v530_v7 = vrot.slane %v529_v34, 4 }
0x26c2   :  { %v7435_v46 = vsel %vm1897_vm12, %v1899_v54, %v1895_v24  ;;  %v2451_v17 = vsel %vm2450_vm14, %v5287_v53, %v2447_v42 }
0x26c3   :  { %v7444_v1 = vsel %vm2453_vm1, %v2455_v28, %v2451_v17 }
0x26c6   :  { %925 = vperm.xlu2 %4968, %v922_v16   ;;  %v2005_v43 = vpop.xlane.xlu1 %2004  ;;  %v2589_v16 = vsub.f32 1.0, %v7444_v1 }
0x26c7   :  { %v2006_v23 = vsub.f32 %v7333_v59, %v2005_v43  ;;  %v1477_v59 = vsub.f32 1.0, %v1345_v31  ;;  %v531_v43 = vmax.f32 %v529_v34, %v530_v7 }
0x26c9   :  { %v2007_v61 = vmul.f32 1.442695, %v2006_v23  ;;  %v532_v47 = vrot.slane %v531_v43, 2  ;;  %v513_v23 = vrot.slane %v512_v55, 1 }
0x26cb   :  { %5290 = vpow2.f32 %v2007_v61  ;;  %v533_v9 = vmax.f32 %v531_v43, %v532_v47  ;;  %v514_v44 = vmax.f32 %v512_v55, %v513_v23 }
0x26cd   :  { %v534_v41 = vrot.slane %v533_v9, 1 }
0x26ce   :  { %1473 = vperm.xlu2 %4968, %v1345_v31   ;;  %v2561_v29 = vpop.xlane.xlu1 %2560  ;;  %v2709_v31 = vsel %vm245_vm0, %v7306_v15, 0.0  ;;  %v7467_v15 = vadd.f32 %v7286_v8, %v7135_v32 }
0x26cf   :  { %1454 = vadd.xlane.f32.xlu0 %v1453_v49  ;;  %v2562_v0 = vsub.f32 %v7339_v13, %v2561_v29  ;;  %v8130_v49 = vmov 0   ;;  %v535_v38 = vmax.f32 %v533_v9, %v534_v41  ;;  %v1044_v29 = vpop.xlane.xlu0 %1043 }
0x26d0   :  { %v3671_v19 = vsel %vm421_vm2, %v7467_v15, -inf }
0x26d1   :  { %v7408_v20 = vpop.xlane.xlu2 %899  ;;  %v7423_v26 = vpop.eup %5290  ;;  %v2563_v58 = vmul.f32 1.442695, %v2562_v0  ;;  %v541_v24 = vsub.f32 %v492_v14, %v535_v38 }
0x26d2   :  { %v2009_v25 = vsel %vm421_vm2, %v7423_v26, 0.0 }
0x26d3   :  { %5292 = vpow2.f32 %v2563_v58  ;;  %v552_v54 = vmul.f32 1.442695, %v541_v24 }
0x26d6   :  { %1480 = vperm.xlu2 %4968, %v1477_v59   ;;  %v538_v59 = vsub.f32 %v7418_v50, %v514_v44 }
0x26d7   :  { %1607 = vadd.xlane.f32.xlu0 %v1606_v18 }
0x26d8   :  { %v546_v11 = vmul.f32 1.442695, %v538_v59 }
0x26d9   :  { %v1053_v56 = vpop.xlane.xlu2 %1052  ;;  %v7460_v33 = vpop.eup %5292 }
0x26da   :  { %v1059_v62 = vadd.f32 %v1053_v56, %v7431_v4  ;;  %v2565_v3 = vsel %vm421_vm2, %v7460_v33, 0.0  ;;  %5294 = vpow2.f32 %v546_v11 }
0x26db   :  { %5296 = vpow2.f32 %v552_v54 }
0x26dc   :  { %v1095_v6 = vsel %vm493_vm3, %v1059_v62, -inf }
0x26dd   :  { %v1096_v13 = vrot.slane %v1095_v6, 4 }
0x26de   :  { %2029 = vperm.xlu2 %4968, %v7435_v46  }
0x26df   :  { %2010 = vadd.xlane.f32.xlu0 %v2009_v25  ;;  %v1097_v61 = vmax.f32 %v1095_v6, %v1096_v13 }
0x26e0   :  { %v7473_v52 = vpop.eup %5294 }
0x26e1   :  { %v7442_v40 = vpop.xlane.xlu2 %1598  ;;  %v1098_v18 = vrot.slane %v1097_v61, 2  ;;  %v568_v32 = vsel %vm493_vm3, %v7473_v52, 0.0  ;;  %v7479_v14 = vpop.eup %5296 }
0x26e2   :  { %v569_v25 = vrot.slane %v568_v32, 4  ;;  %v589_v57 = vsel %vm493_vm3, %v7479_v14, 0.0 }
0x26e3   :  { %v1099_v56 = vmax.f32 %v1097_v61, %v1098_v18 }
0x26e4   :  { %v570_v28 = vadd.f32 %v569_v25, %v568_v32 }
0x26e5   :  { %v1100_v42 = vrot.slane %v1099_v56, 1 }
0x26e6   :  { %2592 = vperm.xlu2 %4968, %v2589_v16   ;;  %v590_v16 = vrot.slane %v589_v57, 4  ;;  %v571_v0 = vrot.slane %v570_v28, 2 }
0x26e7   :  { %2163 = vadd.xlane.f32.xlu0 %v2162_v2  ;;  %v1101_v35 = vmax.f32 %v1099_v56, %v1100_v42 }
0x26e8   :  { %v591_v12 = vadd.f32 %v590_v16, %v589_v57  ;;  %v572_v2 = vadd.f32 %v571_v0, %v570_v28  ;;  %v7507_v28 = vadd.f32 %v1044_v29, %v7413_v27 }
0x26e9   :  { %v7452_v53 = vpop.xlane.xlu2 %2154  ;;  %v1107_v60 = vsub.f32 %v1059_v62, %v1101_v35 }
0x26ea   :  { %v592_v6 = vrot.slane %v591_v12, 2  ;;  %v573_v47 = vrot.slane %v572_v2, 1 }
0x26eb   :  { %v1118_v17 = vmul.f32 1.442695, %v1107_v60 }
0x26ec   :  { %v593_v13 = vadd.f32 %v592_v6, %v591_v12 }
0x26ed   :  { %5298 = vpow2.f32 %v1118_v17 }
0x26ee   :  { %4970 = vset.pattern.permute.xlu2 %v8130_v49  ;;  %v594_v61 = vrot.slane %v593_v13, 1 }
0x26ef   :  { %2710 = vadd.xlane.f32.xlu0 %v2709_v31  ;;  %v574_v31 = vadd.f32 %v573_v47, %v572_v2 }
0x26f1   :  { %v7458_v45 = vpop.xlane.xlu2 %2719  ;;  %5300 = vrcp.f32 %v574_v31  ;;  %vm631_vm4 = vweird.f32 %v574_v31 }
0x26f3   :  { %v7485_v7 = vpop.eup %5298 }
0x26f4   :  { %v1155_v62 = vsel %vm493_vm3, %v7485_v7, 0.0 }
0x26f5   :  { %v1156_v23 = vrot.slane %v1155_v62, 4 }
0x26f7   :  { %2566 = vadd.xlane.f32.xlu0 %v2565_v3  ;;  %v1157_v9 = vadd.f32 %v1156_v23, %v1155_v62  ;;  %v595_v3 = vadd.f32 %v594_v61, %v593_v13  ;;  %v637_v62 = vand.u32 2147483648, %v574_v31 }
0x26f9   :  { %v3267_v5 = vpop.xlane.xlu2 %3266  ;;  %v1158_v41 = vrot.slane %v1157_v9, 2  ;;  %vm676_vm7 = vweird.f32 %v595_v3 }
0x26fa   :  { %v7495_v11 = vadd.f32 %v3267_v5, %v7413_v27 }
0x26fb   :  { %v1159_v38 = vadd.f32 %v1158_v41, %v1157_v9 }
0x26fc   :  { %v3297_v42 = vsel %vm493_vm3, %v7495_v11, -inf }
0x26fd   :  { %v1160_v56 = vrot.slane %v1159_v38, 1  ;;  %v3298_v35 = vrot.slane %v3297_v42, 4 }
0x26ff   :  { %3672 = vmax.xlane.f32.xlu0 %v3671_v19  ;;  %v7501_v54 = vadd.f32 %v1160_v56, %v1159_v38  ;;  %v3299_v5 = vmax.f32 %v3297_v42, %v3298_v35  ;;  %v682_v38 = vand.u32 2147483648, %v595_v3  ;;  %v680_v56 = vand.u32 2147483647, %v595_v3 }
0x2700   :  { %v4377_v42 = vsel %vm245_vm0, %v7309_v48, 0.0 }
0x2701   :  { %v7471_v50 = vpop.xlane.xlu2 %3275  ;;  %v3300_v57 = vrot.slane %v3299_v5, 2  ;;  %vm681_vm11 = vcmp.eq.f32.partialorder %v680_v56, 8.507059e+37  ;;  %vm1242_vm13 = vweird.f32 %v7501_v54 }
0x2702   :  { %v7513_v2 = vadd.f32 %v7471_v50, %v7431_v4 }
0x2703   :  { %v3301_v6 = vmax.f32 %v3299_v5, %v3300_v57 }
0x2704   :  { %v3318_v9 = vsel %vm493_vm3, %v7513_v2, -inf }
0x2705   :  { %v3302_v61 = vrot.slane %v3301_v6, 1  ;;  %v3319_v41 = vrot.slane %v3318_v9, 4 }
0x2707   :  { %v3320_v35 = vmax.f32 %v3318_v9, %v3319_v41 }
0x2709   :  { %v7477_v8 = vpop.xlane.xlu2 %3831 }
0x2711   :  { %v7483_v34 = vpop.xlane.xlu2 %4387 }
0x2717   :  { %v4755_v58 = vpop.permute.xlu0 %4754 }
0x2718   :  { %v4757_v43 = vmul.f32 %v4755_v58, %v7327_v10  ;;  %v5301_v10 = vpop.eup %5300  ;;  %v1074_v58 = vsel %vm493_vm3, %v7507_v28, -inf }
0x2719   :  { %v7490_v55 = vpop.xlane.xlu2 %3116  ;;  %v627_v24 = vmul.f32 %v5301_v10, %v574_v31  ;;  %vm632_vm15 = vweird.f32 %v5301_v10  ;;  %v1075_v13 = vrot.slane %v1074_v58, 4 }
0x271a   :  { %4759 = vrot.lane.b32.xlu1 %v4757_v43, %s5769_s7  ;;  %v635_v43 = vand.u32 2147483647, %v574_v31  ;;  %vm633_vm5 = vmor %vm631_vm4, %vm632_vm15 }
0x271b   :  { %v628_v60 = vsub.f32 1.0, %v627_v24  ;;  %v1076_v31 = vmax.f32 %v1074_v58, %v1075_v13  ;;  %v1246_v58 = vand.u32 2147483647, %v7501_v54 }
0x271c   :  { %vm636_vm6 = vcmp.eq.f32.partialorder %v635_v43, 8.507059e+37 }
0x271d   :  { %v629_v25 = vmul.f32 %v5301_v10, %v628_v60  ;;  %vm1247_vm1 = vcmp.eq.f32.partialorder %v1246_v58, 8.507059e+37 }
0x271f   :  { %v630_v16 = vadd.f32 %v5301_v10, %v629_v25  ;;  %v1077_v25 = vrot.slane %v1076_v31, 2 }
0x2721   :  { %v4229_v44 = vpop.xlane.xlu2 %4228  ;;  %v634_v29 = vsel %vm633_vm5, %v5301_v10, %v630_v16  ;;  %v1078_v48 = vmax.f32 %v1076_v31, %v1077_v25  ;;  %v7558_v25 = vadd.f32 %v7458_v45, %v7431_v4 }
0x2722   :  { %v4230_v59 = vsub.f32 %v7385_v51, %v4229_v44  ;;  %v638_v44 = vor.u32 1.1754944e-38, %v637_v62 }
0x2724   :  { %v4231_v18 = vmul.f32 1.442695, %v4230_v59  ;;  %v639_v50 = vsel %vm636_vm6, %v638_v44, %v634_v29 }
0x2725   :  { %v640_v10 = vmul.f32 %v7473_v52, %v639_v50 }
0x2726   :  { %5302 = vpow2.f32 %v4231_v18 }
0x2727   :  { %5304 = vrcp.f32 %v595_v3 }
0x2728   :  { %5306 = vrcp.f32 %v7501_v54 }
0x272c   :  { %v7499_v19 = vpop.eup %5302 }
0x272d   :  { %v4233_v51 = vsel %vm421_vm2, %v7499_v19, 0.0  ;;  %v5305_v32 = vpop.eup %5304 }
0x272e   :  { %4234 = vadd.xlane.f32.xlu0 %v4233_v51  ;;  %v672_v17 = vmul.f32 %v5305_v32, %v595_v3  ;;  %v7509_v12 = vpop.eup %5306  ;;  %vm677_vm10 = vweird.f32 %v5305_v32  ;;  %v3303_v51 = vmax.f32 %v3301_v6, %v3302_v61  ;;  %v3321_v3 = vrot.slane %v3320_v35, 2 }
0x272f   :  { %v1238_v23 = vmul.f32 %v7509_v12, %v7501_v54  ;;  %vm678_vm8 = vmor %vm676_vm7, %vm677_vm10  ;;  %vm1243_vm12 = vweird.f32 %v7509_v12  ;;  %vm4831_vm7 = vcmask 254976  }
0x2730   :  { %v673_v0 = vsub.f32 1.0, %v672_v17  ;;  %v683_v17 = vor.u32 1.1754944e-38, %v682_v38  ;;  %v3327_v52 = vsub.f32 %v7495_v11, %v3303_v51  ;;  %vm1244_vm14 = vmor %vm1242_vm13, %vm1243_vm12  ;;  %v3322_v6 = vmax.f32 %v3320_v35, %v3321_v3 }
0x2731   :  { %v1239_v18 = vsub.f32 1.0, %v1238_v23  ;;  %v1079_v23 = vrot.slane %v1078_v48, 1 }
0x2732   :  { %v674_v47 = vmul.f32 %v5305_v32, %v673_v0  ;;  %v7532_v0 = vadd.f32 %v7442_v40, %v7413_v27  ;;  %v3335_v11 = vmul.f32 1.442695, %v3327_v52  ;;  %v3323_v50 = vrot.slane %v3322_v6, 1 }
0x2733   :  { %v1240_v5 = vmul.f32 %v7509_v12, %v1239_v18  ;;  %v1080_v61 = vmax.f32 %v1078_v48, %v1079_v23 }
0x2734   :  { %v675_v59 = vadd.f32 %v5305_v32, %v674_v47  ;;  %v1629_v40 = vsel %vm493_vm3, %v7532_v0, -inf  ;;  %5308 = vpow2.f32 %v3335_v11 }
0x2735   :  { %v1241_v16 = vadd.f32 %v7509_v12, %v1240_v5  ;;  %v1104_v56 = vsub.f32 %v7507_v28, %v1080_v61 }
0x2736   :  { %v679_v60 = vsel %vm678_vm8, %v5305_v32, %v675_v59  ;;  %v1248_v32 = vand.u32 2147483648, %v7501_v54  ;;  %v1630_v54 = vrot.slane %v1629_v40, 4 }
0x2737   :  { %v684_v57 = vsel %vm681_vm11, %v683_v17, %v679_v60  ;;  %v1245_v47 = vsel %vm1244_vm14, %v7509_v12, %v1241_v16  ;;  %v7546_v12 = vadd.f32 %v7452_v53, %v7413_v27  ;;  %v1112_v53 = vmul.f32 1.442695, %v1104_v56  ;;  %v3823_v16 = vpop.xlane.xlu1 %3822 }
0x2738   :  { %v685_v62 = vmul.f32 %v7479_v14, %v684_v57  ;;  %v1249_v13 = vor.u32 1.1754944e-38, %v1248_v32  ;;  %v1631_v38 = vmax.f32 %v1629_v40, %v1630_v54  ;;  %v2033_v54 = vsub.f32 1.0, %v7435_v46 }
0x2739   :  { %v2185_v35 = vsel %vm493_vm3, %v7546_v12, -inf  ;;  %5310 = vpow2.f32 %v1112_v53 }
0x273a   :  { %v1250_v44 = vsel %vm1247_vm1, %v1249_v13, %v1245_v47  ;;  %v7551_v51 = vpop.eup %5308  ;;  %v2186_v28 = vrot.slane %v2185_v35, 4 }
0x273b   :  { %v1251_v59 = vmul.f32 %v7485_v7, %v1250_v44  ;;  %v1632_v7 = vrot.slane %v1631_v38, 2  ;;  %v3357_v17 = vsel %vm493_vm3, %v7551_v51, 0.0 }
0x273c   :  { %v3358_v32 = vrot.slane %v3357_v17, 4  ;;  %v2187_v45 = vmax.f32 %v2185_v35, %v2186_v28 }
0x273d   :  { %v1633_v48 = vmax.f32 %v1631_v38, %v1632_v7 }
0x273e   :  { %v3359_v40 = vadd.f32 %v3358_v32, %v3357_v17 }
0x273f   :  { %v1634_v47 = vrot.slane %v1633_v48, 1 }
0x2741   :  { %v1635_v61 = vmax.f32 %v1633_v48, %v1634_v47 }
0x2742   :  { %v7522_v24 = vpop.xlane.xlu0 %1454  ;;  %740 = vperm.xlu0 %4966, %v640_v10   ;;  %v3324_v10 = vmax.f32 %v3322_v6, %v3323_v50  ;;  %v7568_v6 = vadd.f32 %v3823_v16, %v7413_v27 }
0x2744   :  { %4378 = vadd.xlane.f32.xlu1 %v4377_v42  ;;  %v3330_v5 = vsub.f32 %v7513_v2, %v3324_v10  ;;  %v2762_v2 = vsel %vm493_vm3, %v7558_v25, -inf  ;;  %v3853_v44 = vsel %vm493_vm3, %v7568_v6, -inf }
0x2745   :  { %v2763_v23 = vrot.slane %v2762_v2, 4  ;;  %v3854_v7 = vrot.slane %v3853_v44, 4 }
0x274a   :  { %v1608_v43 = vpop.xlane.xlu0 %1607  ;;  %745 = vperm.xlu0 %4966, %v685_v62   ;;  %v3341_v62 = vmul.f32 1.442695, %v3330_v5 }
0x274b   :  { %v1614_v29 = vadd.f32 %v1608_v43, %v7431_v4 }
0x274d   :  { %v1650_v14 = vsel %vm493_vm3, %v1614_v29, -inf }
0x274e   :  { %v1651_v9 = vrot.slane %v1650_v14, 4 }
0x2750   :  { %v1652_v41 = vmax.f32 %v1650_v14, %v1651_v9  ;;  %v2188_v14 = vrot.slane %v2187_v45, 2  ;;  %v7570_v9 = vpop.eup %5310 }
0x2752   :  { %v1653_v18 = vrot.slane %v1652_v41, 2  ;;  %v7548_v31 = vpop.xlane.xlu0 %2010  ;;  %1311 = vperm.xlu0 %4966, %v1251_v59   ;;  %v3360_v59 = vrot.slane %v3359_v40, 2  ;;  %v2189_v35 = vmax.f32 %v2187_v45, %v2188_v14 }
0x2754   :  { %v1654_v42 = vmax.f32 %v1652_v41, %v1653_v18  ;;  %v2764_v41 = vmax.f32 %v2762_v2, %v2763_v23  ;;  %v3361_v28 = vadd.f32 %v3360_v59, %v3359_v40  ;;  %v3855_v2 = vmax.f32 %v3853_v44, %v3854_v7 }
0x2755   :  { %v7592_v40 = vadd.f32 %v7483_v34, %v7431_v4 }
0x2756   :  { %v1655_v60 = vrot.slane %v1654_v42, 1  ;;  %v3856_v44 = vrot.slane %v3855_v2, 2 }
0x2758   :  { %v1656_v57 = vmax.f32 %v1654_v42, %v1655_v60  ;;  %v1134_v42 = vsel %vm493_vm3, %v7570_v9, 0.0  ;;  %v3857_v7 = vmax.f32 %v3855_v2, %v3856_v44 }
0x2759   :  { %v1135_v32 = vrot.slane %v1134_v42, 4 }
0x275a   :  { %v1662_v52 = vsub.f32 %v1614_v29, %v1656_v57  ;;  %v2164_v3 = vpop.xlane.xlu0 %2163  ;;  %v2765_v57 = vrot.slane %v2764_v41, 2 }
0x275b   :  { %v2170_v58 = vadd.f32 %v2164_v3, %v7431_v4  ;;  %v4430_v4 = vsel %vm493_vm3, %v7592_v40, -inf }
0x275c   :  { %v1673_v43 = vmul.f32 1.442695, %v1662_v52  ;;  %v2766_v23 = vmax.f32 %v2764_v41, %v2765_v57 }
0x275d   :  { %v2206_v11 = vsel %vm493_vm3, %v2170_v58, -inf  ;;  %918 = vperm.xlu1 %4967, %v7397_v21  }
0x275e   :  { %5312 = vpow2.f32 %v1673_v43  ;;  %v2207_v29 = vrot.slane %v2206_v11, 4 }
0x275f   :  { %5314 = vpow2.f32 %v3341_v62  ;;  %v2190_v62 = vrot.slane %v2189_v35, 1 }
0x2760   :  { %v2208_v13 = vmax.f32 %v2206_v11, %v2207_v29 }
0x2762   :  { %v2209_v50 = vrot.slane %v2208_v13, 2  ;;  %v2711_v21 = vpop.xlane.xlu0 %2710 }
0x2763   :  { %v2723_v18 = vadd.f32 %v2711_v21, %v7413_v27  ;;  %v1659_v27 = vsub.f32 %v7532_v0, %v1635_v61  ;;  %v1136_v21 = vadd.f32 %v1135_v32, %v1134_v42  ;;  %v2191_v61 = vmax.f32 %v2189_v35, %v2190_v62 }
0x2764   :  { %v7576_v38 = vpop.eup %5312  ;;  %v2210_v10 = vmax.f32 %v2208_v13, %v2209_v50  ;;  %v3362_v13 = vrot.slane %v3361_v28, 1  ;;  %v3858_v32 = vrot.slane %v3857_v7, 1 }
0x2765   :  { %v7578_v56 = vpop.eup %5314  ;;  %v1710_v60 = vsel %vm493_vm3, %v7576_v38, 0.0  ;;  %v2741_v46 = vsel %vm493_vm3, %v2723_v18, -inf  ;;  %2036 = vperm.xlu1 %4967, %v2033_v54   ;;  %v1667_v47 = vmul.f32 1.442695, %v1659_v27  ;;  %v2215_v42 = vsub.f32 %v7546_v12, %v2191_v61 }
0x2766   :  { %v1711_v5 = vrot.slane %v1710_v60, 4  ;;  %v2211_v53 = vrot.slane %v2210_v10, 1  ;;  %v2742_v17 = vrot.slane %v2741_v46, 4  ;;  %v3378_v52 = vsel %vm493_vm3, %v7578_v56, 0.0 }
0x2767   :  { %v3379_v0 = vrot.slane %v3378_v52, 4  ;;  %v1137_v35 = vrot.slane %v1136_v21, 2 }
0x2768   :  { %v1712_v3 = vadd.f32 %v1711_v5, %v1710_v60  ;;  %v2212_v16 = vmax.f32 %v2210_v10, %v2211_v53  ;;  %v2743_v48 = vmax.f32 %v2741_v46, %v2742_v17  ;;  %v7595_v10 = vadd.f32 %v3362_v13, %v3361_v28 }
0x2769   :  { %v3380_v41 = vadd.f32 %v3379_v0, %v3378_v52  ;;  %v2767_v60 = vrot.slane %v2766_v23, 1  ;;  %v4431_v17 = vrot.slane %v4430_v4, 4  ;;  %v3859_v0 = vmax.f32 %v3857_v7, %v3858_v32 }
0x276a   :  { %v1713_v43 = vrot.slane %v1712_v3, 2  ;;  %v2218_v45 = vsub.f32 %v2170_v58, %v2212_v16  ;;  %v2744_v11 = vrot.slane %v2743_v48, 2  ;;  %v7588_v29 = vpop.xlane.xlu0 %2566  ;;  %v2223_v16 = vmul.f32 1.442695, %v2215_v42 }
0x276b   :  { %v3381_v53 = vrot.slane %v3380_v41, 2  ;;  %v2768_v28 = vmax.f32 %v2766_v23, %v2767_v60  ;;  %vm3420_vm8 = vweird.f32 %v7595_v10 }
0x276c   :  { %v1714_v14 = vadd.f32 %v1713_v43, %v1712_v3  ;;  %v2229_v54 = vmul.f32 1.442695, %v2218_v45  ;;  %v2745_v50 = vmax.f32 %v2743_v48, %v2744_v11  ;;  %v4432_v43 = vmax.f32 %v4430_v4, %v4431_v17 }
0x276d   :  { %2585 = vperm.xlu1 %4967, %v7444_v1   ;;  %v3382_v2 = vadd.f32 %v3381_v53, %v3380_v41  ;;  %v2774_v11 = vsub.f32 %v7558_v25, %v2768_v28 }
0x276e   :  { %v1715_v58 = vrot.slane %v1714_v14, 1  ;;  %5316 = vpow2.f32 %v2229_v54  ;;  %v2746_v59 = vrot.slane %v2745_v50, 1 }
0x276f   :  { %5318 = vpow2.f32 %v1667_v47 }
0x2770   :  { %v7599_v34 = vadd.f32 %v1715_v58, %v1714_v14  ;;  %v2747_v46 = vmax.f32 %v2745_v50, %v2746_v59  ;;  %v3383_v50 = vrot.slane %v3382_v2, 1  ;;  %v2785_v58 = vmul.f32 1.442695, %v2774_v11 }
0x2772   :  { %5320 = vrcp.f32 %v7599_v34  ;;  %v2771_v1 = vsub.f32 %v2723_v18, %v2747_v46  ;;  %v3673_v5 = vpop.xlane.xlu0 %3672  ;;  %v1138_v18 = vadd.f32 %v1137_v35, %v1136_v21  ;;  %v4433_v21 = vrot.slane %v4432_v43, 2 }
0x2773   :  { %5322 = vrcp.f32 %v7595_v10  ;;  %v3674_v27 = vsub.f32 %v7467_v15, %v3673_v5  ;;  %v1803_v41 = vand.u32 2147483648, %v7599_v34  ;;  %v1801_v42 = vand.u32 2147483647, %v7599_v34 }
0x2774   :  { %v7605_v57 = vpop.eup %5316  ;;  %v2779_v52 = vmul.f32 1.442695, %v2771_v1  ;;  %v3883_v35 = vsub.f32 %v7568_v6, %v3859_v0  ;;  %v7633_v17 = vadd.f32 %v3383_v50, %v3382_v2  ;;  %vm1797_vm4 = vweird.f32 %v7599_v34 }
0x2775   :  { %v7607_v3 = vpop.eup %5318  ;;  %v2266_v12 = vsel %vm493_vm3, %v7605_v57, 0.0  ;;  %v3675_v48 = vmul.f32 1.442695, %v3674_v27  ;;  %4969 = vset.pattern.permute.xlu1 %v8130_v49  ;;  %v1139_v49 = vrot.slane %v1138_v18, 1  ;;  %v4434_v27 = vmax.f32 %v4432_v43, %v4433_v21 }
0x2776   :  { %v2267_v62 = vrot.slane %v2266_v12, 4  ;;  %5324 = vpow2.f32 %v2779_v52  ;;  %v1689_v45 = vsel %vm493_vm3, %v7607_v3, 0.0  ;;  %v1804_v6 = vor.u32 1.1754944e-38, %v1803_v41 }
0x2777   :  { %5326 = vpow2.f32 %v3675_v48  ;;  %v1690_v54 = vrot.slane %v1689_v45, 4  ;;  %vm1802_vm6 = vcmp.eq.f32.partialorder %v1801_v42, 8.507059e+37  ;;  %v7642_v11 = vadd.f32 %v1139_v49, %v1138_v18 }
0x2778   :  { %v5321_v15 = vpop.eup %5320  ;;  %v2268_v47 = vadd.f32 %v2267_v62, %v2266_v12  ;;  %5328 = vpow2.f32 %v2223_v16 }
0x2779   :  { %v7615_v23 = vpop.eup %5322  ;;  %v1793_v13 = vmul.f32 %v5321_v15, %v7599_v34  ;;  %vm1798_vm15 = vweird.f32 %v5321_v15  ;;  %v1691_v52 = vadd.f32 %v1690_v54, %v1689_v45  ;;  %5330 = vpow2.f32 %v2785_v58 }
0x277a   :  { %v2269_v14 = vrot.slane %v2268_v47, 2  ;;  %v3416_v25 = vmul.f32 %v7615_v23, %v7595_v10  ;;  %vm1799_vm5 = vmor %vm1797_vm4, %vm1798_vm15  ;;  %v4435_v34 = vrot.slane %v4434_v27, 1  ;;  %vm3421_vm10 = vweird.f32 %v7615_v23 }
0x277b   :  { %v1794_v61 = vsub.f32 1.0, %v1793_v13  ;;  %v1692_v13 = vrot.slane %v1691_v52, 2  ;;  %vm7667_vm11 = vmor %vm3420_vm8, %vm3421_vm10  ;;  %vm3465_vm8 = vweird.f32 %v7633_v17 }
0x277c   :  { %v7618_v44 = vpop.eup %5324  ;;  %v2270_v59 = vadd.f32 %v2269_v14, %v2268_v47  ;;  %v3417_v32 = vsub.f32 1.0, %v3416_v25  ;;  %v3891_v47 = vmul.f32 1.442695, %v3883_v35  ;;  %v4436_v18 = vmax.f32 %v4434_v27, %v4435_v34 }
0x277d   :  { %v7623_v60 = vpop.eup %5326  ;;  %v2801_v4 = vsel %vm493_vm3, %v7618_v44, 0.0  ;;  %v1795_v46 = vmul.f32 %v5321_v15, %v1794_v61  ;;  %v1693_v61 = vadd.f32 %v1692_v13, %v1691_v52  ;;  %v3424_v35 = vand.u32 2147483647, %v7595_v10 }
0x277e   :  { %v2271_v7 = vrot.slane %v2270_v59, 1  ;;  %v2802_v1 = vrot.slane %v2801_v4, 4  ;;  %v3677_v5 = vsel %vm421_vm2, %v7623_v60, 0.0  ;;  %v7631_v53 = vpop.eup %5328  ;;  %v3418_v54 = vmul.f32 %v7615_v23, %v3417_v32 }
0x277f   :  { %3678 = vadd.xlane.f32.xlu2 %v3677_v5  ;;  %v1796_v28 = vadd.f32 %v5321_v15, %v1795_v46  ;;  %v2245_v62 = vsel %vm493_vm3, %v7631_v53, 0.0  ;;  %v7649_v21 = vpop.eup %5330  ;;  %v4442_v46 = vsub.f32 %v7592_v40, %v4436_v18  ;;  %vm3425_vm14 = vcmp.eq.f32.partialorder %v3424_v35, 8.507059e+37 }
0x2780   :  { %v7636_v16 = vadd.f32 %v2271_v7, %v2270_v59  ;;  %v2803_v12 = vadd.f32 %v2802_v1, %v2801_v4  ;;  %v2246_v14 = vrot.slane %v2245_v62, 4  ;;  %v3419_v41 = vadd.f32 %v7615_v23, %v3418_v54 }
0x2781   :  { %v1800_v48 = vsel %vm1799_vm5, %v5321_v15, %v1796_v28  ;;  %v3118_v15 = vsub.f32 %v7378_v36, %v7490_v55  ;;  %v2822_v25 = vsel %vm493_vm3, %v7649_v21, 0.0  ;;  %v3426_v4 = vand.u32 2147483648, %v7595_v10 }
0x2782   :  { %5332 = vrcp.f32 %v7636_v16  ;;  %v2804_v2 = vrot.slane %v2803_v12, 2  ;;  %v1805_v43 = vsel %vm1802_vm6, %v1804_v6, %v1800_v48  ;;  %v2247_v36 = vadd.f32 %v2246_v14, %v2245_v62 }
0x2783   :  { %5334 = vrcp.f32 %v7633_v17  ;;  %v1806_v45 = vmul.f32 %v7576_v38, %v1805_v43  ;;  %v3119_v38 = vmul.f32 1.442695, %v3118_v15  ;;  %v2359_v1 = vand.u32 2147483648, %v7636_v16 }
0x2784   :  { %v2805_v0 = vadd.f32 %v2804_v2, %v2803_v12  ;;  %5336 = vrcp.f32 %v7642_v11  ;;  %v2357_v10 = vand.u32 2147483647, %v7636_v16  ;;  %v3423_v52 = vsel %vm7667_vm11, %v7615_v23, %v3419_v41 }
0x2785   :  { %1866 = vperm.xlu0 %4966, %v1806_v45   ;;  %5338 = vpow2.f32 %v3891_v47  ;;  %v1694_v6 = vrot.slane %v1693_v61, 1  ;;  %v2248_v48 = vrot.slane %v2247_v36, 2  ;;  %v2823_v32 = vrot.slane %v2822_v25, 4 }
0x2786   :  { %v2806_v50 = vrot.slane %v2805_v0, 1  ;;  %v3427_v62 = vor.u32 1.1754944e-38, %v3426_v4  ;;  %v4453_v2 = vmul.f32 1.442695, %v4442_v46  ;;  %vm2353_vm13 = vweird.f32 %v7636_v16 }
0x2787   :  { %v2360_v45 = vor.u32 1.1754944e-38, %v2359_v1  ;;  %vm2358_vm1 = vcmp.eq.f32.partialorder %v2357_v10, 8.507059e+37  ;;  %v7689_v54 = vadd.f32 %v1694_v6, %v1693_v61  ;;  %v3471_v6 = vand.u32 2147483648, %v7633_v17 }
0x2788   :  { %v5333_v49 = vpop.eup %5332  ;;  %v7652_v58 = vadd.f32 %v2806_v50, %v2805_v0  ;;  %v3428_v47 = vsel %vm3425_vm14, %v3427_v62, %v3423_v52  ;;  %v2249_v50 = vadd.f32 %v2248_v48, %v2247_v36  ;;  %vm1197_vm14 = vweird.f32 %v7642_v11 }
0x2789   :  { %v7654_v59 = vpop.eup %5334  ;;  %v2349_v55 = vmul.f32 %v5333_v49, %v7636_v16  ;;  %vm2354_vm12 = vweird.f32 %v5333_v49  ;;  %v2824_v16 = vadd.f32 %v2823_v32, %v2822_v25  ;;  %v3469_v32 = vand.u32 2147483647, %v7633_v17 }
0x278a   :  { %5340 = vrcp.f32 %v7652_v58  ;;  %v3461_v27 = vmul.f32 %v7654_v59, %v7633_v17  ;;  %v7673_v28 = vpop.eup %5336  ;;  %v2870_v41 = vand.u32 2147483648, %v7652_v58  ;;  %v2868_v46 = vand.u32 2147483647, %v7652_v58 }
0x278b   :  { %v2350_v42 = vsub.f32 1.0, %v2349_v55  ;;  %5342 = vpow2.f32 %v3119_v38  ;;  %v7681_v12 = vpop.eup %5338  ;;  %v2250_v35 = vrot.slane %v2249_v50, 1  ;;  %vm2864_vm4 = vweird.f32 %v7652_v58 }
0x278c   :  { %v4760_v7 = vpop.permute.xlu1 %4759  ;;  %v3462_v23 = vsub.f32 1.0, %v3461_v27  ;;  %v3913_v14 = vsel %vm493_vm3, %v7681_v12, 0.0  ;;  %5344 = vpow2.f32 %v4453_v2  ;;  %v2871_v25 = vor.u32 1.1754944e-38, %v2870_v41 }
0x278d   :  { %4832 = vst.msk [vmem:[#allocation17] sm:$0x3] %vm4831_vm7, %v4760_v7  ;;  %4945 = vmatmul.msk.f32.vlgmr.msrb.gmra.mxu3 %vm245_vm0, %v4760_v7  ;;  %v2351_v40 = vmul.f32 %v5333_v49, %v2350_v42  ;;  %vm2355_vm0 = vmor %vm2353_vm13, %vm2354_vm12  ;;  %v3914_v61 = vrot.slane %v3913_v14, 4  ;;  %5346 = vrcp.f32 %v7689_v54  ;;  %v1193_v7 = vmul.f32 %v7673_v28, %v7642_v11 }
0x278e   :  { %v3463_v42 = vmul.f32 %v7654_v59, %v3462_v23  ;;  %vm2869_vm6 = vcmp.eq.f32.partialorder %v2868_v46, 8.507059e+37  ;;  %vm3466_vm10 = vweird.f32 %v7654_v59  ;;  %v7706_v10 = vadd.f32 %v2250_v35, %v2249_v50  ;;  %4861 = dma.vmem_to_hbm [thread:$0]  %s4857_s11, 32, %s4859_s29, [#allocation18]  }
0x278f   :  { %v2352_v43 = vadd.f32 %v5333_v49, %v2351_v40  ;;  %v3915_v40 = vadd.f32 %v3914_v61, %v3913_v14  ;;  %vm3467_vm11 = vmor %vm3465_vm8, %vm3466_vm10  ;;  %v1194_v2 = vsub.f32 1.0, %v1193_v7  ;;  %vm3470_vm12 = vcmp.eq.f32.partialorder %v3469_v32, 8.507059e+37 }
0x2790   :  { %v5341_v34 = vpop.eup %5340  ;;  %v3464_v27 = vadd.f32 %v7654_v59, %v3463_v42  ;;  %5348 = vrcp.f32 %v7706_v10  ;;  %vm1198_vm13 = vweird.f32 %v7673_v28  ;;  %vm2308_vm8 = vweird.f32 %v7706_v10 }
0x2791   :  { %v2356_v13 = vsel %vm2355_vm0, %v5333_v49, %v2352_v43  ;;  %v2860_v15 = vmul.f32 %v5341_v34, %v7652_v58  ;;  %v7685_v0 = vpop.eup %5342  ;;  %v3429_v49 = vmul.f32 %v7551_v51, %v3428_v47  ;;  %vm2865_vm15 = vweird.f32 %v5341_v34  ;;  %vm1199_vm0 = vmor %vm1197_vm14, %vm1198_vm13 }
0x2792   :  { %v2361_v18 = vsel %vm2358_vm1, %v2360_v45, %v2356_v13  ;;  %v3121_v36 = vsel %vm421_vm2, %v7685_v0, 0.0  ;;  %vm2866_vm5 = vmor %vm2864_vm4, %vm2865_vm15  ;;  %v7702_v1 = vpop.eup %5344  ;;  %v3916_v45 = vrot.slane %v3915_v40, 2  ;;  %v3472_v47 = vor.u32 1.1754944e-38, %v3471_v6 }
0x2793   :  { %v2362_v38 = vmul.f32 %v7605_v57, %v2361_v18  ;;  %v2861_v55 = vsub.f32 1.0, %v2860_v15  ;;  %v2825_v57 = vrot.slane %v2824_v16, 2  ;;  %v4490_v62 = vsel %vm493_vm3, %v7702_v1, 0.0  ;;  %v5347_v43 = vpop.eup %5346 }
0x2794   :  { %v4491_v15 = vrot.slane %v4490_v62, 4  ;;  %v1195_v23 = vmul.f32 %v7673_v28, %v1194_v2  ;;  %v1748_v17 = vmul.f32 %v5347_v43, %v7689_v54  ;;  %v3917_v14 = vadd.f32 %v3916_v45, %v3915_v40 }
0x2795   :  { %2422 = vperm.xlu0 %4966, %v2362_v38   ;;  %v2862_v4 = vmul.f32 %v5341_v34, %v2861_v55  ;;  %v2826_v58 = vadd.f32 %v2825_v57, %v2824_v16  ;;  %vm1753_vm15 = vweird.f32 %v5347_v43  ;;  %vm1752_vm4 = vweird.f32 %v7689_v54 }
0x2796   :  { %v4492_v18 = vadd.f32 %v4491_v15, %v4490_v62  ;;  %v1749_v38 = vsub.f32 1.0, %v1748_v17  ;;  %v7723_v55 = vpop.eup %5348  ;;  %v3918_v41 = vrot.slane %v3917_v14, 1  ;;  %v1756_v40 = vand.u32 2147483647, %v7689_v54 }
0x2797   :  { %3122 = vadd.xlane.f32.xlu1 %v3121_v36  ;;  %3529 = vperm.xlu2 %4970, %v3429_v49   ;;  %v2863_v51 = vadd.f32 %v5341_v34, %v2862_v4  ;;  %v2827_v13 = vrot.slane %v2826_v58, 1  ;;  %v1203_v49 = vand.u32 2147483648, %v7642_v11  ;;  %v1201_v4 = vand.u32 2147483647, %v7642_v11 }
0x2798   :  { %v4493_v46 = vrot.slane %v4492_v18, 2  ;;  %v1750_v42 = vmul.f32 %v5347_v43, %v1749_v38  ;;  %v2304_v61 = vmul.f32 %v7723_v55, %v7706_v10  ;;  %v7732_v36 = vadd.f32 %v3918_v41, %v3917_v14 }
0x2799   :  { %v2867_v5 = vsel %vm2866_vm5, %v5341_v34, %v2863_v51  ;;  %v3468_v34 = vsel %vm3467_vm11, %v7654_v59, %v3464_v27  ;;  %v7718_v50 = vadd.f32 %v2827_v13, %v2826_v58  ;;  %v1196_v59 = vadd.f32 %v7673_v28, %v1195_v23  ;;  %vm1754_vm5 = vmor %vm1752_vm4, %vm1753_vm15 }
0x279a   :  { %v2872_v52 = vsel %vm2869_vm6, %v2871_v25, %v2867_v5  ;;  %v1204_v35 = vor.u32 1.1754944e-38, %v1203_v49  ;;  %vm1202_vm1 = vcmp.eq.f32.partialorder %v1201_v4, 8.507059e+37  ;;  %v4494_v57 = vadd.f32 %v4493_v46, %v4492_v18 }
0x279b   :  { %v2873_v48 = vmul.f32 %v7618_v44, %v2872_v52  ;;  %v3473_v44 = vsel %vm3470_vm12, %v3472_v47, %v3468_v34  ;;  %5350 = vrcp.f32 %v7718_v50  ;;  %v1751_v25 = vadd.f32 %v5347_v43, %v1750_v42  ;;  %v8133_v52 = vld [vmem:[#allocation34_spill] sm:$0xff] }
0x279c   :  { %v3474_v16 = vmul.f32 %v7578_v56, %v3473_v44  ;;  %v1200_v56 = vsel %vm1199_vm0, %v7673_v28, %v1196_v59  ;;  %5352 = vrcp.f32 %v7408_v20  ;;  %v2305_v11 = vsub.f32 1.0, %v2304_v61 }
0x279d   :  { %2973 = vperm.xlu0 %4966, %v2873_v48   ;;  %v1205_v51 = vsel %vm1202_vm1, %v1204_v35, %v1200_v56  ;;  %v1758_v28 = vand.u32 2147483648, %v7689_v54  ;;  %5354 = vrcp.f32 %v7732_v36  ;;  %v4930_v6 = vmul.f32 -1.442695, %v8133_v52  ;;  %v7755_v54 = vld [vmem:[%s8134_s15] sm:$0xff]  ;;  %v5476_v35 = vld [vmem:[%s8113_s12 + $0x28] sm:$0xff] }
0x279e   :  { %v1206_v27 = vmul.f32 %v7570_v9, %v1205_v51  ;;  %v4495_v58 = vrot.slane %v4494_v57, 1  ;;  %v1755_v48 = vsel %vm1754_vm5, %v5347_v43, %v1751_v25  ;;  %v2306_v32 = vmul.f32 %v7723_v55, %v2305_v11 }
0x279f   :  { %v1759_v2 = vor.u32 1.1754944e-38, %v1758_v28  ;;  %vm1757_vm6 = vcmp.eq.f32.partialorder %v1756_v40, 8.507059e+37  ;;  %5356 = vpow2.f32 %v4930_v6  ;;  %vm2309_vm10 = vweird.f32 %v7723_v55 }
0x27a0   :  { %v7750_v9 = vadd.f32 %v4495_v58, %v4494_v57  ;;  %v2307_v43 = vadd.f32 %v7723_v55, %v2306_v32  ;;  %v2314_v23 = vand.u32 2147483648, %v7706_v10  ;;  %v2312_v18 = vand.u32 2147483647, %v7706_v10  ;;  %vm7770_vm11 = vmor %vm2308_vm8, %vm2309_vm10 }
0x27a1   :  { %v7735_v7 = vpop.eup %5350  ;;  %v7737_v5 = vpop.xlane.xlu0 %4234  ;;  %v1760_v45 = vsel %vm1757_vm6, %v1759_v2, %v1755_v48  ;;  %v7789_v57 = vadd.f32 %v5476_v35, %v7477_v8  ;;  %v2915_v2 = vand.u32 2147483648, %v7718_v50  ;;  %vm2909_vm14 = vweird.f32 %v7718_v50 }
0x27a2   :  { %v2905_v62 = vmul.f32 %v7735_v7, %v7718_v50  ;;  %v7748_v34 = vpop.eup %5352  ;;  %v1761_v14 = vmul.f32 %v7607_v3, %v1760_v45  ;;  %5358 = vrcp.f32 %v7750_v9  ;;  %v5475_v3 = vld [vmem:[%s8113_s12 + $0x10] sm:$0xff]  ;;  %v2311_v10 = vsel %vm7770_vm11, %v7723_v55, %v2307_v43  ;;  %v7796_v55 = vld [vmem:[%s8134_s15 + $0x8] sm:$0xff] }
0x27a3   :  { %v7757_v47 = vpop.eup %5354  ;;  %v902_v15 = vmul.f32 %v7748_v34, %v7408_v20  ;;  %v2315_v51 = vor.u32 1.1754944e-38, %v2314_v23  ;;  %vm2313_vm12 = vcmp.eq.f32.partialorder %v2312_v18, 8.507059e+37  ;;  %vm2910_vm13 = vweird.f32 %v7735_v7 }
0x27a4   :  { %v2906_v13 = vsub.f32 1.0, %v2905_v62  ;;  %v3972_v41 = vmul.f32 %v7757_v47, %v7732_v36  ;;  %v3874_v48 = vsel %vm493_vm3, %v7789_v57, -inf  ;;  %vm7812_vm0 = vmor %vm2909_vm14, %vm2910_vm13  ;;  %vm906_vm1 = vweird.f32 %v7408_v20 }
0x27a5   :  { %3534 = vperm.xlu0 %4966, %v3474_v16   ;;  %v8135_v16 = vld [vmem:[#allocation35_spill] sm:$0xff]  ;;  %v5357_v42 = vpop.eup %5356  ;;  %v903_v61 = vsub.f32 1.0, %v902_v15  ;;  %vm907_vm4 = vweird.f32 %v7748_v34  ;;  %vm3977_vm5 = vweird.f32 %v7757_v47  ;;  %vm3976_vm10 = vweird.f32 %v7732_v36 }
0x27a6   :  { %v4936_v59 = vmul.f32 -1.442695, %v8135_v16  ;;  %v2907_v56 = vmul.f32 %v7735_v7, %v2906_v13  ;;  %v3973_v40 = vsub.f32 1.0, %v3972_v41  ;;  %v7798_v52 = vadd.f32 1.0, %v5357_v42  ;;  %vm7836_vm6 = vmor %vm906_vm1, %vm907_vm4 }
0x27a7   :  { %v904_v58 = vmul.f32 %v7748_v34, %v903_v61  ;;  %v2913_v13 = vand.u32 2147483647, %v7718_v50  ;;  %vm7852_vm8 = vmor %vm3976_vm10, %vm3977_vm5  ;;  %vm4577_vm14 = vweird.f32 %v7750_v9 }
0x27a8   :  { %5360 = vpow2.f32 %v4936_v59  ;;  %v2908_v8 = vadd.f32 %v7735_v7, %v2907_v56  ;;  %v7802_v6 = vpop.eup %5358  ;;  %v2916_v59 = vor.u32 1.1754944e-38, %v2915_v2  ;;  %vm3560_vm4 = vweird.f32 %v7798_v52 }
0x27a9   :  { %5362 = vrcp.f32 %v7798_v52  ;;  %vm2914_vm15 = vcmp.eq.f32.partialorder %v2913_v13, 8.507059e+37  ;;  %v905_v41 = vadd.f32 %v7748_v34, %v904_v58  ;;  %vm4578_vm13 = vweird.f32 %v7802_v6 }
0x27aa   :  { %v2912_v16 = vsel %vm7812_vm0, %v7735_v7, %v2908_v8  ;;  %v3980_v8 = vand.u32 2147483647, %v7732_v36  ;;  %vm7872_vm0 = vmor %vm4577_vm14, %vm4578_vm13 }
0x27b0   :  { %1306 = vperm.xlu1 %4969, %v1206_v27   ;;  %v2316_v27 = vsel %vm2313_vm12, %v2315_v51, %v2311_v10  ;;  %v2917_v10 = vsel %vm2914_vm15, %v2916_v59, %v2912_v16  ;;  %v910_v51 = vand.u32 2147483647, %v7408_v20  ;;  %vm3981_vm12 = vcmp.eq.f32.partialorder %v3980_v8, 8.507059e+37 }
0x27b1   :  { %v2317_v43 = vmul.f32 %v7631_v53, %v2316_v27  ;;  %v4573_v53 = vmul.f32 %v7802_v6, %v7750_v9 }
0x27b2   :  { %vm911_vm11 = vcmp.eq.f32.partialorder %v910_v51, 8.507059e+37 }
0x27b3   :  { %v4574_v61 = vsub.f32 1.0, %v4573_v53 }
0x27b4   :  { %v741_v44 = vpop.permute.xlu0 %740 }
0x27b5   :  { %v748_v17 = vmul.f32 %v741_v44, %v7755_v54 }
0x27b7   :  { %v4379_v38 = vpop.xlane.xlu1 %4378  ;;  %v750_v4 = vrot.slane %v748_v17, 4 }
0x27b8   :  { %v7779_v46 = vadd.f32 %v5475_v3, %v4379_v38  ;;  %1861 = vperm.xlu1 %4969, %v1761_v14   ;;  %v3875_v14 = vrot.slane %v3874_v48, 4  ;;  %v5361_v38 = vpop.eup %5360 }
0x27b9   :  { %v751_v11 = vadd.f32 %v750_v4, %v748_v17  ;;  %v3974_v17 = vmul.f32 %v7757_v47, %v3973_v40  ;;  %v2918_v40 = vmul.f32 %v7649_v21, %v2917_v10  ;;  %v7842_v58 = vpop.eup %5362  ;;  %v909_v21 = vsel %vm7836_vm6, %v7748_v34, %v905_v41 }
0x27ba   :  { %v4409_v25 = vsel %vm493_vm3, %v7779_v46, -inf  ;;  %v3876_v7 = vmax.f32 %v3874_v48, %v3875_v14  ;;  %v7844_v48 = vadd.f32 1.0, %v5361_v38  ;;  %v3556_v59 = vmul.f32 %v7842_v58, %v7798_v52 }
0x27bb   :  { %v4410_v28 = vrot.slane %v4409_v25, 4  ;;  %v752_v15 = vrot.slane %v751_v11, 2  ;;  %v3975_v42 = vadd.f32 %v7757_v47, %v3974_v17  ;;  %v4581_v41 = vand.u32 2147483647, %v7750_v9 }
0x27bc   :  { %v746_v62 = vpop.permute.xlu0 %745  ;;  %v3877_v2 = vrot.slane %v3876_v7, 2  ;;  %vm3561_vm15 = vweird.f32 %v7842_v58 }
0x27bd   :  { %v4411_v32 = vmax.f32 %v4409_v25, %v4410_v28  ;;  %v749_v45 = vmul.f32 %v746_v62, %v7796_v55  ;;  %v753_v4 = vadd.f32 %v752_v15, %v751_v11  ;;  %v912_v25 = vand.u32 2147483648, %v7408_v20  ;;  %vm3562_vm5 = vmor %vm3560_vm4, %vm3561_vm15 }
0x27be   :  { %v3982_v28 = vand.u32 2147483648, %v7732_v36  ;;  %v3979_v36 = vsel %vm7852_vm8, %v7757_v47, %v3975_v42  ;;  %v3878_v16 = vmax.f32 %v3876_v7, %v3877_v2  ;;  %vm4582_vm1 = vcmp.eq.f32.partialorder %v4581_v41, 8.507059e+37 }
0x27bf   :  { %v4412_v44 = vrot.slane %v4411_v32, 2  ;;  %v756_v18 = vrot.slane %v749_v45, 4  ;;  %vm4116_vm8 = vweird.f32 %v7844_v48 }
0x27c0   :  { %2417 = vperm.xlu1 %4969, %v2317_v43   ;;  %v4575_v43 = vmul.f32 %v7802_v6, %v4574_v61  ;;  %v3983_v34 = vor.u32 1.1754944e-38, %v3982_v28  ;;  %v3879_v7 = vrot.slane %v3878_v16, 1 }
0x27c1   :  { %v4413_v50 = vmax.f32 %v4411_v32, %v4412_v44  ;;  %v757_v49 = vadd.f32 %v756_v18, %v749_v45  ;;  %v754_v32 = vrot.slane %v753_v4, 1  ;;  %v913_v44 = vor.u32 1.1754944e-38, %v912_v25 }
0x27c2   :  { %v3984_v18 = vsel %vm3981_vm12, %v3983_v34, %v3979_v36  ;;  %v4576_v53 = vadd.f32 %v7802_v6, %v4575_v43  ;;  %v3880_v11 = vmax.f32 %v3878_v16, %v3879_v7 }
0x27c3   :  { %v4414_v3 = vrot.slane %v4413_v50, 1  ;;  %v758_v56 = vrot.slane %v757_v49, 2  ;;  %v755_v17 = vadd.f32 %v754_v32, %v753_v4  ;;  %v914_v14 = vsel %vm911_vm11, %v913_v44, %v909_v21  ;;  %v926_v4 = vpop.permute.xlu2 %925 }
0x27c4   :  { %v915_v38 = vmul.f32 %v7343_v63, %v914_v14  ;;  %v4580_v63 = vsel %vm7872_vm0, %v7802_v6, %v4576_v53  ;;  %v3564_v44 = vand.u32 2147483647, %v7798_v52 }
0x27c5   :  { %v4415_v35 = vmax.f32 %v4413_v50, %v4414_v3  ;;  %v759_v27 = vadd.f32 %v758_v56, %v757_v49  ;;  %v4583_v50 = vand.u32 2147483648, %v7750_v9  ;;  %v3985_v49 = vmul.f32 %v7681_v12, %v3984_v18 }
0x27c6   :  { %vm3565_vm6 = vcmp.eq.f32.partialorder %v3564_v44, 8.507059e+37 }
0x27c7   :  { %v4439_v62 = vsub.f32 %v7779_v46, %v4415_v35  ;;  %v760_v45 = vrot.slane %v759_v27, 1  ;;  %v8144_v46 = vld [vmem:[#allocation33_spill] sm:$0xff]  ;;  %v4584_v12 = vor.u32 1.1754944e-38, %v4583_v50  ;;  %v3557_v35 = vsub.f32 1.0, %v3556_v59 }
0x27c8   :  { %2978 = vperm.xlu1 %4969, %v2918_v40   ;;  %v4924_v13 = vmul.f32 -1.442695, %v8144_v46 }
0x27c9   :  { %v4447_v15 = vmul.f32 1.442695, %v4439_v62  ;;  %v761_v23 = vadd.f32 %v760_v45, %v759_v27  ;;  %v4585_v40 = vsel %vm4582_vm1, %v4584_v12, %v4580_v63  ;;  %v3558_v62 = vmul.f32 %v7842_v58, %v3557_v35 }
0x27ca   :  { %v4586_v20 = vmul.f32 %v7702_v1, %v4585_v40  ;;  %v3886_v45 = vsub.f32 %v7789_v57, %v3880_v11  ;;  %v4942_v57 = vmul.f32 -1.442695, %v7150_v22  ;;  %v4120_v22 = vand.u32 2147483647, %v7844_v48 }
0x27cb   :  { %5364 = vpow2.f32 %v4447_v15  ;;  %v930_v47 = vsel %vm783_vm9, %v761_v23, %v755_v17  ;;  %v3559_v43 = vadd.f32 %v7842_v58, %v3558_v62 }
0x27cc   :  { %5366 = vrcp.f32 %v7844_v48  ;;  %v932_v42 = vmul.f32 %v930_v47, %v926_v4  ;;  %v3897_v1 = vmul.f32 1.442695, %v3886_v45  ;;  %vm4121_vm12 = vcmp.eq.f32.partialorder %v4120_v22, 8.507059e+37 }
0x27cd   :  { %5368 = vpow2.f32 %v4924_v13  ;;  %v3566_v13 = vand.u32 2147483648, %v7798_v52  ;;  %v3563_v23 = vsel %vm3562_vm5, %v7842_v58, %v3559_v43  ;;  %v4122_v52 = vand.u32 2147483648, %v7844_v48 }
0x27cf   :  { %v919_v3 = vpop.permute.xlu1 %918  ;;  %v3567_v14 = vor.u32 1.1754944e-38, %v3566_v13 }
0x27d0   :  { %v921_v56 = vmul.f32 %v919_v3, %v915_v38  ;;  %4085 = vperm.xlu1 %4969, %v3985_v49   ;;  %v4123_v38 = vor.u32 1.1754944e-38, %v4122_v52  ;;  %v7923_v52 = vpop.permute.xlu2 %1473 }
0x27d1   :  { %v7879_v61 = vpop.eup %5364  ;;  %v3568_v16 = vsel %vm3565_vm6, %v3567_v14, %v3563_v23 }
0x27d2   :  { %v5367_v51 = vpop.eup %5366  ;;  %v4469_v9 = vsel %vm493_vm3, %v7879_v61, 0.0  ;;  %v933_v25 = vadd.f32 %v932_v42, %v921_v56  ;;  %v3701_v44 = vsub.f32 1.0, %v3568_v16 }
0x27d3   :  { %v5369_v28 = vpop.eup %5368  ;;  %v4470_v27 = vrot.slane %v4469_v9, 4  ;;  %v4112_v6 = vmul.f32 %v5367_v51, %v7844_v48  ;;  %vm4117_vm10 = vweird.f32 %v5367_v51 }
0x27d4   :  { %v935_v8 = vrot.slane %v933_v25, 1  ;;  %937 = vst [vmem:[#allocation16] sm:$0x1] %v933_v25  ;;  %v7885_v21 = vadd.f32 1.0, %v5369_v28  ;;  %vm4118_vm11 = vmor %vm4116_vm8, %vm4117_vm10 }
0x27d5   :  { %v4471_v32 = vadd.f32 %v4470_v27, %v4469_v9  ;;  %v4113_v46 = vsub.f32 1.0, %v4112_v6 }
0x27d6   :  { %938 = vst [vmem:[#allocation16 + $0x8] sm:$0x1] %v935_v8  ;;  %5370 = vrcp.f32 %v7885_v21  ;;  %v3010_v8 = vand.u32 2147483648, %v7885_v21 }
0x27d7   :  { %v4472_v2 = vrot.slane %v4471_v32, 2  ;;  %v4114_v17 = vmul.f32 %v5367_v51, %v4113_v46 }
0x27d8   :  { %4646 = vperm.xlu1 %4969, %v4586_v20  }
0x27d9   :  { %v4473_v36 = vadd.f32 %v4472_v2, %v4471_v32  ;;  %v4115_v53 = vadd.f32 %v5367_v51, %v4114_v17  ;;  %v3008_v32 = vand.u32 2147483647, %v7885_v21  ;;  %v3011_v2 = vor.u32 1.1754944e-38, %v3010_v8  ;;  %v7917_v17 = vpop.permute.xlu1 %2036 }
0x27db   :  { %v4474_v15 = vrot.slane %v4473_v36, 1  ;;  %v4119_v50 = vsel %vm4118_vm11, %v5367_v51, %v4115_v53  ;;  %vm3009_vm5 = vcmp.eq.f32.partialorder %v3008_v32, 8.507059e+37 }
0x27dc   :  { %v5371_v18 = vpop.eup %5370  ;;  %v7904_v3 = vsel %vm4121_vm12, %v4123_v38, %v4119_v50  ;;  %v1312_v38 = vpop.permute.xlu0 %1311 }
0x27dd   :  { %v4475_v34 = vadd.f32 %v4474_v15, %v4473_v36  ;;  %v3000_v58 = vmul.f32 %v5371_v18, %v7885_v21  ;;  %vm3005_vm15 = vweird.f32 %v5371_v18 }
0x27df   :  { %5372 = vrcp.f32 %v4475_v34  ;;  %v3001_v4 = vsub.f32 1.0, %v3000_v58  ;;  %v4538_v48 = vand.u32 2147483648, %v4475_v34  ;;  %v4536_v63 = vand.u32 2147483647, %v4475_v34  ;;  %v5477_v58 = vld [vmem:[%s8086_s19] ss:$0 sm:$0xff] }
0x27e0   :  { %5374 = vpow2.f32 %v3897_v1  ;;  %4973 = vset.pattern.permute.xlu1 %v5770_v37  ;;  %vm4532_vm14 = vweird.f32 %v4475_v34 }
0x27e1   :  { %5376 = vpow2.f32 %v4942_v57  ;;  %3697 = vperm.xlu1 %4973, %v3568_v16   ;;  %v3002_v12 = vmul.f32 %v5371_v18, %v3001_v4  ;;  %v4539_v9 = vor.u32 1.1754944e-38, %v4538_v48  ;;  %vm4537_vm1 = vcmp.eq.f32.partialorder %v4536_v63, 8.507059e+37 }
0x27e2   :  { %v1315_v48 = vmul.f32 %v1312_v38, %v7796_v55 }
0x27e3   :  { %v3003_v27 = vadd.f32 %v5371_v18, %v3002_v12 }
0x27e4   :  { %v1322_v12 = vrot.slane %v1315_v48, 4 }
0x27e5   :  { %v5373_v47 = vpop.eup %5372 }
0x27e6   :  { %v7902_v59 = vpop.eup %5374  ;;  %v4528_v49 = vmul.f32 %v5373_v47, %v4475_v34  ;;  %vm4533_vm13 = vweird.f32 %v5373_v47  ;;  %v1323_v8 = vadd.f32 %v1322_v12, %v1315_v48  ;;  %v2023_v12 = vand.u32 2147483648, %v7548_v31 }
0x27e7   :  { %v5377_v41 = vpop.eup %5376  ;;  %v3934_v7 = vsel %vm493_vm3, %v7902_v59, 0.0  ;;  %vm4534_vm0 = vmor %vm4532_vm14, %vm4533_vm13  ;;  %vm3004_vm3 = vweird.f32 %v7885_v21 }
0x27e8   :  { %v4529_v10 = vsub.f32 1.0, %v4528_v49  ;;  %v4666_v56 = vadd.f32 1.0, %v5377_v41  ;;  %v3935_v35 = vrot.slane %v3934_v7, 4  ;;  %vm3006_vm4 = vmor %vm3004_vm3, %vm3005_vm15  ;;  %v7930_v49 = vpop.permute.xlu1 %2585  ;;  %vm1461_vm15 = vweird.f32 %v7522_v24 }
0x27e9   :  { %4253 = vperm.xlu1 %4973, %v7904_v3   ;;  %v3007_v62 = vsel %vm3006_vm4, %v5371_v18, %v3003_v27 }
0x27ea   :  { %v4530_v42 = vmul.f32 %v5373_v47, %v4529_v10  ;;  %5378 = vrcp.f32 %v4666_v56  ;;  %v3936_v40 = vadd.f32 %v3935_v35, %v3934_v7  ;;  %v7913_v45 = vsel %vm3009_vm5, %v3011_v2, %v3007_v62 }
0x27eb   :  { %v3145_v46 = vsub.f32 1.0, %v7913_v45  ;;  %v4678_v57 = vand.u32 2147483648, %v4666_v56  ;;  %vm4672_vm10 = vweird.f32 %v4666_v56  ;;  %v4676_v34 = vand.u32 2147483647, %v4666_v56 }
0x27ec   :  { %v4531_v51 = vadd.f32 %v5373_v47, %v4530_v42  ;;  %v3937_v20 = vrot.slane %v3936_v40, 2 }
0x27ed   :  { %v4679_v14 = vor.u32 1.1754944e-38, %v4678_v57  ;;  %vm4677_vm11 = vcmp.eq.f32.partialorder %v4676_v34, 8.507059e+37 }
0x27ee   :  { %v4535_v25 = vsel %vm4534_vm0, %v5373_v47, %v4531_v51  ;;  %v3938_v43 = vadd.f32 %v3937_v20, %v3936_v40 }
0x27ef   :  { %v4540_v28 = vsel %vm4537_vm1, %v4539_v9, %v4535_v25 }
0x27f0   :  { %v4541_v11 = vmul.f32 %v7879_v61, %v4540_v28  ;;  %v5379_v6 = vpop.eup %5378  ;;  %v3939_v13 = vrot.slane %v3938_v43, 1 }
0x27f1   :  { %v4668_v36 = vmul.f32 %v5379_v6, %v4666_v56  ;;  %vm4673_vm6 = vweird.f32 %v5379_v6  ;;  %v7937_v56 = vpop.permute.xlu2 %1480 }
0x27f2   :  { %4641 = vperm.xlu2 %4970, %v4541_v11   ;;  %v3940_v21 = vadd.f32 %v3939_v13, %v3938_v43  ;;  %vm4674_vm8 = vmor %vm4672_vm10, %vm4673_vm6  ;;  %v1467_v13 = vand.u32 2147483648, %v7522_v24  ;;  %vm2017_vm6 = vweird.f32 %v7548_v31 }
0x27f3   :  { %v4669_v61 = vsub.f32 1.0, %v4668_v36  ;;  %v1324_v36 = vrot.slane %v1323_v8, 2 }
0x27f4   :  { %5380 = vrcp.f32 %v3940_v21  ;;  %vm4021_vm13 = vweird.f32 %v3940_v21  ;;  %v4027_v25 = vand.u32 2147483648, %v3940_v21  ;;  %v4025_v28 = vand.u32 2147483647, %v3940_v21 }
0x27f5   :  { %v4670_v15 = vmul.f32 %v5379_v6, %v4669_v61  ;;  %5382 = vrcp.f32 %v7522_v24 }
0x27f6   :  { %5384 = vrcp.f32 %v7548_v31  ;;  %v4028_v62 = vor.u32 1.1754944e-38, %v4027_v25  ;;  %vm4026_vm0 = vcmp.eq.f32.partialorder %v4025_v28, 8.507059e+37 }
0x27f7   :  { %v4671_v1 = vadd.f32 %v5379_v6, %v4670_v15  ;;  %v1867_v35 = vpop.permute.xlu0 %1866  ;;  %5386 = vrcp.f32 %v7588_v29 }
0x27f8   :  { %v1870_v32 = vmul.f32 %v1867_v35, %v7796_v55 }
0x27f9   :  { %v4675_v23 = vsel %vm4674_vm8, %v5379_v6, %v4671_v1 }
0x27fa   :  { %4972 = vset.pattern.permute.xlu2 %v5770_v37  ;;  %v5381_v18 = vpop.eup %5380  ;;  %v7919_v53 = vsel %vm4677_vm11, %v4679_v14, %v4675_v23  ;;  %v1877_v43 = vrot.slane %v1870_v32, 4  ;;  %v1325_v14 = vadd.f32 %v1324_v36, %v1323_v8 }
0x27fb   :  { %3148 = vperm.xlu2 %4972, %v3145_v46   ;;  %v4017_v16 = vmul.f32 %v5381_v18, %v3940_v21  ;;  %v5383_v41 = vpop.eup %5382  ;;  %vm4022_vm12 = vweird.f32 %v5381_v18  ;;  %v7949_v21 = vpop.permute.xlu2 %2029 }
0x27fc   :  { %v1457_v7 = vmul.f32 %v5383_v41, %v7522_v24  ;;  %v7941_v9 = vpop.eup %5384  ;;  %vm4023_vm14 = vmor %vm4021_vm13, %vm4022_vm12  ;;  %vm1462_vm1 = vweird.f32 %v5383_v41  ;;  %vm2573_vm12 = vweird.f32 %v7588_v29 }
0x27fd   :  { %v4018_v50 = vsub.f32 1.0, %v4017_v16  ;;  %v2013_v11 = vmul.f32 %v7941_v9, %v7548_v31  ;;  %vm1463_vm3 = vmor %vm1461_vm15, %vm1462_vm1  ;;  %v7955_v16 = vpop.eup %5386  ;;  %vm2018_vm5 = vweird.f32 %v7941_v9 }
0x27fe   :  { %v1458_v63 = vsub.f32 1.0, %v1457_v7  ;;  %vm7966_vm10 = vmor %vm2017_vm6, %vm2018_vm5  ;;  %vm2574_vm11 = vweird.f32 %v7955_v16 }
0x27ff   :  { %v4019_v10 = vmul.f32 %v5381_v18, %v4018_v50  ;;  %v2014_v2 = vsub.f32 1.0, %v2013_v11  ;;  %vm7993_vm13 = vmor %vm2573_vm12, %vm2574_vm11 }
0x2800   :  { %v1459_v40 = vmul.f32 %v5383_v41, %v1458_v63 }
0x2801   :  { %v4020_v42 = vadd.f32 %v5381_v18, %v4019_v10  ;;  %v2015_v23 = vmul.f32 %v7941_v9, %v2014_v2 }
0x2802   :  { %v1460_v20 = vadd.f32 %v5383_v41, %v1459_v40 }
0x2803   :  { %3704 = vperm.xlu2 %4972, %v3701_v44   ;;  %v4024_v27 = vsel %vm4023_vm14, %v5381_v18, %v4020_v42  ;;  %v1465_v44 = vand.u32 2147483647, %v7522_v24  ;;  %v1878_v18 = vadd.f32 %v1877_v43, %v1870_v32  ;;  %v7971_v8 = vpop.permute.xlu2 %2592 }
0x2804   :  { %v4029_v6 = vsel %vm4026_vm0, %v4028_v62, %v4024_v27  ;;  %v1464_v34 = vsel %vm1463_vm3, %v5383_v41, %v1460_v20  ;;  %v1326_v41 = vrot.slane %v1325_v14, 1  ;;  %v2021_v27 = vand.u32 2147483647, %v7548_v31 }
0x2805   :  { %v4030_v57 = vmul.f32 %v7902_v59, %v4029_v6  ;;  %vm1466_vm4 = vcmp.eq.f32.partialorder %v1465_v44, 8.507059e+37  ;;  %v2569_v59 = vmul.f32 %v7955_v16, %v7588_v29  ;;  %v1879_v10 = vrot.slane %v1878_v18, 2 }
0x2806   :  { %v1327_v6 = vadd.f32 %v1326_v41, %v1325_v14  ;;  %vm2022_vm8 = vcmp.eq.f32.partialorder %v2021_v27, 8.507059e+37 }
0x2807   :  { %v2423_v46 = vpop.permute.xlu0 %2422  ;;  %v2570_v62 = vsub.f32 1.0, %v2569_v59  ;;  %v1880_v20 = vadd.f32 %v1879_v10, %v1878_v18 }
0x2809   :  { %v1881_v44 = vrot.slane %v1880_v20, 1 }
0x280a   :  { %v7939_v51 = vpop.xlane.xlu1 %3122 }
0x280b   :  { %4809 = vperm.xlu2 %4972, %v7919_v53   ;;  %vm3129_vm5 = vweird.f32 %v7939_v51 }
0x280f   :  { %v2974_v35 = vpop.permute.xlu0 %2973 }
0x2810   :  { %v4780_v22 = vpop.f32.mrf.mxu3 }
0x2811   :  { %v7928_v47 = vadd.f32 %v5477_v58, %v4780_v22  ;;  %v1468_v22 = vor.u32 1.1754944e-38, %v1467_v13  ;;  %v2426_v58 = vmul.f32 %v2423_v46, %v7796_v55  ;;  %v2024_v46 = vor.u32 1.1754944e-38, %v2023_v12 }
0x2813   :  { %v4783_v4 = vsel %vm421_vm2, %v7928_v47, -inf  ;;  %v1469_v38 = vsel %vm1466_vm4, %v1468_v22, %v1464_v34  ;;  %v2433_v48 = vrot.slane %v2426_v58, 4 }
0x2814   :  { %4784 = vmax.xlane.f32.xlu0 %v4783_v4  ;;  %v2016_v4 = vadd.f32 %v7941_v9, %v2015_v23  ;;  %v1470_v25 = vmul.f32 %v7402_v39, %v1469_v38  ;;  %v2981_v39 = vmul.f32 %v2974_v35, %v7755_v54 }
0x2815   :  { %v2434_v2 = vadd.f32 %v2433_v48, %v2426_v58  ;;  %v2579_v58 = vand.u32 2147483648, %v7588_v29 }
0x2816   :  { %v2020_v32 = vsel %vm7966_vm10, %v7941_v9, %v2016_v4  ;;  %v1476_v31 = vmul.f32 %v7923_v52, %v1470_v25  ;;  %v2983_v23 = vrot.slane %v2981_v39, 4  ;;  %v4257_v52 = vsub.f32 1.0, %v7904_v3 }
0x2817   :  { %v2025_v9 = vsel %vm2022_vm8, %v2024_v46, %v2020_v32  ;;  %v2435_v34 = vrot.slane %v2434_v2, 2  ;;  %v2580_v35 = vor.u32 1.1754944e-38, %v2579_v58  ;;  %vm4241_vm8 = vweird.f32 %v7737_v5 }
0x2818   :  { %v2026_v22 = vmul.f32 %v7423_v26, %v2025_v9  ;;  %v2984_v41 = vadd.f32 %v2983_v23, %v2981_v39  ;;  %v2577_v26 = vand.u32 2147483647, %v7588_v29 }
0x2819   :  { %v2436_v59 = vadd.f32 %v2435_v34, %v2434_v2 }
0x281a   :  { %v2985_v27 = vrot.slane %v2984_v41, 2  ;;  %vm2578_vm14 = vcmp.eq.f32.partialorder %v2577_v26, 8.507059e+37 }
0x281b   :  { %v2437_v29 = vrot.slane %v2436_v59, 1 }
0x281c   :  { %v2986_v39 = vadd.f32 %v2985_v27, %v2984_v41 }
0x2822   :  { %v1307_v61 = vpop.permute.xlu1 %1306 }
0x2823   :  { %v1314_v15 = vmul.f32 %v1307_v61, %v7755_v54 }
0x2825   :  { %v1316_v1 = vrot.slane %v1314_v15, 4 }
0x2827   :  { %v1317_v50 = vadd.f32 %v1316_v1, %v1314_v15  ;;  %v2571_v15 = vmul.f32 %v7955_v16, %v2570_v62 }
0x2828   :  { %4090 = vperm.xlu0 %4966, %v4030_v57  }
0x2829   :  { %v1318_v24 = vrot.slane %v1317_v50, 2  ;;  %v2572_v38 = vadd.f32 %v7955_v16, %v2571_v15 }
0x282a   :  { %v1862_v7 = vpop.permute.xlu1 %1861 }
0x282b   :  { %v1319_v42 = vadd.f32 %v1318_v24, %v1317_v50  ;;  %v1869_v63 = vmul.f32 %v1862_v7, %v7755_v54  ;;  %v1882_v24 = vadd.f32 %v1881_v44, %v1880_v20  ;;  %v2576_v12 = vsel %vm7993_vm13, %v7955_v16, %v2572_v38  ;;  %v3535_v20 = vpop.permute.xlu0 %3534 }
0x282c   :  { %v2581_v62 = vsel %vm2578_vm14, %v2580_v35, %v2576_v12  ;;  %v2438_v16 = vadd.f32 %v2437_v29, %v2436_v59 }
0x282d   :  { %v1320_v40 = vrot.slane %v1319_v42, 1  ;;  %v1871_v11 = vrot.slane %v1869_v63, 4 }
0x282f   :  { %v1321_v36 = vadd.f32 %v1320_v40, %v1319_v42  ;;  %v1872_v43 = vadd.f32 %v1871_v11, %v1869_v63  ;;  %v2032_v63 = vmul.f32 %v7949_v21, %v2026_v22 }
0x2830   :  { %4971 = vset.pattern.permute.xlu0 %v5770_v37 }
0x2831   :  { %v1485_v61 = vsel %vm783_vm9, %v1327_v6, %v1321_v36  ;;  %v1873_v13 = vrot.slane %v1872_v43, 2  ;;  %3141 = vperm.xlu0 %4971, %v7913_v45  }
0x2832   :  { %v1487_v1 = vmul.f32 %v1485_v61, %v7937_v56  ;;  %v2418_v57 = vpop.permute.xlu1 %2417  ;;  %v7989_v56 = vpop.xlane.xlu2 %3678 }
0x2833   :  { %v1874_v14 = vadd.f32 %v1873_v13, %v1872_v43  ;;  %v2425_v37 = vmul.f32 %v2418_v57, %v7755_v54  ;;  %5388 = vrcp.f32 %v7989_v56  ;;  %v2582_v43 = vmul.f32 %v7460_v33, %v2581_v62 }
0x2834   :  { %v1488_v18 = vadd.f32 %v1487_v1, %v1476_v31  ;;  %v3538_v31 = vmul.f32 %v3535_v20, %v7796_v55  ;;  %v2987_v33 = vrot.slane %v2986_v39, 1  ;;  %v3691_v27 = vand.u32 2147483648, %v7989_v56 }
0x2835   :  { %v1875_v45 = vrot.slane %v1874_v14, 1  ;;  %v2427_v50 = vrot.slane %v2425_v37, 4  ;;  %v2588_v9 = vmul.f32 %v7930_v49, %v2582_v43  ;;  %vm3685_vm1 = vweird.f32 %v7989_v56 }
0x2836   :  { %v1490_v4 = vrot.slane %v1488_v18, 1  ;;  %1492 = vst [vmem:[#allocation16 + $0x1] sm:$0x1] %v1488_v18  ;;  %v2988_v58 = vadd.f32 %v2987_v33, %v2986_v39  ;;  %v3692_v39 = vor.u32 1.1754944e-38, %v3691_v27  ;;  %5390 = vrcp.f32 %v7939_v51 }
0x2837   :  { %v1876_v10 = vadd.f32 %v1875_v45, %v1874_v14  ;;  %v2428_v3 = vadd.f32 %v2427_v50, %v2425_v37  ;;  %v3545_v14 = vrot.slane %v3538_v31, 4  ;;  %5392 = vrcp.f32 %v7737_v5 }
0x2838   :  { %1493 = vst [vmem:[#allocation16 + $0x9] sm:$0x1] %v1490_v4 }
0x2839   :  { %v2041_v48 = vsel %vm783_vm9, %v1882_v24, %v1876_v10  ;;  %v2429_v42 = vrot.slane %v2428_v3, 2  ;;  %4260 = vperm.xlu0 %4971, %v4257_v52   ;;  %v5389_v1 = vpop.eup %5388  ;;  %v3546_v49 = vadd.f32 %v3545_v14, %v3538_v31 }
0x283a   :  { %v2043_v25 = vmul.f32 %v2041_v48, %v7917_v17  ;;  %v2979_v28 = vpop.permute.xlu1 %2978  ;;  %v3530_v46 = vpop.permute.xlu2 %3529  ;;  %v3681_v52 = vmul.f32 %v5389_v1, %v7989_v56  ;;  %vm3686_vm0 = vweird.f32 %v5389_v1 }
0x283b   :  { %v2430_v40 = vadd.f32 %v2429_v42, %v2428_v3  ;;  %v2982_v11 = vmul.f32 %v2979_v28, %v7796_v55  ;;  %v3537_v57 = vmul.f32 %v3530_v46, %v7755_v54  ;;  %v3547_v59 = vrot.slane %v3546_v49, 2  ;;  %vm3687_vm15 = vmor %vm3685_vm1, %vm3686_vm0 }
0x283c   :  { %v2044_v32 = vadd.f32 %v2043_v25, %v2032_v63  ;;  %v3682_v45 = vsub.f32 1.0, %v3681_v52 }
0x283d   :  { %v2431_v6 = vrot.slane %v2430_v40, 1  ;;  %v2989_v21 = vrot.slane %v2982_v11, 4  ;;  %v3539_v22 = vrot.slane %v3537_v57, 4  ;;  %v3548_v42 = vadd.f32 %v3547_v59, %v3546_v49 }
0x283e   :  { %v2046_v2 = vrot.slane %v2044_v32, 1  ;;  %2048 = vst [vmem:[#allocation16 + $0x2] sm:$0x1] %v2044_v32  ;;  %v3683_v3 = vmul.f32 %v5389_v1, %v3682_v45 }
0x283f   :  { %v2432_v36 = vadd.f32 %v2431_v6, %v2430_v40  ;;  %v2990_v17 = vadd.f32 %v2989_v21, %v2982_v11  ;;  %v3540_v38 = vadd.f32 %v3539_v22, %v3537_v57  ;;  %v3689_v40 = vand.u32 2147483647, %v7989_v56 }
0x2840   :  { %2049 = vst [vmem:[#allocation16 + $0xa] sm:$0x1] %v2046_v2  ;;  %v3684_v35 = vadd.f32 %v5389_v1, %v3683_v3  ;;  %v3549_v11 = vrot.slane %v3548_v42, 1 }
0x2841   :  { %v2597_v61 = vsel %vm783_vm9, %v2438_v16, %v2432_v36  ;;  %v2991_v13 = vrot.slane %v2990_v17, 2  ;;  %4834 = vrot.lane.b32.xlu0 %v7370_v30, %s5767_s28  ;;  %v3541_v26 = vrot.slane %v3540_v38, 2  ;;  %vm3690_vm3 = vcmp.eq.f32.partialorder %v3689_v40, 8.507059e+37 }
0x2842   :  { %v2599_v15 = vmul.f32 %v2597_v61, %v7971_v8  ;;  %v8012_v44 = vpop.permute.xlu1 %4085  ;;  %v3688_v21 = vsel %vm3687_vm15, %v5389_v1, %v3684_v35  ;;  %v4247_v35 = vand.u32 2147483648, %v7737_v5 }
0x2843   :  { %v2992_v34 = vadd.f32 %v2991_v13, %v2990_v17  ;;  %v3542_v25 = vadd.f32 %v3541_v26, %v3540_v38  ;;  %v3693_v36 = vsel %vm3690_vm3, %v3692_v39, %v3688_v21  ;;  %v3550_v17 = vadd.f32 %v3549_v11, %v3548_v42 }
0x2844   :  { %v2600_v23 = vadd.f32 %v2599_v15, %v2588_v9  ;;  %v3694_v13 = vmul.f32 %v7623_v60, %v3693_v36 }
0x2845   :  { %v2993_v37 = vrot.slane %v2992_v34, 1  ;;  %v3543_v2 = vrot.slane %v3542_v25, 1 }
0x2846   :  { %v2602_v18 = vrot.slane %v2600_v23, 1  ;;  %2604 = vst [vmem:[#allocation16 + $0x3] sm:$0x1] %v2600_v23 }
0x2847   :  { %v2994_v30 = vadd.f32 %v2993_v37, %v2992_v34  ;;  %v3544_v61 = vadd.f32 %v3543_v2, %v3542_v25  ;;  %v5391_v37 = vpop.eup %5390 }
0x2848   :  { %2605 = vst [vmem:[#allocation16 + $0xb] sm:$0x1] %v2602_v18  ;;  %v3125_v60 = vmul.f32 %v5391_v37, %v7939_v51  ;;  %v5393_v22 = vpop.eup %5392  ;;  %vm3130_vm4 = vweird.f32 %v5391_v37 }
0x2849   :  { %v3153_v8 = vsel %vm783_vm9, %v2994_v30, %v2988_v58  ;;  %v3709_v15 = vsel %vm783_vm9, %v3550_v17, %v3544_v61  ;;  %v4093_v30 = vmul.f32 %v8012_v44, %v7755_v54  ;;  %vm3131_vm6 = vmor %vm3129_vm5, %vm3130_vm4  ;;  %vm4242_vm10 = vweird.f32 %v5393_v22 }
0x284a   :  { %v4647_v50 = vpop.permute.xlu1 %4646  ;;  %v3126_v18 = vsub.f32 1.0, %v3125_v60  ;;  %vm4243_vm11 = vmor %vm4241_vm8, %vm4242_vm10 }
0x284b   :  { %v4650_v24 = vmul.f32 %v4647_v50, %v7796_v55  ;;  %v4095_v45 = vrot.slane %v4093_v30, 4 }
0x284c   :  { %v4642_v4 = vpop.permute.xlu2 %4641 }
0x284d   :  { %v4657_v41 = vrot.slane %v4650_v24, 4  ;;  %v4649_v10 = vmul.f32 %v4642_v4, %v7755_v54  ;;  %v3135_v4 = vand.u32 2147483648, %v7939_v51  ;;  %v3133_v54 = vand.u32 2147483647, %v7939_v51 }
0x284e   :  { %v4245_v51 = vand.u32 2147483647, %v7737_v5 }
0x284f   :  { %v4658_v7 = vadd.f32 %v4657_v41, %v4650_v24  ;;  %v4651_v48 = vrot.slane %v4649_v10, 4  ;;  %v4096_v24 = vadd.f32 %v4095_v45, %v4093_v30 }
0x2850   :  { %vm4246_vm12 = vcmp.eq.f32.partialorder %v4245_v51, 8.507059e+37 }
0x2851   :  { %v4659_v63 = vrot.slane %v4658_v7, 2  ;;  %v4652_v12 = vadd.f32 %v4651_v48, %v4649_v10  ;;  %v4097_v3 = vrot.slane %v4096_v24, 2 }
0x2853   :  { %v4660_v28 = vadd.f32 %v4659_v63, %v4658_v7  ;;  %v4653_v29 = vrot.slane %v4652_v12, 2  ;;  %v3698_v31 = vpop.permute.xlu1 %3697  ;;  %v3136_v7 = vor.u32 1.1754944e-38, %v3135_v4 }
0x2854   :  { %v3700_v1 = vmul.f32 %v3698_v31, %v3694_v13 }
0x2855   :  { %v4661_v32 = vrot.slane %v4660_v28, 1  ;;  %v4654_v62 = vadd.f32 %v4653_v29, %v4652_v12  ;;  %v3149_v6 = vpop.permute.xlu2 %3148  ;;  %v4098_v12 = vadd.f32 %v4097_v3, %v4096_v24 }
0x2856   :  { %v8022_v20 = vmul.f32 %v3153_v8, %v3149_v6  ;;  %v4237_v8 = vmul.f32 %v5393_v22, %v7737_v5 }
0x2857   :  { %v4655_v16 = vrot.slane %v4654_v62, 1  ;;  %v4662_v46 = vadd.f32 %v4661_v32, %v4660_v28  ;;  %v4099_v11 = vrot.slane %v4098_v12, 1  ;;  %v4248_v32 = vor.u32 1.1754944e-38, %v4247_v35 }
0x2858   :  { %v4238_v50 = vsub.f32 1.0, %v4237_v8 }
0x2859   :  { %v4656_v43 = vadd.f32 %v4655_v16, %v4654_v62  ;;  %v4100_v16 = vadd.f32 %v4099_v11, %v4098_v12 }
0x285a   :  { %v4239_v41 = vmul.f32 %v5393_v22, %v4238_v50 }
0x285b   :  { %v8025_v56 = vsel %vm783_vm9, %v4662_v46, %v4656_v43  ;;  %v4254_v5 = vpop.permute.xlu1 %4253 }
0x285c   :  { %v4240_v63 = vadd.f32 %v5393_v22, %v4239_v41 }
0x285d   :  { %v3705_v9 = vpop.permute.xlu2 %3704 }
0x285e   :  { %v3711_v57 = vmul.f32 %v3709_v15, %v3705_v9  ;;  %v4244_v27 = vsel %vm4243_vm11, %v5393_v22, %v4240_v63 }
0x285f   :  { %v4249_v21 = vsel %vm4246_vm12, %v4248_v32, %v4244_v27 }
0x2860   :  { %v3712_v33 = vadd.f32 %v3711_v57, %v3700_v1  ;;  %v4250_v39 = vmul.f32 %v7499_v19, %v4249_v21 }
0x2862   :  { %v3714_v34 = vrot.slane %v3712_v33, 1  ;;  %3716 = vst [vmem:[#allocation16 + $0x5] sm:$0x1] %v3712_v33  ;;  %v4256_v43 = vmul.f32 %v4254_v5, %v4250_v39 }
0x2864   :  { %3717 = vst [vmem:[#allocation16 + $0xd] sm:$0x1] %v3714_v34 }
0x2865   :  { %v4810_v60 = vpop.permute.xlu2 %4809 }
0x2887   :  { %v4785_v23 = vpop.xlane.xlu0 %4784 }
0x2888   :  { %v4786_v14 = vsub.f32 %v7928_v47, %v4785_v23  ;;  %v3127_v47 = vmul.f32 %v5391_v37, %v3126_v18 }
0x288a   :  { %v4787_v52 = vmul.f32 1.442695, %v4786_v14  ;;  %v3128_v38 = vadd.f32 %v5391_v37, %v3127_v47 }
0x288c   :  { %5394 = vpow2.f32 %v4787_v52  ;;  %v3132_v10 = vsel %vm3131_vm6, %v5391_v37, %v3128_v38 }
0x2892   :  { %v8035_v58 = vpop.eup %5394 }
0x2893   :  { %v4789_v49 = vsel %vm421_vm2, %v8035_v58, 0.0  ;;  %vm3134_vm2 = vcmp.eq.f32.partialorder %v3133_v54, 8.507059e+37 }
0x2894   :  { %4790 = vadd.xlane.f32.xlu1 %v4789_v49  ;;  %v3137_v42 = vsel %vm3134_vm2, %v3136_v7, %v3132_v10 }
0x289a   :  { %v4091_v59 = vpop.permute.xlu0 %4090 }
0x289b   :  { %v4094_v44 = vmul.f32 %v4091_v59, %v7796_v55  ;;  %v3138_v55 = vmul.f32 %v7685_v0, %v3137_v42 }
0x289d   :  { %v4101_v26 = vrot.slane %v4094_v44, 4 }
0x289f   :  { %v4102_v48 = vadd.f32 %v4101_v26, %v4094_v44 }
0x28a1   :  { %v4103_v25 = vrot.slane %v4102_v48, 2 }
0x28a3   :  { %v4104_v28 = vadd.f32 %v4103_v25, %v4102_v48  ;;  %v3142_v29 = vpop.permute.xlu0 %3141 }
0x28a4   :  { %v3144_v40 = vmul.f32 %v3142_v29, %v3138_v55 }
0x28a5   :  { %v4105_v62 = vrot.slane %v4104_v28, 1 }
0x28a6   :  { %v3156_v6 = vadd.f32 %v8022_v20, %v3144_v40  ;;  %v4813_v20 = vsub.f32 1.0, %v7919_v53 }
0x28a7   :  { %v4106_v2 = vadd.f32 %v4105_v62, %v4104_v28 }
0x28a8   :  { %v3158_v0 = vrot.slane %v3156_v6, 1  ;;  %3160 = vst [vmem:[#allocation16 + $0x4] sm:$0x1] %v3156_v6 }
0x28a9   :  { %v4265_v36 = vsel %vm783_vm9, %v4106_v2, %v4100_v16 }
0x28aa   :  { %3161 = vst [vmem:[#allocation16 + $0xc] sm:$0x1] %v3158_v0 }
0x28ab   :  { %v4261_v17 = vpop.permute.xlu0 %4260 }
0x28ac   :  { %v4267_v46 = vmul.f32 %v4265_v36, %v4261_v17 }
0x28ad   :  { %4816 = vperm.xlu1 %4973, %v4813_v20  }
0x28ae   :  { %v4268_v31 = vadd.f32 %v4267_v46, %v4256_v43 }
0x28b0   :  { %v4270_v61 = vrot.slane %v4268_v31, 1  ;;  %4272 = vst [vmem:[#allocation16 + $0x6] sm:$0x1] %v4268_v31 }
0x28b2   :  { %4273 = vst [vmem:[#allocation16 + $0xe] sm:$0x1] %v4270_v61 }
0x28b3   :  { %v4835_v19 = vpop.permute.xlu0 %4834 }
0x28b4   :  { %4837 = vst.msk [vmem:[#allocation19] sm:$0x3] %vm4831_vm7, %v4835_v19 }
0x28b5   :  { %4872 = dma.vmem_to_hbm [thread:$0]  %s4868_s13, 32, %s4870_s10, [#allocation18]  }
0x2907   :  { %v4791_v53 = vpop.xlane.xlu1 %4790 }
0x2908   :  { %5396 = vrcp.f32 %v4791_v53  ;;  %v4803_v57 = vand.u32 2147483648, %v4791_v53  ;;  %v4801_v33 = vand.u32 2147483647, %v4791_v53  ;;  %vm4797_vm13 = vweird.f32 %v4791_v53 }
0x290a   :  { %v4804_v23 = vor.u32 1.1754944e-38, %v4803_v57  ;;  %vm4802_vm0 = vcmp.eq.f32.partialorder %v4801_v33, 8.507059e+37 }
0x290e   :  { %v5397_v13 = vpop.eup %5396 }
0x290f   :  { %v4793_v9 = vmul.f32 %v5397_v13, %v4791_v53  ;;  %vm4798_vm9 = vweird.f32 %v5397_v13 }
0x2910   :  { %vm4799_vm14 = vmor %vm4797_vm13, %vm4798_vm9 }
0x2911   :  { %v4794_v15 = vsub.f32 1.0, %v4793_v9 }
0x2913   :  { %v4795_v1 = vmul.f32 %v5397_v13, %v4794_v15 }
0x2915   :  { %v4796_v34 = vadd.f32 %v5397_v13, %v4795_v1 }
0x2917   :  { %v4800_v14 = vsel %vm4799_vm14, %v5397_v13, %v4796_v34 }
0x2918   :  { %v4805_v37 = vsel %vm4802_vm0, %v4804_v23, %v4800_v14 }
0x2919   :  { %v4806_v52 = vmul.f32 %v8035_v58, %v4805_v37 }
0x291b   :  { %v4812_v22 = vmul.f32 %v4810_v60, %v4806_v52 }
0x291f   :  { %v4817_v18 = vpop.permute.xlu1 %4816 }
0x2920   :  { %v4823_v30 = vmul.f32 %v8025_v56, %v4817_v18 }
0x2922   :  { %v4824_v49 = vadd.f32 %v4823_v30, %v4812_v22 }
0x2924   :  { %v4826_v8 = vrot.slane %v4824_v49, 1  ;;  %4828 = vst [vmem:[#allocation16 + $0x7] sm:$0x1] %v4824_v49 }
0x2926   :  { %4829 = vst [vmem:[#allocation16 + $0xf] sm:$0x1] %v4826_v8 }
0x2927   :  { %4850 = dma.vmem_to_hbm [thread:$0]  %s4843_s14, 256, %s4845_s30, [#allocation4], %s5757_s24, %s5757_s24, %s5758_s6  }
0x2928   :  { %5752 = dma.done.wait [#allocation4], 256  }
0x2929   :  { %5753 = vsyncadd [#allocation4], 4294967040 }
0x292a   :  { %5754 = dma.done.wait [#allocation18], 64  }
0x292b   :  { %5755 = vsyncadd [#allocation18], 4294967232 }
0x292c   :  { %4885 = vsyncpa [#allocation3], 1 }
0x292d   :  { %4886 = vsyncpa [#allocation6], 1 }
0x292e   :  { %4887 = vsyncpa [#allocation9], 1 }
0x292f   :  { %4888 = vsyncpa [#allocation12], 1 }
0x2930   :  { %4889 = vsyncpa [#allocation15], 1 }
0x2931   :  { %4890 = vsyncpa [#allocation4], 1 }
0x2932   :  { %4891 = vsyncpa [#allocation18], 1 }

</bundles_post_ra>
